<compile_context>
chip_gen: v7x
topology: tpu7x:2x2x1
jax: 0.10.0
libtpu: 0.0.40
codegen_flags: <defaults>
</compile_context>

<pallas_src>
import functools
import numpy as np
import jax
import jax.numpy as jnp
from jax.experimental import pallas as pl
from jax.experimental.pallas import tpu as pltpu

# ----------------------------- config (mirrors refineNet) -----------------------------
IN_CHANNELS = 1
CHANNELS    = (8, 16, 32)       # config.refineNet.num_channels
STRIDES     = (2, 2)            # config.refineNet.strides
KSIZE       = 3
PRELU_INIT  = 0.25              # nn.PReLU() default init
IN_EPS      = 1e-5              # nn.InstanceNorm2d default eps (affine=False, biased var)
OUTPUT_MIN  = -1.0
OUTPUT_MAX  = 1.0
H = W = 16
TB = 8                          # samples per grid step (sublane/batch tile = MXU M rows)


# ---------------- host-side constant 0/1 spatial selection matrices ------------------
def _conv_selection(hi, wi, k, stride, pad):
    """S[t, p_in, p_out] = 1 iff input pixel p_in feeds tap t of output pixel p_out."""
    ho = (hi + 2 * pad - k) // stride + 1
    wo = (wi + 2 * pad - k) // stride + 1
    sel = np.zeros((k * k, hi * wi, ho * wo), np.float32)
    for kh in range(k):
        for kw in range(k):
            t = kh * k + kw
            for oh in range(ho):
                ih = oh * stride - pad + kh
                if ih < 0 or ih >= hi:
                    continue
                for ow in range(wo):
                    iw = ow * stride - pad + kw
                    if iw < 0 or iw >= wi:
                        continue
                    sel[t, ih * wi + iw, oh * wo + ow] = 1.0
    return sel


def _convT_selection(hi, wi, k, stride, pad, opad):
    """Selection matrices for ConvTranspose2d(k, stride, padding=pad, output_padding=opad)."""
    ho = (hi - 1) * stride - 2 * pad + k + opad
    wo = (wi - 1) * stride - 2 * pad + k + opad
    sel = np.zeros((k * k, hi * wi, ho * wo), np.float32)
    for kh in range(k):
        for kw in range(k):
            t = kh * k + kw
            for ih in range(hi):
                oh = ih * stride - pad + kh
                if oh < 0 or oh >= ho:
                    continue
                for iw in range(wi):
                    ow = iw * stride - pad + kw
                    if ow < 0 or ow >= wo:
                        continue
                    sel[t, ih * wi + iw, oh * wo + ow] = 1.0
    return sel


def _fold(sel, w):
    """Fold conv weights [k,k,Cin,Cout] with selection [k*k, Min, Mout] into one dense matrix
    T[Cin*Min, Cout*Mout] so the whole conv is  y[TB, Cout*Mout] = x[TB, Cin*Min] @ T."""
    k, _, ci, co = w.shape
    wm = np.asarray(w, np.float32).reshape(k * k, ci, co)
    sel = np.asarray(sel, np.float32)
    t4 = np.einsum("tic,tmn->imcn", wm, sel)           # [ci, Min, co, Mout]
    mi, mo = sel.shape[1], sel.shape[2]
    return t4.reshape(ci * mi, co * mo)


def _seg_matrices(c, m):
    """Segment reduce [C*M, C] (entries 1/M) and broadcast-back [C, C*M] (entries 1) matrices
    for InstanceNorm stats over contiguous per-channel lane segments."""
    red = np.zeros((c * m, c), np.float32)
    bcast = np.zeros((c, c * m), np.float32)
    for ch in range(c):
        red[ch * m:(ch + 1) * m, ch] = 1.0 / m
        bcast[ch, ch * m:(ch + 1) * m] = 1.0
    return red, bcast


# ------------------------------------ fused kernel ------------------------------------
def _refine_fused_kernel(
    x_ref,        # [TB, H*W]  batch tile, lane-dense
    alpha_ref,    # SMEM [6]   PReLU slopes per activation site
    t_d0, b_d0, t_d1, b_d1, t_bt, b_bt,                 # folded down0/down1/bottom (+merged residuals)
    t_u1a, t_u1b, b_u1, t_u1r, b_u1r,                   # up1 ConvT split halves + res unit
    t_u0a, t_u0b, b_u0, t_u0r, b_u0r,                   # up0 ConvT split halves + last conv
    gr8, gb8, gr16, gb16, gr32, gb32,                   # InstanceNorm segment matrices
    o_ref,        # [TB, H*W]
):
    f32 = jnp.float32

    def conv(xs, t_refs, b_ref):
        """One folded conv layer: sum of bf16 MXU dots over the (split) inputs + bias row."""
        acc = None
        for xv, t_ref in zip(xs, t_refs):
            y = jnp.dot(xv.astype(jnp.bfloat16), t_ref[...], preferred_element_type=f32)
            acc = y if acc is None else acc + y
        return acc + b_ref[...]                          # [1, Cout*Mout] broadcasts over TB rows

    def inorm_seg(y, gr_ref, gb_ref):
        """InstanceNorm over each channel's contiguous lane segment (f32 stat matmuls)."""
        m = jnp.dot(y, gr_ref[...], preferred_element_type=f32)          # [TB, C]
        yc = y - jnp.dot(m, gb_ref[...], preferred_element_type=f32)     # centered
        v = jnp.dot(yc * yc, gr_ref[...], preferred_element_type=f32)    # biased var [TB, C]
        inv = jax.lax.rsqrt(v + IN_EPS)
        return yc * jnp.dot(inv, gb_ref[...], preferred_element_type=f32)

    def inorm_full(y):
        """InstanceNorm for a single-channel layer: plain lane reduction."""
        m = jnp.mean(y, axis=1, keepdims=True)
        yc = y - m
        v = jnp.mean(yc * yc, axis=1, keepdims=True)
        return yc * jax.lax.rsqrt(v + IN_EPS)

    def prelu(y, a):
        return jnp.where(y >= 0.0, y, a * y)

    c0, c1, c2 = CHANNELS
    x = x_ref[...].astype(f32)                           # [TB, 256] = [TB, 1*16*16]

    # down0: ResidualUnit(1->8, s2); main + strided-3x3 residual merged along Cout
    y = conv([x], [t_d0], b_d0)                          # [TB, 16*64]
    d0 = prelu(inorm_seg(y[:, :c0 * 64], gr8, gb8), alpha_ref[0]) + y[:, c0 * 64:]

    # down1: ResidualUnit(8->16, s2)
    y = conv([d0], [t_d1], b_d1)                         # [TB, 32*16]
    d1 = prelu(inorm_seg(y[:, :c1 * 16], gr16, gb16), alpha_ref[1]) + y[:, c1 * 16:]

    # bottom: ResidualUnit(16->32, s1); 1x1-conv residual embedded in the merged matrix
    y = conv([d1], [t_bt], b_bt)                         # [TB, 64*16]
    bt = prelu(inorm_seg(y[:, :c2 * 16], gr32, gb32), alpha_ref[2]) + y[:, c2 * 16:]

    # up1: ConvT(48->8, s2)+IN+PReLU on cat([d1, bt]) via split folded halves (no concat)
    y = conv([d1, bt], [t_u1a, t_u1b], b_u1)             # [TB, 8*64]
    u1t = prelu(inorm_seg(y, gr8, gb8), alpha_ref[3])
    #      ResidualUnit(8->8, s1), identity residual
    y = conv([u1t], [t_u1r], b_u1r)
    u1 = prelu(inorm_seg(y, gr8, gb8), alpha_ref[4]) + u1t

    # up0: ConvT(16->1, s2)+IN+PReLU on cat([d0, u1]) via split folded halves
    y = conv([d0, u1], [t_u0a, t_u0b], b_u0)             # [TB, 256]
    u0t = prelu(inorm_full(y), alpha_ref[5])
    #      ResidualUnit(1->1, s1, last-conv-only): conv + bias, identity residual, no norm/act
    u0 = conv([u0t], [t_u0r], b_u0r) + u0t

    # refineNet last activation: SIGMOID rescaled to [OUTPUT_MIN, OUTPUT_MAX]
    sig = 1.0 / (1.0 + jnp.exp(-u0))
    o_ref[...] = (sig * (OUTPUT_MAX - OUTPUT_MIN) + OUTPUT_MIN).astype(o_ref.dtype)


# ------------------------------ parameters & packing ----------------------------------
def init_params(key):
    c0, c1, c2 = CHANNELS
    shapes = {
        "d0_w":  (3, 3, IN_CHANNELS, c0), "d0r_w": (3, 3, IN_CHANNELS, c0),
        "d1_w":  (3, 3, c0, c1),          "d1r_w": (3, 3, c0, c1),
        "bt_w":  (3, 3, c1, c2),          "btr_w": (1, 1, c1, c2),   # 1x1 residual (stride 1)
        "u1t_w": (3, 3, c1 + c2, c0),     "u1r_w": (3, 3, c0, c0),   # inner up: 48 -> 8
        "u0t_w": (3, 3, 2 * c0, 1),       "u0r_w": (3, 3, 1, 1),     # top   up: 16 -> 1
    }
    params = {}
    keys = jax.random.split(key, 2 * len(shapes))
    for i, (name, shp) in enumerate(sorted(shapes.items())):
        params[name] = 0.1 * jax.random.normal(keys[2 * i], shp, jnp.float32)
        params[name.replace("_w", "_b")] = 0.01 * jax.random.normal(
            keys[2 * i + 1], (shp[-1],), jnp.float32)
    # learnable PReLU slopes: down0, down1, bottom, up1-ConvT, up1-res, up0-ConvT
    params["prelu_alpha"] = jnp.full((6,), PRELU_INIT, jnp.float32)
    return params


_PACKED_ORDER = (
    "alphas",
    "t_d0", "b_d0", "t_d1", "b_d1", "t_bt", "b_bt",
    "t_u1a", "t_u1b", "b_u1", "t_u1r", "b_u1r",
    "t_u0a", "t_u0b", "b_u0", "t_u0r", "b_u0r",
    "gr8", "gb8", "gr16", "gb16", "gr32", "gb32",
)


def pack_params(params):
    """One-time host-side fold of every conv into a dense bf16 matrix (done outside jit)."""
    c0, c1, c2 = CHANNELS
    bf = lambda a: jnp.asarray(a, jnp.bfloat16)
    row = lambda b, m: jnp.asarray(np.repeat(np.asarray(b, np.float32), m)[None, :])

    # selection matrices encode stride / 'same' padding / ConvT zero-insertion & asym padding
    sel_d0  = _conv_selection(16, 16, 3, 2, 1)     # [9, 256,  64]
    sel_d1  = _conv_selection(8,  8,  3, 2, 1)     # [9,  64,  16]
    sel_bt  = _conv_selection(4,  4,  3, 1, 1)     # [9,  16,  16]
    sel_u1t = _convT_selection(4, 4, 3, 2, 1, 1)   # [9,  16,  64]
    sel_u1r = _conv_selection(8,  8,  3, 1, 1)     # [9,  64,  64]
    sel_u0t = _convT_selection(8, 8, 3, 2, 1, 1)   # [9,  64, 256]
    sel_u0r = _conv_selection(16, 16, 3, 1, 1)     # [9, 256, 256]

    p = {k: np.asarray(v, np.float32) for k, v in params.items()}

    # merge main + residual convs along Cout (single matmul, split in-kernel at a 128-aligned lane)
    w_d0 = np.concatenate([p["d0_w"], p["d0r_w"]], axis=3)     # [3,3, 1,16]
    w_d1 = np.concatenate([p["d1_w"], p["d1r_w"]], axis=3)     # [3,3, 8,32]
    btr3 = np.zeros((3, 3, c1, c2), np.float32)
    btr3[1, 1] = p["btr_w"][0, 0]                              # 1x1 residual as centre-tap-only 3x3
    w_bt = np.concatenate([p["bt_w"], btr3], axis=3)           # [3,3,16,64]

    gr8,  gb8  = _seg_matrices(c0, 64)     # (C=8,  M=64)
    gr16, gb16 = _seg_matrices(c1, 16)     # (C=16, M=16)
    gr32, gb32 = _seg_matrices(c2, 16)     # (C=32, M=16)

    packed = {
        "alphas": jnp.asarray(p["prelu_alpha"]),
        # folded conv matrices [Cin*Min, Cout*Mout]  (bf16; 0/1 selection entries are exact)
        "t_d0":  bf(_fold(sel_d0, w_d0)),                        # [256, 1024]
        "t_d1":  bf(_fold(sel_d1, w_d1)),                        # [512,  512]
        "t_bt":  bf(_fold(sel_bt, w_bt)),                        # [256, 1024]
        "t_u1a": bf(_fold(sel_u1t, p["u1t_w"][:, :, :c1, :])),   # [256,  512]  (d1 half)
        "t_u1b": bf(_fold(sel_u1t, p["u1t_w"][:, :, c1:, :])),   # [512,  512]  (bt half)
        "t_u1r": bf(_fold(sel_u1r, p["u1r_w"])),                 # [512,  512]
        "t_u0a": bf(_fold(sel_u0t, p["u0t_w"][:, :, :c0, :])),   # [512,  256]  (d0 half)
        "t_u0b": bf(_fold(sel_u0t, p["u0t_w"][:, :, c0:, :])),   # [512,  256]  (u1 half)
        "t_u0r": bf(_fold(sel_u0r, p["u0r_w"])),                 # [256,  256]
        # biases pre-broadcast over each channel's spatial segment (f32 rows)
        "b_d0":  row(np.concatenate([p["d0_b"], p["d0r_b"]]), 64),
        "b_d1":  row(np.concatenate([p["d1_b"], p["d1r_b"]]), 16),
        "b_bt":  row(np.concatenate([p["bt_b"], p["btr_b"]]), 16),
        "b_u1":  row(p["u1t_b"], 64),
        "b_u1r": row(p["u1r_b"], 64),
        "b_u0":  row(p["u0t_b"], 256),
        "b_u0r": row(p["u0r_b"], 256),
        # InstanceNorm segment reduce / broadcast matrices (f32)
        "gr8":  jnp.asarray(gr8),  "gb8":  jnp.asarray(gb8),
        "gr16": jnp.asarray(gr16), "gb16": jnp.asarray(gb16),
        "gr32": jnp.asarray(gr32), "gb32": jnp.asarray(gb32),
    }
    return packed


# ----------------------------------- forward ------------------------------------------
@functools.partial(jax.jit, static_argnames=("tb",))
def refine_net_forward(packed, x_nchw, tb=TB):
    n, c, h, w = x_nchw.shape
    assert c == IN_CHANNELS and h == H and w == W, (n, c, h, w)
    hw = h * w
    x = x_nchw.reshape(n, hw).astype(jnp.float32)          # lane-dense [N, H*W]
    n_pad = ((n + tb - 1) // tb) * tb
    if n_pad != n:
        x = jnp.pad(x, ((0, n_pad - n), (0, 0)))

    operands = [x] + [packed[k] for k in _PACKED_ORDER]
    in_specs = [pl.BlockSpec((tb, hw), lambda i: (i, 0))]
    for name in _PACKED_ORDER:
        if name == "alphas":
            in_specs.append(pl.BlockSpec(memory_space=pltpu.MemorySpace.SMEM))
        else:
            in_specs.append(pl.BlockSpec(packed[name].shape, lambda i: (0, 0)))

    # advisory cost estimate: one folded matmul per conv layer + InstanceNorm segment matmuls
    conv_keys = ("t_d0", "t_d1", "t_bt", "t_u1a", "t_u1b", "t_u1r", "t_u0a", "t_u0b", "t_u0r")
    flops = 2 * n_pad * sum(int(np.prod(packed[k].shape)) for k in conv_keys)
    flops += 8 * n_pad * sum(int(np.prod(packed[k].shape)) * u
                             for k, u in (("gr8", 3), ("gr16", 1), ("gr32", 1)))
    bytes_accessed = 4 * 2 * n_pad * hw + sum(
        int(packed[k].size) * packed[k].dtype.itemsize for k in _PACKED_ORDER)
    transcendentals = n_pad * (2 * hw + 73)

    out = pl.pallas_call(
        _refine_fused_kernel,
        grid=(n_pad // tb,),
        in_specs=in_specs,
        out_specs=pl.BlockSpec((tb, hw), lambda i: (i, 0)),
        out_shape=jax.ShapeDtypeStruct((n_pad, hw), jnp.float32),
        compiler_params=pltpu.CompilerParams(dimension_semantics=("parallel",)),
        cost_estimate=pl.CostEstimate(flops=flops, transcendentals=transcendentals,
                                      bytes_accessed=bytes_accessed),
    )(*operands)
    return out[:n].reshape(n, 1, h, w)                     # NCHW


# ------------------------------------- main --------------------------------------------
if __name__ == "__main__":
    key = jax.random.PRNGKey(0)
    pkey, xkey = jax.random.split(key)
    params = init_params(pkey)
    packed = pack_params(params)

    # batch of 16 -> TB=8 per grid step, grid=(2,) so both v7x TensorCores get work
    x = jax.random.normal(xkey, (16, IN_CHANNELS, H, W), jnp.float32)

    y = refine_net_forward(packed, x)
    jax.block_until_ready(y)

    assert y.shape == (16, 1, H, W), y.shape
    assert bool(jnp.all(jnp.isfinite(y)))
    assert bool(jnp.all(y >= OUTPUT_MIN - 1e-5)) and bool(jnp.all(y <= OUTPUT_MAX + 1e-5))
    print("KERNEL_OK")
</pallas_src>

<mosaic_0001>
module attributes {stable_mosaic.version = 11 : i64} {
  func.func @_refine_fused_kernel(%arg0: i32, %arg1: memref<8x256xf32, #tpu.memory_space<vmem>>, %arg2: memref<6xf32, #tpu.memory_space<smem>>, %arg3: memref<256x1024xbf16, #tpu.memory_space<vmem>>, %arg4: memref<1x1024xf32, #tpu.memory_space<vmem>>, %arg5: memref<512x512xbf16, #tpu.memory_space<vmem>>, %arg6: memref<1x512xf32, #tpu.memory_space<vmem>>, %arg7: memref<256x1024xbf16, #tpu.memory_space<vmem>>, %arg8: memref<1x1024xf32, #tpu.memory_space<vmem>>, %arg9: memref<256x512xbf16, #tpu.memory_space<vmem>>, %arg10: memref<512x512xbf16, #tpu.memory_space<vmem>>, %arg11: memref<1x512xf32, #tpu.memory_space<vmem>>, %arg12: memref<512x512xbf16, #tpu.memory_space<vmem>>, %arg13: memref<1x512xf32, #tpu.memory_space<vmem>>, %arg14: memref<512x256xbf16, #tpu.memory_space<vmem>>, %arg15: memref<512x256xbf16, #tpu.memory_space<vmem>>, %arg16: memref<1x256xf32, #tpu.memory_space<vmem>>, %arg17: memref<256x256xbf16, #tpu.memory_space<vmem>>, %arg18: memref<1x256xf32, #tpu.memory_space<vmem>>, %arg19: memref<512x8xf32, #tpu.memory_space<vmem>>, %arg20: memref<8x512xf32, #tpu.memory_space<vmem>>, %arg21: memref<256x16xf32, #tpu.memory_space<vmem>>, %arg22: memref<16x256xf32, #tpu.memory_space<vmem>>, %arg23: memref<512x32xf32, #tpu.memory_space<vmem>>, %arg24: memref<32x512xf32, #tpu.memory_space<vmem>>, %arg25: memref<8x256xf32, #tpu.memory_space<vmem>>) attributes {dimension_semantics = [#tpu.dimension_semantics<parallel>], iteration_bounds = array<i64: 2>, scalar_prefetch = 0 : i64, scratch_operands = 0 : i64, tpu.core_type = #tpu.core_type<tc>, window_params = [{transform_indices = @transform_0, window_bounds = array<i64: 8, 256>}, {transform_indices = @transform_1, window_bounds = array<i64: 6>}, {pipeline_mode = #tpu.pipeline_mode<synchronous>, transform_indices = @transform_2, window_bounds = array<i64: 256, 1024>}, {pipeline_mode = #tpu.pipeline_mode<synchronous>, transform_indices = @transform_3, window_bounds = array<i64: 1, 1024>}, {pipeline_mode = #tpu.pipeline_mode<synchronous>, transform_indices = @transform_4, window_bounds = array<i64: 512, 512>}, {pipeline_mode = #tpu.pipeline_mode<synchronous>, transform_indices = @transform_5, window_bounds = array<i64: 1, 512>}, {pipeline_mode = #tpu.pipeline_mode<synchronous>, transform_indices = @transform_6, window_bounds = array<i64: 256, 1024>}, {pipeline_mode = #tpu.pipeline_mode<synchronous>, transform_indices = @transform_7, window_bounds = array<i64: 1, 1024>}, {pipeline_mode = #tpu.pipeline_mode<synchronous>, transform_indices = @transform_8, window_bounds = array<i64: 256, 512>}, {pipeline_mode = #tpu.pipeline_mode<synchronous>, transform_indices = @transform_9, window_bounds = array<i64: 512, 512>}, {pipeline_mode = #tpu.pipeline_mode<synchronous>, transform_indices = @transform_10, window_bounds = array<i64: 1, 512>}, {pipeline_mode = #tpu.pipeline_mode<synchronous>, transform_indices = @transform_11, window_bounds = array<i64: 512, 512>}, {pipeline_mode = #tpu.pipeline_mode<synchronous>, transform_indices = @transform_12, window_bounds = array<i64: 1, 512>}, {pipeline_mode = #tpu.pipeline_mode<synchronous>, transform_indices = @transform_13, window_bounds = array<i64: 512, 256>}, {pipeline_mode = #tpu.pipeline_mode<synchronous>, transform_indices = @transform_14, window_bounds = array<i64: 512, 256>}, {pipeline_mode = #tpu.pipeline_mode<synchronous>, transform_indices = @transform_15, window_bounds = array<i64: 1, 256>}, {pipeline_mode = #tpu.pipeline_mode<synchronous>, transform_indices = @transform_16, window_bounds = array<i64: 256, 256>}, {pipeline_mode = #tpu.pipeline_mode<synchronous>, transform_indices = @transform_17, window_bounds = array<i64: 1, 256>}, {pipeline_mode = #tpu.pipeline_mode<synchronous>, transform_indices = @transform_18, window_bounds = array<i64: 512, 8>}, {pipeline_mode = #tpu.pipeline_mode<synchronous>, transform_indices = @transform_19, window_bounds = array<i64: 8, 512>}, {pipeline_mode = #tpu.pipeline_mode<synchronous>, transform_indices = @transform_20, window_bounds = array<i64: 256, 16>}, {pipeline_mode = #tpu.pipeline_mode<synchronous>, transform_indices = @transform_21, window_bounds = array<i64: 16, 256>}, {pipeline_mode = #tpu.pipeline_mode<synchronous>, transform_indices = @transform_22, window_bounds = array<i64: 512, 32>}, {pipeline_mode = #tpu.pipeline_mode<synchronous>, transform_indices = @transform_23, window_bounds = array<i64: 32, 512>}, {transform_indices = @transform_24, window_bounds = array<i64: 8, 256>}]} {
    %c0 = arith.constant 0 : index
    %c0_0 = arith.constant 0 : index
    %0 = vector.load %arg1[%c0, %c0_0] : memref<8x256xf32, #tpu.memory_space<vmem>>, vector<8x256xf32>
    %1 = arith.truncf %0 : vector<8x256xf32> to vector<8x256xbf16>
    %c0_1 = arith.constant 0 : index
    %c0_2 = arith.constant 0 : index
    %2 = vector.load %arg3[%c0_1, %c0_2] : memref<256x1024xbf16, #tpu.memory_space<vmem>>, vector<256x1024xbf16>
    %cst = arith.constant dense<0.000000e+00> : vector<8x1024xf32>
    %3 = tpu.matmul %1, %2, %cst {dimension_numbers = #tpu.dot_dimension_numbers<[1], [0], [0], [1], [0, 0, 1, 1], [], []>} : vector<8x256xbf16>, vector<256x1024xbf16>, vector<8x1024xf32> -> vector<8x1024xf32>
    %c0_3 = arith.constant 0 : index
    %c0_4 = arith.constant 0 : index
    %4 = vector.load %arg4[%c0_3, %c0_4] : memref<1x1024xf32, #tpu.memory_space<vmem>>, vector<1x1024xf32>
    %5 = vector.broadcast %4 : vector<1x1024xf32> to vector<8x1024xf32>
    %6 = arith.addf %3, %5 : vector<8x1024xf32>
    %7 = vector.extract_strided_slice %6 {offsets = [0, 0], sizes = [8, 512], strides = [1, 1]} : vector<8x1024xf32> to vector<8x512xf32>
    %c0_5 = arith.constant 0 : index
    %c0_6 = arith.constant 0 : index
    %8 = vector.load %arg19[%c0_5, %c0_6] : memref<512x8xf32, #tpu.memory_space<vmem>>, vector<512x8xf32>
    %cst_7 = arith.constant dense<0.000000e+00> : vector<8x8xf32>
    %9 = tpu.matmul %7, %8, %cst_7 {dimension_numbers = #tpu.dot_dimension_numbers<[1], [0], [0], [1], [0, 0, 1, 1], [], []>} : vector<8x512xf32>, vector<512x8xf32>, vector<8x8xf32> -> vector<8x8xf32>
    %c0_8 = arith.constant 0 : index
    %c0_9 = arith.constant 0 : index
    %10 = vector.load %arg20[%c0_8, %c0_9] : memref<8x512xf32, #tpu.memory_space<vmem>>, vector<8x512xf32>
    %cst_10 = arith.constant dense<0.000000e+00> : vector<8x512xf32>
    %11 = tpu.matmul %9, %10, %cst_10 {dimension_numbers = #tpu.dot_dimension_numbers<[1], [0], [0], [1], [0, 0, 1, 1], [], []>} : vector<8x8xf32>, vector<8x512xf32>, vector<8x512xf32> -> vector<8x512xf32>
    %12 = arith.subf %7, %11 : vector<8x512xf32>
    %13 = arith.mulf %12, %12 : vector<8x512xf32>
    %c0_11 = arith.constant 0 : index
    %c0_12 = arith.constant 0 : index
    %14 = vector.load %arg19[%c0_11, %c0_12] : memref<512x8xf32, #tpu.memory_space<vmem>>, vector<512x8xf32>
    %cst_13 = arith.constant dense<0.000000e+00> : vector<8x8xf32>
    %15 = tpu.matmul %13, %14, %cst_13 {dimension_numbers = #tpu.dot_dimension_numbers<[1], [0], [0], [1], [0, 0, 1, 1], [], []>} : vector<8x512xf32>, vector<512x8xf32>, vector<8x8xf32> -> vector<8x8xf32>
    %cst_14 = arith.constant 9.99999974E-6 : f32
    %16 = vector.broadcast %cst_14 : f32 to vector<8x8xf32>
    %17 = arith.addf %15, %16 : vector<8x8xf32>
    %18 = math.rsqrt %17 : vector<8x8xf32>
    %c0_15 = arith.constant 0 : index
    %c0_16 = arith.constant 0 : index
    %19 = vector.load %arg20[%c0_15, %c0_16] : memref<8x512xf32, #tpu.memory_space<vmem>>, vector<8x512xf32>
    %cst_17 = arith.constant dense<0.000000e+00> : vector<8x512xf32>
    %20 = tpu.matmul %18, %19, %cst_17 {dimension_numbers = #tpu.dot_dimension_numbers<[1], [0], [0], [1], [0, 0, 1, 1], [], []>} : vector<8x8xf32>, vector<8x512xf32>, vector<8x512xf32> -> vector<8x512xf32>
    %21 = arith.mulf %12, %20 : vector<8x512xf32>
    %c0_18 = arith.constant 0 : index
    %22 = memref.load %arg2[%c0_18] : memref<6xf32, #tpu.memory_space<smem>>
    %cst_19 = arith.constant 0.000000e+00 : f32
    %23 = vector.broadcast %cst_19 : f32 to vector<8x512xf32>
    %24 = arith.cmpf oge, %21, %23 : vector<8x512xf32>
    %25 = vector.broadcast %22 : f32 to vector<8x512xf32>
    %26 = arith.mulf %25, %21 : vector<8x512xf32>
    %27 = arith.select %24, %21, %26 : vector<8x512xi1>, vector<8x512xf32>
    %28 = vector.extract_strided_slice %6 {offsets = [0, 512], sizes = [8, 512], strides = [1, 1]} : vector<8x1024xf32> to vector<8x512xf32>
    %29 = arith.addf %27, %28 : vector<8x512xf32>
    %30 = arith.truncf %29 : vector<8x512xf32> to vector<8x512xbf16>
    %c0_20 = arith.constant 0 : index
    %c0_21 = arith.constant 0 : index
    %31 = vector.load %arg5[%c0_20, %c0_21] : memref<512x512xbf16, #tpu.memory_space<vmem>>, vector<512x512xbf16>
    %cst_22 = arith.constant dense<0.000000e+00> : vector<8x512xf32>
    %32 = tpu.matmul %30, %31, %cst_22 {dimension_numbers = #tpu.dot_dimension_numbers<[1], [0], [0], [1], [0, 0, 1, 1], [], []>} : vector<8x512xbf16>, vector<512x512xbf16>, vector<8x512xf32> -> vector<8x512xf32>
    %c0_23 = arith.constant 0 : index
    %c0_24 = arith.constant 0 : index
    %33 = vector.load %arg6[%c0_23, %c0_24] : memref<1x512xf32, #tpu.memory_space<vmem>>, vector<1x512xf32>
    %34 = vector.broadcast %33 : vector<1x512xf32> to vector<8x512xf32>
    %35 = arith.addf %32, %34 : vector<8x512xf32>
    %36 = vector.extract_strided_slice %35 {offsets = [0, 0], sizes = [8, 256], strides = [1, 1]} : vector<8x512xf32> to vector<8x256xf32>
    %c0_25 = arith.constant 0 : index
    %c0_26 = arith.constant 0 : index
    %37 = vector.load %arg21[%c0_25, %c0_26] : memref<256x16xf32, #tpu.memory_space<vmem>>, vector<256x16xf32>
    %cst_27 = arith.constant dense<0.000000e+00> : vector<8x16xf32>
    %38 = tpu.matmul %36, %37, %cst_27 {dimension_numbers = #tpu.dot_dimension_numbers<[1], [0], [0], [1], [0, 0, 1, 1], [], []>} : vector<8x256xf32>, vector<256x16xf32>, vector<8x16xf32> -> vector<8x16xf32>
    %c0_28 = arith.constant 0 : index
    %c0_29 = arith.constant 0 : index
    %39 = vector.load %arg22[%c0_28, %c0_29] : memref<16x256xf32, #tpu.memory_space<vmem>>, vector<16x256xf32>
    %cst_30 = arith.constant dense<0.000000e+00> : vector<8x256xf32>
    %40 = tpu.matmul %38, %39, %cst_30 {dimension_numbers = #tpu.dot_dimension_numbers<[1], [0], [0], [1], [0, 0, 1, 1], [], []>} : vector<8x16xf32>, vector<16x256xf32>, vector<8x256xf32> -> vector<8x256xf32>
    %41 = arith.subf %36, %40 : vector<8x256xf32>
    %42 = arith.mulf %41, %41 : vector<8x256xf32>
    %c0_31 = arith.constant 0 : index
    %c0_32 = arith.constant 0 : index
    %43 = vector.load %arg21[%c0_31, %c0_32] : memref<256x16xf32, #tpu.memory_space<vmem>>, vector<256x16xf32>
    %cst_33 = arith.constant dense<0.000000e+00> : vector<8x16xf32>
    %44 = tpu.matmul %42, %43, %cst_33 {dimension_numbers = #tpu.dot_dimension_numbers<[1], [0], [0], [1], [0, 0, 1, 1], [], []>} : vector<8x256xf32>, vector<256x16xf32>, vector<8x16xf32> -> vector<8x16xf32>
    %cst_34 = arith.constant 9.99999974E-6 : f32
    %45 = vector.broadcast %cst_34 : f32 to vector<8x16xf32>
    %46 = arith.addf %44, %45 : vector<8x16xf32>
    %47 = math.rsqrt %46 : vector<8x16xf32>
    %c0_35 = arith.constant 0 : index
    %c0_36 = arith.constant 0 : index
    %48 = vector.load %arg22[%c0_35, %c0_36] : memref<16x256xf32, #tpu.memory_space<vmem>>, vector<16x256xf32>
    %cst_37 = arith.constant dense<0.000000e+00> : vector<8x256xf32>
    %49 = tpu.matmul %47, %48, %cst_37 {dimension_numbers = #tpu.dot_dimension_numbers<[1], [0], [0], [1], [0, 0, 1, 1], [], []>} : vector<8x16xf32>, vector<16x256xf32>, vector<8x256xf32> -> vector<8x256xf32>
    %50 = arith.mulf %41, %49 : vector<8x256xf32>
    %c1 = arith.constant 1 : index
    %51 = memref.load %arg2[%c1] : memref<6xf32, #tpu.memory_space<smem>>
    %cst_38 = arith.constant 0.000000e+00 : f32
    %52 = vector.broadcast %cst_38 : f32 to vector<8x256xf32>
    %53 = arith.cmpf oge, %50, %52 : vector<8x256xf32>
    %54 = vector.broadcast %51 : f32 to vector<8x256xf32>
    %55 = arith.mulf %54, %50 : vector<8x256xf32>
    %56 = arith.select %53, %50, %55 : vector<8x256xi1>, vector<8x256xf32>
    %57 = vector.extract_strided_slice %35 {offsets = [0, 256], sizes = [8, 256], strides = [1, 1]} : vector<8x512xf32> to vector<8x256xf32>
    %58 = arith.addf %56, %57 : vector<8x256xf32>
    %59 = arith.truncf %58 : vector<8x256xf32> to vector<8x256xbf16>
    %c0_39 = arith.constant 0 : index
    %c0_40 = arith.constant 0 : index
    %60 = vector.load %arg7[%c0_39, %c0_40] : memref<256x1024xbf16, #tpu.memory_space<vmem>>, vector<256x1024xbf16>
    %cst_41 = arith.constant dense<0.000000e+00> : vector<8x1024xf32>
    %61 = tpu.matmul %59, %60, %cst_41 {dimension_numbers = #tpu.dot_dimension_numbers<[1], [0], [0], [1], [0, 0, 1, 1], [], []>} : vector<8x256xbf16>, vector<256x1024xbf16>, vector<8x1024xf32> -> vector<8x1024xf32>
    %c0_42 = arith.constant 0 : index
    %c0_43 = arith.constant 0 : index
    %62 = vector.load %arg8[%c0_42, %c0_43] : memref<1x1024xf32, #tpu.memory_space<vmem>>, vector<1x1024xf32>
    %63 = vector.broadcast %62 : vector<1x1024xf32> to vector<8x1024xf32>
    %64 = arith.addf %61, %63 : vector<8x1024xf32>
    %65 = vector.extract_strided_slice %64 {offsets = [0, 0], sizes = [8, 512], strides = [1, 1]} : vector<8x1024xf32> to vector<8x512xf32>
    %c0_44 = arith.constant 0 : index
    %c0_45 = arith.constant 0 : index
    %66 = vector.load %arg23[%c0_44, %c0_45] : memref<512x32xf32, #tpu.memory_space<vmem>>, vector<512x32xf32>
    %cst_46 = arith.constant dense<0.000000e+00> : vector<8x32xf32>
    %67 = tpu.matmul %65, %66, %cst_46 {dimension_numbers = #tpu.dot_dimension_numbers<[1], [0], [0], [1], [0, 0, 1, 1], [], []>} : vector<8x512xf32>, vector<512x32xf32>, vector<8x32xf32> -> vector<8x32xf32>
    %c0_47 = arith.constant 0 : index
    %c0_48 = arith.constant 0 : index
    %68 = vector.load %arg24[%c0_47, %c0_48] : memref<32x512xf32, #tpu.memory_space<vmem>>, vector<32x512xf32>
    %cst_49 = arith.constant dense<0.000000e+00> : vector<8x512xf32>
    %69 = tpu.matmul %67, %68, %cst_49 {dimension_numbers = #tpu.dot_dimension_numbers<[1], [0], [0], [1], [0, 0, 1, 1], [], []>} : vector<8x32xf32>, vector<32x512xf32>, vector<8x512xf32> -> vector<8x512xf32>
    %70 = arith.subf %65, %69 : vector<8x512xf32>
    %71 = arith.mulf %70, %70 : vector<8x512xf32>
    %c0_50 = arith.constant 0 : index
    %c0_51 = arith.constant 0 : index
    %72 = vector.load %arg23[%c0_50, %c0_51] : memref<512x32xf32, #tpu.memory_space<vmem>>, vector<512x32xf32>
    %cst_52 = arith.constant dense<0.000000e+00> : vector<8x32xf32>
    %73 = tpu.matmul %71, %72, %cst_52 {dimension_numbers = #tpu.dot_dimension_numbers<[1], [0], [0], [1], [0, 0, 1, 1], [], []>} : vector<8x512xf32>, vector<512x32xf32>, vector<8x32xf32> -> vector<8x32xf32>
    %cst_53 = arith.constant 9.99999974E-6 : f32
    %74 = vector.broadcast %cst_53 : f32 to vector<8x32xf32>
    %75 = arith.addf %73, %74 : vector<8x32xf32>
    %76 = math.rsqrt %75 : vector<8x32xf32>
    %c0_54 = arith.constant 0 : index
    %c0_55 = arith.constant 0 : index
    %77 = vector.load %arg24[%c0_54, %c0_55] : memref<32x512xf32, #tpu.memory_space<vmem>>, vector<32x512xf32>
    %cst_56 = arith.constant dense<0.000000e+00> : vector<8x512xf32>
    %78 = tpu.matmul %76, %77, %cst_56 {dimension_numbers = #tpu.dot_dimension_numbers<[1], [0], [0], [1], [0, 0, 1, 1], [], []>} : vector<8x32xf32>, vector<32x512xf32>, vector<8x512xf32> -> vector<8x512xf32>
    %79 = arith.mulf %70, %78 : vector<8x512xf32>
    %c2 = arith.constant 2 : index
    %80 = memref.load %arg2[%c2] : memref<6xf32, #tpu.memory_space<smem>>
    %cst_57 = arith.constant 0.000000e+00 : f32
    %81 = vector.broadcast %cst_57 : f32 to vector<8x512xf32>
    %82 = arith.cmpf oge, %79, %81 : vector<8x512xf32>
    %83 = vector.broadcast %80 : f32 to vector<8x512xf32>
    %84 = arith.mulf %83, %79 : vector<8x512xf32>
    %85 = arith.select %82, %79, %84 : vector<8x512xi1>, vector<8x512xf32>
    %86 = vector.extract_strided_slice %64 {offsets = [0, 512], sizes = [8, 512], strides = [1, 1]} : vector<8x1024xf32> to vector<8x512xf32>
    %87 = arith.addf %85, %86 : vector<8x512xf32>
    %88 = arith.truncf %58 : vector<8x256xf32> to vector<8x256xbf16>
    %c0_58 = arith.constant 0 : index
    %c0_59 = arith.constant 0 : index
    %89 = vector.load %arg9[%c0_58, %c0_59] : memref<256x512xbf16, #tpu.memory_space<vmem>>, vector<256x512xbf16>
    %cst_60 = arith.constant dense<0.000000e+00> : vector<8x512xf32>
    %90 = tpu.matmul %88, %89, %cst_60 {dimension_numbers = #tpu.dot_dimension_numbers<[1], [0], [0], [1], [0, 0, 1, 1], [], []>} : vector<8x256xbf16>, vector<256x512xbf16>, vector<8x512xf32> -> vector<8x512xf32>
    %91 = arith.truncf %87 : vector<8x512xf32> to vector<8x512xbf16>
    %c0_61 = arith.constant 0 : index
    %c0_62 = arith.constant 0 : index
    %92 = vector.load %arg10[%c0_61, %c0_62] : memref<512x512xbf16, #tpu.memory_space<vmem>>, vector<512x512xbf16>
    %cst_63 = arith.constant dense<0.000000e+00> : vector<8x512xf32>
    %93 = tpu.matmul %91, %92, %cst_63 {dimension_numbers = #tpu.dot_dimension_numbers<[1], [0], [0], [1], [0, 0, 1, 1], [], []>} : vector<8x512xbf16>, vector<512x512xbf16>, vector<8x512xf32> -> vector<8x512xf32>
    %94 = arith.addf %90, %93 : vector<8x512xf32>
    %c0_64 = arith.constant 0 : index
    %c0_65 = arith.constant 0 : index
    %95 = vector.load %arg11[%c0_64, %c0_65] : memref<1x512xf32, #tpu.memory_space<vmem>>, vector<1x512xf32>
    %96 = vector.broadcast %95 : vector<1x512xf32> to vector<8x512xf32>
    %97 = arith.addf %94, %96 : vector<8x512xf32>
    %c0_66 = arith.constant 0 : index
    %c0_67 = arith.constant 0 : index
    %98 = vector.load %arg19[%c0_66, %c0_67] : memref<512x8xf32, #tpu.memory_space<vmem>>, vector<512x8xf32>
    %cst_68 = arith.constant dense<0.000000e+00> : vector<8x8xf32>
    %99 = tpu.matmul %97, %98, %cst_68 {dimension_numbers = #tpu.dot_dimension_numbers<[1], [0], [0], [1], [0, 0, 1, 1], [], []>} : vector<8x512xf32>, vector<512x8xf32>, vector<8x8xf32> -> vector<8x8xf32>
    %c0_69 = arith.constant 0 : index
    %c0_70 = arith.constant 0 : index
    %100 = vector.load %arg20[%c0_69, %c0_70] : memref<8x512xf32, #tpu.memory_space<vmem>>, vector<8x512xf32>
    %cst_71 = arith.constant dense<0.000000e+00> : vector<8x512xf32>
    %101 = tpu.matmul %99, %100, %cst_71 {dimension_numbers = #tpu.dot_dimension_numbers<[1], [0], [0], [1], [0, 0, 1, 1], [], []>} : vector<8x8xf32>, vector<8x512xf32>, vector<8x512xf32> -> vector<8x512xf32>
    %102 = arith.subf %97, %101 : vector<8x512xf32>
    %103 = arith.mulf %102, %102 : vector<8x512xf32>
    %c0_72 = arith.constant 0 : index
    %c0_73 = arith.constant 0 : index
    %104 = vector.load %arg19[%c0_72, %c0_73] : memref<512x8xf32, #tpu.memory_space<vmem>>, vector<512x8xf32>
    %cst_74 = arith.constant dense<0.000000e+00> : vector<8x8xf32>
    %105 = tpu.matmul %103, %104, %cst_74 {dimension_numbers = #tpu.dot_dimension_numbers<[1], [0], [0], [1], [0, 0, 1, 1], [], []>} : vector<8x512xf32>, vector<512x8xf32>, vector<8x8xf32> -> vector<8x8xf32>
    %cst_75 = arith.constant 9.99999974E-6 : f32
    %106 = vector.broadcast %cst_75 : f32 to vector<8x8xf32>
    %107 = arith.addf %105, %106 : vector<8x8xf32>
    %108 = math.rsqrt %107 : vector<8x8xf32>
    %c0_76 = arith.constant 0 : index
    %c0_77 = arith.constant 0 : index
    %109 = vector.load %arg20[%c0_76, %c0_77] : memref<8x512xf32, #tpu.memory_space<vmem>>, vector<8x512xf32>
    %cst_78 = arith.constant dense<0.000000e+00> : vector<8x512xf32>
    %110 = tpu.matmul %108, %109, %cst_78 {dimension_numbers = #tpu.dot_dimension_numbers<[1], [0], [0], [1], [0, 0, 1, 1], [], []>} : vector<8x8xf32>, vector<8x512xf32>, vector<8x512xf32> -> vector<8x512xf32>
    %111 = arith.mulf %102, %110 : vector<8x512xf32>
    %c3 = arith.constant 3 : index
    %112 = memref.load %arg2[%c3] : memref<6xf32, #tpu.memory_space<smem>>
    %cst_79 = arith.constant 0.000000e+00 : f32
    %113 = vector.broadcast %cst_79 : f32 to vector<8x512xf32>
    %114 = arith.cmpf oge, %111, %113 : vector<8x512xf32>
    %115 = vector.broadcast %112 : f32 to vector<8x512xf32>
    %116 = arith.mulf %115, %111 : vector<8x512xf32>
    %117 = arith.select %114, %111, %116 : vector<8x512xi1>, vector<8x512xf32>
    %118 = arith.truncf %117 : vector<8x512xf32> to vector<8x512xbf16>
    %c0_80 = arith.constant 0 : index
    %c0_81 = arith.constant 0 : index
    %119 = vector.load %arg12[%c0_80, %c0_81] : memref<512x512xbf16, #tpu.memory_space<vmem>>, vector<512x512xbf16>
    %cst_82 = arith.constant dense<0.000000e+00> : vector<8x512xf32>
    %120 = tpu.matmul %118, %119, %cst_82 {dimension_numbers = #tpu.dot_dimension_numbers<[1], [0], [0], [1], [0, 0, 1, 1], [], []>} : vector<8x512xbf16>, vector<512x512xbf16>, vector<8x512xf32> -> vector<8x512xf32>
    %c0_83 = arith.constant 0 : index
    %c0_84 = arith.constant 0 : index
    %121 = vector.load %arg13[%c0_83, %c0_84] : memref<1x512xf32, #tpu.memory_space<vmem>>, vector<1x512xf32>
    %122 = vector.broadcast %121 : vector<1x512xf32> to vector<8x512xf32>
    %123 = arith.addf %120, %122 : vector<8x512xf32>
    %c0_85 = arith.constant 0 : index
    %c0_86 = arith.constant 0 : index
    %124 = vector.load %arg19[%c0_85, %c0_86] : memref<512x8xf32, #tpu.memory_space<vmem>>, vector<512x8xf32>
    %cst_87 = arith.constant dense<0.000000e+00> : vector<8x8xf32>
    %125 = tpu.matmul %123, %124, %cst_87 {dimension_numbers = #tpu.dot_dimension_numbers<[1], [0], [0], [1], [0, 0, 1, 1], [], []>} : vector<8x512xf32>, vector<512x8xf32>, vector<8x8xf32> -> vector<8x8xf32>
    %c0_88 = arith.constant 0 : index
    %c0_89 = arith.constant 0 : index
    %126 = vector.load %arg20[%c0_88, %c0_89] : memref<8x512xf32, #tpu.memory_space<vmem>>, vector<8x512xf32>
    %cst_90 = arith.constant dense<0.000000e+00> : vector<8x512xf32>
    %127 = tpu.matmul %125, %126, %cst_90 {dimension_numbers = #tpu.dot_dimension_numbers<[1], [0], [0], [1], [0, 0, 1, 1], [], []>} : vector<8x8xf32>, vector<8x512xf32>, vector<8x512xf32> -> vector<8x512xf32>
    %128 = arith.subf %123, %127 : vector<8x512xf32>
    %129 = arith.mulf %128, %128 : vector<8x512xf32>
    %c0_91 = arith.constant 0 : index
    %c0_92 = arith.constant 0 : index
    %130 = vector.load %arg19[%c0_91, %c0_92] : memref<512x8xf32, #tpu.memory_space<vmem>>, vector<512x8xf32>
    %cst_93 = arith.constant dense<0.000000e+00> : vector<8x8xf32>
    %131 = tpu.matmul %129, %130, %cst_93 {dimension_numbers = #tpu.dot_dimension_numbers<[1], [0], [0], [1], [0, 0, 1, 1], [], []>} : vector<8x512xf32>, vector<512x8xf32>, vector<8x8xf32> -> vector<8x8xf32>
    %cst_94 = arith.constant 9.99999974E-6 : f32
    %132 = vector.broadcast %cst_94 : f32 to vector<8x8xf32>
    %133 = arith.addf %131, %132 : vector<8x8xf32>
    %134 = math.rsqrt %133 : vector<8x8xf32>
    %c0_95 = arith.constant 0 : index
    %c0_96 = arith.constant 0 : index
    %135 = vector.load %arg20[%c0_95, %c0_96] : memref<8x512xf32, #tpu.memory_space<vmem>>, vector<8x512xf32>
    %cst_97 = arith.constant dense<0.000000e+00> : vector<8x512xf32>
    %136 = tpu.matmul %134, %135, %cst_97 {dimension_numbers = #tpu.dot_dimension_numbers<[1], [0], [0], [1], [0, 0, 1, 1], [], []>} : vector<8x8xf32>, vector<8x512xf32>, vector<8x512xf32> -> vector<8x512xf32>
    %137 = arith.mulf %128, %136 : vector<8x512xf32>
    %c4 = arith.constant 4 : index
    %138 = memref.load %arg2[%c4] : memref<6xf32, #tpu.memory_space<smem>>
    %cst_98 = arith.constant 0.000000e+00 : f32
    %139 = vector.broadcast %cst_98 : f32 to vector<8x512xf32>
    %140 = arith.cmpf oge, %137, %139 : vector<8x512xf32>
    %141 = vector.broadcast %138 : f32 to vector<8x512xf32>
    %142 = arith.mulf %141, %137 : vector<8x512xf32>
    %143 = arith.select %140, %137, %142 : vector<8x512xi1>, vector<8x512xf32>
    %144 = arith.addf %143, %117 : vector<8x512xf32>
    %145 = arith.truncf %29 : vector<8x512xf32> to vector<8x512xbf16>
    %c0_99 = arith.constant 0 : index
    %c0_100 = arith.constant 0 : index
    %146 = vector.load %arg14[%c0_99, %c0_100] : memref<512x256xbf16, #tpu.memory_space<vmem>>, vector<512x256xbf16>
    %cst_101 = arith.constant dense<0.000000e+00> : vector<8x256xf32>
    %147 = tpu.matmul %145, %146, %cst_101 {dimension_numbers = #tpu.dot_dimension_numbers<[1], [0], [0], [1], [0, 0, 1, 1], [], []>} : vector<8x512xbf16>, vector<512x256xbf16>, vector<8x256xf32> -> vector<8x256xf32>
    %148 = arith.truncf %144 : vector<8x512xf32> to vector<8x512xbf16>
    %c0_102 = arith.constant 0 : index
    %c0_103 = arith.constant 0 : index
    %149 = vector.load %arg15[%c0_102, %c0_103] : memref<512x256xbf16, #tpu.memory_space<vmem>>, vector<512x256xbf16>
    %cst_104 = arith.constant dense<0.000000e+00> : vector<8x256xf32>
    %150 = tpu.matmul %148, %149, %cst_104 {dimension_numbers = #tpu.dot_dimension_numbers<[1], [0], [0], [1], [0, 0, 1, 1], [], []>} : vector<8x512xbf16>, vector<512x256xbf16>, vector<8x256xf32> -> vector<8x256xf32>
    %151 = arith.addf %147, %150 : vector<8x256xf32>
    %c0_105 = arith.constant 0 : index
    %c0_106 = arith.constant 0 : index
    %152 = vector.load %arg16[%c0_105, %c0_106] : memref<1x256xf32, #tpu.memory_space<vmem>>, vector<1x256xf32>
    %153 = vector.broadcast %152 : vector<1x256xf32> to vector<8x256xf32>
    %154 = arith.addf %151, %153 : vector<8x256xf32>
    %cst_107 = arith.constant dense<0.000000e+00> : vector<8xf32>
    %155 = vector.multi_reduction <add>, %154, %cst_107 [1] : vector<8x256xf32> to vector<8xf32>
    %156 = vector.shape_cast %155 : vector<8xf32> to vector<8x1xf32>
    %cst_108 = arith.constant 2.560000e+02 : f32
    %157 = vector.broadcast %cst_108 : f32 to vector<8x1xf32>
    %158 = arith.divf %156, %157 : vector<8x1xf32>
    %159 = vector.broadcast %158 : vector<8x1xf32> to vector<8x256xf32>
    %160 = arith.subf %154, %159 : vector<8x256xf32>
    %161 = arith.mulf %160, %160 : vector<8x256xf32>
    %cst_109 = arith.constant dense<0.000000e+00> : vector<8xf32>
    %162 = vector.multi_reduction <add>, %161, %cst_109 [1] : vector<8x256xf32> to vector<8xf32>
    %163 = vector.shape_cast %162 : vector<8xf32> to vector<8x1xf32>
    %cst_110 = arith.constant 2.560000e+02 : f32
    %164 = vector.broadcast %cst_110 : f32 to vector<8x1xf32>
    %165 = arith.divf %163, %164 : vector<8x1xf32>
    %cst_111 = arith.constant 9.99999974E-6 : f32
    %166 = vector.broadcast %cst_111 : f32 to vector<8x1xf32>
    %167 = arith.addf %165, %166 : vector<8x1xf32>
    %168 = math.rsqrt %167 : vector<8x1xf32>
    %169 = vector.broadcast %168 : vector<8x1xf32> to vector<8x256xf32>
    %170 = arith.mulf %160, %169 : vector<8x256xf32>
    %c5 = arith.constant 5 : index
    %171 = memref.load %arg2[%c5] : memref<6xf32, #tpu.memory_space<smem>>
    %cst_112 = arith.constant 0.000000e+00 : f32
    %172 = vector.broadcast %cst_112 : f32 to vector<8x256xf32>
    %173 = arith.cmpf oge, %170, %172 : vector<8x256xf32>
    %174 = vector.broadcast %171 : f32 to vector<8x256xf32>
    %175 = arith.mulf %174, %170 : vector<8x256xf32>
    %176 = arith.select %173, %170, %175 : vector<8x256xi1>, vector<8x256xf32>
    %177 = arith.truncf %176 : vector<8x256xf32> to vector<8x256xbf16>
    %c0_113 = arith.constant 0 : index
    %c0_114 = arith.constant 0 : index
    %178 = vector.load %arg17[%c0_113, %c0_114] : memref<256x256xbf16, #tpu.memory_space<vmem>>, vector<256x256xbf16>
    %cst_115 = arith.constant dense<0.000000e+00> : vector<8x256xf32>
    %179 = tpu.matmul %177, %178, %cst_115 {dimension_numbers = #tpu.dot_dimension_numbers<[1], [0], [0], [1], [0, 0, 1, 1], [], []>} : vector<8x256xbf16>, vector<256x256xbf16>, vector<8x256xf32> -> vector<8x256xf32>
    %c0_116 = arith.constant 0 : index
    %c0_117 = arith.constant 0 : index
    %180 = vector.load %arg18[%c0_116, %c0_117] : memref<1x256xf32, #tpu.memory_space<vmem>>, vector<1x256xf32>
    %181 = vector.broadcast %180 : vector<1x256xf32> to vector<8x256xf32>
    %182 = arith.addf %179, %181 : vector<8x256xf32>
    %183 = arith.addf %182, %176 : vector<8x256xf32>
    %cst_118 = arith.constant 0.000000e+00 : f32
    %184 = vector.broadcast %cst_118 : f32 to vector<8x256xf32>
    %185 = arith.subf %184, %183 : vector<8x256xf32>
    %186 = math.exp %185 : vector<8x256xf32>
    %cst_119 = arith.constant 1.000000e+00 : f32
    %187 = vector.broadcast %cst_119 : f32 to vector<8x256xf32>
    %188 = arith.addf %187, %186 : vector<8x256xf32>
    %cst_120 = arith.constant 1.000000e+00 : f32
    %189 = vector.broadcast %cst_120 : f32 to vector<8x256xf32>
    %190 = arith.divf %189, %188 : vector<8x256xf32>
    %cst_121 = arith.constant 2.000000e+00 : f32
    %191 = vector.broadcast %cst_121 : f32 to vector<8x256xf32>
    %192 = arith.mulf %190, %191 : vector<8x256xf32>
    %cst_122 = arith.constant -1.000000e+00 : f32
    %193 = vector.broadcast %cst_122 : f32 to vector<8x256xf32>
    %194 = arith.addf %192, %193 : vector<8x256xf32>
    %c0_123 = arith.constant 0 : index
    %c0_124 = arith.constant 0 : index
    %195 = vector.load %arg25[%c0_123, %c0_124] : memref<8x256xf32, #tpu.memory_space<vmem>>, vector<8x256xf32>
    tpu.vector_store %arg25[%c0_123, %c0_124], %194 {strides = array<i32>} : memref<8x256xf32, #tpu.memory_space<vmem>>, vector<8x256xf32>,
    return
  }
  func.func @transform_0(%arg0: i32) -> (i32, i32) {
    %c0_i32 = arith.constant 0 : i32
    %c0_i32_0 = arith.constant 0 : i32
    return %arg0, %c0_i32 : i32, i32
  }
  func.func @transform_1(%arg0: i32) -> i32 {
    %c0_i32 = arith.constant 0 : i32
    %c0_i32_0 = arith.constant 0 : i32
    return %c0_i32 : i32
  }
  func.func @transform_2(%arg0: i32) -> (i32, i32) {
    %c0_i32 = arith.constant 0 : i32
    %c0_i32_0 = arith.constant 0 : i32
    %c0_i32_1 = arith.constant 0 : i32
    return %c0_i32, %c0_i32_0 : i32, i32
  }
  func.func @transform_3(%arg0: i32) -> (i32, i32) {
    %c0_i32 = arith.constant 0 : i32
    %c0_i32_0 = arith.constant 0 : i32
    %c0_i32_1 = arith.constant 0 : i32
    return %c0_i32, %c0_i32_0 : i32, i32
  }
  func.func @transform_4(%arg0: i32) -> (i32, i32) {
    %c0_i32 = arith.constant 0 : i32
    %c0_i32_0 = arith.constant 0 : i32
    %c0_i32_1 = arith.constant 0 : i32
    return %c0_i32, %c0_i32_0 : i32, i32
  }
  func.func @transform_5(%arg0: i32) -> (i32, i32) {
    %c0_i32 = arith.constant 0 : i32
    %c0_i32_0 = arith.constant 0 : i32
    %c0_i32_1 = arith.constant 0 : i32
    return %c0_i32, %c0_i32_0 : i32, i32
  }
  func.func @transform_6(%arg0: i32) -> (i32, i32) {
    %c0_i32 = arith.constant 0 : i32
    %c0_i32_0 = arith.constant 0 : i32
    %c0_i32_1 = arith.constant 0 : i32
    return %c0_i32, %c0_i32_0 : i32, i32
  }
  func.func @transform_7(%arg0: i32) -> (i32, i32) {
    %c0_i32 = arith.constant 0 : i32
    %c0_i32_0 = arith.constant 0 : i32
    %c0_i32_1 = arith.constant 0 : i32
    return %c0_i32, %c0_i32_0 : i32, i32
  }
  func.func @transform_8(%arg0: i32) -> (i32, i32) {
    %c0_i32 = arith.constant 0 : i32
    %c0_i32_0 = arith.constant 0 : i32
    %c0_i32_1 = arith.constant 0 : i32
    return %c0_i32, %c0_i32_0 : i32, i32
  }
  func.func @transform_9(%arg0: i32) -> (i32, i32) {
    %c0_i32 = arith.constant 0 : i32
    %c0_i32_0 = arith.constant 0 : i32
    %c0_i32_1 = arith.constant 0 : i32
    return %c0_i32, %c0_i32_0 : i32, i32
  }
  func.func @transform_10(%arg0: i32) -> (i32, i32) {
    %c0_i32 = arith.constant 0 : i32
    %c0_i32_0 = arith.constant 0 : i32
    %c0_i32_1 = arith.constant 0 : i32
    return %c0_i32, %c0_i32_0 : i32, i32
  }
  func.func @transform_11(%arg0: i32) -> (i32, i32) {
    %c0_i32 = arith.constant 0 : i32
    %c0_i32_0 = arith.constant 0 : i32
    %c0_i32_1 = arith.constant 0 : i32
    return %c0_i32, %c0_i32_0 : i32, i32
  }
  func.func @transform_12(%arg0: i32) -> (i32, i32) {
    %c0_i32 = arith.constant 0 : i32
    %c0_i32_0 = arith.constant 0 : i32
    %c0_i32_1 = arith.constant 0 : i32
    return %c0_i32, %c0_i32_0 : i32, i32
  }
  func.func @transform_13(%arg0: i32) -> (i32, i32) {
    %c0_i32 = arith.constant 0 : i32
    %c0_i32_0 = arith.constant 0 : i32
    %c0_i32_1 = arith.constant 0 : i32
    return %c0_i32, %c0_i32_0 : i32, i32
  }
  func.func @transform_14(%arg0: i32) -> (i32, i32) {
    %c0_i32 = arith.constant 0 : i32
    %c0_i32_0 = arith.constant 0 : i32
    %c0_i32_1 = arith.constant 0 : i32
    return %c0_i32, %c0_i32_0 : i32, i32
  }
  func.func @transform_15(%arg0: i32) -> (i32, i32) {
    %c0_i32 = arith.constant 0 : i32
    %c0_i32_0 = arith.constant 0 : i32
    %c0_i32_1 = arith.constant 0 : i32
    return %c0_i32, %c0_i32_0 : i32, i32
  }
  func.func @transform_16(%arg0: i32) -> (i32, i32) {
    %c0_i32 = arith.constant 0 : i32
    %c0_i32_0 = arith.constant 0 : i32
    %c0_i32_1 = arith.constant 0 : i32
    return %c0_i32, %c0_i32_0 : i32, i32
  }
  func.func @transform_17(%arg0: i32) -> (i32, i32) {
    %c0_i32 = arith.constant 0 : i32
    %c0_i32_0 = arith.constant 0 : i32
    %c0_i32_1 = arith.constant 0 : i32
    return %c0_i32, %c0_i32_0 : i32, i32
  }
  func.func @transform_18(%arg0: i32) -> (i32, i32) {
    %c0_i32 = arith.constant 0 : i32
    %c0_i32_0 = arith.constant 0 : i32
    %c0_i32_1 = arith.constant 0 : i32
    return %c0_i32, %c0_i32_0 : i32, i32
  }
  func.func @transform_19(%arg0: i32) -> (i32, i32) {
    %c0_i32 = arith.constant 0 : i32
    %c0_i32_0 = arith.constant 0 : i32
    %c0_i32_1 = arith.constant 0 : i32
    return %c0_i32, %c0_i32_0 : i32, i32
  }
  func.func @transform_20(%arg0: i32) -> (i32, i32) {
    %c0_i32 = arith.constant 0 : i32
    %c0_i32_0 = arith.constant 0 : i32
    %c0_i32_1 = arith.constant 0 : i32
    return %c0_i32, %c0_i32_0 : i32, i32
  }
  func.func @transform_21(%arg0: i32) -> (i32, i32) {
    %c0_i32 = arith.constant 0 : i32
    %c0_i32_0 = arith.constant 0 : i32
    %c0_i32_1 = arith.constant 0 : i32
    return %c0_i32, %c0_i32_0 : i32, i32
  }
  func.func @transform_22(%arg0: i32) -> (i32, i32) {
    %c0_i32 = arith.constant 0 : i32
    %c0_i32_0 = arith.constant 0 : i32
    %c0_i32_1 = arith.constant 0 : i32
    return %c0_i32, %c0_i32_0 : i32, i32
  }
  func.func @transform_23(%arg0: i32) -> (i32, i32) {
    %c0_i32 = arith.constant 0 : i32
    %c0_i32_0 = arith.constant 0 : i32
    %c0_i32_1 = arith.constant 0 : i32
    return %c0_i32, %c0_i32_0 : i32, i32
  }
  func.func @transform_24(%arg0: i32) -> (i32, i32) {
    %c0_i32 = arith.constant 0 : i32
    %c0_i32_0 = arith.constant 0 : i32
    return %arg0, %c0_i32 : i32, i32
  }
}

</mosaic_0001>

<bundles_post_ra>
// kernel: refine_net_forward.1
= control target key start
LH: loop header
LB: loop body
LE: loop exit
PB: predicated region body
PF: predicated region fallthrough
CT: control target
= control target key end

     0   :  { %s16745_s0 = inlined_call_operand.vmem [shape: f32[16,256], index: 0, kind: input, shape index: {}]   ;;  %s16746_s1 = inlined_call_operand.hbm [shape: f32[6], index: 1, kind: input, shape index: {}]   ;;  %s16747_s2 = inlined_call_operand.vmem [shape: bf16[256,1024], index: 2, kind: input, shape index: {}]   ;;  %s16748_s3 = inlined_call_operand.vmem [shape: f32[1,1024], index: 3, kind: input, shape index: {}]   ;;  %s16749_s4 = inlined_call_operand.hbm [shape: bf16[512,512], index: 4, kind: input, shape index: {}]   ;;  %s16750_s5 = inlined_call_operand.vmem [shape: f32[1,512], index: 5, kind: input, shape index: {}]   ;;  %s16751_s6 = inlined_call_operand.hbm [shape: bf16[256,1024], index: 6, kind: input, shape index: {}]   ;;  %s16752_s7 = inlined_call_operand.vmem [shape: f32[1,1024], index: 7, kind: input, shape index: {}]   ;;  %s16753_s8 = inlined_call_operand.vmem [shape: bf16[256,512], index: 8, kind: input, shape index: {}]   ;;  %s16754_s9 = inlined_call_operand.hbm [shape: bf16[512,512], index: 9, kind: input, shape index: {}]   ;;  %s16755_s10 = inlined_call_operand.vmem [shape: f32[1,512], index: 10, kind: input, shape index: {}]   ;;  %s16756_s11 = inlined_call_operand.hbm [shape: bf16[512,512], index: 11, kind: input, shape index: {}]   ;;  %s16757_s12 = inlined_call_operand.hbm [shape: f32[1,512], index: 12, kind: input, shape index: {}]   ;;  %s16758_s13 = inlined_call_operand.hbm [shape: bf16[512,256], index: 13, kind: input, shape index: {}]   ;;  %s16759_s14 = inlined_call_operand.hbm [shape: bf16[512,256], index: 14, kind: input, shape index: {}]   ;;  %s16760_s15 = inlined_call_operand.hbm [shape: f32[1,256], index: 15, kind: input, shape index: {}]   ;;  %s16761_s16 = inlined_call_operand.vmem [shape: bf16[256,256], index: 16, kind: input, shape index: {}]   ;;  %s16762_s17 = inlined_call_operand.hbm [shape: f32[1,256], index: 17, kind: input, shape index: {}]   ;;  %s16763_s18 = inlined_call_operand.vmem [shape: f32[512,8], index: 18, kind: input, shape index: {}]   ;;  %s16764_s19 = inlined_call_operand.hbm [shape: f32[8,512], index: 19, kind: input, shape index: {}]   ;;  %s16765_s20 = inlined_call_operand.vmem [shape: f32[256,16], index: 20, kind: input, shape index: {}]   ;;  %s16766_s21 = inlined_call_operand.hbm [shape: f32[16,256], index: 21, kind: input, shape index: {}]   ;;  %s16767_s22 = inlined_call_operand.vmem [shape: f32[512,32], index: 22, kind: input, shape index: {}]   ;;  %s16768_s23 = inlined_call_operand.hbm [shape: f32[32,512], index: 23, kind: input, shape index: {}]   ;;  %s16769_s24 = inlined_call_operand.vmem [shape: f32[16,256], index: 24, kind: output, shape index: {}]  }
   0x1   :  { %16871 = sst [smem:[#allocation72_spill]] %s16745_s0 }
   0x2   :  { %16872 = sst [smem:[#allocation73_spill]] %s16746_s1 }
   0x3   :  { %16873 = sst [smem:[#allocation74_spill]] %s16747_s2 }
   0x4   :  { %16874 = sst [smem:[#allocation75_spill]] %s16748_s3 }
   0x5   :  { %16875 = sst [smem:[#allocation76_spill]] %s16749_s4 }
   0x6   :  { %16876 = sst [smem:[#allocation77_spill]] %s16750_s5 }
   0x7   :  { %16877 = sst [smem:[#allocation78_spill]] %s16751_s6 }
   0x8   :  { %16878 = sst [smem:[#allocation79_spill]] %s16752_s7 }
   0x9   :  { %16879 = sst [smem:[#allocation80_spill]] %s16753_s8 }
   0xa   :  { %16880 = sst [smem:[#allocation81_spill]] %s16754_s9 }
   0xb   :  { %16881 = sst [smem:[#allocation82_spill]] %s16755_s10 }
   0xc   :  { %16882 = sst [smem:[#allocation83_spill]] %s16756_s11 }
   0xd   :  { %16883 = sst [smem:[#allocation84_spill]] %s16757_s12 }
   0xe   :  { %16884 = sst [smem:[#allocation85_spill]] %s16758_s13 }
   0xf   :  { %16885 = sst [smem:[#allocation86_spill]] %s16761_s16 }
  0x10   :  { %16886 = sst [smem:[#allocation87_spill]] %s16767_s22 }
  0x11   :  { %16887 = sst [smem:[#allocation88_spill]] %s16769_s24 }
  0x12   :  { %29 = vsyncpa [#allocation4], 0 }
  0x13   :  { %30 = vsyncpa [#allocation3], 0 }
  0x14   :  { %31 = vsyncpa [#allocation7], 0 }
  0x15   :  { %32 = vsyncpa [#allocation10], 0 }
  0x16   :  { %33 = vsyncpa [#allocation13], 0 }
  0x17   :  { %34 = vsyncpa [#allocation16], 0 }
  0x18   :  { %35 = vsyncpa [#allocation19], 0 }
  0x19   :  { %36 = vsyncpa [#allocation22], 0  ;;  %s14340_s5 = smov 0  }
  0x1a LB: > { %16888 = sst [smem:[#allocation31_spill]] %s14193_s5  ;;  %s14195_s26 = smov [#allocation6]   ;;  %s14193_s5 = sphi %s14340_s5, %s42_s5  }
  0x1b   : > { %s625_s27 = sshll.u32 %s14195_s26, 4  ;;  %s14346_s28 = sadd.s32 4294967295, %s14193_s5   ;;  %s14351_s27 = int_to_ptr.vmem [resolvable:$true] %s625_s27 }
  0x1c   : > { %p10535_p0 = scmp.ge.s32.totalorder %s14193_s5, 1  ;;  %p582_p1 = scmp.lt.s32.totalorder %s14193_s5, 3 }
  0x1d   : > { %p16784_p2 = scmp.eq.s32.totalorder %s14346_s28, 0  ;;  %s14196_s29 = smov [#allocation9]  }
  0x1e   : > { %p14353_p3 = pnand %p10535_p0, %p582_p1  ;;  %s660_s0 = sshll.u32 %s14196_s29, 4  ;;  %s14365_s0 = int_to_ptr.vmem [resolvable:$true] %s660_s0 }
  0x1f   : > { %s14197_s7 = smov [#allocation12]   ;;  %s16891_s8 = sld [smem:[#allocation78_spill]] }
  0x20   : > { %s16889_s6 = scalar_select %p14353_p3, 1, 0 }
  0x21   : > { %p12775_p4 = pneg %p14353_p3  ;;  %s684_s30 = sshll.u32 %s14197_s7, 4  ;;  %s14367_s30 = int_to_ptr.vmem [resolvable:$true] %s684_s30 }
  0x23   : > { %p14361_p5 = pnand %p16784_p2, %p12775_p4 }
  0x25   : > { %s13806_s4 = scalar_lea.hbm %s16891_s8, 16384  ;;  %p14377_p7 = pneg %p14361_p5 }
  0x26   : > { %p13807_p6 = scmp.ne.s32.totalorder %s16891_s8, %s13806_s4  ;;  %p13813_p10 = scmp.lt.u32.totalorder %s13806_s4, %s16891_s8 }
  0x28   : > { %p13809_p8 = pnand %p14377_p7, %p13807_p6 }
  0x2a   : > { %p13810_p9 = pneg %p13809_p8 }
  0x2c   : > { %p13815_p11 = pnand %p13813_p10, %p13810_p9 }
  0x2e   : > { %13818 = shalt.err (!%p13815_p11)
}
  0x2f   : > { %s13819_s3 = scalar_lea.vmem %s14351_s27, 16384  ;;  %p13827_p1 = scmp.lt.s32.totalorder %s14351_s27, %s14351_s27 }
  0x30   : > { %p13820_p12 = scmp.ne.s32.totalorder %s14351_s27, %s13819_s3  ;;  %p13828_p4 = scmp.lt.s32.totalorder %s13819_s3, %s13819_s3 }
  0x32   : > { %p13822_p13 = pnand %p13820_p12, %p14377_p7  ;;  %p13829_p6 = por %p13828_p4, %p13827_p1 }
  0x34   : > { %p13823_p0 = pneg %p13822_p13 }
  0x36   : > { %p13830_p8 = pnand %p13829_p6, %p13823_p0 }
  0x38   : > { %13833 = shalt.err (!%p13830_p8)
}
  0x39   : > { %s16778_s25 = smov 512   ;;  %s16779_s4 = smov 32  }
  0x3a   : > { %12784 = dma.hbm_to_vmem [thread:$0]  (!%p14361_p5), %s16891_s8, 16384, %s14351_s27, [#allocation7], %s16778_s25, %s16778_s25, %s16779_s4  }
  0x3b   : > { %s16893_s11 = sld [smem:[#allocation83_spill]] }
  0x41   : > { %s13834_s3 = scalar_lea.hbm %s16893_s11, 16384 }
  0x42   : > { %p13835_p9 = scmp.ne.s32.totalorder %s16893_s11, %s13834_s3  ;;  %p13841_p12 = scmp.lt.u32.totalorder %s13834_s3, %s16893_s11 }
  0x44   : > { %p13837_p10 = pnand %p13835_p9, %p14377_p7 }
  0x46   : > { %p13838_p11 = pneg %p13837_p10 }
  0x48   : > { %p13843_p13 = pnand %p13841_p12, %p13838_p11 }
  0x4a   : > { %13846 = shalt.err (!%p13843_p13)
}
  0x4b   : > { %s13847_s27 = scalar_lea.vmem %s14365_s0, 16384  ;;  %p13855_p6 = scmp.lt.s32.totalorder %s14365_s0, %s14365_s0 }
  0x4c   : > { %p13848_p0 = scmp.ne.s32.totalorder %s14365_s0, %s13847_s27  ;;  %p13856_p8 = scmp.lt.s32.totalorder %s13847_s27, %s13847_s27 }
  0x4e   : > { %p13850_p1 = pnand %p13848_p0, %p14377_p7  ;;  %p13857_p9 = por %p13856_p8, %p13855_p6 }
  0x50   : > { %p13851_p4 = pneg %p13850_p1 }
  0x52   : > { %p13858_p10 = pnand %p13857_p9, %p13851_p4 }
  0x54   : > { %13861 = shalt.err (!%p13858_p10)
}
  0x55   : > { %s16780_s16 = smov 256   ;;  %s16782_s10 = smov 16  }
  0x56   : > { %12790 = dma.hbm_to_vmem [thread:$0]  (!%p14361_p5), %s16893_s11, 16384, %s14365_s0, [#allocation10], %s16780_s16, %s16780_s16, %s16782_s10  }
  0x57   : > { %s16894_s13 = sld [smem:[#allocation85_spill]] }
  0x5d   : > { %s13862_s29 = scalar_lea.hbm %s16894_s13, 8192 }
  0x5e   : > { %p13863_p11 = scmp.ne.s32.totalorder %s16894_s13, %s13862_s29  ;;  %p13869_p0 = scmp.lt.u32.totalorder %s13862_s29, %s16894_s13 }
  0x60   : > { %p13865_p12 = pnand %p13863_p11, %p14377_p7 }
  0x62   : > { %p13866_p13 = pneg %p13865_p12 }
  0x64   : > { %p13871_p1 = pnand %p13869_p0, %p13866_p13 }
  0x66   : > { %13874 = shalt.err (!%p13871_p1)
}
  0x67   : > { %s13875_s0 = scalar_lea.vmem %s14367_s30, 8192  ;;  %p13883_p9 = scmp.lt.s32.totalorder %s14367_s30, %s14367_s30 }
  0x68   : > { %p13876_p4 = scmp.ne.s32.totalorder %s14367_s30, %s13875_s0  ;;  %p13884_p10 = scmp.lt.s32.totalorder %s13875_s0, %s13875_s0 }
  0x6a   : > { %p13878_p6 = pnand %p13876_p4, %p14377_p7  ;;  %p13885_p11 = por %p13884_p10, %p13883_p9 }
  0x6c   : > { %p13879_p8 = pneg %p13878_p6 }
  0x6e   : > { %p13886_p12 = pnand %p13885_p11, %p13879_p8 }
  0x70   : > { %13889 = shalt.err (!%p13886_p12)
}
  0x71   : > { %s16786_s22 = smov 128   ;;  %s16787_s25 = smov 8  }
  0x72   : > { %12796 = dma.hbm_to_vmem [thread:$0]  (!%p14361_p5), %s16894_s13, 8192, %s14367_s30, [#allocation13], %s16786_s22, %s16786_s22, %s16787_s25  }
  0x73   : > { %s14204_s26 = smov [#allocation15]   ;;  %s14205_s7 = smov [#allocation18]  }
  0x74   : > { %s711_s29 = sshll.u32 %s14204_s26, 4  ;;  %s739_s3 = sshll.u32 %s14205_s7, 4  ;;  %s712_s29 = int_to_ptr.vmem [resolvable:$true] %s711_s29  ;;  %s14453_s3 = int_to_ptr.vmem [resolvable:$true] %s739_s3 }
  0x75   : > { %s13890_s4 = scalar_lea.hbm %s16760_s15, 32 }
  0x76   : > { %p13891_p13 = scmp.ne.s32.totalorder %s16760_s15, %s13890_s4  ;;  %p13897_p4 = scmp.lt.u32.totalorder %s13890_s4, %s16760_s15 }
  0x78   : > { %p13893_p0 = pnand %p13891_p13, %p14377_p7 }
  0x7a   : > { %p13894_p1 = pneg %p13893_p0 }
  0x7c   : > { %p13899_p6 = pnand %p13897_p4, %p13894_p1 }
  0x7e   : > { %13902 = shalt.err (!%p13899_p6)
}
  0x7f   : > { %s13903_s1 = scalar_lea.vmem %s712_s29, 32  ;;  %p13911_p11 = scmp.lt.s32.totalorder %s712_s29, %s712_s29 }
  0x80   : > { %p13904_p8 = scmp.ne.s32.totalorder %s712_s29, %s13903_s1  ;;  %p13912_p12 = scmp.lt.s32.totalorder %s13903_s1, %s13903_s1 }
  0x82   : > { %p13906_p9 = pnand %p13904_p8, %p14377_p7  ;;  %p13913_p2 = por %p13912_p12, %p13911_p11 }
  0x84   : > { %p13907_p10 = pneg %p13906_p9 }
  0x86   : > { %p13914_p3 = pnand %p13913_p2, %p13907_p10 }
  0x88   : > { %13917 = shalt.err (!%p13914_p3)
}
  0x89   : > { %12802 = dma.hbm_to_vmem [thread:$0]  (!%p14361_p5), %s16760_s15, 32, %s712_s29, [#allocation16]  }
  0x8a   : > { %s13918_s7 = scalar_lea.hbm %s16764_s19, 512 }
  0x8b   : > { %p13919_p13 = scmp.ne.s32.totalorder %s16764_s19, %s13918_s7  ;;  %p13925_p2 = scmp.lt.u32.totalorder %s13918_s7, %s16764_s19 }
  0x8d   : > { %p13921_p0 = pnand %p13919_p13, %p14377_p7 }
  0x8f   : > { %p13922_p1 = pneg %p13921_p0 }
  0x91   : > { %p13927_p3 = pnand %p13925_p2, %p13922_p1 }
  0x93   : > { %13930 = shalt.err (!%p13927_p3)
}
  0x94   : > { %s13931_s29 = scalar_lea.vmem %s14453_s3, 512  ;;  %p13939_p9 = scmp.lt.s32.totalorder %s14453_s3, %s14453_s3 }
  0x95   : > { %p13932_p4 = scmp.ne.s32.totalorder %s14453_s3, %s13931_s29  ;;  %p13940_p10 = scmp.lt.s32.totalorder %s13931_s29, %s13931_s29 }
  0x97   : > { %p13934_p6 = pnand %p13932_p4, %p14377_p7  ;;  %p13941_p11 = por %p13940_p10, %p13939_p9 }
  0x99   : > { %p13935_p8 = pneg %p13934_p6 }
  0x9b   : > { %p13942_p12 = pnand %p13941_p11, %p13935_p8 }
  0x9d   : > { %13945 = shalt.err (!%p13942_p12)
}
  0x9e   : > { %12808 = dma.hbm_to_vmem [thread:$0]  (!%p14361_p5), %s16764_s19, 512, %s14453_s3, [#allocation19]  }
  0x9f   : > { %s16895_s26 = sld [smem:[#allocation73_spill]] }
  0xa5   : > { %s13946_s7 = scalar_lea.hbm %s16895_s26, 16 }
  0xa6   : > { %p13947_p13 = scmp.ne.s32.totalorder %s16895_s26, %s13946_s7  ;;  %p13953_p2 = scmp.lt.u32.totalorder %s13946_s7, %s16895_s26 }
  0xa8   : > { %p13949_p0 = pnand %p13947_p13, %p14377_p7 }
  0xaa   : > { %p13950_p1 = pneg %p13949_p0 }
  0xac   : > { %p13955_p3 = pnand %p13953_p2, %p13950_p1 }
  0xae   : > { %13958 = shalt.err (!%p13955_p3)
}
  0xaf   : > { %s14206_s29 = smov [#allocation2]   ;;  %s14207_s16 = smov [#allocation5]  }
  0xb0   : > { %12778 = dma.hbm_to_smem (!%p14361_p5), %s16895_s26, 16, %s14206_s29, [#allocation4]  }
  0xb1   : > { %s609_s10 = sshll.u32 %s14207_s16, 4  ;;  %s14208_s4 = smov [#allocation8]   ;;  %s610_s10 = int_to_ptr.vmem [resolvable:$true] %s609_s10 }
  0xb2   : > { %s644_s27 = sshll.u32 %s14208_s4, 4  ;;  %s16896_s25 = sld [smem:[#allocation76_spill]]  ;;  %s645_s27 = int_to_ptr.vmem [resolvable:$true] %s644_s27 }
  0xb8   : > { %s13959_s24 = scalar_lea.hbm %s16896_s25, 16384 }
  0xb9   : > { %p13960_p4 = scmp.ne.s32.totalorder %s16896_s25, %s13959_s24  ;;  %p13966_p9 = scmp.lt.u32.totalorder %s13959_s24, %s16896_s25 }
  0xbb   : > { %p13962_p6 = pnand %p13960_p4, %p14377_p7 }
  0xbd   : > { %p13963_p8 = pneg %p13962_p6 }
  0xbf   : > { %p13968_p10 = pnand %p13966_p9, %p13963_p8 }
  0xc1   : > { %13971 = shalt.err (!%p13968_p10)
}
  0xc2   : > { %s13972_s29 = scalar_lea.vmem %s610_s10, 16384  ;;  %p13980_p0 = scmp.lt.s32.totalorder %s610_s10, %s610_s10 }
  0xc3   : > { %p13973_p11 = scmp.ne.s32.totalorder %s610_s10, %s13972_s29  ;;  %p13981_p1 = scmp.lt.s32.totalorder %s13972_s29, %s13972_s29 }
  0xc5   : > { %p13975_p12 = pnand %p13973_p11, %p14377_p7  ;;  %p13982_p2 = por %p13981_p1, %p13980_p0 }
  0xc7   : > { %p13976_p13 = pneg %p13975_p12 }
  0xc9   : > { %p13983_p3 = pnand %p13982_p2, %p13976_p13 }
  0xcb   : > { %13986 = shalt.err (!%p13983_p3)
}
  0xcc   : > { %s16897_s22 = smov 16   ;;  %s16898_s1 = smov 256  }
  0xcd   : > { %12781 = dma.hbm_to_vmem [thread:$0]  (!%p14361_p5), %s16896_s25, 16384, %s610_s10, [#allocation3], %s16898_s1, %s16898_s1, %s16897_s22  }
  0xce   : > { %s16899_s9 = sld [smem:[#allocation81_spill]] }
  0xd4   : > { %s13987_s24 = scalar_lea.hbm %s16899_s9, 16384 }
  0xd5   : > { %p13988_p4 = scmp.ne.s32.totalorder %s16899_s9, %s13987_s24  ;;  %p13994_p9 = scmp.lt.u32.totalorder %s13987_s24, %s16899_s9 }
  0xd7   : > { %p13990_p6 = pnand %p13988_p4, %p14377_p7 }
  0xd9   : > { %p13991_p8 = pneg %p13990_p6 }
  0xdb   : > { %p13996_p10 = pnand %p13994_p9, %p13991_p8 }
  0xdd   : > { %13999 = shalt.err (!%p13996_p10)
}
  0xde   : > { %s14000_s8 = scalar_lea.vmem %s645_s27, 16384  ;;  %p14008_p0 = scmp.lt.s32.totalorder %s645_s27, %s645_s27 }
  0xdf   : > { %p14001_p11 = scmp.ne.s32.totalorder %s645_s27, %s14000_s8  ;;  %p14009_p1 = scmp.lt.s32.totalorder %s14000_s8, %s14000_s8 }
  0xe1   : > { %p14003_p12 = pnand %p14001_p11, %p14377_p7  ;;  %p14010_p2 = por %p14009_p1, %p14008_p0 }
  0xe3   : > { %p14004_p13 = pneg %p14003_p12 }
  0xe5   : > { %p14011_p3 = pnand %p14010_p2, %p14004_p13 }
  0xe7   : > { %14014 = shalt.err (!%p14011_p3)
}
  0xe8   : > { %12787 = dma.hbm_to_vmem [thread:$0]  (!%p14361_p5), %s16899_s9, 16384, %s645_s27, [#allocation7], %s16898_s1, %s16898_s1, %s16897_s22  }
  0xe9   : > { %s14209_s4 = smov [#allocation11]   ;;  %s14210_s24 = smov [#allocation14]  }
  0xea   : > { %s674_s0 = sshll.u32 %s14209_s4, 4  ;;  %s697_s7 = sshll.u32 %s14210_s24, 4  ;;  %s675_s0 = int_to_ptr.vmem [resolvable:$true] %s674_s0  ;;  %s698_s7 = int_to_ptr.vmem [resolvable:$true] %s697_s7 }
  0xeb   : > { %s16900_s12 = sld [smem:[#allocation84_spill]] }
  0xf1   : > { %s14015_s29 = scalar_lea.hbm %s16900_s12, 64 }
  0xf2   : > { %p14016_p4 = scmp.ne.s32.totalorder %s16900_s12, %s14015_s29  ;;  %p14022_p9 = scmp.lt.u32.totalorder %s14015_s29, %s16900_s12 }
  0xf4   : > { %p14018_p6 = pnand %p14016_p4, %p14377_p7 }
  0xf6   : > { %p14019_p8 = pneg %p14018_p6 }
  0xf8   : > { %p14024_p10 = pnand %p14022_p9, %p14019_p8 }
  0xfa   : > { %14027 = shalt.err (!%p14024_p10)
}
  0xfb   : > { %s14028_s27 = scalar_lea.vmem %s675_s0, 64  ;;  %p14036_p0 = scmp.lt.s32.totalorder %s675_s0, %s675_s0 }
  0xfc   : > { %p14029_p11 = scmp.ne.s32.totalorder %s675_s0, %s14028_s27  ;;  %p14037_p1 = scmp.lt.s32.totalorder %s14028_s27, %s14028_s27 }
  0xfe   : > { %p14031_p12 = pnand %p14029_p11, %p14377_p7  ;;  %p14038_p2 = por %p14037_p1, %p14036_p0 }
 0x100   : > { %p14032_p13 = pneg %p14031_p12 }
 0x102   : > { %p14039_p3 = pnand %p14038_p2, %p14032_p13 }
 0x104   : > { %14042 = shalt.err (!%p14039_p3)
}
 0x105   : > { %12793 = dma.hbm_to_vmem [thread:$0]  (!%p14361_p5), %s16900_s12, 64, %s675_s0, [#allocation10]  }
 0x106   : > { %s14043_s24 = scalar_lea.hbm %s16759_s14, 8192 }
 0x107   : > { %p14044_p4 = scmp.ne.s32.totalorder %s16759_s14, %s14043_s24  ;;  %p14050_p9 = scmp.lt.u32.totalorder %s14043_s24, %s16759_s14 }
 0x109   : > { %p14046_p6 = pnand %p14044_p4, %p14377_p7 }
 0x10b   : > { %p14047_p8 = pneg %p14046_p6 }
 0x10d   : > { %p14052_p10 = pnand %p14050_p9, %p14047_p8 }
 0x10f   : > { %14055 = shalt.err (!%p14052_p10)
}
 0x110   : > { %s14056_s10 = scalar_lea.vmem %s698_s7, 8192  ;;  %p14064_p0 = scmp.lt.s32.totalorder %s698_s7, %s698_s7 }
 0x111   : > { %p14057_p11 = scmp.ne.s32.totalorder %s698_s7, %s14056_s10  ;;  %p14065_p1 = scmp.lt.s32.totalorder %s14056_s10, %s14056_s10 }
 0x113   : > { %p14059_p12 = pnand %p14057_p11, %p14377_p7  ;;  %p14066_p2 = por %p14065_p1, %p14064_p0 }
 0x115   : > { %p14060_p13 = pneg %p14059_p12 }
 0x117   : > { %p14067_p3 = pnand %p14066_p2, %p14060_p13 }
 0x119   : > { %14070 = shalt.err (!%p14067_p3)
}
 0x11a   : > { %s16901_s0 = smov 8   ;;  %s16902_s27 = smov 128  }
 0x11b   : > { %12799 = dma.hbm_to_vmem [thread:$0]  (!%p14361_p5), %s16759_s14, 8192, %s698_s7, [#allocation13], %s16902_s27, %s16902_s27, %s16901_s0  }
 0x11c   : > { %s14211_s13 = smov [#allocation17]   ;;  %s14212_s24 = smov [#allocation20]  }
 0x11d   : > { %s725_s4 = sshll.u32 %s14211_s13, 4  ;;  %s752_s30 = sshll.u32 %s14212_s24, 4  ;;  %s726_s4 = int_to_ptr.vmem [resolvable:$true] %s725_s4  ;;  %s753_s30 = int_to_ptr.vmem [resolvable:$true] %s752_s30 }
 0x11e   : > { %s14071_s8 = scalar_lea.hbm %s16762_s17, 32 }
 0x11f   : > { %p14072_p4 = scmp.ne.s32.totalorder %s16762_s17, %s14071_s8  ;;  %p14078_p9 = scmp.lt.u32.totalorder %s14071_s8, %s16762_s17 }
 0x121   : > { %p14074_p6 = pnand %p14072_p4, %p14377_p7 }
 0x123   : > { %p14075_p8 = pneg %p14074_p6 }
 0x125   : > { %p14080_p10 = pnand %p14078_p9, %p14075_p8 }
 0x127   : > { %14083 = shalt.err (!%p14080_p10)
}
 0x128   : > { %s14084_s7 = scalar_lea.vmem %s726_s4, 32  ;;  %p14092_p0 = scmp.lt.s32.totalorder %s726_s4, %s726_s4 }
 0x129   : > { %p14085_p11 = scmp.ne.s32.totalorder %s726_s4, %s14084_s7  ;;  %p14093_p1 = scmp.lt.s32.totalorder %s14084_s7, %s14084_s7 }
 0x12b   : > { %p14087_p12 = pnand %p14085_p11, %p14377_p7  ;;  %p14094_p2 = por %p14093_p1, %p14092_p0 }
 0x12d   : > { %p14088_p13 = pneg %p14087_p12 }
 0x12f   : > { %p14095_p3 = pnand %p14094_p2, %p14088_p13 }
 0x131   : > { %14098 = shalt.err (!%p14095_p3)
}
 0x132   : > { %12805 = dma.hbm_to_vmem [thread:$0]  (!%p14361_p5), %s16762_s17, 32, %s726_s4, [#allocation16]  }
 0x133   : > { %s14099_s16 = scalar_lea.hbm %s16766_s21, 512 }
 0x134   : > { %p14100_p4 = scmp.ne.s32.totalorder %s16766_s21, %s14099_s16  ;;  %p14106_p9 = scmp.lt.u32.totalorder %s14099_s16, %s16766_s21 }
 0x136   : > { %p14102_p6 = pnand %p14100_p4, %p14377_p7 }
 0x138   : > { %p14103_p8 = pneg %p14102_p6 }
 0x13a   : > { %p14108_p10 = pnand %p14106_p9, %p14103_p8 }
 0x13c   : > { %14111 = shalt.err (!%p14108_p10)
}
 0x13d   : > { %s14112_s8 = scalar_lea.vmem %s753_s30, 512  ;;  %p14120_p0 = scmp.lt.s32.totalorder %s753_s30, %s753_s30 }
 0x13e   : > { %p14113_p11 = scmp.ne.s32.totalorder %s753_s30, %s14112_s8  ;;  %p14121_p1 = scmp.lt.s32.totalorder %s14112_s8, %s14112_s8 }
 0x140   : > { %p14115_p12 = pnand %p14113_p11, %p14377_p7  ;;  %p14122_p2 = por %p14121_p1, %p14120_p0 }
 0x142   : > { %p14116_p13 = pneg %p14115_p12 }
 0x144   : > { %p14123_p3 = pnand %p14122_p2, %p14116_p13 }
 0x146   : > { %14126 = shalt.err (!%p14123_p3)
}
 0x147   : > { %12811 = dma.hbm_to_vmem [thread:$0]  (!%p14361_p5), %s16766_s21, 512, %s753_s30, [#allocation19], %s16898_s1, %s16898_s1, %s16897_s22  }
 0x148   : > { %s14213_s11 = smov [#allocation21]   ;;  %s14127_s12 = scalar_lea.hbm %s16768_s23, 2048 }
 0x149   : > { %s768_s7 = sshll.u32 %s14213_s11, 4  ;;  %p14128_p4 = scmp.ne.s32.totalorder %s16768_s23, %s14127_s12  ;;  %s769_s7 = int_to_ptr.vmem [resolvable:$true] %s768_s7 }
 0x14a   : > { %p14134_p9 = scmp.lt.u32.totalorder %s14127_s12, %s16768_s23 }
 0x14b   : > { %p14130_p6 = pnand %p14128_p4, %p14377_p7 }
 0x14d   : > { %p14131_p8 = pneg %p14130_p6 }
 0x14f   : > { %p14136_p10 = pnand %p14134_p9, %p14131_p8 }
 0x151   : > { %14139 = shalt.err (!%p14136_p10)
}
 0x152   : > { %s14140_s22 = scalar_lea.vmem %s769_s7, 2048  ;;  %p14148_p0 = scmp.lt.s32.totalorder %s769_s7, %s769_s7 }
 0x153   : > { %p14141_p11 = scmp.ne.s32.totalorder %s769_s7, %s14140_s22  ;;  %p14149_p1 = scmp.lt.s32.totalorder %s14140_s22, %s14140_s22 }
 0x155   : > { %p14143_p12 = pnand %p14141_p11, %p14377_p7  ;;  %p14150_p2 = por %p14149_p1, %p14148_p0 }
 0x157   : > { %p14144_p13 = pneg %p14143_p12 }
 0x159   : > { %p14151_p3 = pnand %p14150_p2, %p14144_p13 }
 0x15b   : > { %14154 = shalt.err (!%p14151_p3)
}
 0x15c   : > { %s16903_s1 = smov 32   ;;  %s16904_s30 = smov 512  }
 0x15d   : > { %12814 = dma.hbm_to_vmem [thread:$0]  (!%p14361_p5), %s16768_s23, 2048, %s769_s7, [#allocation22], %s16904_s30, %s16904_s30, %s16903_s1  }
 0x15e   : > { %p16905_p4 = scmp.ne.s32.totalorder %s16889_s6, 0 }
 0x160   : > { %792 = sbr.rel (%p16905_p4) target bundleno = 7117 (0x1bcd), region = 116 }
 0x167   : > { %p16906_p7 = scmp.eq.s32.totalorder %s14346_s28, 0 }
 0x169   : > { %14160 = dma.done.wait (%p16906_p7), [#allocation4], 16   ;;  %p16907_p6 = pmov %p16906_p7 }
 0x16b   : > { %14162 = vsyncadd (%p16907_p6), [#allocation4], 4294967280  ;;  %p16908_p8 = pmov %p16907_p6 }
 0x16c   : > { %p16909_p9 = pmov %p16907_p6 }
 0x16d   : > { %14164 = dma.done.wait (%p16908_p8), [#allocation3], 16384  }
 0x16e   : > { %14166 = vsyncadd (%p16909_p9), [#allocation3], 4294950912  ;;  %p16910_p10 = pmov %p16907_p6 }
 0x16f   : > { %p16911_p5 = pmov %p16907_p6 }
 0x170   : > { %14168 = dma.done.wait (%p16910_p10), [#allocation7], 32768  }
 0x171   : > { %14170 = vsyncadd (%p16911_p5), [#allocation7], 4294934528  ;;  %p16912_p11 = pmov %p16911_p5 }
 0x172   : > { %p16913_p12 = pmov %p16911_p5 }
 0x173   : > { %14172 = dma.done.wait (%p16912_p11), [#allocation10], 16448  }
 0x174   : > { %14174 = vsyncadd (%p16913_p12), [#allocation10], 4294950848  ;;  %p16914_p13 = pmov %p16911_p5 }
 0x175   : > { %p16915_p0 = pmov %p16911_p5 }
 0x176   : > { %14176 = dma.done.wait (%p16914_p13), [#allocation13], 16384  }
 0x177   : > { %14178 = vsyncadd (%p16915_p0), [#allocation13], 4294950912  ;;  %p16916_p1 = pmov %p16915_p0 }
 0x178   : > { %p16917_p2 = pmov %p16915_p0 }
 0x179   : > { %14180 = dma.done.wait (%p16916_p1), [#allocation16], 64  }
 0x17a   : > { %14182 = vsyncadd (%p16917_p2), [#allocation16], 4294967232  ;;  %p16918_p3 = pmov %p16915_p0 }
 0x17b   : > { %p16919_p4 = pmov %p16915_p0 }
 0x17c   : > { %14184 = dma.done.wait (%p16918_p3), [#allocation19], 1024  }
 0x17d   : > { %14186 = vsyncadd (%p16919_p4), [#allocation19], 4294966272  ;;  %p16920_p7 = pmov %p16915_p0 }
 0x17e   : > { %p16921_p6 = pmov %p16915_p0 }
 0x17f   : > { %14188 = dma.done.wait (%p16920_p7), [#allocation22], 2048  }
 0x180   : > { %14190 = vsyncadd (%p16921_p6), [#allocation22], 4294965248 }
 0x181   : > { %846 = sfence }
 0x182   : > { %s16922_s2 = sld [smem:[#allocation74_spill]]  ;;  %p907_p8 = scmp.lt.s32.totalorder %s14346_s28, 1  ;;  %vm2103_vm0 = vcmask 64512   ;;  %vm3629_vm5 = vcmask 130048   ;;  %vm5061_vm8 = vcmask 261120  }
 0x183   : > { %s16923_s6 = sld [smem:[#allocation72_spill]]  ;;  %s16941_s10 = sld [smem:[#allocation75_spill]] }
 0x184   : > { %s17020_s28 = smov (!%p907_p8, %s14346_s28), 1  ;;  %s2547_s29 = sld [smem:[#allocation2]] }
 0x185   : > { %s11457_s24 = sshll.u32 %s17020_s28, 4  ;;  %s16965_s13 = sld [smem:[#allocation77_spill]] }
 0x186   : > { %s10830_s22 = sld [smem:[#allocation2 + $0x1]]  ;;  %s16967_s3 = sld [smem:[#allocation87_spill]] }
 0x187   : > { %s16968_s0 = sld [smem:[#allocation79_spill]]  ;;  %s10963_s12 = sld [smem:[#allocation2 + $0x2]] }
 0x188   : > { %v921_v0 = vld [vmem:[%s16922_s2] sm:$0xff]  ;;  %v922_v11 = vld [vmem:[%s16922_s2 + $0x8] sm:$0xff]  ;;  %s11160_s1 = sld [smem:[#allocation2 + $0x3]]  ;;  %s11293_s30 = sld [smem:[#allocation2 + $0x4]] }
 0x189   : > { %v925_v1 = vld [vmem:[%s16922_s2 + $0x20] sm:$0xff]  ;;  %v926_v12 = vld [vmem:[%s16922_s2 + $0x28] sm:$0xff]  ;;  %s14751_s8 = scalar_lea.vmem %s16923_s6, %s11457_s24  ;;  %s17015_s5 = sld [smem:[#allocation86_spill]] }
 0x18a   : > { %v929_v2 = vld [vmem:[%s16922_s2 + $0x40] sm:$0xff]  ;;  %v10569_v3 = vcombine.high %v921_v0, %v925_v1  ;;  %v10568_v4 = vcombine.low %v921_v0, %v925_v1  ;;  %v10571_v15 = vcombine.high %v922_v11, %v926_v12  ;;  %v10570_v16 = vcombine.low %v922_v11, %v926_v12  ;;  %v930_v17 = vld [vmem:[%s16922_s2 + $0x48] sm:$0xff]  ;;  %s11422_s11 = sld [smem:[#allocation2 + $0x5]] }
 0x18b   : > { %v933_v5 = vld [vmem:[%s16922_s2 + $0x60] sm:$0xff]  ;;  %v934_v18 = vld [vmem:[%s16922_s2 + $0x68] sm:$0xff] }
 0x18c   : > { %v10577_v6 = vcombine.high %v929_v2, %v933_v5  ;;  %v937_v7 = vld [vmem:[%s16922_s2 + $0x80] sm:$0xff]  ;;  %1731 = vmatprep.subr.bf16.mxu0 %v10569_v3  ;;  %v10576_v9 = vcombine.low %v929_v2, %v933_v5  ;;  %1772 = vmatprep.subr.bf16.mxu1 %v10571_v15  ;;  %v10579_v20 = vcombine.high %v930_v17, %v934_v18  ;;  %v938_v21 = vld [vmem:[%s16922_s2 + $0x88] sm:$0xff] }
 0x18d   : > { %v941_v8 = vld [vmem:[%s16922_s2 + $0xa0] sm:$0xff]  ;;  %1732 = vmatpush1.bf16.msra.mxu0 %v10568_v4  ;;  %v942_v22 = vld [vmem:[%s16922_s2 + $0xa8] sm:$0xff]  ;;  %1773 = vmatpush1.bf16.msra.mxu1 %v10570_v16  ;;  %v10578_v24 = vcombine.low %v930_v17, %v934_v18 }
 0x18e   : > { %1733 = vmatprep.subr.bf16.mxu0 %v10577_v6  ;;  %v10585_v10 = vcombine.high %v937_v7, %v941_v8  ;;  %v945_v13 = vld [vmem:[%s16922_s2 + $0xc0] sm:$0xff]  ;;  %v10584_v19 = vcombine.low %v937_v7, %v941_v8  ;;  %1774 = vmatprep.subr.bf16.mxu1 %v10579_v20  ;;  %v10587_v27 = vcombine.high %v938_v21, %v942_v22  ;;  %v946_v28 = vld [vmem:[%s16922_s2 + $0xc8] sm:$0xff] }
 0x18f   : > { %v949_v14 = vld [vmem:[%s16922_s2 + $0xe0] sm:$0xff]  ;;  %v950_v29 = vld [vmem:[%s16922_s2 + $0xe8] sm:$0xff]  ;;  %v10586_v32 = vcombine.low %v938_v21, %v942_v22  ;;  %s17016_s6 = smov %s17015_s5 }
 0x190   : > { %v10593_v23 = vcombine.high %v945_v13, %v949_v14  ;;  %v953_v25 = vld [vmem:[%s16922_s2 + $0x100] sm:$0xff]  ;;  %v10592_v30 = vcombine.low %v945_v13, %v949_v14  ;;  %v10595_v35 = vcombine.high %v946_v28, %v950_v29  ;;  %v954_v36 = vld [vmem:[%s16922_s2 + $0x108] sm:$0xff]  ;;  %v10594_v41 = vcombine.low %v946_v28, %v950_v29 }
 0x191   : > { %1734 = vmatpush1.bf16.msra.mxu0 %v10576_v9  ;;  %v957_v26 = vld [vmem:[%s16922_s2 + $0x120] sm:$0xff]  ;;  %1775 = vmatpush1.bf16.msra.mxu1 %v10578_v24  ;;  %v958_v37 = vld [vmem:[%s16922_s2 + $0x128] sm:$0xff] }
 0x192   : > { %1735 = vmatprep.subr.bf16.mxu0 %v10585_v10  ;;  %v10601_v31 = vcombine.high %v953_v25, %v957_v26  ;;  %v961_v33 = vld [vmem:[%s16922_s2 + $0x140] sm:$0xff]  ;;  %1776 = vmatprep.subr.bf16.mxu1 %v10587_v27  ;;  %v10600_v38 = vcombine.low %v953_v25, %v957_v26  ;;  %v918_v39 = vld [vmem:[%s14751_s8 + $0x8] sm:$0xff]  ;;  %v10603_v45 = vcombine.high %v954_v36, %v958_v37 }
 0x193   : > { %v965_v34 = vld [vmem:[%s16922_s2 + $0x160] sm:$0xff]  ;;  %v14766_v42 = vpack.c.bf16 %v918_v39, %v918_v39  ;;  %v962_v46 = vld [vmem:[%s16922_s2 + $0x148] sm:$0xff]  ;;  %v10602_v50 = vcombine.low %v954_v36, %v958_v37 }
 0x194   : > { %v10609_v40 = vcombine.high %v961_v33, %v965_v34  ;;  %v969_v43 = vld [vmem:[%s16922_s2 + $0x180] sm:$0xff]  ;;  %v966_v47 = vld [vmem:[%s16922_s2 + $0x168] sm:$0xff]  ;;  %v10608_v48 = vcombine.low %v961_v33, %v965_v34 }
 0x195   : > { %1736 = vmatpush1.bf16.msra.mxu0 %v10584_v19  ;;  %1777 = vmatpush1.bf16.msra.mxu1 %v10586_v32  ;;  %v973_v44 = vld [vmem:[%s16922_s2 + $0x1a0] sm:$0xff]  ;;  %v10611_v53 = vcombine.high %v962_v46, %v966_v47  ;;  %v970_v54 = vld [vmem:[%s16922_s2 + $0x188] sm:$0xff]  ;;  %v10610_v58 = vcombine.low %v962_v46, %v966_v47 }
 0x196   : > { %1737 = vmatprep.subr.bf16.mxu0 %v10593_v23  ;;  %1778 = vmatprep.subr.bf16.mxu1 %v10595_v35  ;;  %v10617_v49 = vcombine.high %v969_v43, %v973_v44  ;;  %v977_v51 = vld [vmem:[%s16922_s2 + $0x1c0] sm:$0xff]  ;;  %v974_v55 = vld [vmem:[%s16922_s2 + $0x1a8] sm:$0xff]  ;;  %v10616_v56 = vcombine.low %v969_v43, %v973_v44 }
 0x197   : > { %1763 = vmatprep.mubr.bf16.mxu0 %v14766_v42  ;;  %1804 = vmatprep.mubr.bf16.mxu1 %v14766_v42  ;;  %v981_v52 = vld [vmem:[%s16922_s2 + $0x1e0] sm:$0xff]  ;;  %v10619_v61 = vcombine.high %v970_v54, %v974_v55  ;;  %v978_v62 = vld [vmem:[%s16922_s2 + $0x1c8] sm:$0xff]  ;;  %v10618_v2 = vcombine.low %v970_v54, %v974_v55 }
 0x198   : > { %v10625_v57 = vcombine.high %v977_v51, %v981_v52  ;;  %v985_v59 = vld [vmem:[%s16922_s2 + $0x200] sm:$0xff]  ;;  %v982_v63 = vld [vmem:[%s16922_s2 + $0x1e8] sm:$0xff]  ;;  %v10624_v0 = vcombine.low %v977_v51, %v981_v52 }
 0x199   : > { %1738 = vmatpush1.bf16.msra.mxu0 %v10592_v30  ;;  %1779 = vmatpush1.bf16.msra.mxu1 %v10594_v41  ;;  %v989_v60 = vld [vmem:[%s16922_s2 + $0x220] sm:$0xff]  ;;  %v10627_v5 = vcombine.high %v978_v62, %v982_v63  ;;  %v986_v6 = vld [vmem:[%s16922_s2 + $0x208] sm:$0xff]  ;;  %v10626_v10 = vcombine.low %v978_v62, %v982_v63 }
 0x19a   : > { %1739 = vmatprep.subr.bf16.mxu0 %v10601_v31  ;;  %1780 = vmatprep.subr.bf16.mxu1 %v10603_v45  ;;  %v10633_v1 = vcombine.high %v985_v59, %v989_v60  ;;  %v993_v3 = vld [vmem:[%s16922_s2 + $0x240] sm:$0xff]  ;;  %v990_v7 = vld [vmem:[%s16922_s2 + $0x228] sm:$0xff]  ;;  %v10632_v8 = vcombine.low %v985_v59, %v989_v60  ;;  %v927_v59 = vld [vmem:[%s16922_s2 + $0x30] sm:$0xff] }
 0x19b   : > { %v997_v4 = vld [vmem:[%s16922_s2 + $0x260] sm:$0xff]  ;;  %v10635_v13 = vcombine.high %v986_v6, %v990_v7  ;;  %v994_v14 = vld [vmem:[%s16922_s2 + $0x248] sm:$0xff]  ;;  %v10634_v18 = vcombine.low %v986_v6, %v990_v7 }
 0x19c   : > { %v10641_v9 = vcombine.high %v993_v3, %v997_v4  ;;  %v1001_v11 = vld [vmem:[%s16922_s2 + $0x280] sm:$0xff]  ;;  %v998_v15 = vld [vmem:[%s16922_s2 + $0x268] sm:$0xff]  ;;  %v10640_v16 = vcombine.low %v993_v3, %v997_v4  ;;  %v931_v3 = vld [vmem:[%s16922_s2 + $0x50] sm:$0xff] }
 0x19d   : > { %1740 = vmatpush1.bf16.msra.mxu0 %v10600_v38  ;;  %1781 = vmatpush1.bf16.msra.mxu1 %v10602_v50  ;;  %v1005_v12 = vld [vmem:[%s16922_s2 + $0x2a0] sm:$0xff]  ;;  %v10643_v21 = vcombine.high %v994_v14, %v998_v15  ;;  %v1002_v22 = vld [vmem:[%s16922_s2 + $0x288] sm:$0xff]  ;;  %v10642_v28 = vcombine.low %v994_v14, %v998_v15  ;;  %v935_v4 = vld [vmem:[%s16922_s2 + $0x70] sm:$0xff] }
 0x19e   : > { %1741 = vmatprep.subr.bf16.mxu0 %v10609_v40  ;;  %1782 = vmatprep.subr.bf16.mxu1 %v10611_v53  ;;  %v10649_v17 = vcombine.high %v1001_v11, %v1005_v12  ;;  %v1009_v19 = vld [vmem:[%s16922_s2 + $0x2c0] sm:$0xff]  ;;  %v1006_v23 = vld [vmem:[%s16922_s2 + $0x2a8] sm:$0xff]  ;;  %v10648_v24 = vcombine.low %v1001_v11, %v1005_v12  ;;  %v943_v11 = vld [vmem:[%s16922_s2 + $0xb0] sm:$0xff]  ;;  %v10580_v14 = vcombine.low %v931_v3, %v935_v4 }
 0x19f   : > { %v1013_v20 = vld [vmem:[%s16922_s2 + $0x2e0] sm:$0xff]  ;;  %v1010_v29 = vld [vmem:[%s16922_s2 + $0x2c8] sm:$0xff]  ;;  %v10651_v30 = vcombine.high %v1002_v22, %v1006_v23  ;;  %v10650_v36 = vcombine.low %v1002_v22, %v1006_v23  ;;  %v947_v15 = vld [vmem:[%s16922_s2 + $0xd0] sm:$0xff] }
 0x1a0   : > { %v10657_v25 = vcombine.high %v1009_v19, %v1013_v20  ;;  %v1017_v26 = vld [vmem:[%s16922_s2 + $0x300] sm:$0xff]  ;;  %v1014_v31 = vld [vmem:[%s16922_s2 + $0x2e8] sm:$0xff]  ;;  %v10656_v32 = vcombine.low %v1009_v19, %v1013_v20  ;;  %v955_v19 = vld [vmem:[%s16922_s2 + $0x110] sm:$0xff] }
 0x1a1   : > { %1742 = vmatpush1.bf16.msra.mxu0 %v10608_v48  ;;  %1783 = vmatpush1.bf16.msra.mxu1 %v10610_v58  ;;  %v1021_v27 = vld [vmem:[%s16922_s2 + $0x320] sm:$0xff]  ;;  %v1018_v37 = vld [vmem:[%s16922_s2 + $0x308] sm:$0xff]  ;;  %v10659_v39 = vcombine.high %v1010_v29, %v1014_v31  ;;  %v10658_v45 = vcombine.low %v1010_v29, %v1014_v31  ;;  %v923_v58 = vld [vmem:[%s16922_s2 + $0x10] sm:$0xff] }
 0x1a2   : > { %1743 = vmatprep.subr.bf16.mxu0 %v10617_v49  ;;  %1784 = vmatprep.subr.bf16.mxu1 %v10619_v61  ;;  %v1025_v33 = vld [vmem:[%s16922_s2 + $0x340] sm:$0xff]  ;;  %v10665_v35 = vcombine.high %v1017_v26, %v1021_v27  ;;  %v1022_v38 = vld [vmem:[%s16922_s2 + $0x328] sm:$0xff]  ;;  %v10664_v40 = vcombine.low %v1017_v26, %v1021_v27  ;;  %v10573_v6 = vcombine.high %v923_v58, %v927_v59  ;;  %v959_v20 = vld [vmem:[%s16922_s2 + $0x130] sm:$0xff] }
 0x1a3   : > { %v1029_v34 = vld [vmem:[%s16922_s2 + $0x360] sm:$0xff]  ;;  %v1026_v46 = vld [vmem:[%s16922_s2 + $0x348] sm:$0xff]  ;;  %v10667_v48 = vcombine.high %v1018_v37, %v1022_v38  ;;  %v10666_v53 = vcombine.low %v1018_v37, %v1022_v38  ;;  %v963_v23 = vld [vmem:[%s16922_s2 + $0x150] sm:$0xff]  ;;  %v10604_v26 = vcombine.low %v955_v19, %v959_v20 }
 0x1a4   : > { %v1033_v41 = vld [vmem:[%s16922_s2 + $0x380] sm:$0xff]  ;;  %v10673_v44 = vcombine.high %v1025_v33, %v1029_v34  ;;  %v1030_v47 = vld [vmem:[%s16922_s2 + $0x368] sm:$0xff]  ;;  %v10672_v49 = vcombine.low %v1025_v33, %v1029_v34  ;;  %v971_v27 = vld [vmem:[%s16922_s2 + $0x190] sm:$0xff] }
 0x1a5   : > { %1744 = vmatpush1.bf16.msra.mxu0 %v10616_v56  ;;  %1785 = vmatpush1.bf16.msra.mxu1 %v10618_v2  ;;  %v1037_v43 = vld [vmem:[%s16922_s2 + $0x3a0] sm:$0xff]  ;;  %v1034_v54 = vld [vmem:[%s16922_s2 + $0x388] sm:$0xff]  ;;  %v10675_v56 = vcombine.high %v1026_v46, %v1030_v47  ;;  %v10674_v61 = vcombine.low %v1026_v46, %v1030_v47  ;;  %v983_v31 = vld [vmem:[%s16922_s2 + $0x1f0] sm:$0xff] }
 0x1a6   : > { %1745 = vmatprep.subr.bf16.mxu0 %v10625_v57  ;;  %1786 = vmatprep.subr.bf16.mxu1 %v10627_v5  ;;  %v1041_v50 = vld [vmem:[%s16922_s2 + $0x3c0] sm:$0xff]  ;;  %v10681_v52 = vcombine.high %v1033_v41, %v1037_v43  ;;  %v1038_v55 = vld [vmem:[%s16922_s2 + $0x3a8] sm:$0xff]  ;;  %v10680_v57 = vcombine.low %v1033_v41, %v1037_v43  ;;  %v987_v34 = vld [vmem:[%s16922_s2 + $0x210] sm:$0xff] }
 0x1a7   : > { %v1045_v51 = vld [vmem:[%s16922_s2 + $0x3e0] sm:$0xff]  ;;  %v1042_v62 = vld [vmem:[%s16922_s2 + $0x3c8] sm:$0xff]  ;;  %v10682_v5 = vcombine.low %v1034_v54, %v1038_v55  ;;  %v995_v38 = vld [vmem:[%s16922_s2 + $0x250] sm:$0xff] }
 0x1a8   : > { %v10689_v60 = vcombine.high %v1041_v50, %v1045_v51  ;;  %v1046_v63 = vld [vmem:[%s16922_s2 + $0x3e8] sm:$0xff]  ;;  %v10688_v2 = vcombine.low %v1041_v50, %v1045_v51  ;;  %v1003_v43 = vld [vmem:[%s16922_s2 + $0x290] sm:$0xff] }
 0x1a9   : > { %1746 = vmatpush1.bf16.msra.mxu0 %v10624_v0  ;;  %1787 = vmatpush1.bf16.msra.mxu1 %v10626_v10  ;;  %v917_v0 = vld [vmem:[%s14751_s8] sm:$0xff]  ;;  %v10691_v7 = vcombine.high %v1042_v62, %v1046_v63  ;;  %v939_v10 = vld [vmem:[%s16922_s2 + $0x90] sm:$0xff]  ;;  %v10690_v12 = vcombine.low %v1042_v62, %v1046_v63 }
 0x1aa   : > { %1747 = vmatprep.subr.bf16.mxu0 %v10633_v1  ;;  %1788 = vmatprep.subr.bf16.mxu1 %v10635_v13  ;;  %v10683_v1 = vcombine.high %v1034_v54, %v1038_v55  ;;  %v10581_v13 = vcombine.high %v931_v3, %v935_v4  ;;  %v1011_v47 = vld [vmem:[%s16922_s2 + $0x2d0] sm:$0xff]  ;;  %v1911_v3 = vld [vmem:[%s16763_s18 + $0x80] sm:$0xff]  ;;  %v1912_v4 = vld [vmem:[%s16763_s18 + $0x88] sm:$0xff] }
 0x1ab   : > { %v1019_v51 = vld [vmem:[%s16922_s2 + $0x310] sm:$0xff] }
 0x1ac   : > { %v1027_v55 = vld [vmem:[%s16922_s2 + $0x350] sm:$0xff] }
 0x1ad   : > { %1748 = vmatpush1.bf16.msra.mxu0 %v10632_v8  ;;  %1789 = vmatpush1.bf16.msra.mxu1 %v10634_v18  ;;  %v14909_v8 = vpack.c.bf16 %v917_v0, %v917_v0  ;;  %v10588_v18 = vcombine.low %v939_v10, %v943_v11  ;;  %v1043_v63 = vld [vmem:[%s16922_s2 + $0x3d0] sm:$0xff] }
 0x1ae   : > { %1749 = vmatprep.subr.bf16.mxu0 %v10641_v9  ;;  %1790 = vmatprep.subr.bf16.mxu1 %v10643_v21  ;;  %v10572_v9 = vcombine.low %v923_v58, %v927_v59  ;;  %v1035_v59 = vld [vmem:[%s16922_s2 + $0x390] sm:$0xff] }
 0x1af   : > { %v1047_v0 = vld [vmem:[%s16922_s2 + $0x3f0] sm:$0xff] }
 0x1b1   : > { %1750 = vmatpush1.bf16.msra.mxu0 %v10640_v16  ;;  %1791 = vmatpush1.bf16.msra.mxu1 %v10642_v28  ;;  %v951_v16 = vld [vmem:[%s16922_s2 + $0xf0] sm:$0xff] }
 0x1b2   : > { %1751 = vmatprep.subr.bf16.mxu0 %v10649_v17  ;;  %1792 = vmatprep.subr.bf16.mxu1 %v10651_v30  ;;  %v10589_v17 = vcombine.high %v939_v10, %v943_v11  ;;  %v10597_v21 = vcombine.high %v947_v15, %v951_v16  ;;  %v10596_v22 = vcombine.low %v947_v15, %v951_v16  ;;  %v979_v30 = vld [vmem:[%s16922_s2 + $0x1d0] sm:$0xff]  ;;  %v1914_v11 = vld [vmem:[%s16763_s18 + $0x98] sm:$0xff]  ;;  %v1915_v16 = vld [vmem:[%s16763_s18 + $0xa0] sm:$0xff] }
 0x1b3   : > { %v10628_v37 = vcombine.low %v979_v30, %v983_v31  ;;  %v1913_v10 = vld [vmem:[%s16763_s18 + $0x90] sm:$0xff] }
 0x1b5   : > { %1752 = vmatpush1.bf16.msra.mxu0 %v10648_v24  ;;  %1793 = vmatpush1.bf16.msra.mxu1 %v10650_v36  ;;  %v967_v24 = vld [vmem:[%s16922_s2 + $0x170] sm:$0xff]  ;;  %v10629_v36 = vcombine.high %v979_v30, %v983_v31  ;;  %v1903_v30 = vld [vmem:[%s16763_s18 + $0x40] sm:$0xff]  ;;  %v1904_v31 = vld [vmem:[%s16763_s18 + $0x48] sm:$0xff] }
 0x1b6   : > { %1753 = vmatprep.subr.bf16.mxu0 %v10657_v25  ;;  %1794 = vmatprep.subr.bf16.mxu1 %v10659_v39  ;;  %v10605_v25 = vcombine.high %v955_v19, %v959_v20  ;;  %v10613_v28 = vcombine.high %v963_v23, %v967_v24  ;;  %v10612_v29 = vcombine.low %v963_v23, %v967_v24  ;;  %v999_v39 = vld [vmem:[%s16922_s2 + $0x270] sm:$0xff]  ;;  %v1899_v19 = vld [vmem:[%s16763_s18 + $0x20] sm:$0xff]  ;;  %v1900_v20 = vld [vmem:[%s16763_s18 + $0x28] sm:$0xff] }
 0x1b7   : > { %v10644_v46 = vcombine.low %v995_v38, %v999_v39  ;;  %v1918_v23 = vld [vmem:[%s16763_s18 + $0xb8] sm:$0xff] }
 0x1b9   : > { %1754 = vmatpush1.bf16.msra.mxu0 %v10656_v32  ;;  %1795 = vmatpush1.bf16.msra.mxu1 %v10658_v45  ;;  %v10645_v45 = vcombine.high %v995_v38, %v999_v39  ;;  %v15098_v38 = vpack.c.bf16 %v1904_v31, %v1903_v30  ;;  %v1923_v39 = vld [vmem:[%s16763_s18 + $0xe0] sm:$0xff]  ;;  %v988_v30 = vld [vmem:[%s16922_s2 + $0x218] sm:$0xff] }
 0x1ba   : > { %1755 = vmatprep.subr.bf16.mxu0 %v10665_v35  ;;  %1796 = vmatprep.subr.bf16.mxu1 %v10667_v48  ;;  %v991_v35 = vld [vmem:[%s16922_s2 + $0x230] sm:$0xff]  ;;  %v992_v31 = vld [vmem:[%s16922_s2 + $0x238] sm:$0xff] }
 0x1bb   : > { %v10636_v41 = vcombine.low %v987_v34, %v991_v35  ;;  %v1015_v48 = vld [vmem:[%s16922_s2 + $0x2f0] sm:$0xff]  ;;  %16932 = vst [vmem:[#allocation40_spill] sm:$0xff] %v15098_v38 }
 0x1bc   : > { %v10660_v54 = vcombine.low %v1011_v47, %v1015_v48 }
 0x1bd   : > { %1756 = vmatpush1.bf16.msra.mxu0 %v10664_v40  ;;  %1797 = vmatpush1.bf16.msra.mxu1 %v10666_v53  ;;  %v10637_v40 = vcombine.high %v987_v34, %v991_v35  ;;  %v10661_v53 = vcombine.high %v1011_v47, %v1015_v48  ;;  %v1922_v34 = vld [vmem:[%s16763_s18 + $0xd8] sm:$0xff] }
 0x1be   : > { %1757 = vmatprep.subr.bf16.mxu0 %v10673_v44  ;;  %1798 = vmatprep.subr.bf16.mxu1 %v10675_v56  ;;  %v1007_v44 = vld [vmem:[%s16922_s2 + $0x2b0] sm:$0xff]  ;;  %v1926_v47 = vld [vmem:[%s16763_s18 + $0xf8] sm:$0xff] }
 0x1bf   : > { %v10652_v50 = vcombine.low %v1003_v43, %v1007_v44  ;;  %v1031_v56 = vld [vmem:[%s16922_s2 + $0x370] sm:$0xff] }
 0x1c0   : > { %v10676_v62 = vcombine.low %v1027_v55, %v1031_v56 }
 0x1c1   : > { %1758 = vmatpush1.bf16.msra.mxu0 %v10672_v49  ;;  %1799 = vmatpush1.bf16.msra.mxu1 %v10674_v61  ;;  %v10653_v49 = vcombine.high %v1003_v43, %v1007_v44  ;;  %v10677_v61 = vcombine.high %v1027_v55, %v1031_v56  ;;  %v1907_v43 = vld [vmem:[%s16763_s18 + $0x60] sm:$0xff]  ;;  %v1908_v44 = vld [vmem:[%s16763_s18 + $0x68] sm:$0xff] }
 0x1c2   : > { %1759 = vmatprep.subr.bf16.mxu0 %v10681_v52  ;;  %1800 = vmatprep.subr.bf16.mxu1 %v10683_v1  ;;  %v1023_v52 = vld [vmem:[%s16922_s2 + $0x330] sm:$0xff] }
 0x1c3   : > { %v10668_v58 = vcombine.low %v1019_v51, %v1023_v52 }
 0x1c5   : > { %1760 = vmatpush1.bf16.msra.mxu0 %v10680_v57  ;;  %1801 = vmatpush1.bf16.msra.mxu1 %v10682_v5  ;;  %v10669_v57 = vcombine.high %v1019_v51, %v1023_v52  ;;  %v10693_v5 = vcombine.high %v1043_v63, %v1047_v0  ;;  %v15134_v51 = vpack.c.bf16 %v1908_v44, %v1907_v43  ;;  %v1943_v52 = vld [vmem:[%s16763_s18 + $0x180] sm:$0xff] }
 0x1c6   : > { %1761 = vmatprep.subr.bf16.mxu0 %v10689_v60  ;;  %1802 = vmatprep.subr.bf16.mxu1 %v10691_v7  ;;  %v1039_v60 = vld [vmem:[%s16922_s2 + $0x3b0] sm:$0xff]  ;;  %v1896_v7 = vld [vmem:[%s16763_s18 + $0x8] sm:$0xff] }
 0x1c7   : > { %v10685_v1 = vcombine.high %v1035_v59, %v1039_v60  ;;  %16936 = vst [vmem:[#allocation44_spill] sm:$0xff] %v15134_v51 }
 0x1c9   : > { %1762 = vmatpush1.bf16.msra.mxu0 %v10688_v2  ;;  %1803 = vmatpush1.bf16.msra.mxu1 %v10690_v12  ;;  %v10684_v2 = vcombine.low %v1035_v59, %v1039_v60  ;;  %v15017_v12 = vpack.c.bf16 %v1912_v4, %v1911_v3  ;;  %v948_v4 = vld [vmem:[%s16922_s2 + $0xd8] sm:$0xff] }
 0x1ca   : > { %1813 = vmatprep.subr.bf16.mxu0 %v10573_v6  ;;  %v1895_v6 = vld [vmem:[%s16763_s18] sm:$0xff] }
 0x1cb   : > { %v15025_v15 = vpack.c.bf16 %v1896_v7, %v1895_v6 }
 0x1cc   : > { %1764 = vmatmul.mubr.bf16.vlgmr.msra.gmra.mrb[0].mxu0 %v14909_v8  ;;  %1805 = vmatmul.mubr.bf16.vlgmr.msra.gmra.mrb[0].mxu1 %v14909_v8 }
 0x1cd   : > { %1814 = vmatpush1.bf16.msra.mxu0 %v10572_v9  ;;  %1845 = vmatprep.mubr.bf16.mxu0 %v14766_v42  ;;  %v10692_v9 = vcombine.low %v1043_v63, %v1047_v0  ;;  %16924 = vst [vmem:[#allocation32_spill] sm:$0xff] %v15025_v15  ;;  %v940_v63 = vld [vmem:[%s16922_s2 + $0x98] sm:$0xff] }
 0x1ce   : > { %1815 = vmatprep.subr.bf16.mxu0 %v10581_v13  ;;  %1886 = vmatprep.mubr.bf16.mxu1 %v14766_v42  ;;  %v975_v42 = vld [vmem:[%s16922_s2 + $0x1b0] sm:$0xff] }
 0x1cf   : > { %v10621_v32 = vcombine.high %v971_v27, %v975_v42  ;;  %v10620_v33 = vcombine.low %v971_v27, %v975_v42  ;;  %v1897_v13 = vld [vmem:[%s16763_s18 + $0x10] sm:$0xff]  ;;  %v15062_v27 = vpack.c.bf16 %v1900_v20, %v1899_v19  ;;  %v1919_v42 = vld [vmem:[%s16763_s18 + $0xc0] sm:$0xff]  ;;  %v972_v19 = vld [vmem:[%s16922_s2 + $0x198] sm:$0xff] }
 0x1d0   : > { %v976_v20 = vld [vmem:[%s16922_s2 + $0x1b8] sm:$0xff] }
 0x1d1   : > { %1816 = vmatpush1.bf16.msra.mxu0 %v10580_v14  ;;  %v1898_v14 = vld [vmem:[%s16763_s18 + $0x18] sm:$0xff]  ;;  %16928 = vst [vmem:[#allocation36_spill] sm:$0xff] %v15062_v27 }
 0x1d2   : > { %1817 = vmatprep.subr.bf16.mxu0 %v10589_v17  ;;  %v1916_v17 = vld [vmem:[%s16763_s18 + $0xa8] sm:$0xff] }
 0x1d3   : > { %v15053_v24 = vpack.c.bf16 %v1916_v17, %v1915_v16 }
 0x1d5   : > { %1818 = vmatpush1.bf16.msra.mxu0 %v10588_v18  ;;  %v15034_v18 = vpack.c.bf16 %v1914_v11, %v1913_v10  ;;  %16927 = vst [vmem:[#allocation35_spill] sm:$0xff] %v15053_v24  ;;  %v960_v10 = vld [vmem:[%s16922_s2 + $0x138] sm:$0xff] }
 0x1d6   : > { %1819 = vmatprep.subr.bf16.mxu0 %v10597_v21  ;;  %v15044_v21 = vpack.c.bf16 %v1898_v14, %v1897_v13  ;;  %v964_v13 = vld [vmem:[%s16922_s2 + $0x158] sm:$0xff] }
 0x1d7   : > { %16925 = vst [vmem:[#allocation33_spill] sm:$0xff] %v15034_v18  ;;  %v968_v14 = vld [vmem:[%s16922_s2 + $0x178] sm:$0xff] }
 0x1d8   : > { %16926 = vst [vmem:[#allocation34_spill] sm:$0xff] %v15044_v21 }
 0x1d9   : > { %1820 = vmatpush1.bf16.msra.mxu0 %v10596_v22  ;;  %v1917_v22 = vld [vmem:[%s16763_s18 + $0xb0] sm:$0xff] }
 0x1da   : > { %1821 = vmatprep.subr.bf16.mxu0 %v10605_v25  ;;  %v1901_v25 = vld [vmem:[%s16763_s18 + $0x30] sm:$0xff] }
 0x1dd   : > { %1822 = vmatpush1.bf16.msra.mxu0 %v10604_v26  ;;  %v1902_v26 = vld [vmem:[%s16763_s18 + $0x38] sm:$0xff] }
 0x1de   : > { %1823 = vmatprep.subr.bf16.mxu0 %v10613_v28  ;;  %v1920_v28 = vld [vmem:[%s16763_s18 + $0xc8] sm:$0xff] }
 0x1df   : > { %v15089_v35 = vpack.c.bf16 %v1920_v28, %v1919_v42  ;;  %v10623_v42 = vcombine.high %v972_v19, %v976_v20  ;;  %v10622_v28 = vcombine.low %v972_v19, %v976_v20  ;;  %v1931_v20 = vld [vmem:[%s16763_s18 + $0x120] sm:$0xff] }
 0x1e1   : > { %1824 = vmatpush1.bf16.msra.mxu0 %v10612_v29  ;;  %v15071_v29 = vpack.c.bf16 %v1918_v23, %v1917_v22  ;;  %16931 = vst [vmem:[#allocation39_spill] sm:$0xff] %v15089_v35  ;;  %v10615_v22 = vcombine.high %v964_v13, %v968_v14  ;;  %v10614_v23 = vcombine.low %v964_v13, %v968_v14  ;;  %v1948_v13 = vld [vmem:[%s16763_s18 + $0x1a8] sm:$0xff] }
 0x1e2   : > { %1825 = vmatprep.subr.bf16.mxu0 %v10621_v32  ;;  %v15080_v32 = vpack.c.bf16 %v1902_v26, %v1901_v25  ;;  %v980_v25 = vld [vmem:[%s16922_s2 + $0x1d8] sm:$0xff] }
 0x1e3   : > { %16929 = vst [vmem:[#allocation37_spill] sm:$0xff] %v15071_v29  ;;  %v984_v26 = vld [vmem:[%s16922_s2 + $0x1f8] sm:$0xff] }
 0x1e4   : > { %16930 = vst [vmem:[#allocation38_spill] sm:$0xff] %v15080_v32 }
 0x1e5   : > { %1826 = vmatpush1.bf16.msra.mxu0 %v10620_v33  ;;  %v1921_v33 = vld [vmem:[%s16763_s18 + $0xd0] sm:$0xff] }
 0x1e6   : > { %1827 = vmatprep.subr.bf16.mxu0 %v10629_v36  ;;  %v1905_v36 = vld [vmem:[%s16763_s18 + $0x50] sm:$0xff] }
 0x1e9   : > { %1828 = vmatpush1.bf16.msra.mxu0 %v10628_v37  ;;  %v1906_v37 = vld [vmem:[%s16763_s18 + $0x58] sm:$0xff] }
 0x1ea   : > { %1829 = vmatprep.subr.bf16.mxu0 %v10637_v40  ;;  %v1924_v40 = vld [vmem:[%s16763_s18 + $0xe8] sm:$0xff] }
 0x1eb   : > { %v15125_v48 = vpack.c.bf16 %v1924_v40, %v1923_v39  ;;  %v10639_v39 = vcombine.high %v988_v30, %v992_v31  ;;  %v10638_v40 = vcombine.low %v988_v30, %v992_v31 }
 0x1ed   : > { %1830 = vmatpush1.bf16.msra.mxu0 %v10636_v41  ;;  %v15107_v41 = vpack.c.bf16 %v1922_v34, %v1921_v33  ;;  %16935 = vst [vmem:[#allocation43_spill] sm:$0xff] %v15125_v48  ;;  %v10631_v33 = vcombine.high %v980_v25, %v984_v26  ;;  %v10630_v34 = vcombine.low %v980_v25, %v984_v26  ;;  %v1949_v26 = vld [vmem:[%s16763_s18 + $0x1b0] sm:$0xff] }
 0x1ee   : > { %1831 = vmatprep.subr.bf16.mxu0 %v10645_v45  ;;  %v15116_v45 = vpack.c.bf16 %v1906_v37, %v1905_v36  ;;  %v996_v36 = vld [vmem:[%s16922_s2 + $0x258] sm:$0xff] }
 0x1ef   : > { %16933 = vst [vmem:[#allocation41_spill] sm:$0xff] %v15107_v41  ;;  %v1000_v37 = vld [vmem:[%s16922_s2 + $0x278] sm:$0xff] }
 0x1f0   : > { %16934 = vst [vmem:[#allocation42_spill] sm:$0xff] %v15116_v45  ;;  %v10647_v43 = vcombine.high %v996_v36, %v1000_v37  ;;  %v10646_v44 = vcombine.low %v996_v36, %v1000_v37  ;;  %v1951_v36 = vld [vmem:[%s16763_s18 + $0x1c0] sm:$0xff]  ;;  %v1952_v37 = vld [vmem:[%s16763_s18 + $0x1c8] sm:$0xff] }
 0x1f1   : > { %1832 = vmatpush1.bf16.msra.mxu0 %v10644_v46  ;;  %v1925_v46 = vld [vmem:[%s16763_s18 + $0xf0] sm:$0xff] }
 0x1f2   : > { %1833 = vmatprep.subr.bf16.mxu0 %v10653_v49  ;;  %v1909_v49 = vld [vmem:[%s16763_s18 + $0x70] sm:$0xff] }
 0x1f5   : > { %1834 = vmatpush1.bf16.msra.mxu0 %v10652_v50  ;;  %v1910_v50 = vld [vmem:[%s16763_s18 + $0x78] sm:$0xff] }
 0x1f6   : > { %1835 = vmatprep.subr.bf16.mxu0 %v10661_v53  ;;  %v1944_v53 = vld [vmem:[%s16763_s18 + $0x188] sm:$0xff]  ;;  %v15146_v55 = vpack.c.bf16 %v1910_v50, %v1909_v49  ;;  %v15221_v50 = vld [vmem:[%s16941_s10] sm:$0xff] }
 0x1f7   : > { %v15149_v56 = vpack.c.bf16 %v1944_v53, %v1943_v52 }
 0x1f8   : > { %16938 = vst [vmem:[#allocation46_spill] sm:$0xff] %v15146_v55 }
 0x1f9   : > { %1836 = vmatpush1.bf16.msra.mxu0 %v10660_v54  ;;  %v15143_v54 = vpack.c.bf16 %v1926_v47, %v1925_v46  ;;  %16939 = vst [vmem:[#allocation47_spill] sm:$0xff] %v15149_v56  ;;  %v1051_v46 = vlaneseq }
 0x1fa   : > { %1837 = vmatprep.subr.bf16.mxu0 %v10669_v57  ;;  %v924_v57 = vld [vmem:[%s16922_s2 + $0x18] sm:$0xff] }
 0x1fb   : > { %16937 = vst [vmem:[#allocation45_spill] sm:$0xff] %v15143_v54  ;;  %v15213_v47 = vshrl.u32 %v1051_v46, 7  ;;  %v1953_v46 = vld [vmem:[%s16763_s18 + $0x1d0] sm:$0xff] }
 0x1fd   : > { %1838 = vmatpush1.bf16.msra.mxu0 %v10668_v58  ;;  %v928_v58 = vld [vmem:[%s16922_s2 + $0x38] sm:$0xff]  ;;  %v15216_v49 = vsub.s32 1, %v15213_v47  ;;  %v15224_v52 = vsub.s32 0, %v15213_v47 }
 0x1fe   : > { %1839 = vmatprep.subr.bf16.mxu0 %v10677_v61  ;;  %v10574_v59 = vcombine.low %v924_v57, %v928_v58  ;;  %v10575_v60 = vcombine.high %v924_v57, %v928_v58  ;;  %v932_v61 = vld [vmem:[%s16922_s2 + $0x58] sm:$0xff]  ;;  %v1927_v58 = vld [vmem:[%s16763_s18 + $0x100] sm:$0xff] }
 0x1ff   : > { %16940 = vst [vmem:[#allocation48_spill] sm:$0xff] %v15216_v49  ;;  %16942 = vst [vmem:[#allocation49_spill] sm:$0xff] %v15224_v52  ;;  %v1058_v53 = vrot.slane %v15221_v50, %v15216_v49  ;;  %v1054_v57 = vrot.slane %v15221_v50, %v15224_v52 }
 0x200   : > { %1854 = vmatprep.subr.bf16.mxu1 %v10575_v60  ;;  %v15237_v60 = vsub.s32 3, %v15213_v47 }
 0x201   : > { %1840 = vmatpush1.bf16.msra.mxu0 %v10676_v62  ;;  %1855 = vmatpush1.bf16.msra.mxu1 %v10574_v59  ;;  %v936_v62 = vld [vmem:[%s16922_s2 + $0x78] sm:$0xff]  ;;  %v1928_v59 = vld [vmem:[%s16763_s18 + $0x108] sm:$0xff] }
 0x202   : > { %1841 = vmatprep.subr.bf16.mxu0 %v10685_v1  ;;  %v10582_v0 = vcombine.low %v932_v61, %v936_v62  ;;  %v10583_v1 = vcombine.high %v932_v61, %v936_v62  ;;  %16943 = vst [vmem:[#allocation50_spill] sm:$0xff] %v15237_v60  ;;  %v1945_v62 = vld [vmem:[%s16763_s18 + $0x190] sm:$0xff] }
 0x204   : > { %1856 = vmatprep.subr.bf16.mxu1 %v10583_v1 }
 0x205   : > { %1842 = vmatpush1.bf16.msra.mxu0 %v10684_v2  ;;  %v944_v2 = vld [vmem:[%s16922_s2 + $0xb8] sm:$0xff]  ;;  %1857 = vmatpush1.bf16.msra.mxu1 %v10582_v0 }
 0x206   : > { %1843 = vmatprep.subr.bf16.mxu0 %v10693_v5  ;;  %v10591_v3 = vcombine.high %v940_v63, %v944_v2  ;;  %v952_v5 = vld [vmem:[%s16922_s2 + $0xf8] sm:$0xff]  ;;  %v10590_v6 = vcombine.low %v940_v63, %v944_v2 }
 0x207   : > { %v10599_v7 = vcombine.high %v948_v4, %v952_v5  ;;  %v10598_v11 = vcombine.low %v948_v4, %v952_v5  ;;  %v1946_v63 = vld [vmem:[%s16763_s18 + $0x198] sm:$0xff] }
 0x208   : > { %1858 = vmatprep.subr.bf16.mxu1 %v10591_v3  ;;  %v15247_v3 = vpack.c.bf16 %v1928_v59, %v1927_v58  ;;  %v1937_v59 = vld [vmem:[%s16763_s18 + $0x150] sm:$0xff] }
 0x209   : > { %1844 = vmatpush1.bf16.msra.mxu0 %v10692_v9  ;;  %v956_v9 = vld [vmem:[%s16922_s2 + $0x118] sm:$0xff]  ;;  %1859 = vmatpush1.bf16.msra.mxu1 %v10590_v6  ;;  %v15251_v6 = vpack.c.bf16 %v1946_v63, %v1945_v62  ;;  %v1955_v62 = vld [vmem:[%s16763_s18 + $0x1e0] sm:$0xff]  ;;  %v1956_v63 = vld [vmem:[%s16763_s18 + $0x1e8] sm:$0xff] }
 0x20a   : > { %12090 = vmatprep.subr.bf16.mxu0 %v15017_v12  ;;  %1860 = vmatprep.subr.bf16.mxu1 %v10599_v7  ;;  %v10607_v16 = vcombine.high %v956_v9, %v960_v10  ;;  %v10606_v17 = vcombine.low %v956_v9, %v960_v10  ;;  %16944 = vst [vmem:[#allocation51_spill] sm:$0xff] %v15247_v3  ;;  %v1929_v7 = vld [vmem:[%s16763_s18 + $0x110] sm:$0xff]  ;;  %v1930_v9 = vld [vmem:[%s16763_s18 + $0x118] sm:$0xff] }
 0x20b   : > { %16945 = vst [vmem:[#allocation52_spill] sm:$0xff] %v15251_v6  ;;  %v1066_v10 = vrot.slane %v15221_v50, %v15237_v60 }
 0x20c   : > { %1846 = vmatmul.mubr.bf16.vlgmr.msra.gmra.mrb[4].mxu0 %v14909_v8 }
 0x20d   : > { %12092 = vmatpush3.bf16.msra.mxu0 %v15025_v15  ;;  %1861 = vmatpush1.bf16.msra.mxu1 %v10598_v11  ;;  %v1947_v11 = vld [vmem:[%s16763_s18 + $0x1a0] sm:$0xff] }
 0x20e   : > { %12094 = vmatprep.subr.bf16.mxu0 %v15034_v18  ;;  %1862 = vmatprep.subr.bf16.mxu1 %v10607_v16  ;;  %v15270_v16 = vpack.c.bf16 %v1930_v9, %v1929_v7  ;;  %v15273_v19 = vpack.c.bf16 %v1948_v13, %v1947_v11  ;;  %v1940_v7 = vld [vmem:[%s16763_s18 + $0x168] sm:$0xff]  ;;  %v1957_v9 = vld [vmem:[%s16763_s18 + $0x1f0] sm:$0xff]  ;;  %v15366_v13 = vsub.s32 2, %v15213_v47 }
 0x210   : > { %16946 = vst [vmem:[#allocation53_spill] sm:$0xff] %v15270_v16  ;;  %16947 = vst [vmem:[#allocation54_spill] sm:$0xff] %v15273_v19 }
 0x211   : > { %12096 = vmatpush3.bf16.msra.mxu0 %v15044_v21  ;;  %1863 = vmatpush1.bf16.msra.mxu1 %v10606_v17  ;;  %16957 = vst [vmem:[#allocation64_spill] sm:$0xff] %v15366_v13 }
 0x212   : > { %12098 = vmatprep.subr.bf16.mxu0 %v15053_v24  ;;  %1864 = vmatprep.subr.bf16.mxu1 %v10615_v22  ;;  %v1932_v22 = vld [vmem:[%s16763_s18 + $0x128] sm:$0xff] }
 0x213   : > { %v15291_v30 = vpack.c.bf16 %v1932_v22, %v1931_v20  ;;  %v1941_v20 = vld [vmem:[%s16763_s18 + $0x170] sm:$0xff]  ;;  %v1942_v22 = vld [vmem:[%s16763_s18 + $0x178] sm:$0xff] }
 0x215   : > { %12100 = vmatpush3.bf16.msra.mxu0 %v15062_v27  ;;  %1865 = vmatpush1.bf16.msra.mxu1 %v10614_v23  ;;  %16948 = vst [vmem:[#allocation55_spill] sm:$0xff] %v15291_v30 }
 0x216   : > { %12102 = vmatprep.subr.bf16.mxu0 %v15071_v29  ;;  %1866 = vmatprep.subr.bf16.mxu1 %v10623_v42  ;;  %v1950_v42 = vld [vmem:[%s16763_s18 + $0x1b8] sm:$0xff] }
 0x217   : > { %v15294_v31 = vpack.c.bf16 %v1950_v42, %v1949_v26  ;;  %v1062_v26 = vrot.slane %v15221_v50, %v15366_v13 }
 0x219   : > { %12104 = vmatpush3.bf16.msra.mxu0 %v15080_v32  ;;  %1867 = vmatpush1.bf16.msra.mxu1 %v10622_v28  ;;  %16949 = vst [vmem:[#allocation56_spill] sm:$0xff] %v15294_v31 }
 0x21a   : > { %12106 = vmatprep.subr.bf16.mxu0 %v15089_v35  ;;  %1868 = vmatprep.subr.bf16.mxu1 %v10631_v33  ;;  %v1933_v33 = vld [vmem:[%s16763_s18 + $0x130] sm:$0xff] }
 0x21d   : > { %12108 = vmatpush3.bf16.msra.mxu0 %v15098_v38  ;;  %1869 = vmatpush1.bf16.msra.mxu1 %v10630_v34  ;;  %v1934_v34 = vld [vmem:[%s16763_s18 + $0x138] sm:$0xff] }
 0x21e   : > { %12110 = vmatprep.subr.bf16.mxu0 %v15107_v41  ;;  %1870 = vmatprep.subr.bf16.mxu1 %v10639_v39  ;;  %v15309_v39 = vpack.c.bf16 %v1934_v34, %v1933_v33 }
 0x220   : > { %16950 = vst [vmem:[#allocation57_spill] sm:$0xff] %v15309_v39 }
 0x221   : > { %12112 = vmatpush3.bf16.msra.mxu0 %v15116_v45  ;;  %1871 = vmatpush1.bf16.msra.mxu1 %v10638_v40  ;;  %v15312_v40 = vpack.c.bf16 %v1952_v37, %v1951_v36  ;;  %v1004_v37 = vld [vmem:[%s16922_s2 + $0x298] sm:$0xff] }
 0x222   : > { %12114 = vmatprep.subr.bf16.mxu0 %v15125_v48  ;;  %1872 = vmatprep.subr.bf16.mxu1 %v10647_v43  ;;  %v1935_v43 = vld [vmem:[%s16763_s18 + $0x140] sm:$0xff] }
 0x223   : > { %16951 = vst [vmem:[#allocation58_spill] sm:$0xff] %v15312_v40 }
 0x225   : > { %12116 = vmatpush3.bf16.msra.mxu0 %v15134_v51  ;;  %1873 = vmatpush1.bf16.msra.mxu1 %v10646_v44  ;;  %v1936_v44 = vld [vmem:[%s16763_s18 + $0x148] sm:$0xff] }
 0x226   : > { %12118 = vmatprep.subr.bf16.mxu0 %v15143_v54 }
 0x229   : > { %12120 = vmatpush3.bf16.msra.mxu0 %v15146_v55 }
 0x22a   : > { %12122 = vmatprep.subr.bf16.mxu0 %v15149_v56 }
 0x29f   : > { %v1765_v61 = vpop.f32.mrb[0].mxu0  ;;  %v1806_v14 = vpop.f32.mrb[0].mxu1 }
 0x2a0   : > { %v1767_v0 = vpop.f32.mrb[1].mxu0  ;;  %v15249_v4 = vadd.f32 %v1765_v61, %v1054_v57  ;;  %v1808_v17 = vpop.f32.mrb[1].mxu1  ;;  %v15327_v57 = vpack.c.bf16 %v1936_v44, %v1935_v43  ;;  %v1938_v61 = vld [vmem:[%s16763_s18 + $0x158] sm:$0xff]  ;;  %v15384_v42 = vadd.f32 %v1806_v14, %v1062_v26 }
 0x2a1   : > { %v15245_v1 = vadd.f32 %v1767_v0, %v1058_v53  ;;  %v1769_v2 = vpop.f32.mrb[2].mxu0  ;;  %v15281_v23 = vadd.f32 %v1808_v17, %v1066_v10  ;;  %v1810_v25 = vpop.f32.mrb[2].mxu1  ;;  %v1954_v53 = vld [vmem:[%s16763_s18 + $0x1d8] sm:$0xff]  ;;  %v15345_v0 = vpack.c.bf16 %v1938_v61, %v1937_v59 }
 0x2a2   : > { %v1770_v5 = vpop.f32.mrb[3].mxu0  ;;  %v1811_v28 = vpop.f32.mrb[3].mxu1  ;;  %16952 = vst [vmem:[#allocation59_spill] sm:$0xff] %v15327_v57  ;;  %v15330_v58 = vpack.c.bf16 %v1954_v53, %v1953_v46  ;;  %v15348_v2 = vpack.c.bf16 %v1956_v63, %v1955_v62  ;;  %v1958_v10 = vld [vmem:[%s16763_s18 + $0x1f8] sm:$0xff]  ;;  %v15378_v25 = vpack.c.bf16 %v1942_v22, %v1941_v20 }
 0x2a3   : > { %2023 = vmatprep.mubr.f32.mxu0 %v15245_v1  ;;  %16954 = vst [vmem:[#allocation61_spill] sm:$0xff] %v15345_v0  ;;  %v1939_v5 = vld [vmem:[%s16763_s18 + $0x160] sm:$0xff]  ;;  %v15369_v17 = vpack.c.bf16 %v1958_v10, %v1957_v9  ;;  %v1008_v43 = vld [vmem:[%s16922_s2 + $0x2b8] sm:$0xff] }
 0x2a4   : > { %2024 = vmatmul.mubr.f32.vlgmr.msra.gmra.mrb[8].mxu0 %v15249_v4  ;;  %16953 = vst [vmem:[#allocation60_spill] sm:$0xff] %v15330_v58  ;;  %16955 = vst [vmem:[#allocation62_spill] sm:$0xff] %v15348_v2  ;;  %v15363_v11 = vpack.c.bf16 %v1940_v7, %v1939_v5  ;;  %v1012_v14 = vld [vmem:[%s16922_s2 + $0x2d8] sm:$0xff]  ;;  %v10654_v44 = vcombine.low %v1004_v37, %v1008_v43  ;;  %v10655_v46 = vcombine.high %v1004_v37, %v1008_v43 }
 0x2a5   : > { %12124 = vmatpush3.bf16.msra.mxu0 %v15247_v3  ;;  %2093 = vmatprep.mubr.f32.mxu0 %v15281_v23  ;;  %16958 = vst [vmem:[#allocation65_spill] sm:$0xff] %v15369_v17  ;;  %16959 = vst [vmem:[#allocation66_spill] sm:$0xff] %v15378_v25  ;;  %v1016_v53 = vld [vmem:[%s16922_s2 + $0x2f8] sm:$0xff] }
 0x2a6   : > { %12126 = vmatprep.subr.bf16.mxu0 %v15251_v6  ;;  %16956 = vst [vmem:[#allocation63_spill] sm:$0xff] %v15363_v11  ;;  %v10663_v59 = vcombine.high %v1012_v14, %v1016_v53  ;;  %v1020_v61 = vld [vmem:[%s16922_s2 + $0x318] sm:$0xff]  ;;  %1874 = vmatprep.subr.bf16.mxu1 %v10655_v46  ;;  %v10662_v63 = vcombine.low %v1012_v14, %v1016_v53  ;;  %v2102_v53 = vld [vmem:[#allocation18 + $0x18] sm:$0xff] }
 0x2a7   : > { %v1024_v62 = vld [vmem:[%s16922_s2 + $0x338] sm:$0xff]  ;;  %1875 = vmatpush1.bf16.msra.mxu1 %v10654_v44 }
 0x2a8   : > { %1876 = vmatprep.subr.bf16.mxu1 %v10663_v59  ;;  %v10671_v5 = vcombine.high %v1020_v61, %v1024_v62  ;;  %v1028_v7 = vld [vmem:[%s16922_s2 + $0x358] sm:$0xff]  ;;  %v10670_v10 = vcombine.low %v1020_v61, %v1024_v62  ;;  %v2100_v61 = vld [vmem:[#allocation18 + $0x8] sm:$0xff]  ;;  %v15432_v62 = vld [vmem:[#allocation18] sm:$0xff] }
 0x2a9   : > { %12128 = vmatpush3.bf16.msra.mxu0 %v15270_v16  ;;  %v1032_v9 = vld [vmem:[%s16922_s2 + $0x378] sm:$0xff] }
 0x2aa   : > { %12130 = vmatprep.subr.bf16.mxu0 %v15273_v19  ;;  %v10679_v20 = vcombine.high %v1028_v7, %v1032_v9  ;;  %v1036_v22 = vld [vmem:[%s16922_s2 + $0x398] sm:$0xff] }
 0x2ab   : > { %1877 = vmatpush1.bf16.msra.mxu1 %v10662_v63  ;;  %v1040_v26 = vld [vmem:[%s16922_s2 + $0x3b8] sm:$0xff]  ;;  %v16792_v63 = vmov 0.0  }
 0x2ac   : > { %1878 = vmatprep.subr.bf16.mxu1 %v10671_v5  ;;  %v1044_v37 = vld [vmem:[%s16922_s2 + $0x3d8] sm:$0xff]  ;;  %v10686_v14 = vcombine.low %v1036_v22, %v1040_v26 }
 0x2ad   : > { %12132 = vmatpush3.bf16.msra.mxu0 %v15291_v30  ;;  %v1048_v43 = vld [vmem:[%s16922_s2 + $0x3f8] sm:$0xff] }
 0x2ae   : > { %12134 = vmatprep.subr.bf16.mxu0 %v15294_v31  ;;  %v10695_v44 = vcombine.high %v1044_v37, %v1048_v43  ;;  %v10694_v46 = vcombine.low %v1044_v37, %v1048_v43  ;;  %v15428_v59 = vld [vmem:[#allocation18 + $0x10] sm:$0xff] }
 0x2af   : > { %1879 = vmatpush1.bf16.msra.mxu1 %v10670_v10 }
 0x2b0   : > { %1880 = vmatprep.subr.bf16.mxu1 %v10679_v20 }
 0x2b1   : > { %12136 = vmatpush3.bf16.msra.mxu0 %v15309_v39 }
 0x2b2   : > { %12138 = vmatprep.subr.bf16.mxu0 %v15312_v40 }
 0x2b5   : > { %12140 = vmatpush3.bf16.msra.mxu0 %v15327_v57 }
 0x2b6   : > { %12142 = vmatprep.subr.bf16.mxu0 %v15330_v58 }
 0x2b9   : > { %12144 = vmatpush3.bf16.msra.mxu0 %v15345_v0 }
 0x2ba   : > { %12146 = vmatprep.subr.bf16.mxu0 %v15348_v2 }
 0x2bd   : > { %12148 = vmatpush3.bf16.msra.mxu0 %v15363_v11 }
 0x2be   : > { %12150 = vmatprep.subr.bf16.mxu0 %v15369_v17 }
 0x2c1   : > { %12152 = vmatpush3.bf16.msra.mxu0 %v15378_v25 }
 0x2c2   : > { %2107 = vmatprep.subr.mxu0 %v2100_v61 }
 0x2c4   : > { %2094 = vmatmul.mubr.f32.vlgmr.msra.gmra.mrb[10].mxu0 %v15384_v42 }
 0x2c5   : > { %2108 = vmatpush1.msra.mxu0 %v15432_v62  ;;  %2171 = vmatprep.mubr.f32.mxu0 %v16792_v63 }
 0x2c6   : > { %12154 = vmatprep.subr.bf16.mxu0 %v15017_v12 }
 0x2df   : > { %v15387_v28 = vpop.f32.mrb[4].mxu0 }
 0x2e0   : > { %v15389_v33 = vpop.f32.mrb[5].mxu0 }
 0x2e1   : > { %v1851_v34 = vpop.f32.mrb[6].mxu0 }
 0x2e2   : > { %v1852_v36 = vpop.f32.mrb[7].mxu0  ;;  %v10678_v34 = vcombine.low %v1028_v7, %v1032_v9 }
 0x2e3   : > { %v10687_v36 = vcombine.high %v1036_v22, %v1040_v26 }
 0x2e4   : > { %1881 = vmatpush1.bf16.msra.mxu1 %v10678_v34 }
 0x2e5   : > { %1882 = vmatprep.subr.bf16.mxu1 %v10687_v36 }
 0x2e8   : > { %1883 = vmatpush1.bf16.msra.mxu1 %v10686_v14 }
 0x2e9   : > { %1884 = vmatprep.subr.bf16.mxu1 %v10695_v44 }
 0x2ec   : > { %1885 = vmatpush1.bf16.msra.mxu1 %v10694_v46 }
 0x2ed   : > { %2178 = vmatprep.subr.mxu1 %v2102_v53 }
 0x2ef   : > { %1887 = vmatmul.mubr.bf16.vlgmr.msra.gmra.mrb[4].mxu1 %v14909_v8 }
 0x2f0   : > { %2179 = vmatpush1.msra.mxu1 %v15428_v59  ;;  %2242 = vmatprep.mubr.f32.mxu1 %v16792_v63 }
 0x2f1   : > { %12186 = vmatprep.subr.bf16.mxu1 %v15149_v56  ;;  %v5059_v56 = vld [vmem:[#allocation21 + $0x70] sm:$0xff] }
 0x377   : > { %v11491_v8 = vpop.f32.mrb[8].mxu0 }
 0x378   : > { %v11492_v5 = vpop.f32.mrb[9].mxu0 }
 0x379   : > { %v11493_v7 = vadd.f32 %v11492_v5, %v11491_v8 }
 0x397   : > { %v11526_v9 = vpop.f32.mrb[10].mxu0 }
 0x398   : > { %v11527_v10 = vpop.f32.mrb[11].mxu0 }
 0x399   : > { %v11528_v20 = vadd.f32 %v11527_v10, %v11526_v9 }
 0x39b   : > { %v2096_v22 = vadd.f32 %v11528_v20, %v11493_v7 }
 0x39d   : > { %10696 = vmatmul.mubr.msk.f32.vlgmr.msra.gmra.mrb[12].mxu0 %vm2103_vm0, %v2096_v22  ;;  %10697 = vmatmul.mubr.msk.f32.vlgmr.msra.gmra.mrb[8].mxu1 %vm2103_vm0, %v2096_v22 }
 0x39e   : > { %12156 = vmatpush3.bf16.msra.mxu0 %v15025_v15  ;;  %12188 = vmatpush3.bf16.msra.mxu1 %v15247_v3 }
 0x39f   : > { %12158 = vmatprep.subr.bf16.mxu0 %v15034_v18  ;;  %12190 = vmatprep.subr.bf16.mxu1 %v15251_v6 }
 0x3a2   : > { %12160 = vmatpush3.bf16.msra.mxu0 %v15044_v21  ;;  %12192 = vmatpush3.bf16.msra.mxu1 %v15270_v16 }
 0x3a3   : > { %12162 = vmatprep.subr.bf16.mxu0 %v15053_v24  ;;  %12194 = vmatprep.subr.bf16.mxu1 %v15273_v19 }
 0x3a6   : > { %12164 = vmatpush3.bf16.msra.mxu0 %v15062_v27  ;;  %12196 = vmatpush3.bf16.msra.mxu1 %v15291_v30 }
 0x3a7   : > { %12166 = vmatprep.subr.bf16.mxu0 %v15071_v29  ;;  %12198 = vmatprep.subr.bf16.mxu1 %v15294_v31  ;;  %v5051_v31 = vld [vmem:[#allocation21 + $0x30] sm:$0xff] }
 0x3aa   : > { %12168 = vmatpush3.bf16.msra.mxu0 %v15080_v32  ;;  %12200 = vmatpush3.bf16.msra.mxu1 %v15309_v39  ;;  %v5052_v39 = vld [vmem:[#allocation21 + $0x38] sm:$0xff] }
 0x3ab   : > { %12170 = vmatprep.subr.bf16.mxu0 %v15089_v35  ;;  %12202 = vmatprep.subr.bf16.mxu1 %v15312_v40  ;;  %v4856_v35 = vld [vmem:[%s16967_s3 + $0x78] sm:$0xff] }
 0x3ae   : > { %12172 = vmatpush3.bf16.msra.mxu0 %v15098_v38  ;;  %12204 = vmatpush3.bf16.msra.mxu1 %v15327_v57  ;;  %v4855_v57 = vld [vmem:[%s16967_s3 + $0x70] sm:$0xff] }
 0x3af   : > { %12174 = vmatprep.subr.bf16.mxu0 %v15107_v41  ;;  %12206 = vmatprep.subr.bf16.mxu1 %v15330_v58 }
 0x3b2   : > { %12176 = vmatpush3.bf16.msra.mxu0 %v15116_v45  ;;  %12208 = vmatpush3.bf16.msra.mxu1 %v15345_v0 }
 0x3b3   : > { %12178 = vmatprep.subr.bf16.mxu0 %v15125_v48  ;;  %12210 = vmatprep.subr.bf16.mxu1 %v15348_v2 }
 0x3b6   : > { %12180 = vmatpush3.bf16.msra.mxu0 %v15134_v51  ;;  %12212 = vmatpush3.bf16.msra.mxu1 %v15363_v11 }
 0x3b7   : > { %12182 = vmatprep.subr.bf16.mxu0 %v15143_v54  ;;  %12214 = vmatprep.subr.bf16.mxu1 %v15369_v17 }
 0x3ba   : > { %12184 = vmatpush3.bf16.msra.mxu0 %v15146_v55  ;;  %12216 = vmatpush3.bf16.msra.mxu1 %v15378_v25  ;;  %v12968_v25 = vld [vmem:[#allocation5 + $0x208] ss:$16 sps:$4 sm:$0xff]  }
 0x3bb   : > { %2401 = vmatprep.subr.mxu0 %v2100_v61  ;;  %2472 = vmatprep.subr.mxu1 %v2102_v53 }
 0x3c2   : > { %v15470_v26 = vpop.f32.mrb[4].mxu1 }
 0x3c3   : > { %v15472_v34 = vpop.f32.mrb[5].mxu1 }
 0x3c4   : > { %v1892_v36 = vpop.f32.mrb[6].mxu1 }
 0x3c5   : > { %v1893_v37 = vpop.f32.mrb[7].mxu1 }
 0x470   : > { %v2173_v43 = vpop.f32.mrb[12].mxu0  ;;  %v2244_v14 = vpop.f32.mrb[8].mxu1 }
 0x471   : > { %v15475_v44 = vsub.f32 %v15249_v4, %v2173_v43  ;;  %v15478_v46 = vsub.f32 %v15384_v42, %v2244_v14  ;;  %v2175_v8 = vpop.f32.mrb[13].mxu0  ;;  %v2246_v5 = vpop.f32.mrb[9].mxu1 }
 0x472   : > { %v15481_v7 = vsub.f32 %v15245_v1, %v2175_v8  ;;  %v15484_v53 = vsub.f32 %v15281_v23, %v2246_v5  ;;  %v12871_v1 = vld [vmem:[#allocation5 + $0x4] ss:$16 sps:$4 sm:$0xff]   ;;  %v12874_v23 = vld [vmem:[#allocation5 + $0xc] ss:$16 sps:$4 sm:$0xff]   ;;  %v12872_v5 = vld [vmem:[#allocation5 + $0x8] ss:$16 sps:$4 sm:$0xff]  }
 0x473   : > { %v2253_v4 = vmul.f32 %v15475_v44, %v15475_v44  ;;  %v2255_v42 = vmul.f32 %v15478_v46, %v15478_v46 }
 0x474   : > { %v2254_v61 = vmul.f32 %v15481_v7, %v15481_v7  ;;  %v2256_v9 = vmul.f32 %v15484_v53, %v15484_v53 }
 0x476   : > { %2321 = vmatprep.mubr.f32.mxu0 %v2254_v61  ;;  %2391 = vmatprep.mubr.f32.mxu1 %v2256_v9  ;;  %v12877_v61 = vld [vmem:[#allocation5 + $0x24] ss:$16 sps:$4 sm:$0xff]   ;;  %v12880_v9 = vld [vmem:[#allocation5 + $0x2c] ss:$16 sps:$4 sm:$0xff]  }
 0x477   : > { %2322 = vmatmul.mubr.f32.vlgmr.msra.gmra.mrb[14].mxu0 %v2253_v4  ;;  %2392 = vmatmul.mubr.f32.vlgmr.msra.gmra.mrb[10].mxu1 %v2255_v42  ;;  %v12875_v4 = vld [vmem:[#allocation5 + $0x20] ss:$16 sps:$4 sm:$0xff]   ;;  %v12878_v42 = vld [vmem:[#allocation5 + $0x28] ss:$16 sps:$4 sm:$0xff]  }
 0x478   : > { %2402 = vmatpush1.msra.mxu0 %v15432_v62  ;;  %2465 = vmatprep.mubr.f32.mxu0 %v16792_v63  ;;  %v12869_v62 = vld [vmem:[#allocation5] ss:$16 sps:$4 sm:$0xff]  }
 0x479   : > { %2473 = vmatpush1.msra.mxu1 %v15428_v59  ;;  %2536 = vmatprep.mubr.f32.mxu1 %v16792_v63 }
 0x47a   : > { %3359 = vmatprep.subr.bf16.mxu0 %v12871_v1  ;;  %3441 = vmatprep.subr.bf16.mxu1 %v12874_v23  ;;  %v12883_v1 = vld [vmem:[#allocation5 + $0x44] ss:$16 sps:$4 sm:$0xff]   ;;  %v12886_v23 = vld [vmem:[#allocation5 + $0x4c] ss:$16 sps:$4 sm:$0xff]  }
 0x54a   : > { %v11561_v10 = vpop.f32.mrb[14].mxu0  ;;  %v11596_v20 = vpop.f32.mrb[10].mxu1 }
 0x54b   : > { %v11562_v22 = vpop.f32.mrb[15].mxu0  ;;  %v11597_v36 = vpop.f32.mrb[11].mxu1 }
 0x54c   : > { %v11563_v37 = vadd.f32 %v11562_v22, %v11561_v10  ;;  %v11598_v43 = vadd.f32 %v11597_v36, %v11596_v20  ;;  %v12881_v10 = vld [vmem:[#allocation5 + $0x40] ss:$16 sps:$4 sm:$0xff]   ;;  %v12884_v20 = vld [vmem:[#allocation5 + $0x48] ss:$16 sps:$4 sm:$0xff]   ;;  %v12889_v22 = vld [vmem:[#allocation5 + $0x64] ss:$16 sps:$4 sm:$0xff]  }
 0x54d   : > { %v12892_v36 = vld [vmem:[#allocation5 + $0x6c] ss:$16 sps:$4 sm:$0xff]  }
 0x54e   : > { %v2324_v14 = vadd.f32 1e-05, %v11563_v37  ;;  %v12887_v37 = vld [vmem:[#allocation5 + $0x60] ss:$16 sps:$4 sm:$0xff]  }
 0x550   : > { %v2394_v8 = vadd.f32 %v11598_v43, %v2324_v14  ;;  %v12890_v43 = vld [vmem:[#allocation5 + $0x68] ss:$16 sps:$4 sm:$0xff]   ;;  %v12895_v14 = vld [vmem:[#allocation5 + $0x84] ss:$16 sps:$4 sm:$0xff]  }
 0x552   : > { %13781 = vrsqrt.f32 %v2394_v8  ;;  %v12898_v8 = vld [vmem:[#allocation5 + $0x8c] ss:$16 sps:$4 sm:$0xff]  }
 0x55c   : > { %v13782_v59 = vpop.eup %13781 }
 0x55d   : > { %10698 = vmatmul.mubr.msk.f32.vlgmr.msra.gmra.mrb[16].mxu0 %vm2103_vm0, %v13782_v59  ;;  %10699 = vmatmul.mubr.msk.f32.vlgmr.msra.gmra.mrb[12].mxu1 %vm2103_vm0, %v13782_v59  ;;  %v12899_v59 = vld [vmem:[#allocation5 + $0xa0] ss:$16 sps:$4 sm:$0xff]  }
 0x55e   : > { %3360 = vmatpush1.bf16.msra.mxu0 %v12869_v62  ;;  %3442 = vmatpush1.bf16.msra.mxu1 %v12872_v5  ;;  %v12893_v62 = vld [vmem:[#allocation5 + $0x80] ss:$16 sps:$4 sm:$0xff]   ;;  %v12896_v5 = vld [vmem:[#allocation5 + $0x88] ss:$16 sps:$4 sm:$0xff]  }
 0x55f   : > { %3361 = vmatprep.subr.bf16.mxu0 %v12877_v61  ;;  %3443 = vmatprep.subr.bf16.mxu1 %v12880_v9  ;;  %v12901_v61 = vld [vmem:[#allocation5 + $0xa4] ss:$16 sps:$4 sm:$0xff]   ;;  %v12904_v9 = vld [vmem:[#allocation5 + $0xac] ss:$16 sps:$4 sm:$0xff]  }
 0x562   : > { %3362 = vmatpush1.bf16.msra.mxu0 %v12875_v4  ;;  %3444 = vmatpush1.bf16.msra.mxu1 %v12878_v42  ;;  %v12902_v4 = vld [vmem:[#allocation5 + $0xa8] ss:$16 sps:$4 sm:$0xff]   ;;  %v12907_v42 = vld [vmem:[#allocation5 + $0xc4] ss:$16 sps:$4 sm:$0xff]  }
 0x563   : > { %3363 = vmatprep.subr.bf16.mxu0 %v12883_v1  ;;  %3445 = vmatprep.subr.bf16.mxu1 %v12886_v23  ;;  %v12910_v1 = vld [vmem:[#allocation5 + $0xcc] ss:$16 sps:$4 sm:$0xff]   ;;  %v12905_v23 = vld [vmem:[#allocation5 + $0xc0] ss:$16 sps:$4 sm:$0xff]  }
 0x566   : > { %3364 = vmatpush1.bf16.msra.mxu0 %v12881_v10  ;;  %3446 = vmatpush1.bf16.msra.mxu1 %v12884_v20  ;;  %v12908_v10 = vld [vmem:[#allocation5 + $0xc8] ss:$16 sps:$4 sm:$0xff]   ;;  %v12913_v20 = vld [vmem:[#allocation5 + $0xe4] ss:$16 sps:$4 sm:$0xff]  }
 0x567   : > { %3365 = vmatprep.subr.bf16.mxu0 %v12889_v22  ;;  %3447 = vmatprep.subr.bf16.mxu1 %v12892_v36  ;;  %v12916_v22 = vld [vmem:[#allocation5 + $0xec] ss:$16 sps:$4 sm:$0xff]   ;;  %v12911_v36 = vld [vmem:[#allocation5 + $0xe0] ss:$16 sps:$4 sm:$0xff]  }
 0x56a   : > { %3366 = vmatpush1.bf16.msra.mxu0 %v12887_v37  ;;  %3448 = vmatpush1.bf16.msra.mxu1 %v12890_v43  ;;  %v12914_v37 = vld [vmem:[#allocation5 + $0xe8] ss:$16 sps:$4 sm:$0xff]   ;;  %v12919_v43 = vld [vmem:[#allocation5 + $0x104] ss:$16 sps:$4 sm:$0xff]  }
 0x56b   : > { %3367 = vmatprep.subr.bf16.mxu0 %v12895_v14  ;;  %3449 = vmatprep.subr.bf16.mxu1 %v12898_v8  ;;  %v12922_v14 = vld [vmem:[#allocation5 + $0x10c] ss:$16 sps:$4 sm:$0xff]   ;;  %v12917_v8 = vld [vmem:[#allocation5 + $0x100] ss:$16 sps:$4 sm:$0xff]  }
 0x56e   : > { %3368 = vmatpush1.bf16.msra.mxu0 %v12893_v62  ;;  %3450 = vmatpush1.bf16.msra.mxu1 %v12896_v5  ;;  %v12920_v62 = vld [vmem:[#allocation5 + $0x108] ss:$16 sps:$4 sm:$0xff]   ;;  %v12925_v5 = vld [vmem:[#allocation5 + $0x124] ss:$16 sps:$4 sm:$0xff]  }
 0x56f   : > { %3369 = vmatprep.subr.bf16.mxu0 %v12901_v61  ;;  %3451 = vmatprep.subr.bf16.mxu1 %v12904_v9  ;;  %v12928_v61 = vld [vmem:[#allocation5 + $0x12c] ss:$16 sps:$4 sm:$0xff]   ;;  %v12923_v9 = vld [vmem:[#allocation5 + $0x120] ss:$16 sps:$4 sm:$0xff]  }
 0x572   : > { %3370 = vmatpush1.bf16.msra.mxu0 %v12899_v59  ;;  %3452 = vmatpush1.bf16.msra.mxu1 %v12902_v4  ;;  %v12926_v59 = vld [vmem:[#allocation5 + $0x128] ss:$16 sps:$4 sm:$0xff]   ;;  %v12931_v4 = vld [vmem:[#allocation5 + $0x144] ss:$16 sps:$4 sm:$0xff]  }
 0x573   : > { %3371 = vmatprep.subr.bf16.mxu0 %v12907_v42  ;;  %3453 = vmatprep.subr.bf16.mxu1 %v12910_v1  ;;  %v12934_v42 = vld [vmem:[#allocation5 + $0x14c] ss:$16 sps:$4 sm:$0xff]   ;;  %v12929_v1 = vld [vmem:[#allocation5 + $0x140] ss:$16 sps:$4 sm:$0xff]  }
 0x576   : > { %3372 = vmatpush1.bf16.msra.mxu0 %v12905_v23  ;;  %3454 = vmatpush1.bf16.msra.mxu1 %v12908_v10  ;;  %v12932_v23 = vld [vmem:[#allocation5 + $0x148] ss:$16 sps:$4 sm:$0xff]   ;;  %v12937_v10 = vld [vmem:[#allocation5 + $0x164] ss:$16 sps:$4 sm:$0xff]  }
 0x577   : > { %3373 = vmatprep.subr.bf16.mxu0 %v12913_v20  ;;  %3455 = vmatprep.subr.bf16.mxu1 %v12916_v22  ;;  %v12940_v20 = vld [vmem:[#allocation5 + $0x16c] ss:$16 sps:$4 sm:$0xff]   ;;  %v12935_v22 = vld [vmem:[#allocation5 + $0x160] ss:$16 sps:$4 sm:$0xff]  }
 0x57a   : > { %3374 = vmatpush1.bf16.msra.mxu0 %v12911_v36  ;;  %3456 = vmatpush1.bf16.msra.mxu1 %v12914_v37  ;;  %v12938_v36 = vld [vmem:[#allocation5 + $0x168] ss:$16 sps:$4 sm:$0xff]   ;;  %v12943_v37 = vld [vmem:[#allocation5 + $0x184] ss:$16 sps:$4 sm:$0xff]  }
 0x57b   : > { %3375 = vmatprep.subr.bf16.mxu0 %v12919_v43  ;;  %3457 = vmatprep.subr.bf16.mxu1 %v12922_v14  ;;  %v12946_v43 = vld [vmem:[#allocation5 + $0x18c] ss:$16 sps:$4 sm:$0xff]   ;;  %v12941_v14 = vld [vmem:[#allocation5 + $0x180] ss:$16 sps:$4 sm:$0xff]  }
 0x57e   : > { %3376 = vmatpush1.bf16.msra.mxu0 %v12917_v8  ;;  %3458 = vmatpush1.bf16.msra.mxu1 %v12920_v62  ;;  %v12944_v8 = vld [vmem:[#allocation5 + $0x188] ss:$16 sps:$4 sm:$0xff]   ;;  %v12949_v62 = vld [vmem:[#allocation5 + $0x1a4] ss:$16 sps:$4 sm:$0xff]  }
 0x57f   : > { %3377 = vmatprep.subr.bf16.mxu0 %v12925_v5  ;;  %3459 = vmatprep.subr.bf16.mxu1 %v12928_v61  ;;  %v12952_v5 = vld [vmem:[#allocation5 + $0x1ac] ss:$16 sps:$4 sm:$0xff]   ;;  %v12947_v61 = vld [vmem:[#allocation5 + $0x1a0] ss:$16 sps:$4 sm:$0xff]  }
 0x582   : > { %3378 = vmatpush1.bf16.msra.mxu0 %v12923_v9  ;;  %3460 = vmatpush1.bf16.msra.mxu1 %v12926_v59  ;;  %v12950_v9 = vld [vmem:[#allocation5 + $0x1a8] ss:$16 sps:$4 sm:$0xff]   ;;  %v12955_v59 = vld [vmem:[#allocation5 + $0x1c4] ss:$16 sps:$4 sm:$0xff]  }
 0x583   : > { %3379 = vmatprep.subr.bf16.mxu0 %v12931_v4  ;;  %3461 = vmatprep.subr.bf16.mxu1 %v12934_v42  ;;  %v12958_v4 = vld [vmem:[#allocation5 + $0x1cc] ss:$16 sps:$4 sm:$0xff]   ;;  %v12953_v42 = vld [vmem:[#allocation5 + $0x1c0] ss:$16 sps:$4 sm:$0xff]  }
 0x586   : > { %3380 = vmatpush1.bf16.msra.mxu0 %v12929_v1  ;;  %3462 = vmatpush1.bf16.msra.mxu1 %v12932_v23  ;;  %v12956_v1 = vld [vmem:[#allocation5 + $0x1c8] ss:$16 sps:$4 sm:$0xff]   ;;  %v12961_v23 = vld [vmem:[#allocation5 + $0x1e4] ss:$16 sps:$4 sm:$0xff]  }
 0x587   : > { %3381 = vmatprep.subr.bf16.mxu0 %v12937_v10  ;;  %3463 = vmatprep.subr.bf16.mxu1 %v12940_v20  ;;  %v12964_v10 = vld [vmem:[#allocation5 + $0x1ec] ss:$16 sps:$4 sm:$0xff]   ;;  %v12959_v20 = vld [vmem:[#allocation5 + $0x1e0] ss:$16 sps:$4 sm:$0xff]  }
 0x58a   : > { %3382 = vmatpush1.bf16.msra.mxu0 %v12935_v22  ;;  %3464 = vmatpush1.bf16.msra.mxu1 %v12938_v36  ;;  %v12962_v22 = vld [vmem:[#allocation5 + $0x1e8] ss:$16 sps:$4 sm:$0xff]   ;;  %v12967_v36 = vld [vmem:[#allocation5 + $0x204] ss:$16 sps:$4 sm:$0xff]  }
 0x58b   : > { %3383 = vmatprep.subr.bf16.mxu0 %v12943_v37  ;;  %3465 = vmatprep.subr.bf16.mxu1 %v12946_v43  ;;  %v12970_v37 = vld [vmem:[#allocation5 + $0x20c] ss:$16 sps:$4 sm:$0xff]   ;;  %v16790_v43 = vsub.s32 4, %v15213_v47 }
 0x58e   : > { %3384 = vmatpush1.bf16.msra.mxu0 %v12941_v14  ;;  %3466 = vmatpush1.bf16.msra.mxu1 %v12944_v8  ;;  %v16789_v14 = vsub.s32 6, %v15213_v47  ;;  %v16791_v8 = vsub.s32 5, %v15213_v47 }
 0x58f   : > { %3385 = vmatprep.subr.bf16.mxu0 %v12949_v62  ;;  %3467 = vmatprep.subr.bf16.mxu1 %v12952_v5  ;;  %v16794_v62 = vsub.s32 7, %v15213_v47  ;;  %v1070_v5 = vrot.slane %v15221_v50, %v16790_v43 }
 0x592   : > { %3386 = vmatpush1.bf16.msra.mxu0 %v12947_v61  ;;  %3468 = vmatpush1.bf16.msra.mxu1 %v12950_v9  ;;  %v1078_v61 = vrot.slane %v15221_v50, %v16789_v14 }
 0x593   : > { %3387 = vmatprep.subr.bf16.mxu0 %v12955_v59  ;;  %3469 = vmatprep.subr.bf16.mxu1 %v12958_v4  ;;  %v2552_v59 = vstv %s2547_s29 }
 0x596   : > { %3388 = vmatpush1.bf16.msra.mxu0 %v12953_v42  ;;  %3470 = vmatpush1.bf16.msra.mxu1 %v12956_v1  ;;  %v1074_v42 = vrot.slane %v15221_v50, %v16791_v8  ;;  %v1082_v1 = vrot.slane %v15221_v50, %v16794_v62  ;;  %v12965_v62 = vld [vmem:[#allocation5 + $0x200] ss:$16 sps:$4 sm:$0xff]  }
 0x597   : > { %3389 = vmatprep.subr.bf16.mxu0 %v12961_v23  ;;  %3471 = vmatprep.subr.bf16.mxu1 %v12964_v10 }
 0x59a   : > { %3390 = vmatpush1.bf16.msra.mxu0 %v12959_v20  ;;  %3472 = vmatpush1.bf16.msra.mxu1 %v12962_v22 }
 0x59b   : > { %3400 = vmatprep.subr.bf16.mxu0 %v12967_v36  ;;  %3482 = vmatprep.subr.bf16.mxu1 %v12970_v37  ;;  %v1848_v36 = vadd.f32 %v15387_v28, %v1070_v5  ;;  %v1889_v37 = vadd.f32 %v15470_v26, %v1078_v61 }
 0x630   : > { %v2467_v9 = vpop.f32.mrb[16].mxu0  ;;  %v2538_v4 = vpop.f32.mrb[12].mxu1 }
 0x631   : > { %v2543_v23 = vmul.f32 %v2467_v9, %v15475_v44  ;;  %v2545_v10 = vmul.f32 %v2538_v4, %v15478_v46  ;;  %v2469_v20 = vpop.f32.mrb[17].mxu0  ;;  %v2540_v22 = vpop.f32.mrb[13].mxu1  ;;  %v1850_v46 = vadd.f32 %v15389_v33, %v1074_v42  ;;  %v1891_v9 = vadd.f32 %v15472_v34, %v1082_v1  ;;  %v12973_v33 = vld [vmem:[#allocation5 + $0x224] ss:$16 sps:$4 sm:$0xff]   ;;  %v12976_v34 = vld [vmem:[#allocation5 + $0x22c] ss:$16 sps:$4 sm:$0xff]  }
 0x632   : > { %v2544_v14 = vmul.f32 %v2469_v20, %v15481_v7  ;;  %v2546_v43 = vmul.f32 %v2540_v22, %v15484_v53  ;;  %v12977_v42 = vld [vmem:[#allocation5 + $0x240] ss:$16 sps:$4 sm:$0xff]   ;;  %v12980_v1 = vld [vmem:[#allocation5 + $0x248] ss:$16 sps:$4 sm:$0xff]  }
 0x633   : > { %vm2548_vm1 = vcmp.ge.f32.partialorder %v2543_v23, 0.0  ;;  %v2553_v8 = vmul.f32 %v2552_v59, %v2543_v23  ;;  %vm2550_vm2 = vcmp.ge.f32.partialorder %v2545_v10, 0.0  ;;  %v2555_v63 = vmul.f32 %v2552_v59, %v2545_v10 }
 0x634   : > { %vm2549_vm3 = vcmp.ge.f32.partialorder %v2544_v14, 0.0  ;;  %v2554_v50 = vmul.f32 %v2552_v59, %v2544_v14  ;;  %vm2551_vm4 = vcmp.ge.f32.partialorder %v2546_v43, 0.0  ;;  %v2556_v44 = vmul.f32 %v2552_v59, %v2546_v43  ;;  %v12982_v59 = vld [vmem:[#allocation5 + $0x24c] ss:$16 sps:$4 sm:$0xff]  }
 0x635   : > { %v2557_v4 = vsel %vm2548_vm1, %v2543_v23, %v2553_v8  ;;  %v2559_v28 = vsel %vm2550_vm2, %v2545_v10, %v2555_v63  ;;  %v12979_v8 = vld [vmem:[#allocation5 + $0x244] ss:$16 sps:$4 sm:$0xff]   ;;  %v12988_v10 = vld [vmem:[#allocation5 + $0x26c] ss:$16 sps:$4 sm:$0xff]  }
 0x636   : > { %v2561_v5 = vadd.f32 %v2557_v4, %v1848_v36  ;;  %v15524_v26 = vadd.f32 %v2559_v28, %v1889_v37  ;;  %v2558_v7 = vsel %vm2549_vm3, %v2544_v14, %v2554_v50  ;;  %v2560_v61 = vsel %vm2551_vm4, %v2546_v43, %v2556_v44  ;;  %v12971_v43 = vld [vmem:[#allocation5 + $0x220] ss:$16 sps:$4 sm:$0xff]   ;;  %v12974_v14 = vld [vmem:[#allocation5 + $0x228] ss:$16 sps:$4 sm:$0xff]   ;;  %v12985_v23 = vld [vmem:[#allocation5 + $0x264] ss:$16 sps:$4 sm:$0xff]  }
 0x637   : > { %v2562_v53 = vadd.f32 %v2558_v7, %v1850_v46  ;;  %v2564_v20 = vadd.f32 %v2560_v61, %v1891_v9  ;;  %v12991_v36 = vld [vmem:[#allocation5 + $0x284] ss:$16 sps:$4 sm:$0xff]   ;;  %v12994_v37 = vld [vmem:[#allocation5 + $0x28c] ss:$16 sps:$4 sm:$0xff]   ;;  %v12989_v50 = vld [vmem:[#allocation5 + $0x280] ss:$16 sps:$4 sm:$0xff]  }
 0x638   : > { %v15528_v55 = vpack.c.bf16 %v2561_v5, %v2561_v5  ;;  %v12992_v44 = vld [vmem:[#allocation5 + $0x288] ss:$16 sps:$4 sm:$0xff]   ;;  %v12997_v46 = vld [vmem:[#allocation5 + $0x2a4] ss:$16 sps:$4 sm:$0xff]   ;;  %v13000_v9 = vld [vmem:[#allocation5 + $0x2ac] ss:$16 sps:$4 sm:$0xff]  }
 0x639   : > { %v15526_v22 = vpack.c.bf16 %v2562_v53, %v2562_v53  ;;  %v15534_v63 = vpack.c.bf16 %v2564_v20, %v2564_v20  ;;  %v12995_v4 = vld [vmem:[#allocation5 + $0x2a0] ss:$16 sps:$4 sm:$0xff]   ;;  %v12998_v28 = vld [vmem:[#allocation5 + $0x2a8] ss:$16 sps:$4 sm:$0xff]   ;;  %v13003_v5 = vld [vmem:[#allocation5 + $0x2c4] ss:$16 sps:$4 sm:$0xff]  }
 0x63a   : > { %16961 = vst [vmem:[#allocation68_spill] sm:$0xff] %v15528_v55  ;;  %v13006_v7 = vld [vmem:[#allocation5 + $0x2cc] ss:$16 sps:$4 sm:$0xff]   ;;  %v13001_v61 = vld [vmem:[#allocation5 + $0x2c0] ss:$16 sps:$4 sm:$0xff]  }
 0x63b   : > { %16960 = vst [vmem:[#allocation67_spill] sm:$0xff] %v15526_v22  ;;  %3391 = vmatprep.mubr.bf16.mxu0 %v15526_v22  ;;  %3473 = vmatprep.mubr.bf16.mxu1 %v15526_v22  ;;  %16962 = vst [vmem:[#allocation69_spill] sm:$0xff] %v15534_v63  ;;  %v13004_v53 = vld [vmem:[#allocation5 + $0x2c8] ss:$16 sps:$4 sm:$0xff]   ;;  %v13009_v20 = vld [vmem:[#allocation5 + $0x2e4] ss:$16 sps:$4 sm:$0xff]  }
 0x63c   : > { %3392 = vmatmul.mubr.bf16.vlgmr.msra.gmra.mrb[20].mxu0 %v15528_v55  ;;  %3474 = vmatmul.mubr.bf16.vlgmr.msra.gmra.mrb[16].mxu1 %v15528_v55 }
 0x63d   : > { %3401 = vmatpush1.bf16.msra.mxu0 %v12965_v62  ;;  %3483 = vmatpush1.bf16.msra.mxu1 %v12968_v25  ;;  %v12983_v25 = vld [vmem:[#allocation5 + $0x260] ss:$16 sps:$4 sm:$0xff]   ;;  %v12986_v62 = vld [vmem:[#allocation5 + $0x268] ss:$16 sps:$4 sm:$0xff]  }
 0x63e   : > { %3432 = vmatprep.mubr.bf16.mxu0 %v15534_v63  ;;  %3514 = vmatprep.mubr.bf16.mxu1 %v15534_v63 }
 0x63f   : > { %3402 = vmatprep.subr.bf16.mxu0 %v12973_v33  ;;  %3484 = vmatprep.subr.bf16.mxu1 %v12976_v34  ;;  %v13012_v33 = vld [vmem:[#allocation5 + $0x2ec] ss:$16 sps:$4 sm:$0xff]   ;;  %v13007_v34 = vld [vmem:[#allocation5 + $0x2e0] ss:$16 sps:$4 sm:$0xff]  }
 0x641   : > { %3403 = vmatpush1.bf16.msra.mxu0 %v12971_v43  ;;  %3485 = vmatpush1.bf16.msra.mxu1 %v12974_v14  ;;  %v13010_v43 = vld [vmem:[#allocation5 + $0x2e8] ss:$16 sps:$4 sm:$0xff]   ;;  %v13015_v14 = vld [vmem:[#allocation5 + $0x304] ss:$16 sps:$4 sm:$0xff]  }
 0x642   : > { %3404 = vmatprep.subr.bf16.mxu0 %v12979_v8  ;;  %3486 = vmatprep.subr.bf16.mxu1 %v12982_v59  ;;  %v13018_v8 = vld [vmem:[#allocation5 + $0x30c] ss:$16 sps:$4 sm:$0xff]   ;;  %v13013_v59 = vld [vmem:[#allocation5 + $0x300] ss:$16 sps:$4 sm:$0xff]  }
 0x645   : > { %3405 = vmatpush1.bf16.msra.mxu0 %v12977_v42  ;;  %3487 = vmatpush1.bf16.msra.mxu1 %v12980_v1  ;;  %v13016_v42 = vld [vmem:[#allocation5 + $0x308] ss:$16 sps:$4 sm:$0xff]   ;;  %v13021_v1 = vld [vmem:[#allocation5 + $0x324] ss:$16 sps:$4 sm:$0xff]  }
 0x646   : > { %3406 = vmatprep.subr.bf16.mxu0 %v12985_v23  ;;  %3488 = vmatprep.subr.bf16.mxu1 %v12988_v10  ;;  %v13024_v23 = vld [vmem:[#allocation5 + $0x32c] ss:$16 sps:$4 sm:$0xff]   ;;  %v13019_v10 = vld [vmem:[#allocation5 + $0x320] ss:$16 sps:$4 sm:$0xff]  }
 0x649   : > { %3407 = vmatpush1.bf16.msra.mxu0 %v12983_v25  ;;  %3489 = vmatpush1.bf16.msra.mxu1 %v12986_v62  ;;  %v13022_v25 = vld [vmem:[#allocation5 + $0x328] ss:$16 sps:$4 sm:$0xff]   ;;  %v13027_v62 = vld [vmem:[#allocation5 + $0x344] ss:$16 sps:$4 sm:$0xff]  }
 0x64a   : > { %3408 = vmatprep.subr.bf16.mxu0 %v12991_v36  ;;  %3490 = vmatprep.subr.bf16.mxu1 %v12994_v37  ;;  %v13030_v36 = vld [vmem:[#allocation5 + $0x34c] ss:$16 sps:$4 sm:$0xff]   ;;  %v13025_v37 = vld [vmem:[#allocation5 + $0x340] ss:$16 sps:$4 sm:$0xff]  }
 0x64d   : > { %3409 = vmatpush1.bf16.msra.mxu0 %v12989_v50  ;;  %3491 = vmatpush1.bf16.msra.mxu1 %v12992_v44  ;;  %v13028_v50 = vld [vmem:[#allocation5 + $0x348] ss:$16 sps:$4 sm:$0xff]   ;;  %v13033_v44 = vld [vmem:[#allocation5 + $0x364] ss:$16 sps:$4 sm:$0xff]  }
 0x64e   : > { %3410 = vmatprep.subr.bf16.mxu0 %v12997_v46  ;;  %3492 = vmatprep.subr.bf16.mxu1 %v13000_v9  ;;  %v13036_v46 = vld [vmem:[#allocation5 + $0x36c] ss:$16 sps:$4 sm:$0xff]   ;;  %v13031_v9 = vld [vmem:[#allocation5 + $0x360] ss:$16 sps:$4 sm:$0xff]  }
 0x651   : > { %3411 = vmatpush1.bf16.msra.mxu0 %v12995_v4  ;;  %3493 = vmatpush1.bf16.msra.mxu1 %v12998_v28  ;;  %v13034_v4 = vld [vmem:[#allocation5 + $0x368] ss:$16 sps:$4 sm:$0xff]   ;;  %v13039_v28 = vld [vmem:[#allocation5 + $0x384] ss:$16 sps:$4 sm:$0xff]  }
 0x652   : > { %3412 = vmatprep.subr.bf16.mxu0 %v13003_v5  ;;  %3494 = vmatprep.subr.bf16.mxu1 %v13006_v7  ;;  %v13042_v5 = vld [vmem:[#allocation5 + $0x38c] ss:$16 sps:$4 sm:$0xff]   ;;  %v13037_v7 = vld [vmem:[#allocation5 + $0x380] ss:$16 sps:$4 sm:$0xff]  }
 0x655   : > { %3413 = vmatpush1.bf16.msra.mxu0 %v13001_v61  ;;  %3495 = vmatpush1.bf16.msra.mxu1 %v13004_v53  ;;  %v13040_v61 = vld [vmem:[#allocation5 + $0x388] ss:$16 sps:$4 sm:$0xff]   ;;  %v13045_v53 = vld [vmem:[#allocation5 + $0x3a4] ss:$16 sps:$4 sm:$0xff]  }
 0x656   : > { %3414 = vmatprep.subr.bf16.mxu0 %v13009_v20  ;;  %3496 = vmatprep.subr.bf16.mxu1 %v13012_v33  ;;  %v13048_v20 = vld [vmem:[#allocation5 + $0x3ac] ss:$16 sps:$4 sm:$0xff]   ;;  %v13043_v33 = vld [vmem:[#allocation5 + $0x3a0] ss:$16 sps:$4 sm:$0xff]  }
 0x659   : > { %3415 = vmatpush1.bf16.msra.mxu0 %v13007_v34  ;;  %3497 = vmatpush1.bf16.msra.mxu1 %v13010_v43  ;;  %v13046_v34 = vld [vmem:[#allocation5 + $0x3a8] ss:$16 sps:$4 sm:$0xff]   ;;  %v13051_v43 = vld [vmem:[#allocation5 + $0x3c4] ss:$16 sps:$4 sm:$0xff]  }
 0x65a   : > { %3416 = vmatprep.subr.bf16.mxu0 %v13015_v14  ;;  %3498 = vmatprep.subr.bf16.mxu1 %v13018_v8  ;;  %v13054_v14 = vld [vmem:[#allocation5 + $0x3cc] ss:$16 sps:$4 sm:$0xff]   ;;  %v13049_v8 = vld [vmem:[#allocation5 + $0x3c0] ss:$16 sps:$4 sm:$0xff]  }
 0x65d   : > { %3417 = vmatpush1.bf16.msra.mxu0 %v13013_v59  ;;  %3499 = vmatpush1.bf16.msra.mxu1 %v13016_v42  ;;  %v13052_v59 = vld [vmem:[#allocation5 + $0x3c8] ss:$16 sps:$4 sm:$0xff]   ;;  %v13057_v42 = vld [vmem:[#allocation5 + $0x3e4] ss:$16 sps:$4 sm:$0xff]  }
 0x65e   : > { %3418 = vmatprep.subr.bf16.mxu0 %v13021_v1  ;;  %3500 = vmatprep.subr.bf16.mxu1 %v13024_v23  ;;  %v13060_v1 = vld [vmem:[#allocation5 + $0x3ec] ss:$16 sps:$4 sm:$0xff]   ;;  %v13055_v23 = vld [vmem:[#allocation5 + $0x3e0] ss:$16 sps:$4 sm:$0xff]  }
 0x661   : > { %3419 = vmatpush1.bf16.msra.mxu0 %v13019_v10  ;;  %3501 = vmatpush1.bf16.msra.mxu1 %v13022_v25  ;;  %v13058_v10 = vld [vmem:[#allocation5 + $0x3e8] ss:$16 sps:$4 sm:$0xff]   ;;  %v15540_v25 = vpack.c.bf16 %v15524_v26, %v15524_v26 }
 0x662   : > { %3420 = vmatprep.subr.bf16.mxu0 %v13027_v62  ;;  %3502 = vmatprep.subr.bf16.mxu1 %v13030_v36  ;;  %v16964_v62 = vmov 0.0   ;;  %v3539_v36 = vld [vmem:[%s16765_s20 + $0x80] sm:$0xff] }
 0x663   : > { %16963 = vst [vmem:[#allocation70_spill] sm:$0xff] %v15540_v25 }
 0x665   : > { %3421 = vmatpush1.bf16.msra.mxu0 %v13025_v37  ;;  %3503 = vmatpush1.bf16.msra.mxu1 %v13028_v50  ;;  %v3540_v37 = vld [vmem:[%s16765_s20 + $0x88] sm:$0xff]  ;;  %v3523_v50 = vld [vmem:[%s16765_s20] sm:$0xff] }
 0x666   : > { %3422 = vmatprep.subr.bf16.mxu0 %v13033_v44  ;;  %3504 = vmatprep.subr.bf16.mxu1 %v13036_v46  ;;  %v15554_v26 = vpack.c.bf16 %v3540_v37, %v3539_v36  ;;  %v3524_v44 = vld [vmem:[%s16765_s20 + $0x8] sm:$0xff]  ;;  %v3541_v46 = vld [vmem:[%s16765_s20 + $0x90] sm:$0xff] }
 0x667   : > { %v3548_v36 = vld [vmem:[%s16765_s20 + $0xc8] sm:$0xff] }
 0x669   : > { %3423 = vmatpush1.bf16.msra.mxu0 %v13031_v9  ;;  %3505 = vmatpush1.bf16.msra.mxu1 %v13034_v4  ;;  %v3542_v9 = vld [vmem:[%s16765_s20 + $0x98] sm:$0xff]  ;;  %v15565_v4 = vpack.c.bf16 %v3524_v44, %v3523_v50  ;;  %v3531_v44 = vld [vmem:[%s16765_s20 + $0x40] sm:$0xff] }
 0x66a   : > { %3424 = vmatprep.subr.bf16.mxu0 %v13039_v28  ;;  %3506 = vmatprep.subr.bf16.mxu1 %v13042_v5  ;;  %v15567_v28 = vpack.c.bf16 %v3542_v9, %v3541_v46  ;;  %v3525_v5 = vld [vmem:[%s16765_s20 + $0x10] sm:$0xff]  ;;  %v3532_v46 = vld [vmem:[%s16765_s20 + $0x48] sm:$0xff] }
 0x66b   : > { %v3549_v9 = vld [vmem:[%s16765_s20 + $0xd0] sm:$0xff] }
 0x66d   : > { %3425 = vmatpush1.bf16.msra.mxu0 %v13037_v7  ;;  %3507 = vmatpush1.bf16.msra.mxu1 %v13040_v61  ;;  %v3526_v7 = vld [vmem:[%s16765_s20 + $0x18] sm:$0xff]  ;;  %v3543_v61 = vld [vmem:[%s16765_s20 + $0xa0] sm:$0xff] }
 0x66e   : > { %3426 = vmatprep.subr.bf16.mxu0 %v13045_v53  ;;  %3508 = vmatprep.subr.bf16.mxu1 %v13048_v20  ;;  %v3544_v53 = vld [vmem:[%s16765_s20 + $0xa8] sm:$0xff]  ;;  %v15583_v20 = vpack.c.bf16 %v3526_v7, %v3525_v5  ;;  %v3550_v5 = vld [vmem:[%s16765_s20 + $0xd8] sm:$0xff]  ;;  %v15637_v7 = vpack.c.bf16 %v3532_v46, %v3531_v44  ;;  %v3553_v44 = vld [vmem:[%s16765_s20 + $0xf0] sm:$0xff] }
 0x66f   : > { %v3554_v46 = vld [vmem:[%s16765_s20 + $0xf8] sm:$0xff] }
 0x671   : > { %3427 = vmatpush1.bf16.msra.mxu0 %v13043_v33  ;;  %3509 = vmatpush1.bf16.msra.mxu1 %v13046_v34  ;;  %v15586_v33 = vpack.c.bf16 %v3544_v53, %v3543_v61  ;;  %v3527_v34 = vld [vmem:[%s16765_s20 + $0x20] sm:$0xff]  ;;  %v15640_v61 = vpack.c.bf16 %v3550_v5, %v3549_v9  ;;  %v3533_v53 = vld [vmem:[%s16765_s20 + $0x50] sm:$0xff]  ;;  %v12245_v9 = vpack.c.bf16 %v3554_v46, %v3553_v44 }
 0x672   : > { %3428 = vmatprep.subr.bf16.mxu0 %v13051_v43  ;;  %3510 = vmatprep.subr.bf16.mxu1 %v13054_v14  ;;  %v3528_v43 = vld [vmem:[%s16765_s20 + $0x28] sm:$0xff]  ;;  %v3545_v14 = vld [vmem:[%s16765_s20 + $0xb0] sm:$0xff] }
 0x673   : > { %v3537_v5 = vld [vmem:[%s16765_s20 + $0x70] sm:$0xff] }
 0x675   : > { %3429 = vmatpush1.bf16.msra.mxu0 %v13049_v8  ;;  %3511 = vmatpush1.bf16.msra.mxu1 %v13052_v59  ;;  %v3546_v8 = vld [vmem:[%s16765_s20 + $0xb8] sm:$0xff]  ;;  %v15601_v59 = vpack.c.bf16 %v3528_v43, %v3527_v34  ;;  %v3551_v43 = vld [vmem:[%s16765_s20 + $0xe0] sm:$0xff] }
 0x676   : > { %3430 = vmatprep.subr.bf16.mxu0 %v13057_v42  ;;  %3512 = vmatprep.subr.bf16.mxu1 %v13060_v1  ;;  %v15604_v42 = vpack.c.bf16 %v3546_v8, %v3545_v14  ;;  %v3529_v1 = vld [vmem:[%s16765_s20 + $0x30] sm:$0xff]  ;;  %v3534_v34 = vld [vmem:[%s16765_s20 + $0x58] sm:$0xff]  ;;  %v3552_v14 = vld [vmem:[%s16765_s20 + $0xe8] sm:$0xff] }
 0x677   : > { %v15655_v8 = vpack.c.bf16 %v3534_v34, %v3533_v53  ;;  %v3538_v53 = vld [vmem:[%s16765_s20 + $0x78] sm:$0xff] }
 0x678   : > { %v12247_v34 = vpack.c.bf16 %v3538_v53, %v3537_v5  ;;  %v2697_v5 = vld [vmem:[%s16965_s13] sm:$0xf]  ;;  %s16973_s13 = sld [smem:[#allocation80_spill]] }
 0x679   : > { %3431 = vmatpush1.bf16.msra.mxu0 %v13055_v23  ;;  %3513 = vmatpush1.bf16.msra.mxu1 %v13058_v10  ;;  %v3530_v23 = vld [vmem:[%s16765_s20 + $0x38] sm:$0xff]  ;;  %v3547_v10 = vld [vmem:[%s16765_s20 + $0xc0] sm:$0xff]  ;;  %v2710_v53 = vrot.slane %v2697_v5, %v15366_v13  ;;  %v2714_v17 = vrot.slane %v2697_v5, %v15237_v60 }
 0x67a   : > { %12218 = vmatprep.subr.bf16.mxu0 %v15554_v26  ;;  %v15619_v37 = vpack.c.bf16 %v3530_v23, %v3529_v1  ;;  %v15622_v50 = vpack.c.bf16 %v3548_v36, %v3547_v10  ;;  %v15658_v1 = vpack.c.bf16 %v3552_v14, %v3551_v43  ;;  %v3535_v23 = vld [vmem:[%s16765_s20 + $0x60] sm:$0xff]  ;;  %v3536_v10 = vld [vmem:[%s16765_s20 + $0x68] sm:$0xff]  ;;  %v3626_v43 = vld [vmem:[#allocation20 + $0x8] sm:$0xff] }
 0x67b   : > { %v15667_v36 = vpack.c.bf16 %v3536_v10, %v3535_v23  ;;  %v3628_v14 = vld [vmem:[#allocation20 + $0x18] sm:$0xff]  ;;  %v3625_v23 = vld [vmem:[#allocation20] sm:$0xff] }
 0x67c   : > { %3433 = vmatmul.mubr.bf16.vlgmr.msra.gmra.mrb[20].mxu0 %v15540_v25  ;;  %3515 = vmatmul.mubr.bf16.vlgmr.msra.gmra.mrb[20].mxu1 %v15540_v25  ;;  %v12249_v10 = vpack.c.bf16 %v3628_v14, %v3626_v43  ;;  %v3627_v25 = vld [vmem:[#allocation20 + $0x10] sm:$0xff]  ;;  %v2706_v43 = vrot.slane %v2697_v5, %v15216_v49  ;;  %v2702_v14 = vrot.slane %v2697_v5, %v15224_v52  ;;  %v3892_v5 = vld [vmem:[#allocation6 + $0xc8] sm:$0xff] }
 0x67d   : > { %3697 = vmatprep.mubr.f32.mxu1 %v16964_v62  ;;  %12220 = vmatpush3.bf16.msra.mxu0 %v15565_v4  ;;  %v12251_v55 = vpack.c.bf16 %v3627_v25, %v3625_v23 }
 0x67e   : > { %12222 = vmatprep.subr.bf16.mxu0 %v15567_v28  ;;  %12250 = vmatprep.subr.bf16.mxu1 %v12249_v10 }
 0x67f   : > { %12252 = vmatpush1.bf16.msra.mxu1 %v12251_v55 }
 0x680   : > { %12254 = vmatprep.subr.bf16.mxu1 %v15554_v26 }
 0x681   : > { %12224 = vmatpush3.bf16.msra.mxu0 %v15583_v20 }
 0x682   : > { %12226 = vmatprep.subr.bf16.mxu0 %v15586_v33 }
 0x685   : > { %12228 = vmatpush3.bf16.msra.mxu0 %v15601_v59 }
 0x686   : > { %12230 = vmatprep.subr.bf16.mxu0 %v15604_v42 }
 0x689   : > { %12232 = vmatpush3.bf16.msra.mxu0 %v15619_v37 }
 0x68a   : > { %12234 = vmatprep.subr.bf16.mxu0 %v15622_v50 }
 0x68d   : > { %12236 = vmatpush3.bf16.msra.mxu0 %v15637_v7 }
 0x68e   : > { %12238 = vmatprep.subr.bf16.mxu0 %v15640_v61 }
 0x691   : > { %12240 = vmatpush3.bf16.msra.mxu0 %v15655_v8 }
 0x692   : > { %12242 = vmatprep.subr.bf16.mxu0 %v15658_v1 }
 0x695   : > { %12244 = vmatpush3.bf16.msra.mxu0 %v15667_v36 }
 0x696   : > { %12246 = vmatprep.subr.bf16.mxu0 %v12245_v9 }
 0x699   : > { %12248 = vmatpush3.bf16.msra.mxu0 %v12247_v34 }
 0x69a   : > { %12286 = vmatprep.subr.bf16.mxu0 %v12249_v10 }
 0x70f   : > { %v3475_v44 = vpop.f32.mrb[16].mxu1 }
 0x710   : > { %v3477_v46 = vpop.f32.mrb[17].mxu1  ;;  %v3476_v25 = vadd.f32 %v3475_v44, %v2710_v53  ;;  %v3896_v53 = vld [vmem:[#allocation6 + $0xe8] sm:$0xff] }
 0x711   : > { %v3479_v63 = vpop.f32.mrb[18].mxu1  ;;  %v3478_v23 = vadd.f32 %v3477_v46, %v2714_v17 }
 0x712   : > { %v3480_v22 = vpop.f32.mrb[19].mxu1 }
 0x74f   : > { %v3434_v10 = vpop.f32.mrb[20].mxu0  ;;  %v3516_v26 = vpop.f32.mrb[20].mxu1 }
 0x750   : > { %v15691_v54 = vadd.f32 %v3516_v26, %v3476_v25  ;;  %v3436_v63 = vpop.f32.mrb[21].mxu0  ;;  %v3518_v22 = vpop.f32.mrb[21].mxu1  ;;  %v12705_v0 = vadd.f32 %v3434_v10, %v2702_v14  ;;  %v10857_v25 = vcombine.low %v3892_v5, %v3896_v53  ;;  %v3900_v14 = vld [vmem:[#allocation6 + $0x108] sm:$0xff] }
 0x751   : > { %v12706_v11 = vadd.f32 %v3436_v63, %v2706_v43  ;;  %v15693_v51 = vadd.f32 %v3518_v22, %v3478_v23  ;;  %v3438_v2 = vpop.f32.mrb[22].mxu0  ;;  %v3520_v48 = vpop.f32.mrb[22].mxu1  ;;  %v10858_v43 = vcombine.high %v3892_v5, %v3896_v53  ;;  %v3904_v23 = vld [vmem:[#allocation6 + $0x128] sm:$0xff] }
 0x752   : > { %v3439_v45 = vpop.f32.mrb[23].mxu0  ;;  %v3521_v58 = vpop.f32.mrb[23].mxu1  ;;  %v10866_v10 = vcombine.high %v3900_v14, %v3904_v23  ;;  %v10865_v26 = vcombine.low %v3900_v14, %v3904_v23  ;;  %v3908_v63 = vld [vmem:[#allocation6 + $0x148] sm:$0xff] }
 0x753   : > { %3619 = vmatprep.mubr.f32.mxu0 %v12706_v11  ;;  %v3912_v22 = vld [vmem:[#allocation6 + $0x168] sm:$0xff] }
 0x754   : > { %3620 = vmatmul.mubr.f32.vlgmr.msra.gmra.mrb[18].mxu0 %v12705_v0 }
 0x755   : > { %12288 = vmatpush1.bf16.msra.mxu0 %v12251_v55  ;;  %3846 = vmatprep.mubr.f32.mxu0 %v16964_v62 }
 0x827   : > { %v11631_v17 = vpop.f32.mrb[18].mxu0 }
 0x828   : > { %v11632_v44 = vpop.f32.mrb[19].mxu0 }
 0x829   : > { %v11633_v46 = vadd.f32 %v11632_v44, %v11631_v17  ;;  %v10874_v17 = vcombine.high %v3908_v63, %v3912_v22  ;;  %v10873_v44 = vcombine.low %v3908_v63, %v3912_v22 }
 0x82b   : > { %10828 = vmatmul.mubr.msk.f32.vlgmr.msra.gmra.mrb[14].mxu1 %vm3629_vm5, %v11633_v46  ;;  %v3916_v46 = vld [vmem:[#allocation6 + $0x188] sm:$0xff] }
 0x82c   : > { %12256 = vmatpush3.bf16.msra.mxu1 %v15565_v4 }
 0x82d   : > { %12258 = vmatprep.subr.bf16.mxu1 %v15567_v28  ;;  %v15718_v28 = vld [vmem:[#allocation6] sm:$0xff] }
 0x830   : > { %12260 = vmatpush3.bf16.msra.mxu1 %v15583_v20  ;;  %v15720_v20 = vld [vmem:[#allocation6 + $0x20] sm:$0xff] }
 0x831   : > { %12262 = vmatprep.subr.bf16.mxu1 %v15586_v33  ;;  %v3868_v33 = vld [vmem:[#allocation6 + $0x8] sm:$0xff] }
 0x834   : > { %12264 = vmatpush3.bf16.msra.mxu1 %v15601_v59  ;;  %v3872_v59 = vld [vmem:[#allocation6 + $0x28] sm:$0xff] }
 0x835   : > { %12266 = vmatprep.subr.bf16.mxu1 %v15604_v42  ;;  %v10833_v42 = vcombine.low %v3868_v33, %v3872_v59 }
 0x838   : > { %12268 = vmatpush3.bf16.msra.mxu1 %v15619_v37  ;;  %v10834_v37 = vcombine.high %v3868_v33, %v3872_v59  ;;  %v3928_v33 = vld [vmem:[#allocation6 + $0x1e8] sm:$0xff] }
 0x839   : > { %12270 = vmatprep.subr.bf16.mxu1 %v15622_v50  ;;  %v3876_v50 = vld [vmem:[#allocation6 + $0x48] sm:$0xff] }
 0x83c   : > { %12272 = vmatpush3.bf16.msra.mxu1 %v15637_v7  ;;  %v3880_v7 = vld [vmem:[#allocation6 + $0x68] sm:$0xff] }
 0x83d   : > { %12274 = vmatprep.subr.bf16.mxu1 %v15640_v61  ;;  %v10842_v61 = vcombine.high %v3876_v50, %v3880_v7 }
 0x840   : > { %12276 = vmatpush3.bf16.msra.mxu1 %v15655_v8  ;;  %v10841_v8 = vcombine.low %v3876_v50, %v3880_v7 }
 0x841   : > { %12278 = vmatprep.subr.bf16.mxu1 %v15658_v1  ;;  %v3884_v1 = vld [vmem:[#allocation6 + $0x88] sm:$0xff] }
 0x844   : > { %12280 = vmatpush3.bf16.msra.mxu1 %v15667_v36  ;;  %v3888_v36 = vld [vmem:[#allocation6 + $0xa8] sm:$0xff] }
 0x845   : > { %12282 = vmatprep.subr.bf16.mxu1 %v12245_v9  ;;  %v10850_v9 = vcombine.high %v3884_v1, %v3888_v36 }
 0x848   : > { %12284 = vmatpush3.bf16.msra.mxu1 %v12247_v34  ;;  %v10849_v34 = vcombine.low %v3884_v1, %v3888_v36 }
 0x849   : > { %4718 = vmatprep.subr.bf16.mxu1 %v10834_v37  ;;  %v3936_v37 = vld [vmem:[#allocation6 + $0x228] sm:$0xff] }
 0x8fe   : > { %v3699_v45 = vpop.f32.mrb[14].mxu1 }
 0x8ff   : > { %v15710_v48 = vsub.f32 %v12705_v0, %v3699_v45  ;;  %v3701_v55 = vpop.f32.mrb[15].mxu1  ;;  %v10831_v0 = vcombine.low %v15718_v28, %v15720_v20  ;;  %v3920_v45 = vld [vmem:[#allocation6 + $0x1a8] sm:$0xff] }
 0x900   : > { %v15712_v58 = vsub.f32 %v12706_v11, %v3701_v55  ;;  %v10832_v11 = vcombine.high %v15718_v28, %v15720_v20  ;;  %v10882_v55 = vcombine.high %v3916_v46, %v3920_v45 }
 0x901   : > { %v3706_v4 = vmul.f32 %v15710_v48, %v15710_v48 }
 0x902   : > { %v3707_v2 = vmul.f32 %v15712_v58, %v15712_v58  ;;  %4677 = vmatprep.subr.bf16.mxu0 %v10832_v11 }
 0x904   : > { %3772 = vmatprep.mubr.f32.mxu1 %v3707_v2  ;;  %v10881_v2 = vcombine.low %v3916_v46, %v3920_v45 }
 0x905   : > { %3773 = vmatmul.mubr.f32.vlgmr.msra.gmra.mrb[24].mxu1 %v3706_v4  ;;  %v3924_v4 = vld [vmem:[#allocation6 + $0x1c8] sm:$0xff] }
 0x906   : > { %4719 = vmatpush1.bf16.msra.mxu1 %v10833_v42  ;;  %v10890_v11 = vcombine.high %v3924_v4, %v3928_v33  ;;  %v10889_v59 = vcombine.low %v3924_v4, %v3928_v33  ;;  %v3932_v42 = vld [vmem:[#allocation6 + $0x208] sm:$0xff] }
 0x907   : > { %4720 = vmatprep.subr.bf16.mxu1 %v10842_v61  ;;  %v10898_v50 = vcombine.high %v3932_v42, %v3936_v37  ;;  %v10897_v7 = vcombine.low %v3932_v42, %v3936_v37  ;;  %v3940_v61 = vld [vmem:[#allocation6 + $0x248] sm:$0xff] }
 0x90a   : > { %4721 = vmatpush1.bf16.msra.mxu1 %v10841_v8  ;;  %v3944_v8 = vld [vmem:[#allocation6 + $0x268] sm:$0xff] }
 0x90b   : > { %4722 = vmatprep.subr.bf16.mxu1 %v10850_v9  ;;  %v10906_v1 = vcombine.high %v3940_v61, %v3944_v8  ;;  %v10905_v36 = vcombine.low %v3940_v61, %v3944_v8  ;;  %v3948_v9 = vld [vmem:[#allocation6 + $0x288] sm:$0xff] }
 0x90e   : > { %4723 = vmatpush1.bf16.msra.mxu1 %v10849_v34  ;;  %v3952_v34 = vld [vmem:[#allocation6 + $0x2a8] sm:$0xff] }
 0x90f   : > { %4724 = vmatprep.subr.bf16.mxu1 %v10858_v43  ;;  %v10914_v5 = vcombine.high %v3948_v9, %v3952_v34  ;;  %v10913_v53 = vcombine.low %v3948_v9, %v3952_v34  ;;  %v3956_v43 = vld [vmem:[#allocation6 + $0x2c8] sm:$0xff] }
 0x912   : > { %4725 = vmatpush1.bf16.msra.mxu1 %v10857_v25  ;;  %v3960_v25 = vld [vmem:[#allocation6 + $0x2e8] sm:$0xff] }
 0x913   : > { %4726 = vmatprep.subr.bf16.mxu1 %v10866_v10  ;;  %v10922_v14 = vcombine.high %v3956_v43, %v3960_v25  ;;  %v10921_v23 = vcombine.low %v3956_v43, %v3960_v25  ;;  %v3964_v10 = vld [vmem:[#allocation6 + $0x308] sm:$0xff] }
 0x916   : > { %4727 = vmatpush1.bf16.msra.mxu1 %v10865_v26  ;;  %v3968_v26 = vld [vmem:[#allocation6 + $0x328] sm:$0xff] }
 0x917   : > { %4728 = vmatprep.subr.bf16.mxu1 %v10874_v17  ;;  %v10930_v63 = vcombine.high %v3964_v10, %v3968_v26  ;;  %v10929_v22 = vcombine.low %v3964_v10, %v3968_v26  ;;  %v3972_v17 = vld [vmem:[#allocation6 + $0x348] sm:$0xff]  ;;  %v3919_v10 = vld [vmem:[#allocation6 + $0x1a0] sm:$0xff] }
 0x91a   : > { %4729 = vmatpush1.bf16.msra.mxu1 %v10873_v44  ;;  %v3976_v44 = vld [vmem:[#allocation6 + $0x368] sm:$0xff] }
 0x91b   : > { %4730 = vmatprep.subr.bf16.mxu1 %v10882_v55  ;;  %v10938_v46 = vcombine.high %v3972_v17, %v3976_v44  ;;  %v10937_v45 = vcombine.low %v3972_v17, %v3976_v44  ;;  %v3927_v17 = vld [vmem:[#allocation6 + $0x1e0] sm:$0xff] }
 0x91e   : > { %4731 = vmatpush1.bf16.msra.mxu1 %v10881_v2 }
 0x91f   : > { %4732 = vmatprep.subr.bf16.mxu1 %v10890_v11  ;;  %v3875_v11 = vld [vmem:[#allocation6 + $0x40] sm:$0xff] }
 0x922   : > { %4733 = vmatpush1.bf16.msra.mxu1 %v10889_v59  ;;  %v3879_v59 = vld [vmem:[#allocation6 + $0x60] sm:$0xff] }
 0x923   : > { %4734 = vmatprep.subr.bf16.mxu1 %v10898_v50  ;;  %v10840_v42 = vcombine.high %v3875_v11, %v3879_v59  ;;  %v3883_v50 = vld [vmem:[#allocation6 + $0x80] sm:$0xff]  ;;  %v10839_v61 = vcombine.low %v3875_v11, %v3879_v59 }
 0x924   : > { %v3943_v11 = vld [vmem:[#allocation6 + $0x260] sm:$0xff] }
 0x926   : > { %4735 = vmatpush1.bf16.msra.mxu1 %v10897_v7  ;;  %v3887_v7 = vld [vmem:[#allocation6 + $0xa0] sm:$0xff] }
 0x927   : > { %4736 = vmatprep.subr.bf16.mxu1 %v10906_v1  ;;  %v10848_v8 = vcombine.high %v3883_v50, %v3887_v7  ;;  %v3891_v1 = vld [vmem:[#allocation6 + $0xc0] sm:$0xff]  ;;  %v10847_v9 = vcombine.low %v3883_v50, %v3887_v7 }
 0x928   : > { %v3951_v50 = vld [vmem:[#allocation6 + $0x2a0] sm:$0xff] }
 0x92a   : > { %4737 = vmatpush1.bf16.msra.mxu1 %v10905_v36  ;;  %v3895_v36 = vld [vmem:[#allocation6 + $0xe0] sm:$0xff] }
 0x92b   : > { %4738 = vmatprep.subr.bf16.mxu1 %v10914_v5  ;;  %v10856_v34 = vcombine.high %v3891_v1, %v3895_v36  ;;  %v3899_v5 = vld [vmem:[#allocation6 + $0x100] sm:$0xff]  ;;  %v10855_v43 = vcombine.low %v3891_v1, %v3895_v36 }
 0x92c   : > { %v3959_v1 = vld [vmem:[#allocation6 + $0x2e0] sm:$0xff] }
 0x92e   : > { %4739 = vmatpush1.bf16.msra.mxu1 %v10913_v53  ;;  %v3903_v53 = vld [vmem:[#allocation6 + $0x120] sm:$0xff] }
 0x92f   : > { %4740 = vmatprep.subr.bf16.mxu1 %v10922_v14  ;;  %v10864_v25 = vcombine.high %v3899_v5, %v3903_v53  ;;  %v3907_v14 = vld [vmem:[#allocation6 + $0x140] sm:$0xff]  ;;  %v10863_v28 = vcombine.low %v3899_v5, %v3903_v53 }
 0x930   : > { %v3967_v5 = vld [vmem:[#allocation6 + $0x320] sm:$0xff] }
 0x932   : > { %4741 = vmatpush1.bf16.msra.mxu1 %v10921_v23  ;;  %v3911_v23 = vld [vmem:[#allocation6 + $0x160] sm:$0xff] }
 0x933   : > { %4742 = vmatprep.subr.bf16.mxu1 %v10930_v63  ;;  %v10872_v20 = vcombine.high %v3907_v14, %v3911_v23  ;;  %v10871_v26 = vcombine.low %v3907_v14, %v3911_v23  ;;  %v3975_v14 = vld [vmem:[#allocation6 + $0x360] sm:$0xff] }
 0x936   : > { %4743 = vmatpush1.bf16.msra.mxu1 %v10929_v22  ;;  %v3923_v22 = vld [vmem:[#allocation6 + $0x1c0] sm:$0xff] }
 0x937   : > { %4744 = vmatprep.subr.bf16.mxu1 %v10938_v46  ;;  %v10888_v46 = vcombine.high %v3923_v22, %v3927_v17 }
 0x93a   : > { %4745 = vmatpush1.bf16.msra.mxu1 %v10937_v45  ;;  %v3931_v45 = vld [vmem:[#allocation6 + $0x200] sm:$0xff] }
 0x9d8   : > { %v11666_v55 = vpop.f32.mrb[24].mxu1 }
 0x9d9   : > { %v11667_v2 = vpop.f32.mrb[25].mxu1 }
 0x9da   : > { %v11668_v4 = vadd.f32 %v11667_v2, %v11666_v55  ;;  %v3935_v55 = vld [vmem:[#allocation6 + $0x220] sm:$0xff]  ;;  %v10887_v2 = vcombine.low %v3923_v22, %v3927_v17  ;;  %v3984_v22 = vld [vmem:[#allocation6 + $0x3a8] sm:$0xff] }
 0x9db   : > { %v10895_v59 = vcombine.low %v3931_v45, %v3935_v55 }
 0x9dc   : > { %v3775_v33 = vadd.f32 1e-05, %v11668_v4  ;;  %v10896_v4 = vcombine.high %v3931_v45, %v3935_v55  ;;  %v3987_v45 = vld [vmem:[#allocation6 + $0x3c0] sm:$0xff] }
 0x9dd   : > { %v3991_v55 = vld [vmem:[#allocation6 + $0x3e0] sm:$0xff] }
 0x9de   : > { %13783 = vrsqrt.f32 %v3775_v33  ;;  %v3939_v33 = vld [vmem:[#allocation6 + $0x240] sm:$0xff] }
 0x9df   : > { %v10903_v7 = vcombine.low %v3939_v33, %v3943_v11 }
 0x9e8   : > { %v13784_v37 = vpop.eup %13783 }
 0x9e9   : > { %10829 = vmatmul.mubr.msk.f32.vlgmr.msra.gmra.mrb[24].mxu0 %vm3629_vm5, %v13784_v37  ;;  %v3947_v37 = vld [vmem:[#allocation6 + $0x280] sm:$0xff] }
 0x9ea   : > { %4678 = vmatpush1.bf16.msra.mxu0 %v10831_v0  ;;  %v3915_v0 = vld [vmem:[#allocation6 + $0x180] sm:$0xff]  ;;  %v10911_v36 = vcombine.low %v3947_v37, %v3951_v50 }
 0x9eb   : > { %4679 = vmatprep.subr.bf16.mxu0 %v10840_v42  ;;  %v10880_v63 = vcombine.high %v3915_v0, %v3919_v10  ;;  %v10879_v44 = vcombine.low %v3915_v0, %v3919_v10  ;;  %v10904_v42 = vcombine.high %v3939_v33, %v3943_v11  ;;  %v3979_v0 = vld [vmem:[#allocation6 + $0x380] sm:$0xff]  ;;  %v3992_v33 = vld [vmem:[#allocation6 + $0x3e8] sm:$0xff]  ;;  %v10951_v11 = vcombine.low %v3987_v45, %v3991_v55 }
 0x9ec   : > { %v3983_v10 = vld [vmem:[#allocation6 + $0x3a0] sm:$0xff] }
 0x9ed   : > { %v10943_v17 = vcombine.low %v3979_v0, %v3983_v10 }
 0x9ee   : > { %4680 = vmatpush1.bf16.msra.mxu0 %v10839_v61  ;;  %v10912_v61 = vcombine.high %v3947_v37, %v3951_v50  ;;  %v3869_v37 = vld [vmem:[#allocation6 + $0x10] sm:$0xff] }
 0x9ef   : > { %4681 = vmatprep.subr.bf16.mxu0 %v10848_v8  ;;  %v3955_v8 = vld [vmem:[#allocation6 + $0x2c0] sm:$0xff]  ;;  %v3873_v50 = vld [vmem:[#allocation6 + $0x30] sm:$0xff] }
 0x9f0   : > { %v10919_v53 = vcombine.low %v3955_v8, %v3959_v1 }
 0x9f2   : > { %4682 = vmatpush1.bf16.msra.mxu0 %v10847_v9  ;;  %v10920_v9 = vcombine.high %v3955_v8, %v3959_v1  ;;  %v3874_v8 = vld [vmem:[#allocation6 + $0x38] sm:$0xff]  ;;  %v10835_v1 = vcombine.low %v3869_v37, %v3873_v50 }
 0x9f3   : > { %4683 = vmatprep.subr.bf16.mxu0 %v10856_v34  ;;  %v3963_v34 = vld [vmem:[#allocation6 + $0x300] sm:$0xff] }
 0x9f4   : > { %v10927_v23 = vcombine.low %v3963_v34, %v3967_v5 }
 0x9f6   : > { %4684 = vmatpush1.bf16.msra.mxu0 %v10855_v43  ;;  %v10928_v43 = vcombine.high %v3963_v34, %v3967_v5  ;;  %v3858_v5 = vstv %s10830_s22  ;;  %s17006_s22 = sld [smem:[#allocation82_spill]] }
 0x9f7   : > { %4685 = vmatprep.subr.bf16.mxu0 %v10864_v25  ;;  %v3971_v25 = vld [vmem:[#allocation6 + $0x340] sm:$0xff] }
 0x9fa   : > { %4686 = vmatpush1.bf16.msra.mxu0 %v10863_v28  ;;  %v10936_v28 = vcombine.high %v3971_v25, %v3975_v14 }
 0x9fb   : > { %4687 = vmatprep.subr.bf16.mxu0 %v10872_v20  ;;  %v10935_v20 = vcombine.low %v3971_v25, %v3975_v14 }
 0x9fe   : > { %4688 = vmatpush1.bf16.msra.mxu0 %v10871_v26  ;;  %v3980_v26 = vld [vmem:[#allocation6 + $0x388] sm:$0xff] }
 0x9ff   : > { %4689 = vmatprep.subr.bf16.mxu0 %v10880_v63  ;;  %v10944_v63 = vcombine.high %v3979_v0, %v3983_v10 }
 0xa02   : > { %4690 = vmatpush1.bf16.msra.mxu0 %v10879_v44  ;;  %v10945_v44 = vcombine.low %v3980_v26, %v3984_v22 }
 0xa03   : > { %4691 = vmatprep.subr.bf16.mxu0 %v10888_v46  ;;  %v10946_v46 = vcombine.high %v3980_v26, %v3984_v22  ;;  %v3877_v26 = vld [vmem:[#allocation6 + $0x50] sm:$0xff]  ;;  %v3878_v22 = vld [vmem:[#allocation6 + $0x58] sm:$0xff] }
 0xa05   : > { %4746 = vmatprep.subr.bf16.mxu1 %v10946_v46  ;;  %v3885_v46 = vld [vmem:[#allocation6 + $0x90] sm:$0xff] }
 0xa06   : > { %4692 = vmatpush1.bf16.msra.mxu0 %v10887_v2  ;;  %v3988_v2 = vld [vmem:[#allocation6 + $0x3c8] sm:$0xff]  ;;  %4747 = vmatpush1.bf16.msra.mxu1 %v10945_v44 }
 0xa07   : > { %4693 = vmatprep.subr.bf16.mxu0 %v10896_v4  ;;  %v10952_v4 = vcombine.high %v3987_v45, %v3991_v55  ;;  %v3889_v55 = vld [vmem:[#allocation6 + $0xb0] sm:$0xff] }
 0xa0a   : > { %4694 = vmatpush1.bf16.msra.mxu0 %v10895_v59  ;;  %v10953_v59 = vcombine.low %v3988_v2, %v3992_v33 }
 0xa0b   : > { %4695 = vmatprep.subr.bf16.mxu0 %v10904_v42  ;;  %v10954_v42 = vcombine.high %v3988_v2, %v3992_v33  ;;  %v3890_v2 = vld [vmem:[#allocation6 + $0xb8] sm:$0xff]  ;;  %v10852_v33 = vcombine.high %v3885_v46, %v3889_v55 }
 0xa0d   : > { %4748 = vmatprep.subr.bf16.mxu1 %v10954_v42  ;;  %v3897_v42 = vld [vmem:[#allocation6 + $0xf0] sm:$0xff] }
 0xa0e   : > { %4696 = vmatpush1.bf16.msra.mxu0 %v10903_v7  ;;  %v3870_v7 = vld [vmem:[#allocation6 + $0x18] sm:$0xff]  ;;  %4749 = vmatpush1.bf16.msra.mxu1 %v10953_v59  ;;  %v3893_v59 = vld [vmem:[#allocation6 + $0xd0] sm:$0xff] }
 0xa0f   : > { %4697 = vmatprep.subr.bf16.mxu0 %v10912_v61  ;;  %v10836_v61 = vcombine.high %v3869_v37, %v3873_v50  ;;  %v3894_v37 = vld [vmem:[#allocation6 + $0xd8] sm:$0xff] }
 0xa10   : > { %v3898_v50 = vld [vmem:[#allocation6 + $0xf8] sm:$0xff] }
 0xa12   : > { %4698 = vmatpush1.bf16.msra.mxu0 %v10911_v36  ;;  %v10837_v36 = vcombine.low %v3870_v7, %v3874_v8 }
 0xa13   : > { %4699 = vmatprep.subr.bf16.mxu0 %v10920_v9  ;;  %v10838_v9 = vcombine.high %v3870_v7, %v3874_v8  ;;  %v10851_v7 = vcombine.low %v3885_v46, %v3889_v55  ;;  %v10860_v8 = vcombine.high %v3893_v59, %v3897_v42  ;;  %v3921_v46 = vld [vmem:[#allocation6 + $0x1b0] sm:$0xff] }
 0xa15   : > { %4800 = vmatprep.subr.bf16.mxu1 %v10838_v9  ;;  %v3905_v9 = vld [vmem:[#allocation6 + $0x130] sm:$0xff] }
 0xa16   : > { %4700 = vmatpush1.bf16.msra.mxu0 %v10919_v53 }
 0xa17   : > { %4701 = vmatprep.subr.bf16.mxu0 %v10928_v43 }
 0xa1a   : > { %4702 = vmatpush1.bf16.msra.mxu0 %v10927_v23 }
 0xa1b   : > { %4703 = vmatprep.subr.bf16.mxu0 %v10936_v28 }
 0xa1e   : > { %4704 = vmatpush1.bf16.msra.mxu0 %v10935_v20 }
 0xa1f   : > { %4705 = vmatprep.subr.bf16.mxu0 %v10944_v63  ;;  %v3881_v63 = vld [vmem:[#allocation6 + $0x70] sm:$0xff] }
 0xa22   : > { %4706 = vmatpush1.bf16.msra.mxu0 %v10943_v17  ;;  %v3882_v17 = vld [vmem:[#allocation6 + $0x78] sm:$0xff] }
 0xa23   : > { %4707 = vmatprep.subr.bf16.mxu0 %v10952_v4  ;;  %v10846_v45 = vcombine.high %v3878_v22, %v3882_v17  ;;  %v10845_v4 = vcombine.low %v3878_v22, %v3882_v17  ;;  %v3917_v17 = vld [vmem:[#allocation6 + $0x190] sm:$0xff] }
 0xa26   : > { %4708 = vmatpush1.bf16.msra.mxu0 %v10951_v11 }
 0xa27   : > { %4759 = vmatprep.subr.bf16.mxu0 %v10836_v61 }
 0xabc   : > { %v3848_v34 = vpop.f32.mrb[24].mxu0 }
 0xabd   : > { %v3853_v53 = vmul.f32 %v3848_v34, %v15710_v48  ;;  %v3850_v43 = vpop.f32.mrb[25].mxu0  ;;  %v3902_v34 = vld [vmem:[#allocation6 + $0x118] sm:$0xff] }
 0xabe   : > { %v3854_v25 = vmul.f32 %v3850_v43, %v15712_v58  ;;  %v10844_v58 = vcombine.high %v3877_v26, %v3881_v63  ;;  %v10861_v43 = vcombine.low %v3894_v37, %v3898_v50 }
 0xabf   : > { %vm3856_vm6 = vcmp.ge.f32.partialorder %v3853_v53, 0.0  ;;  %v3859_v14 = vmul.f32 %v3858_v5, %v3853_v53 }
 0xac0   : > { %vm3857_vm7 = vcmp.ge.f32.partialorder %v3854_v25, 0.0  ;;  %v3860_v23 = vmul.f32 %v3858_v5, %v3854_v25  ;;  %v3906_v5 = vld [vmem:[#allocation6 + $0x138] sm:$0xff] }
 0xac1   : > { %v3861_v28 = vsel %vm3856_vm6, %v3853_v53, %v3859_v14  ;;  %v10859_v53 = vcombine.low %v3893_v59, %v3897_v42  ;;  %v10870_v14 = vcombine.high %v3902_v34, %v3906_v5  ;;  %v3930_v59 = vld [vmem:[#allocation6 + $0x1f8] sm:$0xff]  ;;  %v10883_v42 = vcombine.low %v3917_v17, %v3921_v46 }
 0xac2   : > { %v3863_v20 = vadd.f32 %v3861_v28, %v15691_v54  ;;  %v3862_v0 = vsel %vm3857_vm7, %v3854_v25, %v3860_v23  ;;  %v3886_v54 = vld [vmem:[#allocation6 + $0x98] sm:$0xff]  ;;  %v3909_v23 = vld [vmem:[#allocation6 + $0x150] sm:$0xff] }
 0xac3   : > { %v3864_v10 = vadd.f32 %v3862_v0, %v15693_v51  ;;  %v10843_v51 = vcombine.low %v3877_v26, %v3881_v63  ;;  %v10854_v11 = vcombine.high %v3886_v54, %v3890_v2  ;;  %v10853_v61 = vcombine.low %v3886_v54, %v3890_v2  ;;  %v3913_v28 = vld [vmem:[#allocation6 + $0x170] sm:$0xff]  ;;  %v3914_v0 = vld [vmem:[#allocation6 + $0x178] sm:$0xff] }
 0xac4   : > { %v15736_v48 = vpack.c.bf16 %v3863_v20, %v3863_v20  ;;  %v3910_v20 = vld [vmem:[#allocation6 + $0x158] sm:$0xff]  ;;  %v10869_v26 = vcombine.low %v3902_v34, %v3906_v5  ;;  %v10876_v63 = vcombine.high %v3909_v23, %v3913_v28  ;;  %v10875_v55 = vcombine.low %v3909_v23, %v3913_v28 }
 0xac5   : > { %v15734_v44 = vpack.c.bf16 %v3864_v10, %v3864_v10  ;;  %v10878_v22 = vcombine.high %v3910_v20, %v3914_v0  ;;  %v10877_v54 = vcombine.low %v3910_v20, %v3914_v0  ;;  %v10884_v2 = vcombine.high %v3917_v17, %v3921_v46  ;;  %v3946_v23 = vld [vmem:[#allocation6 + $0x278] sm:$0xff] }
 0xac6   : > { %16966 = vst [vmem:[#allocation71_spill] sm:$0xff] %v15736_v48  ;;  %v3954_v17 = vld [vmem:[#allocation6 + $0x2b8] sm:$0xff] }
 0xac7   : > { %4709 = vmatprep.mubr.bf16.mxu0 %v15734_v44  ;;  %4750 = vmatprep.mubr.bf16.mxu1 %v15734_v44 }
 0xac8   : > { %4710 = vmatmul.mubr.bf16.vlgmr.msra.gmra.mrb[28].mxu0 %v15736_v48  ;;  %4751 = vmatmul.mubr.bf16.vlgmr.msra.gmra.mrb[28].mxu1 %v15736_v48 }
 0xac9   : > { %4760 = vmatpush1.bf16.msra.mxu0 %v10835_v1  ;;  %4801 = vmatpush1.bf16.msra.mxu1 %v10837_v36  ;;  %v10862_v1 = vcombine.high %v3894_v37, %v3898_v50  ;;  %v3901_v36 = vld [vmem:[#allocation6 + $0x110] sm:$0xff] }
 0xaca   : > { %4791 = vmatprep.mubr.bf16.mxu0 %v15734_v44  ;;  %4832 = vmatprep.mubr.bf16.mxu1 %v15734_v44  ;;  %v10868_v25 = vcombine.high %v3901_v36, %v3905_v9  ;;  %v10867_v10 = vcombine.low %v3901_v36, %v3905_v9  ;;  %v3938_v36 = vld [vmem:[#allocation6 + $0x238] sm:$0xff] }
 0xacb   : > { %4761 = vmatprep.subr.bf16.mxu0 %v10844_v58  ;;  %4802 = vmatprep.subr.bf16.mxu1 %v10846_v45  ;;  %v3918_v58 = vld [vmem:[#allocation6 + $0x198] sm:$0xff] }
 0xacc   : > { %v3922_v45 = vld [vmem:[#allocation6 + $0x1b8] sm:$0xff] }
 0xacd   : > { %4762 = vmatpush1.bf16.msra.mxu0 %v10843_v51  ;;  %4803 = vmatpush1.bf16.msra.mxu1 %v10845_v4  ;;  %v10886_v51 = vcombine.high %v3918_v58, %v3922_v45  ;;  %v3925_v4 = vld [vmem:[#allocation6 + $0x1d0] sm:$0xff]  ;;  %v10885_v37 = vcombine.low %v3918_v58, %v3922_v45 }
 0xace   : > { %4763 = vmatprep.subr.bf16.mxu0 %v10852_v33  ;;  %4804 = vmatprep.subr.bf16.mxu1 %v10854_v11  ;;  %v3929_v33 = vld [vmem:[#allocation6 + $0x1f0] sm:$0xff]  ;;  %v3926_v11 = vld [vmem:[#allocation6 + $0x1d8] sm:$0xff] }
 0xacf   : > { %v10892_v50 = vcombine.high %v3925_v4, %v3929_v33  ;;  %v10891_v9 = vcombine.low %v3925_v4, %v3929_v33  ;;  %v10893_v34 = vcombine.low %v3926_v11, %v3930_v59  ;;  %v3962_v4 = vld [vmem:[#allocation6 + $0x2f8] sm:$0xff] }
 0xad1   : > { %4764 = vmatpush1.bf16.msra.mxu0 %v10851_v7  ;;  %4805 = vmatpush1.bf16.msra.mxu1 %v10853_v61  ;;  %v10894_v7 = vcombine.high %v3926_v11, %v3930_v59  ;;  %v3933_v61 = vld [vmem:[#allocation6 + $0x210] sm:$0xff] }
 0xad2   : > { %4765 = vmatprep.subr.bf16.mxu0 %v10860_v8  ;;  %4806 = vmatprep.subr.bf16.mxu1 %v10862_v1  ;;  %v3937_v8 = vld [vmem:[#allocation6 + $0x230] sm:$0xff]  ;;  %v3934_v1 = vld [vmem:[#allocation6 + $0x218] sm:$0xff] }
 0xad3   : > { %v10900_v5 = vcombine.high %v3933_v61, %v3937_v8  ;;  %v10899_v28 = vcombine.low %v3933_v61, %v3937_v8  ;;  %v10901_v20 = vcombine.low %v3934_v1, %v3938_v36  ;;  %v3970_v61 = vld [vmem:[#allocation6 + $0x338] sm:$0xff] }
 0xad5   : > { %4766 = vmatpush1.bf16.msra.mxu0 %v10859_v53  ;;  %4807 = vmatpush1.bf16.msra.mxu1 %v10861_v43  ;;  %v10902_v53 = vcombine.high %v3934_v1, %v3938_v36  ;;  %v3941_v43 = vld [vmem:[#allocation6 + $0x250] sm:$0xff] }
 0xad6   : > { %4767 = vmatprep.subr.bf16.mxu0 %v10868_v25  ;;  %4808 = vmatprep.subr.bf16.mxu1 %v10870_v14  ;;  %v3945_v25 = vld [vmem:[#allocation6 + $0x270] sm:$0xff]  ;;  %v3942_v14 = vld [vmem:[#allocation6 + $0x258] sm:$0xff] }
 0xad7   : > { %v10908_v0 = vcombine.high %v3941_v43, %v3945_v25  ;;  %v10907_v46 = vcombine.low %v3941_v43, %v3945_v25  ;;  %v10909_v58 = vcombine.low %v3942_v14, %v3946_v23  ;;  %v3978_v43 = vld [vmem:[#allocation6 + $0x378] sm:$0xff] }
 0xad9   : > { %4768 = vmatpush1.bf16.msra.mxu0 %v10867_v10  ;;  %4809 = vmatpush1.bf16.msra.mxu1 %v10869_v26  ;;  %v10910_v10 = vcombine.high %v3942_v14, %v3946_v23  ;;  %v3949_v26 = vld [vmem:[#allocation6 + $0x290] sm:$0xff] }
 0xada   : > { %4769 = vmatprep.subr.bf16.mxu0 %v10876_v63  ;;  %4810 = vmatprep.subr.bf16.mxu1 %v10878_v22  ;;  %v3953_v63 = vld [vmem:[#allocation6 + $0x2b0] sm:$0xff]  ;;  %v3950_v22 = vld [vmem:[#allocation6 + $0x298] sm:$0xff] }
 0xadb   : > { %v10916_v45 = vcombine.high %v3949_v26, %v3953_v63  ;;  %v10915_v33 = vcombine.low %v3949_v26, %v3953_v63  ;;  %v10917_v11 = vcombine.low %v3950_v22, %v3954_v17  ;;  %v3986_v26 = vld [vmem:[#allocation6 + $0x3b8] sm:$0xff] }
 0xadd   : > { %4770 = vmatpush1.bf16.msra.mxu0 %v10875_v55  ;;  %4811 = vmatpush1.bf16.msra.mxu1 %v10877_v54  ;;  %v10918_v55 = vcombine.high %v3950_v22, %v3954_v17  ;;  %v3957_v54 = vld [vmem:[#allocation6 + $0x2d0] sm:$0xff] }
 0xade   : > { %4771 = vmatprep.subr.bf16.mxu0 %v10884_v2  ;;  %4812 = vmatprep.subr.bf16.mxu1 %v10886_v51  ;;  %v3961_v2 = vld [vmem:[#allocation6 + $0x2f0] sm:$0xff]  ;;  %v3958_v51 = vld [vmem:[#allocation6 + $0x2d8] sm:$0xff] }
 0xadf   : > { %v10924_v59 = vcombine.high %v3957_v54, %v3961_v2  ;;  %v10923_v8 = vcombine.low %v3957_v54, %v3961_v2  ;;  %v10925_v1 = vcombine.low %v3958_v51, %v3962_v4  ;;  %v3994_v54 = vld [vmem:[#allocation6 + $0x3f8] sm:$0xff] }
 0xae1   : > { %4772 = vmatpush1.bf16.msra.mxu0 %v10883_v42  ;;  %4813 = vmatpush1.bf16.msra.mxu1 %v10885_v37  ;;  %v10926_v42 = vcombine.high %v3958_v51, %v3962_v4  ;;  %v3965_v37 = vld [vmem:[#allocation6 + $0x310] sm:$0xff] }
 0xae2   : > { %4773 = vmatprep.subr.bf16.mxu0 %v10892_v50  ;;  %4814 = vmatprep.subr.bf16.mxu1 %v10894_v7  ;;  %v3969_v50 = vld [vmem:[#allocation6 + $0x330] sm:$0xff]  ;;  %v3966_v7 = vld [vmem:[#allocation6 + $0x318] sm:$0xff] }
 0xae3   : > { %v10932_v36 = vcombine.high %v3965_v37, %v3969_v50  ;;  %v10931_v25 = vcombine.low %v3965_v37, %v3969_v50  ;;  %v10933_v14 = vcombine.low %v3966_v7, %v3970_v61  ;;  %v4890_v37 = vld [vmem:[%s16967_s3 + $0x188] sm:$0xff] }
 0xae5   : > { %4774 = vmatpush1.bf16.msra.mxu0 %v10891_v9  ;;  %4815 = vmatpush1.bf16.msra.mxu1 %v10893_v34  ;;  %v10934_v9 = vcombine.high %v3966_v7, %v3970_v61  ;;  %v3973_v34 = vld [vmem:[#allocation6 + $0x350] sm:$0xff]  ;;  %v4841_v61 = vld [vmem:[%s16967_s3] sm:$0xff] }
 0xae6   : > { %4775 = vmatprep.subr.bf16.mxu0 %v10900_v5  ;;  %4816 = vmatprep.subr.bf16.mxu1 %v10902_v53  ;;  %v3977_v5 = vld [vmem:[#allocation6 + $0x370] sm:$0xff]  ;;  %v3974_v53 = vld [vmem:[#allocation6 + $0x358] sm:$0xff] }
 0xae7   : > { %v10940_v23 = vcombine.high %v3973_v34, %v3977_v5  ;;  %v10939_v63 = vcombine.low %v3973_v34, %v3977_v5  ;;  %v10941_v22 = vcombine.low %v3974_v53, %v3978_v43  ;;  %v4874_v34 = vld [vmem:[%s16967_s3 + $0x108] sm:$0xff]  ;;  %v4859_v5 = vld [vmem:[%s16967_s3 + $0x90] sm:$0xff] }
 0xae9   : > { %4776 = vmatpush1.bf16.msra.mxu0 %v10899_v28  ;;  %4817 = vmatpush1.bf16.msra.mxu1 %v10901_v20  ;;  %v10942_v28 = vcombine.high %v3974_v53, %v3978_v43  ;;  %v3981_v20 = vld [vmem:[#allocation6 + $0x390] sm:$0xff]  ;;  %v4860_v53 = vld [vmem:[%s16967_s3 + $0x98] sm:$0xff] }
 0xaea   : > { %4777 = vmatprep.subr.bf16.mxu0 %v10908_v0  ;;  %4818 = vmatprep.subr.bf16.mxu1 %v10910_v10  ;;  %v3985_v0 = vld [vmem:[#allocation6 + $0x3b0] sm:$0xff]  ;;  %v3982_v10 = vld [vmem:[#allocation6 + $0x398] sm:$0xff] }
 0xaeb   : > { %v10948_v17 = vcombine.high %v3981_v20, %v3985_v0  ;;  %v10947_v2 = vcombine.low %v3981_v20, %v3985_v0  ;;  %v10949_v51 = vcombine.low %v3982_v10, %v3986_v26  ;;  %v4891_v43 = vld [vmem:[%s16967_s3 + $0x190] sm:$0xff]  ;;  %v4844_v20 = vld [vmem:[%s16967_s3 + $0x18] sm:$0xff]  ;;  %v15796_v0 = vpack.c.bf16 %v4860_v53, %v4859_v5 }
 0xaec   : > { %v4879_v53 = vld [vmem:[%s16967_s3 + $0x130] sm:$0xff] }
 0xaed   : > { %4778 = vmatpush1.bf16.msra.mxu0 %v10907_v46  ;;  %4819 = vmatpush1.bf16.msra.mxu1 %v10909_v58  ;;  %v10950_v46 = vcombine.high %v3982_v10, %v3986_v26  ;;  %v3989_v58 = vld [vmem:[#allocation6 + $0x3d0] sm:$0xff] }
 0xaee   : > { %4779 = vmatprep.subr.bf16.mxu0 %v10916_v45  ;;  %4820 = vmatprep.subr.bf16.mxu1 %v10918_v55  ;;  %v3993_v45 = vld [vmem:[#allocation6 + $0x3f0] sm:$0xff]  ;;  %v3990_v55 = vld [vmem:[#allocation6 + $0x3d8] sm:$0xff] }
 0xaef   : > { %v10956_v4 = vcombine.high %v3989_v58, %v3993_v45  ;;  %v10955_v50 = vcombine.low %v3989_v58, %v3993_v45  ;;  %v10957_v7 = vcombine.low %v3990_v55, %v3994_v54  ;;  %v4875_v26 = vld [vmem:[%s16967_s3 + $0x110] sm:$0xff]  ;;  %v4894_v58 = vld [vmem:[%s16967_s3 + $0x1a8] sm:$0xff] }
 0xaf1   : > { %4780 = vmatpush1.bf16.msra.mxu0 %v10915_v33  ;;  %4821 = vmatpush1.bf16.msra.mxu1 %v10917_v11  ;;  %v10958_v33 = vcombine.high %v3990_v55, %v3994_v54  ;;  %v4857_v11 = vld [vmem:[%s16967_s3 + $0x80] sm:$0xff] }
 0xaf2   : > { %4781 = vmatprep.subr.bf16.mxu0 %v10924_v59  ;;  %4822 = vmatprep.subr.bf16.mxu1 %v10926_v42  ;;  %v4858_v59 = vld [vmem:[%s16967_s3 + $0x88] sm:$0xff]  ;;  %v4889_v42 = vld [vmem:[%s16967_s3 + $0x180] sm:$0xff] }
 0xaf3   : > { %v4845_v54 = vld [vmem:[%s16967_s3 + $0x20] sm:$0xff] }
 0xaf5   : > { %4782 = vmatpush1.bf16.msra.mxu0 %v10923_v8  ;;  %4823 = vmatpush1.bf16.msra.mxu1 %v10925_v1  ;;  %v4842_v8 = vld [vmem:[%s16967_s3 + $0x8] sm:$0xff]  ;;  %v15762_v1 = vpack.c.bf16 %v4858_v59, %v4857_v11  ;;  %v4863_v59 = vld [vmem:[%s16967_s3 + $0xb0] sm:$0xff] }
 0xaf6   : > { %4783 = vmatprep.subr.bf16.mxu0 %v10932_v36  ;;  %4824 = vmatprep.subr.bf16.mxu1 %v10934_v9  ;;  %v15764_v36 = vpack.c.bf16 %v4890_v37, %v4889_v42  ;;  %v4873_v9 = vld [vmem:[%s16967_s3 + $0x100] sm:$0xff]  ;;  %v4878_v11 = vld [vmem:[%s16967_s3 + $0x128] sm:$0xff]  ;;  %v4864_v42 = vld [vmem:[%s16967_s3 + $0xb8] sm:$0xff] }
 0xaf7   : > { %v4895_v37 = vld [vmem:[%s16967_s3 + $0x1b0] sm:$0xff] }
 0xaf9   : > { %4784 = vmatpush1.bf16.msra.mxu0 %v10931_v25  ;;  %4825 = vmatpush1.bf16.msra.mxu1 %v10933_v14  ;;  %v4892_v25 = vld [vmem:[%s16967_s3 + $0x198] sm:$0xff]  ;;  %v15784_v14 = vpack.c.bf16 %v4842_v8, %v4841_v61  ;;  %v4847_v8 = vld [vmem:[%s16967_s3 + $0x30] sm:$0xff] }
 0xafa   : > { %4785 = vmatprep.subr.bf16.mxu0 %v10940_v23  ;;  %4826 = vmatprep.subr.bf16.mxu1 %v10942_v28  ;;  %v15786_v23 = vpack.c.bf16 %v4874_v34, %v4873_v9  ;;  %v4843_v28 = vld [vmem:[%s16967_s3 + $0x10] sm:$0xff]  ;;  %v15798_v10 = vpack.c.bf16 %v4892_v25, %v4891_v43  ;;  %v4848_v9 = vld [vmem:[%s16967_s3 + $0x38] sm:$0xff]  ;;  %v15870_v34 = vpack.c.bf16 %v4864_v42, %v4863_v59  ;;  %v4865_v25 = vld [vmem:[%s16967_s3 + $0xc0] sm:$0xff] }
 0xafb   : > { %v15822_v45 = vpack.c.bf16 %v4844_v20, %v4843_v28  ;;  %v4880_v43 = vld [vmem:[%s16967_s3 + $0x138] sm:$0xff]  ;;  %v4866_v28 = vld [vmem:[%s16967_s3 + $0xc8] sm:$0xff]  ;;  %v4897_v20 = vld [vmem:[%s16967_s3 + $0x1c0] sm:$0xff] }
 0xafc   : > { %v4868_v59 = vld [vmem:[%s16967_s3 + $0xd8] sm:$0xff]  ;;  %v4899_v42 = vld [vmem:[%s16967_s3 + $0x1d0] sm:$0xff] }
 0xafd   : > { %4786 = vmatpush1.bf16.msra.mxu0 %v10939_v63  ;;  %4827 = vmatpush1.bf16.msra.mxu1 %v10941_v22  ;;  %v4876_v63 = vld [vmem:[%s16967_s3 + $0x118] sm:$0xff]  ;;  %v4861_v22 = vld [vmem:[%s16967_s3 + $0xa0] sm:$0xff] }
 0xafe   : > { %4787 = vmatprep.subr.bf16.mxu0 %v10948_v17  ;;  %4828 = vmatprep.subr.bf16.mxu1 %v10950_v46  ;;  %v4862_v17 = vld [vmem:[%s16967_s3 + $0xa8] sm:$0xff]  ;;  %v4893_v46 = vld [vmem:[%s16967_s3 + $0x1a0] sm:$0xff]  ;;  %v15824_v55 = vpack.c.bf16 %v4876_v63, %v4875_v26  ;;  %v15894_v63 = vpack.c.bf16 %v4848_v9, %v4847_v8  ;;  %v4851_v9 = vld [vmem:[%s16967_s3 + $0x50] sm:$0xff] }
 0xaff   : > { %v4898_v26 = vld [vmem:[%s16967_s3 + $0x1c8] sm:$0xff] }
 0xb01   : > { %4788 = vmatpush1.bf16.msra.mxu0 %v10947_v2  ;;  %4829 = vmatpush1.bf16.msra.mxu1 %v10949_v51  ;;  %v4846_v2 = vld [vmem:[%s16967_s3 + $0x28] sm:$0xff]  ;;  %v15834_v51 = vpack.c.bf16 %v4862_v17, %v4861_v22  ;;  %v15896_v22 = vpack.c.bf16 %v4880_v43, %v4879_v53  ;;  %v4849_v17 = vld [vmem:[%s16967_s3 + $0x40] sm:$0xff]  ;;  %v4852_v53 = vld [vmem:[%s16967_s3 + $0x58] sm:$0xff] }
 0xb02   : > { %4789 = vmatprep.subr.bf16.mxu0 %v10956_v4  ;;  %4830 = vmatprep.subr.bf16.mxu1 %v10958_v33  ;;  %v15836_v4 = vpack.c.bf16 %v4894_v58, %v4893_v46  ;;  %v4877_v33 = vld [vmem:[%s16967_s3 + $0x120] sm:$0xff]  ;;  %v4850_v46 = vld [vmem:[%s16967_s3 + $0x48] sm:$0xff]  ;;  %v15906_v58 = vpack.c.bf16 %v4866_v28, %v4865_v25  ;;  %v4883_v28 = vld [vmem:[%s16967_s3 + $0x150] sm:$0xff] }
 0xb03   : > { %v15860_v61 = vpack.c.bf16 %v4878_v11, %v4877_v33  ;;  %v4882_v33 = vld [vmem:[%s16967_s3 + $0x148] sm:$0xff]  ;;  %v4867_v11 = vld [vmem:[%s16967_s3 + $0xd0] sm:$0xff] }
 0xb04   : > { %v15942_v43 = vpack.c.bf16 %v4868_v59, %v4867_v11  ;;  %v4853_v59 = vld [vmem:[%s16967_s3 + $0x60] sm:$0xff] }
 0xb05   : > { %4790 = vmatpush1.bf16.msra.mxu0 %v10955_v50  ;;  %4831 = vmatpush1.bf16.msra.mxu1 %v10957_v7  ;;  %v4896_v50 = vld [vmem:[%s16967_s3 + $0x1b8] sm:$0xff]  ;;  %v15858_v7 = vpack.c.bf16 %v4846_v2, %v4845_v54  ;;  %v15908_v54 = vpack.c.bf16 %v4898_v26, %v4897_v20  ;;  %v4881_v2 = vld [vmem:[%s16967_s3 + $0x140] sm:$0xff] }
 0xb06   : > { %12290 = vmatprep.subr.bf16.mxu0 %v15762_v1  ;;  %12322 = vmatprep.subr.bf16.mxu1 %v15764_v36  ;;  %v15872_v5 = vpack.c.bf16 %v4896_v50, %v4895_v37  ;;  %v4900_v37 = vld [vmem:[%s16967_s3 + $0x1d8] sm:$0xff]  ;;  %v15930_v50 = vpack.c.bf16 %v4850_v46, %v4849_v17  ;;  %v15932_v8 = vpack.c.bf16 %v4882_v33, %v4881_v2  ;;  %v4869_v26 = vld [vmem:[%s16967_s3 + $0xe0] sm:$0xff]  ;;  %v4870_v17 = vld [vmem:[%s16967_s3 + $0xe8] sm:$0xff] }
 0xb07   : > { %v15944_v25 = vpack.c.bf16 %v4900_v37, %v4899_v42  ;;  %v4884_v20 = vld [vmem:[%s16967_s3 + $0x158] sm:$0xff]  ;;  %v4901_v46 = vld [vmem:[%s16967_s3 + $0x1e0] sm:$0xff]  ;;  %v4902_v2 = vld [vmem:[%s16967_s3 + $0x1e8] sm:$0xff]  ;;  %v15966_v33 = vpack.c.bf16 %v4852_v53, %v4851_v9  ;;  %v15978_v37 = vpack.c.bf16 %v4870_v17, %v4869_v26 }
 0xb08   : > { %4792 = vmatmul.mubr.bf16.vlgmr.msra.gmra.mrb[32].mxu0 %v15736_v48  ;;  %4833 = vmatmul.mubr.bf16.vlgmr.msra.gmra.mrb[32].mxu1 %v15736_v48  ;;  %v15968_v11 = vpack.c.bf16 %v4884_v20, %v4883_v28  ;;  %v4854_v42 = vld [vmem:[%s16967_s3 + $0x68] sm:$0xff]  ;;  %v15980_v41 = vpack.c.bf16 %v4902_v2, %v4901_v46  ;;  %v4885_v9 = vld [vmem:[%s16967_s3 + $0x160] sm:$0xff]  ;;  %v4871_v28 = vld [vmem:[%s16967_s3 + $0xf0] sm:$0xff] }
 0xb09   : > { %12292 = vmatpush3.bf16.msra.mxu0 %v15784_v14  ;;  %12324 = vmatpush3.bf16.msra.mxu1 %v15786_v23  ;;  %v4886_v53 = vld [vmem:[%s16967_s3 + $0x168] sm:$0xff]  ;;  %v4872_v20 = vld [vmem:[%s16967_s3 + $0xf8] sm:$0xff]  ;;  %v4903_v26 = vld [vmem:[%s16967_s3 + $0x1f0] sm:$0xff]  ;;  %v16002_v46 = vpack.c.bf16 %v4854_v42, %v4853_v59 }
 0xb0a   : > { %12294 = vmatprep.subr.bf16.mxu0 %v15796_v0  ;;  %12326 = vmatprep.subr.bf16.mxu1 %v15798_v10  ;;  %v4904_v17 = vld [vmem:[%s16967_s3 + $0x1f8] sm:$0xff]  ;;  %v16004_v2 = vpack.c.bf16 %v4886_v53, %v4885_v9  ;;  %v16011_v38 = vpack.c.bf16 %v4872_v20, %v4871_v28  ;;  %v4887_v59 = vld [vmem:[%s16967_s3 + $0x170] sm:$0xff]  ;;  %v16026_v9 = vpack.c.bf16 %v4856_v35, %v4855_v57  ;;  %v16043_v35 = vld [vmem:[%s16968_s0] sm:$0xff]  ;;  %s17017_s0 = sld [smem:[#allocation88_spill]] }
 0xb0b   : > { %v16013_v40 = vpack.c.bf16 %v4904_v17, %v4903_v26  ;;  %v4888_v42 = vld [vmem:[%s16967_s3 + $0x178] sm:$0xff]  ;;  %v5046_v28 = vld [vmem:[#allocation21 + $0x8] sm:$0xff]  ;;  %v5048_v26 = vld [vmem:[#allocation21 + $0x18] sm:$0xff]  ;;  %v4004_v57 = vrot.slane %v16043_v35, %v15216_v49 }
 0xb0c   : > { %v16028_v53 = vpack.c.bf16 %v4888_v42, %v4887_v59  ;;  %v5050_v20 = vld [vmem:[#allocation21 + $0x28] sm:$0xff]  ;;  %v16036_v32 = vpack.c.bf16 %v5052_v39, %v5048_v26  ;;  %v4012_v59 = vrot.slane %v16043_v35, %v15237_v60  ;;  %v5045_v42 = vld [vmem:[#allocation21] sm:$0xff]  ;;  %v4000_v39 = vrot.slane %v16043_v35, %v15224_v52  ;;  %v5047_v26 = vld [vmem:[#allocation21 + $0x10] sm:$0xff] }
 0xb0d   : > { %12296 = vmatpush3.bf16.msra.mxu0 %v15822_v45  ;;  %12328 = vmatpush3.bf16.msra.mxu1 %v15824_v55  ;;  %v16034_v17 = vpack.c.bf16 %v5050_v20, %v5046_v28  ;;  %v4008_v28 = vrot.slane %v16043_v35, %v15366_v13  ;;  %v5049_v20 = vld [vmem:[#allocation21 + $0x20] sm:$0xff]  ;;  %v16059_v6 = vpack.c.bf16 %v5051_v31, %v5047_v26  ;;  %v5054_v31 = vld [vmem:[#allocation21 + $0x48] sm:$0xff]  ;;  %v5055_v48 = vld [vmem:[#allocation21 + $0x50] sm:$0xff] }
 0xb0e   : > { %12298 = vmatprep.subr.bf16.mxu0 %v15834_v51  ;;  %12330 = vmatprep.subr.bf16.mxu1 %v15836_v4  ;;  %v16057_v21 = vpack.c.bf16 %v5049_v20, %v5045_v42  ;;  %v5057_v20 = vld [vmem:[#allocation21 + $0x60] sm:$0xff] }
 0xb11   : > { %12300 = vmatpush3.bf16.msra.mxu0 %v15858_v7  ;;  %12332 = vmatpush3.bf16.msra.mxu1 %v15860_v61 }
 0xb12   : > { %12302 = vmatprep.subr.bf16.mxu0 %v15870_v34  ;;  %12334 = vmatprep.subr.bf16.mxu1 %v15872_v5 }
 0xb15   : > { %12304 = vmatpush3.bf16.msra.mxu0 %v15894_v63  ;;  %12336 = vmatpush3.bf16.msra.mxu1 %v15896_v22 }
 0xb16   : > { %12306 = vmatprep.subr.bf16.mxu0 %v15906_v58  ;;  %12338 = vmatprep.subr.bf16.mxu1 %v15908_v54 }
 0xb19   : > { %12308 = vmatpush3.bf16.msra.mxu0 %v15930_v50  ;;  %12340 = vmatpush3.bf16.msra.mxu1 %v15932_v8 }
 0xb1a   : > { %12310 = vmatprep.subr.bf16.mxu0 %v15942_v43  ;;  %12342 = vmatprep.subr.bf16.mxu1 %v15944_v25 }
 0xb1d   : > { %12312 = vmatpush3.bf16.msra.mxu0 %v15966_v33  ;;  %12344 = vmatpush3.bf16.msra.mxu1 %v15968_v11 }
 0xb1e   : > { %12314 = vmatprep.subr.bf16.mxu0 %v15978_v37  ;;  %12346 = vmatprep.subr.bf16.mxu1 %v15980_v41 }
 0xb21   : > { %12316 = vmatpush3.bf16.msra.mxu0 %v16002_v46  ;;  %12348 = vmatpush3.bf16.msra.mxu1 %v16004_v2 }
 0xb22   : > { %12318 = vmatprep.subr.bf16.mxu0 %v16011_v38  ;;  %12350 = vmatprep.subr.bf16.mxu1 %v16013_v40 }
 0xb25   : > { %12320 = vmatpush3.bf16.msra.mxu0 %v16026_v9  ;;  %12352 = vmatpush3.bf16.msra.mxu1 %v16028_v53 }
 0xb26   : > { %12354 = vmatprep.subr.bf16.mxu0 %v16034_v17  ;;  %12362 = vmatprep.subr.bf16.mxu1 %v16036_v32 }
 0xb9b   : > { %v4711_v29 = vpop.f32.mrb[28].mxu0  ;;  %v4752_v30 = vpop.f32.mrb[28].mxu1 }
 0xb9c   : > { %v4713_v27 = vpop.f32.mrb[29].mxu0  ;;  %v4754_v19 = vpop.f32.mrb[29].mxu1  ;;  %v16061_v52 = vadd.f32 %v4711_v29, %v4000_v39  ;;  %v16063_v13 = vadd.f32 %v4752_v30, %v4008_v28  ;;  %v5060_v39 = vld [vmem:[#allocation21 + $0x78] sm:$0xff]  ;;  %v5053_v28 = vld [vmem:[#allocation21 + $0x40] sm:$0xff] }
 0xb9d   : > { %v16053_v24 = vadd.f32 %v4713_v27, %v4004_v57  ;;  %v16055_v49 = vadd.f32 %v4754_v19, %v4012_v59  ;;  %v4715_v16 = vpop.f32.mrb[30].mxu0  ;;  %v4756_v60 = vpop.f32.mrb[30].mxu1  ;;  %v5058_v57 = vld [vmem:[#allocation21 + $0x68] sm:$0xff]  ;;  %v5056_v59 = vld [vmem:[#allocation21 + $0x58] sm:$0xff]  ;;  %v16085_v15 = vpack.c.bf16 %v5057_v20, %v5053_v28 }
 0xb9e   : > { %v4716_v18 = vpop.f32.mrb[31].mxu0  ;;  %v4757_v3 = vpop.f32.mrb[31].mxu1  ;;  %v16081_v42 = vpack.c.bf16 %v5058_v57, %v5054_v31  ;;  %v16083_v26 = vpack.c.bf16 %v5060_v39, %v5056_v59  ;;  %v13094_v28 = vld [vmem:[#allocation8 + $0x2a0] ss:$16 sps:$4 sm:$0xff]   ;;  %v13099_v20 = vld [vmem:[#allocation8 + $0xc4] ss:$16 sps:$4 sm:$0xff]  }
 0xb9f   : > { %4969 = vmatprep.mubr.f32.mxu0 %v16053_v24  ;;  %5039 = vmatprep.mubr.f32.mxu1 %v16055_v49 }
 0xba0   : > { %4970 = vmatmul.mubr.f32.vlgmr.msra.gmra.mrb[26].mxu0 %v16061_v52  ;;  %5040 = vmatmul.mubr.f32.vlgmr.msra.gmra.mrb[26].mxu1 %v16063_v13 }
 0xba1   : > { %12356 = vmatpush1.bf16.msra.mxu0 %v16057_v21  ;;  %12364 = vmatpush1.bf16.msra.mxu1 %v16059_v6 }
 0xba2   : > { %5129 = vmatprep.mubr.f32.mxu0 %v16964_v62  ;;  %5200 = vmatprep.mubr.f32.mxu1 %v16964_v62 }
 0xba3   : > { %12358 = vmatprep.subr.bf16.mxu0 %v16081_v42  ;;  %12366 = vmatprep.subr.bf16.mxu1 %v16083_v26 }
 0xba5   : > { %12360 = vmatpush1.bf16.msra.mxu0 %v16085_v15 }
 0xba6   : > { %12370 = vmatprep.subr.bf16.mxu0 %v15762_v1 }
 0xbdb   : > { %v16073_v27 = vpop.f32.mrb[32].mxu0  ;;  %v16075_v18 = vpop.f32.mrb[32].mxu1 }
 0xbdc   : > { %v16077_v29 = vpop.f32.mrb[33].mxu0  ;;  %v16079_v60 = vpop.f32.mrb[33].mxu1 }
 0xbdd   : > { %v4797_v3 = vpop.f32.mrb[34].mxu0  ;;  %v4838_v16 = vpop.f32.mrb[34].mxu1 }
 0xbde   : > { %v4798_v19 = vpop.f32.mrb[35].mxu0  ;;  %v4839_v30 = vpop.f32.mrb[35].mxu1  ;;  %v16088_v3 = vpack.c.bf16 %v5059_v56, %v5055_v48 }
 0xbe0   : > { %12368 = vmatpush1.bf16.msra.mxu1 %v16088_v3 }
 0xbe1   : > { %12402 = vmatprep.subr.bf16.mxu1 %v15764_v36 }
 0xc73   : > { %v11701_v16 = vpop.f32.mrb[26].mxu0  ;;  %v11736_v19 = vpop.f32.mrb[26].mxu1 }
 0xc74   : > { %v11702_v30 = vpop.f32.mrb[27].mxu0  ;;  %v11737_v31 = vpop.f32.mrb[27].mxu1 }
 0xc75   : > { %v11703_v57 = vadd.f32 %v11702_v30, %v11701_v16  ;;  %v11738_v59 = vadd.f32 %v11737_v31, %v11736_v19  ;;  %v13100_v16 = vld [vmem:[#allocation8 + $0x2c0] ss:$16 sps:$4 sm:$0xff]   ;;  %v13105_v19 = vld [vmem:[#allocation8 + $0xe4] ss:$16 sps:$4 sm:$0xff]  }
 0xc76   : > { %v13108_v30 = vld [vmem:[#allocation8 + $0x2e4] ss:$16 sps:$4 sm:$0xff]   ;;  %v13103_v31 = vld [vmem:[#allocation8 + $0xe0] ss:$16 sps:$4 sm:$0xff]  }
 0xc77   : > { %v5042_v39 = vadd.f32 %v11738_v59, %v11703_v57  ;;  %v13106_v57 = vld [vmem:[#allocation8 + $0x2e0] ss:$16 sps:$4 sm:$0xff]   ;;  %v13111_v59 = vld [vmem:[#allocation8 + $0x104] ss:$16 sps:$4 sm:$0xff]  }
 0xc79   : > { %10959 = vmatmul.mubr.msk.f32.vlgmr.msra.gmra.mrb[36].mxu0 %vm5061_vm8, %v5042_v39  ;;  %10960 = vmatmul.mubr.msk.f32.vlgmr.msra.gmra.mrb[36].mxu1 %vm5061_vm8, %v5042_v39  ;;  %v13114_v39 = vld [vmem:[#allocation8 + $0x304] ss:$16 sps:$4 sm:$0xff]  }
 0xc7a   : > { %12372 = vmatpush3.bf16.msra.mxu0 %v15784_v14  ;;  %12404 = vmatpush3.bf16.msra.mxu1 %v15786_v23 }
 0xc7b   : > { %12374 = vmatprep.subr.bf16.mxu0 %v15796_v0  ;;  %12406 = vmatprep.subr.bf16.mxu1 %v15798_v10 }
 0xc7e   : > { %12376 = vmatpush3.bf16.msra.mxu0 %v15822_v45  ;;  %12408 = vmatpush3.bf16.msra.mxu1 %v15824_v55 }
 0xc7f   : > { %12378 = vmatprep.subr.bf16.mxu0 %v15834_v51  ;;  %12410 = vmatprep.subr.bf16.mxu1 %v15836_v4 }
 0xc82   : > { %12380 = vmatpush3.bf16.msra.mxu0 %v15858_v7  ;;  %12412 = vmatpush3.bf16.msra.mxu1 %v15860_v61  ;;  %v13061_v7 = vld [vmem:[#allocation8] ss:$16 sps:$4 sm:$0xff]  }
 0xc83   : > { %12382 = vmatprep.subr.bf16.mxu0 %v15870_v34  ;;  %12414 = vmatprep.subr.bf16.mxu1 %v15872_v5  ;;  %v13064_v61 = vld [vmem:[#allocation8 + $0x200] ss:$16 sps:$4 sm:$0xff]   ;;  %v13069_v34 = vld [vmem:[#allocation8 + $0x24] ss:$16 sps:$4 sm:$0xff]  }
 0xc84   : > { %v13072_v5 = vld [vmem:[#allocation8 + $0x224] ss:$16 sps:$4 sm:$0xff]  }
 0xc86   : > { %12384 = vmatpush3.bf16.msra.mxu0 %v15894_v63  ;;  %12416 = vmatpush3.bf16.msra.mxu1 %v15896_v22  ;;  %v13067_v63 = vld [vmem:[#allocation8 + $0x20] ss:$16 sps:$4 sm:$0xff]  }
 0xc87   : > { %12386 = vmatprep.subr.bf16.mxu0 %v15906_v58  ;;  %12418 = vmatprep.subr.bf16.mxu1 %v15908_v54  ;;  %v13070_v22 = vld [vmem:[#allocation8 + $0x220] ss:$16 sps:$4 sm:$0xff]   ;;  %v13075_v58 = vld [vmem:[#allocation8 + $0x44] ss:$16 sps:$4 sm:$0xff]  }
 0xc88   : > { %v13078_v54 = vld [vmem:[#allocation8 + $0x244] ss:$16 sps:$4 sm:$0xff]  }
 0xc8a   : > { %12388 = vmatpush3.bf16.msra.mxu0 %v15930_v50  ;;  %12420 = vmatpush3.bf16.msra.mxu1 %v15932_v8  ;;  %v13073_v50 = vld [vmem:[#allocation8 + $0x40] ss:$16 sps:$4 sm:$0xff]  }
 0xc8b   : > { %12390 = vmatprep.subr.bf16.mxu0 %v15942_v43  ;;  %12422 = vmatprep.subr.bf16.mxu1 %v15944_v25  ;;  %v13076_v8 = vld [vmem:[#allocation8 + $0x240] ss:$16 sps:$4 sm:$0xff]   ;;  %v13081_v43 = vld [vmem:[#allocation8 + $0x64] ss:$16 sps:$4 sm:$0xff]  }
 0xc8c   : > { %v13084_v25 = vld [vmem:[#allocation8 + $0x264] ss:$16 sps:$4 sm:$0xff]  }
 0xc8e   : > { %12392 = vmatpush3.bf16.msra.mxu0 %v15966_v33  ;;  %12424 = vmatpush3.bf16.msra.mxu1 %v15968_v11  ;;  %v13079_v33 = vld [vmem:[#allocation8 + $0x60] ss:$16 sps:$4 sm:$0xff]  }
 0xc8f   : > { %12394 = vmatprep.subr.bf16.mxu0 %v15978_v37  ;;  %12426 = vmatprep.subr.bf16.mxu1 %v15980_v41  ;;  %v13082_v11 = vld [vmem:[#allocation8 + $0x260] ss:$16 sps:$4 sm:$0xff]   ;;  %v13087_v37 = vld [vmem:[#allocation8 + $0x84] ss:$16 sps:$4 sm:$0xff]  }
 0xc92   : > { %12396 = vmatpush3.bf16.msra.mxu0 %v16002_v46  ;;  %12428 = vmatpush3.bf16.msra.mxu1 %v16004_v2  ;;  %v13090_v46 = vld [vmem:[#allocation8 + $0x284] ss:$16 sps:$4 sm:$0xff]   ;;  %v13085_v2 = vld [vmem:[#allocation8 + $0x80] ss:$16 sps:$4 sm:$0xff]  }
 0xc93   : > { %12398 = vmatprep.subr.bf16.mxu0 %v16011_v38  ;;  %12430 = vmatprep.subr.bf16.mxu1 %v16013_v40 }
 0xc96   : > { %12400 = vmatpush3.bf16.msra.mxu0 %v16026_v9  ;;  %12432 = vmatpush3.bf16.msra.mxu1 %v16028_v53  ;;  %v13088_v9 = vld [vmem:[#allocation8 + $0x280] ss:$16 sps:$4 sm:$0xff]   ;;  %v13093_v53 = vld [vmem:[#allocation8 + $0xa4] ss:$16 sps:$4 sm:$0xff]  }
 0xc97   : > { %12434 = vmatprep.subr.bf16.mxu0 %v16034_v17  ;;  %12442 = vmatprep.subr.bf16.mxu1 %v16036_v32  ;;  %v13096_v17 = vld [vmem:[#allocation8 + $0x2a4] ss:$16 sps:$4 sm:$0xff]  }
 0xd4c   : > { %v5131_v56 = vpop.f32.mrb[36].mxu0  ;;  %v5202_v48 = vpop.f32.mrb[36].mxu1 }
 0xd4d   : > { %v16130_v41 = vsub.f32 %v16061_v52, %v5131_v56  ;;  %v16133_v1 = vsub.f32 %v16063_v13, %v5202_v48  ;;  %v5133_v36 = vpop.f32.mrb[37].mxu0  ;;  %v5204_v38 = vpop.f32.mrb[37].mxu1  ;;  %v13109_v56 = vld [vmem:[#allocation8 + $0x100] ss:$16 sps:$4 sm:$0xff]  }
 0xd4e   : > { %v16136_v40 = vsub.f32 %v16053_v24, %v5133_v36  ;;  %v16139_v14 = vsub.f32 %v16055_v49, %v5204_v38  ;;  %v13063_v24 = vld [vmem:[#allocation8 + $0x4] ss:$16 sps:$4 sm:$0xff]   ;;  %v13112_v48 = vld [vmem:[#allocation8 + $0x300] ss:$16 sps:$4 sm:$0xff]  }
 0xd4f   : > { %v5211_v52 = vmul.f32 %v16130_v41, %v16130_v41  ;;  %v5213_v13 = vmul.f32 %v16133_v1, %v16133_v1  ;;  %v13066_v49 = vld [vmem:[#allocation8 + $0x204] ss:$16 sps:$4 sm:$0xff]  }
 0xd50   : > { %v5212_v23 = vmul.f32 %v16136_v40, %v16136_v40  ;;  %v5214_v32 = vmul.f32 %v16139_v14, %v16139_v14  ;;  %v13117_v36 = vld [vmem:[#allocation8 + $0x124] ss:$16 sps:$4 sm:$0xff]  }
 0xd51   : > { %v13120_v38 = vld [vmem:[#allocation8 + $0x324] ss:$16 sps:$4 sm:$0xff]  }
 0xd52   : > { %5279 = vmatprep.mubr.f32.mxu0 %v5212_v23  ;;  %5349 = vmatprep.mubr.f32.mxu1 %v5214_v32  ;;  %v13115_v23 = vld [vmem:[#allocation8 + $0x120] ss:$16 sps:$4 sm:$0xff]  }
 0xd53   : > { %5280 = vmatmul.mubr.f32.vlgmr.msra.gmra.mrb[38].mxu0 %v5211_v52  ;;  %5350 = vmatmul.mubr.f32.vlgmr.msra.gmra.mrb[38].mxu1 %v5213_v13  ;;  %v13118_v32 = vld [vmem:[#allocation8 + $0x320] ss:$16 sps:$4 sm:$0xff]   ;;  %v13123_v52 = vld [vmem:[#allocation8 + $0x144] ss:$16 sps:$4 sm:$0xff]  }
 0xd54   : > { %12436 = vmatpush1.bf16.msra.mxu0 %v16057_v21  ;;  %12444 = vmatpush1.bf16.msra.mxu1 %v16059_v6  ;;  %v13126_v13 = vld [vmem:[#allocation8 + $0x344] ss:$16 sps:$4 sm:$0xff]  }
 0xd55   : > { %12438 = vmatprep.subr.bf16.mxu0 %v16081_v42  ;;  %12446 = vmatprep.subr.bf16.mxu1 %v16083_v26  ;;  %v13091_v42 = vld [vmem:[#allocation8 + $0xa0] ss:$16 sps:$4 sm:$0xff]   ;;  %v13102_v26 = vld [vmem:[#allocation8 + $0x2c4] ss:$16 sps:$4 sm:$0xff]  }
 0xd56   : > { %5423 = vmatprep.mubr.f32.mxu0 %v16964_v62  ;;  %5494 = vmatprep.mubr.f32.mxu1 %v16964_v62 }
 0xd58   : > { %12440 = vmatpush1.bf16.msra.mxu0 %v16085_v15  ;;  %12448 = vmatpush1.bf16.msra.mxu1 %v16088_v3  ;;  %v13097_v3 = vld [vmem:[#allocation8 + $0xc0] ss:$16 sps:$4 sm:$0xff]  }
 0xd59   : > { %6359 = vmatprep.subr.bf16.mxu0 %v13063_v24  ;;  %6400 = vmatprep.subr.bf16.mxu1 %v13066_v49  ;;  %v13121_v24 = vld [vmem:[#allocation8 + $0x140] ss:$16 sps:$4 sm:$0xff]  }
 0xd5a   : > { %v13124_v49 = vld [vmem:[#allocation8 + $0x340] ss:$16 sps:$4 sm:$0xff]  }
 0xe26   : > { %v11771_v0 = vpop.f32.mrb[38].mxu0  ;;  %v11806_v21 = vpop.f32.mrb[38].mxu1 }
 0xe27   : > { %v11772_v10 = vpop.f32.mrb[39].mxu0  ;;  %v11807_v6 = vpop.f32.mrb[39].mxu1 }
 0xe28   : > { %v11773_v45 = vadd.f32 %v11772_v10, %v11771_v0  ;;  %v11808_v55 = vadd.f32 %v11807_v6, %v11806_v21  ;;  %v13129_v0 = vld [vmem:[#allocation8 + $0x164] ss:$16 sps:$4 sm:$0xff]   ;;  %v13127_v10 = vld [vmem:[#allocation8 + $0x160] ss:$16 sps:$4 sm:$0xff]  }
 0xe29   : > { %v13132_v21 = vld [vmem:[#allocation8 + $0x364] ss:$16 sps:$4 sm:$0xff]   ;;  %v13130_v6 = vld [vmem:[#allocation8 + $0x360] ss:$16 sps:$4 sm:$0xff]  }
 0xe2a   : > { %v5282_v51 = vadd.f32 1e-05, %v11773_v45  ;;  %v13135_v45 = vld [vmem:[#allocation8 + $0x184] ss:$16 sps:$4 sm:$0xff]  }
 0xe2c   : > { %v5352_v4 = vadd.f32 %v11808_v55, %v5282_v51  ;;  %v13138_v55 = vld [vmem:[#allocation8 + $0x384] ss:$16 sps:$4 sm:$0xff]   ;;  %v13133_v51 = vld [vmem:[#allocation8 + $0x180] ss:$16 sps:$4 sm:$0xff]  }
 0xe2e   : > { %13785 = vrsqrt.f32 %v5352_v4  ;;  %v13136_v4 = vld [vmem:[#allocation8 + $0x380] ss:$16 sps:$4 sm:$0xff]  }
 0xe38   : > { %v13786_v15 = vpop.eup %13785 }
 0xe39   : > { %10961 = vmatmul.mubr.msk.f32.vlgmr.msra.gmra.mrb[40].mxu0 %vm5061_vm8, %v13786_v15  ;;  %10962 = vmatmul.mubr.msk.f32.vlgmr.msra.gmra.mrb[40].mxu1 %vm5061_vm8, %v13786_v15  ;;  %v13147_v15 = vld [vmem:[#allocation8 + $0x1c4] ss:$16 sps:$4 sm:$0xff]  }
 0xe3a   : > { %6360 = vmatpush1.bf16.msra.mxu0 %v13061_v7  ;;  %6401 = vmatpush1.bf16.msra.mxu1 %v13064_v61  ;;  %v13141_v7 = vld [vmem:[#allocation8 + $0x1a4] ss:$16 sps:$4 sm:$0xff]  }
 0xe3b   : > { %6361 = vmatprep.subr.bf16.mxu0 %v13069_v34  ;;  %6402 = vmatprep.subr.bf16.mxu1 %v13072_v5  ;;  %v13144_v61 = vld [vmem:[#allocation8 + $0x3a4] ss:$16 sps:$4 sm:$0xff]   ;;  %v13139_v34 = vld [vmem:[#allocation8 + $0x1a0] ss:$16 sps:$4 sm:$0xff]  }
 0xe3c   : > { %v13142_v5 = vld [vmem:[#allocation8 + $0x3a0] ss:$16 sps:$4 sm:$0xff]  }
 0xe3e   : > { %6362 = vmatpush1.bf16.msra.mxu0 %v13067_v63  ;;  %6403 = vmatpush1.bf16.msra.mxu1 %v13070_v22  ;;  %v13150_v63 = vld [vmem:[#allocation8 + $0x3c4] ss:$16 sps:$4 sm:$0xff]   ;;  %v13145_v22 = vld [vmem:[#allocation8 + $0x1c0] ss:$16 sps:$4 sm:$0xff]  }
 0xe3f   : > { %6363 = vmatprep.subr.bf16.mxu0 %v13075_v58  ;;  %6404 = vmatprep.subr.bf16.mxu1 %v13078_v54  ;;  %v13148_v58 = vld [vmem:[#allocation8 + $0x3c0] ss:$16 sps:$4 sm:$0xff]   ;;  %v13153_v54 = vld [vmem:[#allocation8 + $0x1e4] ss:$16 sps:$4 sm:$0xff]  }
 0xe42   : > { %6364 = vmatpush1.bf16.msra.mxu0 %v13073_v50  ;;  %6405 = vmatpush1.bf16.msra.mxu1 %v13076_v8  ;;  %v13156_v50 = vld [vmem:[#allocation8 + $0x3e4] ss:$16 sps:$4 sm:$0xff]   ;;  %v13151_v8 = vld [vmem:[#allocation8 + $0x1e0] ss:$16 sps:$4 sm:$0xff]  }
 0xe43   : > { %6365 = vmatprep.subr.bf16.mxu0 %v13081_v43  ;;  %6406 = vmatprep.subr.bf16.mxu1 %v13084_v25  ;;  %v13154_v43 = vld [vmem:[#allocation8 + $0x3e0] ss:$16 sps:$4 sm:$0xff]   ;;  %v13159_v25 = vld [vmem:[#allocation8 + $0xc] ss:$16 sps:$4 sm:$0xff]  }
 0xe46   : > { %6366 = vmatpush1.bf16.msra.mxu0 %v13079_v33  ;;  %6407 = vmatpush1.bf16.msra.mxu1 %v13082_v11  ;;  %v13162_v33 = vld [vmem:[#allocation8 + $0x20c] ss:$16 sps:$4 sm:$0xff]   ;;  %v16969_v11 = vsub.s32 4, %v15213_v47 }
 0xe47   : > { %6367 = vmatprep.subr.bf16.mxu0 %v13087_v37  ;;  %6408 = vmatprep.subr.bf16.mxu1 %v13090_v46  ;;  %v16970_v46 = vsub.s32 6, %v15213_v47 }
 0xe48   : > { %v4016_v37 = vrot.slane %v16043_v35, %v16969_v11  ;;  %v13193_v11 = vld [vmem:[#allocation8 + $0xc8] ss:$16 sps:$4 sm:$0xff]  }
 0xe4a   : > { %6368 = vmatpush1.bf16.msra.mxu0 %v13085_v2  ;;  %6409 = vmatpush1.bf16.msra.mxu1 %v13088_v9  ;;  %v4024_v2 = vrot.slane %v16043_v35, %v16970_v46  ;;  %v13201_v46 = vld [vmem:[#allocation8 + $0xec] ss:$16 sps:$4 sm:$0xff]  }
 0xe4b   : > { %6369 = vmatprep.subr.bf16.mxu0 %v13093_v53  ;;  %6410 = vmatprep.subr.bf16.mxu1 %v13096_v17  ;;  %v5510_v53 = vstv %s10963_s12  ;;  %s916_s12 = scalar_lea.vmem %s17017_s0, %s11457_s24 }
 0xe4e   : > { %6370 = vmatpush1.bf16.msra.mxu0 %v13091_v42  ;;  %6411 = vmatpush1.bf16.msra.mxu1 %v13094_v28  ;;  %v16971_v42 = vsub.s32 5, %v15213_v47 }
 0xe4f   : > { %6371 = vmatprep.subr.bf16.mxu0 %v13099_v20  ;;  %6412 = vmatprep.subr.bf16.mxu1 %v13102_v26  ;;  %v16972_v20 = vsub.s32 7, %v15213_v47 }
 0xe50   : > { %v4020_v28 = vrot.slane %v16043_v35, %v16971_v42  ;;  %v13210_v42 = vld [vmem:[#allocation8 + $0x30c] ss:$16 sps:$4 sm:$0xff]  }
 0xe51   : > { %v4028_v26 = vrot.slane %v16043_v35, %v16972_v20  ;;  %v13208_v20 = vld [vmem:[#allocation8 + $0x308] ss:$16 sps:$4 sm:$0xff]  }
 0xe52   : > { %6372 = vmatpush1.bf16.msra.mxu0 %v13097_v3  ;;  %6413 = vmatpush1.bf16.msra.mxu1 %v13100_v16 }
 0xe53   : > { %6373 = vmatprep.subr.bf16.mxu0 %v13105_v19  ;;  %6414 = vmatprep.subr.bf16.mxu1 %v13108_v30 }
 0xe56   : > { %6374 = vmatpush1.bf16.msra.mxu0 %v13103_v31  ;;  %6415 = vmatpush1.bf16.msra.mxu1 %v13106_v57  ;;  %v4794_v31 = vadd.f32 %v16073_v27, %v4016_v37  ;;  %v4835_v57 = vadd.f32 %v16075_v18, %v4024_v2  ;;  %v13196_v37 = vld [vmem:[#allocation8 + $0x2c8] ss:$16 sps:$4 sm:$0xff]   ;;  %v13204_v2 = vld [vmem:[#allocation8 + $0x2ec] ss:$16 sps:$4 sm:$0xff]  }
 0xe57   : > { %6375 = vmatprep.subr.bf16.mxu0 %v13111_v59  ;;  %6416 = vmatprep.subr.bf16.mxu1 %v13114_v39 }
 0xe5a   : > { %6376 = vmatpush1.bf16.msra.mxu0 %v13109_v56  ;;  %6417 = vmatpush1.bf16.msra.mxu1 %v13112_v48  ;;  %v4837_v48 = vadd.f32 %v16079_v60, %v4028_v26  ;;  %v13168_v60 = vld [vmem:[#allocation8 + $0x22c] ss:$16 sps:$4 sm:$0xff]  }
 0xe5b   : > { %6377 = vmatprep.subr.bf16.mxu0 %v13117_v36  ;;  %6418 = vmatprep.subr.bf16.mxu1 %v13120_v38  ;;  %v13213_v26 = vld [vmem:[#allocation8 + $0x12c] ss:$16 sps:$4 sm:$0xff]  }
 0xe5e   : > { %6378 = vmatpush1.bf16.msra.mxu0 %v13115_v23  ;;  %6419 = vmatpush1.bf16.msra.mxu1 %v13118_v32 }
 0xe5f   : > { %6379 = vmatprep.subr.bf16.mxu0 %v13123_v52  ;;  %6420 = vmatprep.subr.bf16.mxu1 %v13126_v13 }
 0xe62   : > { %6380 = vmatpush1.bf16.msra.mxu0 %v13121_v24  ;;  %6421 = vmatpush1.bf16.msra.mxu1 %v13124_v49  ;;  %v13157_v24 = vld [vmem:[#allocation8 + $0x8] ss:$16 sps:$4 sm:$0xff]  }
 0xe63   : > { %6381 = vmatprep.subr.bf16.mxu0 %v13129_v0  ;;  %6422 = vmatprep.subr.bf16.mxu1 %v13132_v21  ;;  %v13160_v49 = vld [vmem:[#allocation8 + $0x208] ss:$16 sps:$4 sm:$0xff]  }
 0xe66   : > { %6382 = vmatpush1.bf16.msra.mxu0 %v13127_v10  ;;  %6423 = vmatpush1.bf16.msra.mxu1 %v13130_v6  ;;  %v13163_v10 = vld [vmem:[#allocation8 + $0x28] ss:$16 sps:$4 sm:$0xff]  }
 0xe67   : > { %6383 = vmatprep.subr.bf16.mxu0 %v13135_v45  ;;  %6424 = vmatprep.subr.bf16.mxu1 %v13138_v55  ;;  %v13166_v6 = vld [vmem:[#allocation8 + $0x228] ss:$16 sps:$4 sm:$0xff]   ;;  %v13171_v45 = vld [vmem:[#allocation8 + $0x4c] ss:$16 sps:$4 sm:$0xff]  }
 0xe68   : > { %v13174_v55 = vld [vmem:[#allocation8 + $0x24c] ss:$16 sps:$4 sm:$0xff]  }
 0xe6a   : > { %6384 = vmatpush1.bf16.msra.mxu0 %v13133_v51  ;;  %6425 = vmatpush1.bf16.msra.mxu1 %v13136_v4  ;;  %v13169_v51 = vld [vmem:[#allocation8 + $0x48] ss:$16 sps:$4 sm:$0xff]  }
 0xe6b   : > { %6385 = vmatprep.subr.bf16.mxu0 %v13141_v7  ;;  %6426 = vmatprep.subr.bf16.mxu1 %v13144_v61  ;;  %v13172_v4 = vld [vmem:[#allocation8 + $0x248] ss:$16 sps:$4 sm:$0xff]   ;;  %v13177_v7 = vld [vmem:[#allocation8 + $0x6c] ss:$16 sps:$4 sm:$0xff]  }
 0xe6c   : > { %v13180_v61 = vld [vmem:[#allocation8 + $0x26c] ss:$16 sps:$4 sm:$0xff]  }
 0xe6e   : > { %6386 = vmatpush1.bf16.msra.mxu0 %v13139_v34  ;;  %6427 = vmatpush1.bf16.msra.mxu1 %v13142_v5  ;;  %v13175_v34 = vld [vmem:[#allocation8 + $0x68] ss:$16 sps:$4 sm:$0xff]  }
 0xe6f   : > { %6387 = vmatprep.subr.bf16.mxu0 %v13147_v15  ;;  %6428 = vmatprep.subr.bf16.mxu1 %v13150_v63  ;;  %v13178_v5 = vld [vmem:[#allocation8 + $0x268] ss:$16 sps:$4 sm:$0xff]   ;;  %v13183_v15 = vld [vmem:[#allocation8 + $0x8c] ss:$16 sps:$4 sm:$0xff]  }
 0xe70   : > { %v13186_v63 = vld [vmem:[#allocation8 + $0x28c] ss:$16 sps:$4 sm:$0xff]  }
 0xe72   : > { %6388 = vmatpush1.bf16.msra.mxu0 %v13145_v22  ;;  %6429 = vmatpush1.bf16.msra.mxu1 %v13148_v58  ;;  %v13181_v22 = vld [vmem:[#allocation8 + $0x88] ss:$16 sps:$4 sm:$0xff]  }
 0xe73   : > { %6389 = vmatprep.subr.bf16.mxu0 %v13153_v54  ;;  %6430 = vmatprep.subr.bf16.mxu1 %v13156_v50  ;;  %v13184_v58 = vld [vmem:[#allocation8 + $0x288] ss:$16 sps:$4 sm:$0xff]   ;;  %v13189_v54 = vld [vmem:[#allocation8 + $0xac] ss:$16 sps:$4 sm:$0xff]  }
 0xe74   : > { %v13192_v50 = vld [vmem:[#allocation8 + $0x2ac] ss:$16 sps:$4 sm:$0xff]  }
 0xe76   : > { %6390 = vmatpush1.bf16.msra.mxu0 %v13151_v8  ;;  %6431 = vmatpush1.bf16.msra.mxu1 %v13154_v43  ;;  %v13187_v8 = vld [vmem:[#allocation8 + $0xa8] ss:$16 sps:$4 sm:$0xff]  }
 0xe77   : > { %6441 = vmatprep.subr.bf16.mxu0 %v13159_v25  ;;  %6482 = vmatprep.subr.bf16.mxu1 %v13162_v33  ;;  %v13190_v43 = vld [vmem:[#allocation8 + $0x2a8] ss:$16 sps:$4 sm:$0xff]   ;;  %v13195_v25 = vld [vmem:[#allocation8 + $0xcc] ss:$16 sps:$4 sm:$0xff]  }
 0xe78   : > { %v13198_v33 = vld [vmem:[#allocation8 + $0x2cc] ss:$16 sps:$4 sm:$0xff]  }
 0xf0c   : > { %v5425_v9 = vpop.f32.mrb[40].mxu0  ;;  %v5496_v17 = vpop.f32.mrb[40].mxu1 }
 0xf0d   : > { %v5501_v3 = vmul.f32 %v5425_v9, %v16130_v41  ;;  %v5503_v16 = vmul.f32 %v5496_v17, %v16133_v1  ;;  %v5427_v19 = vpop.f32.mrb[41].mxu0  ;;  %v5498_v30 = vpop.f32.mrb[41].mxu1  ;;  %v4796_v1 = vadd.f32 %v16077_v29, %v4020_v28  ;;  %v13165_v29 = vld [vmem:[#allocation8 + $0x2c] ss:$16 sps:$4 sm:$0xff]   ;;  %v13199_v9 = vld [vmem:[#allocation8 + $0xe8] ss:$16 sps:$4 sm:$0xff]  }
 0xf0e   : > { %v5502_v59 = vmul.f32 %v5427_v19, %v16136_v40  ;;  %v5504_v39 = vmul.f32 %v5498_v30, %v16139_v14  ;;  %v13207_v17 = vld [vmem:[#allocation8 + $0x10c] ss:$16 sps:$4 sm:$0xff]   ;;  %v13205_v28 = vld [vmem:[#allocation8 + $0x108] ss:$16 sps:$4 sm:$0xff]  }
 0xf0f   : > { %vm5506_vm9 = vcmp.ge.f32.partialorder %v5501_v3, 0.0  ;;  %v5511_v56 = vmul.f32 %v5510_v53, %v5501_v3  ;;  %vm5508_vm10 = vcmp.ge.f32.partialorder %v5503_v16, 0.0  ;;  %v5513_v47 = vmul.f32 %v5510_v53, %v5503_v16  ;;  %v13214_v19 = vld [vmem:[#allocation8 + $0x328] ss:$16 sps:$4 sm:$0xff]   ;;  %v13219_v30 = vld [vmem:[#allocation8 + $0x14c] ss:$16 sps:$4 sm:$0xff]  }
 0xf10   : > { %vm5507_vm11 = vcmp.ge.f32.partialorder %v5502_v59, 0.0  ;;  %v5512_v35 = vmul.f32 %v5510_v53, %v5502_v59  ;;  %vm5509_vm12 = vcmp.ge.f32.partialorder %v5504_v39, 0.0  ;;  %v5514_v41 = vmul.f32 %v5510_v53, %v5504_v39  ;;  %v13202_v53 = vld [vmem:[#allocation8 + $0x2e8] ss:$16 sps:$4 sm:$0xff]  }
 0xf11   : > { %v5515_v36 = vsel %vm5506_vm9, %v5501_v3, %v5511_v56  ;;  %v5517_v27 = vsel %vm5508_vm10, %v5503_v16, %v5513_v47  ;;  %v13216_v3 = vld [vmem:[#allocation8 + $0x32c] ss:$16 sps:$4 sm:$0xff]   ;;  %v13211_v16 = vld [vmem:[#allocation8 + $0x128] ss:$16 sps:$4 sm:$0xff]  }
 0xf12   : > { %v5519_v38 = vadd.f32 %v5515_v36, %v4794_v31  ;;  %v5521_v18 = vadd.f32 %v5517_v27, %v4835_v57  ;;  %v5516_v23 = vsel %vm5507_vm11, %v5502_v59, %v5512_v35  ;;  %v5518_v40 = vsel %vm5509_vm12, %v5504_v39, %v5514_v41  ;;  %v13222_v31 = vld [vmem:[#allocation8 + $0x34c] ss:$16 sps:$4 sm:$0xff]   ;;  %v13217_v57 = vld [vmem:[#allocation8 + $0x148] ss:$16 sps:$4 sm:$0xff]  }
 0xf13   : > { %v5520_v32 = vadd.f32 %v5516_v23, %v4796_v1  ;;  %v5522_v14 = vadd.f32 %v5518_v40, %v4837_v48  ;;  %v13220_v59 = vld [vmem:[#allocation8 + $0x348] ss:$16 sps:$4 sm:$0xff]   ;;  %v13225_v39 = vld [vmem:[#allocation8 + $0x16c] ss:$16 sps:$4 sm:$0xff]  }
 0xf14   : > { %v16179_v0 = vpack.c.bf16 %v5519_v38, %v5519_v38  ;;  %v16181_v21 = vpack.c.bf16 %v5521_v18, %v5521_v18  ;;  %v13228_v56 = vld [vmem:[#allocation8 + $0x36c] ss:$16 sps:$4 sm:$0xff]   ;;  %v13223_v47 = vld [vmem:[#allocation8 + $0x168] ss:$16 sps:$4 sm:$0xff]  }
 0xf15   : > { %v5588_v52 = vpack.c.bf16 %v5520_v32, %v5520_v32  ;;  %v5590_v13 = vpack.c.bf16 %v5522_v14, %v5522_v14  ;;  %v13226_v35 = vld [vmem:[#allocation8 + $0x368] ss:$16 sps:$4 sm:$0xff]   ;;  %v13231_v41 = vld [vmem:[#allocation8 + $0x18c] ss:$16 sps:$4 sm:$0xff]  }
 0xf16   : > { %v13234_v1 = vld [vmem:[#allocation8 + $0x38c] ss:$16 sps:$4 sm:$0xff]   ;;  %v13229_v48 = vld [vmem:[#allocation8 + $0x188] ss:$16 sps:$4 sm:$0xff]  }
 0xf17   : > { %6391 = vmatprep.mubr.bf16.mxu0 %v5588_v52  ;;  %6432 = vmatprep.mubr.bf16.mxu1 %v5590_v13  ;;  %v13232_v36 = vld [vmem:[#allocation8 + $0x388] ss:$16 sps:$4 sm:$0xff]   ;;  %v13237_v27 = vld [vmem:[#allocation8 + $0x1ac] ss:$16 sps:$4 sm:$0xff]  }
 0xf18   : > { %6392 = vmatmul.mubr.bf16.vlgmr.msra.gmra.mrb[44].mxu0 %v16179_v0  ;;  %6433 = vmatmul.mubr.bf16.vlgmr.msra.gmra.mrb[44].mxu1 %v16181_v21  ;;  %v13240_v38 = vld [vmem:[#allocation8 + $0x3ac] ss:$16 sps:$4 sm:$0xff]   ;;  %v13235_v18 = vld [vmem:[#allocation8 + $0x1a8] ss:$16 sps:$4 sm:$0xff]  }
 0xf19   : > { %6442 = vmatpush1.bf16.msra.mxu0 %v13157_v24  ;;  %6483 = vmatpush1.bf16.msra.mxu1 %v13160_v49  ;;  %v13238_v23 = vld [vmem:[#allocation8 + $0x3a8] ss:$16 sps:$4 sm:$0xff]   ;;  %v13243_v40 = vld [vmem:[#allocation8 + $0x1cc] ss:$16 sps:$4 sm:$0xff]  }
 0xf1a   : > { %6473 = vmatprep.mubr.bf16.mxu0 %v5588_v52  ;;  %6514 = vmatprep.mubr.bf16.mxu1 %v5590_v13  ;;  %v13246_v32 = vld [vmem:[#allocation8 + $0x3cc] ss:$16 sps:$4 sm:$0xff]   ;;  %v13241_v14 = vld [vmem:[#allocation8 + $0x1c8] ss:$16 sps:$4 sm:$0xff]  }
 0xf1b   : > { %6443 = vmatprep.subr.bf16.mxu0 %v13165_v29  ;;  %6484 = vmatprep.subr.bf16.mxu1 %v13168_v60  ;;  %v13244_v52 = vld [vmem:[#allocation8 + $0x3c8] ss:$16 sps:$4 sm:$0xff]   ;;  %v13249_v13 = vld [vmem:[#allocation8 + $0x1ec] ss:$16 sps:$4 sm:$0xff]   ;;  %v13255_v60 = vld [vmem:[%s16973_s13 + $0x4] ss:$16 sps:$4 sm:$0xff]  }
 0xf1c   : > { %v13252_v24 = vld [vmem:[#allocation8 + $0x3ec] ss:$16 sps:$4 sm:$0xff]   ;;  %v13247_v49 = vld [vmem:[#allocation8 + $0x1e8] ss:$16 sps:$4 sm:$0xff]  }
 0xf1d   : > { %6444 = vmatpush1.bf16.msra.mxu0 %v13163_v10  ;;  %6485 = vmatpush1.bf16.msra.mxu1 %v13166_v6  ;;  %v13250_v29 = vld [vmem:[#allocation8 + $0x3e8] ss:$16 sps:$4 sm:$0xff]   ;;  %v13258_v10 = vld [vmem:[%s16973_s13 + $0xc] ss:$16 sps:$4 sm:$0xff]   ;;  %v13253_v6 = vld [vmem:[%s16973_s13] ss:$16 sps:$4 sm:$0xff]  }
 0xf1e   : > { %6445 = vmatprep.subr.bf16.mxu0 %v13171_v45  ;;  %6486 = vmatprep.subr.bf16.mxu1 %v13174_v55  ;;  %v13256_v45 = vld [vmem:[%s16973_s13 + $0x8] ss:$16 sps:$4 sm:$0xff]   ;;  %v13261_v55 = vld [vmem:[%s16973_s13 + $0x24] ss:$16 sps:$4 sm:$0xff]  }
 0xf21   : > { %6446 = vmatpush1.bf16.msra.mxu0 %v13169_v51  ;;  %6487 = vmatpush1.bf16.msra.mxu1 %v13172_v4  ;;  %v13264_v51 = vld [vmem:[%s16973_s13 + $0x2c] ss:$16 sps:$4 sm:$0xff]   ;;  %v13259_v4 = vld [vmem:[%s16973_s13 + $0x20] ss:$16 sps:$4 sm:$0xff]  }
 0xf22   : > { %6447 = vmatprep.subr.bf16.mxu0 %v13177_v7  ;;  %6488 = vmatprep.subr.bf16.mxu1 %v13180_v61  ;;  %v13262_v7 = vld [vmem:[%s16973_s13 + $0x28] ss:$16 sps:$4 sm:$0xff]   ;;  %v13265_v61 = vld [vmem:[%s16973_s13 + $0x40] ss:$16 sps:$4 sm:$0xff]  }
 0xf25   : > { %6448 = vmatpush1.bf16.msra.mxu0 %v13175_v34  ;;  %6489 = vmatpush1.bf16.msra.mxu1 %v13178_v5  ;;  %v13273_v34 = vld [vmem:[%s16973_s13 + $0x64] ss:$16 sps:$4 sm:$0xff]   ;;  %v13276_v5 = vld [vmem:[%s16973_s13 + $0x6c] ss:$16 sps:$4 sm:$0xff]  }
 0xf26   : > { %6449 = vmatprep.subr.bf16.mxu0 %v13183_v15  ;;  %6490 = vmatprep.subr.bf16.mxu1 %v13186_v63  ;;  %v13271_v15 = vld [vmem:[%s16973_s13 + $0x60] ss:$16 sps:$4 sm:$0xff]   ;;  %v13274_v63 = vld [vmem:[%s16973_s13 + $0x68] ss:$16 sps:$4 sm:$0xff]  }
 0xf29   : > { %6450 = vmatpush1.bf16.msra.mxu0 %v13181_v22  ;;  %6491 = vmatpush1.bf16.msra.mxu1 %v13184_v58  ;;  %v13279_v22 = vld [vmem:[%s16973_s13 + $0x84] ss:$16 sps:$4 sm:$0xff]   ;;  %v13282_v58 = vld [vmem:[%s16973_s13 + $0x8c] ss:$16 sps:$4 sm:$0xff]  }
 0xf2a   : > { %6451 = vmatprep.subr.bf16.mxu0 %v13189_v54  ;;  %6492 = vmatprep.subr.bf16.mxu1 %v13192_v50  ;;  %v13277_v54 = vld [vmem:[%s16973_s13 + $0x80] ss:$16 sps:$4 sm:$0xff]   ;;  %v13280_v50 = vld [vmem:[%s16973_s13 + $0x88] ss:$16 sps:$4 sm:$0xff]  }
 0xf2d   : > { %6452 = vmatpush1.bf16.msra.mxu0 %v13187_v8  ;;  %6493 = vmatpush1.bf16.msra.mxu1 %v13190_v43  ;;  %v13285_v8 = vld [vmem:[%s16973_s13 + $0xa4] ss:$16 sps:$4 sm:$0xff]   ;;  %v13288_v43 = vld [vmem:[%s16973_s13 + $0xac] ss:$16 sps:$4 sm:$0xff]  }
 0xf2e   : > { %6453 = vmatprep.subr.bf16.mxu0 %v13195_v25  ;;  %6494 = vmatprep.subr.bf16.mxu1 %v13198_v33  ;;  %v13283_v25 = vld [vmem:[%s16973_s13 + $0xa0] ss:$16 sps:$4 sm:$0xff]   ;;  %v13286_v33 = vld [vmem:[%s16973_s13 + $0xa8] ss:$16 sps:$4 sm:$0xff]  }
 0xf31   : > { %6454 = vmatpush1.bf16.msra.mxu0 %v13193_v11  ;;  %6495 = vmatpush1.bf16.msra.mxu1 %v13196_v37  ;;  %v13291_v11 = vld [vmem:[%s16973_s13 + $0xc4] ss:$16 sps:$4 sm:$0xff]   ;;  %v13294_v37 = vld [vmem:[%s16973_s13 + $0xcc] ss:$16 sps:$4 sm:$0xff]  }
 0xf32   : > { %6455 = vmatprep.subr.bf16.mxu0 %v13201_v46  ;;  %6496 = vmatprep.subr.bf16.mxu1 %v13204_v2  ;;  %v13289_v46 = vld [vmem:[%s16973_s13 + $0xc0] ss:$16 sps:$4 sm:$0xff]   ;;  %v13292_v2 = vld [vmem:[%s16973_s13 + $0xc8] ss:$16 sps:$4 sm:$0xff]  }
 0xf35   : > { %6456 = vmatpush1.bf16.msra.mxu0 %v13199_v9  ;;  %6497 = vmatpush1.bf16.msra.mxu1 %v13202_v53  ;;  %v13297_v9 = vld [vmem:[%s16973_s13 + $0xe4] ss:$16 sps:$4 sm:$0xff]   ;;  %v13300_v53 = vld [vmem:[%s16973_s13 + $0xec] ss:$16 sps:$4 sm:$0xff]  }
 0xf36   : > { %6457 = vmatprep.subr.bf16.mxu0 %v13207_v17  ;;  %6498 = vmatprep.subr.bf16.mxu1 %v13210_v42  ;;  %v13295_v17 = vld [vmem:[%s16973_s13 + $0xe0] ss:$16 sps:$4 sm:$0xff]   ;;  %v13298_v42 = vld [vmem:[%s16973_s13 + $0xe8] ss:$16 sps:$4 sm:$0xff]  }
 0xf39   : > { %6458 = vmatpush1.bf16.msra.mxu0 %v13205_v28  ;;  %6499 = vmatpush1.bf16.msra.mxu1 %v13208_v20  ;;  %v13303_v28 = vld [vmem:[%s16973_s13 + $0x104] ss:$16 sps:$4 sm:$0xff]   ;;  %v13306_v20 = vld [vmem:[%s16973_s13 + $0x10c] ss:$16 sps:$4 sm:$0xff]  }
 0xf3a   : > { %6459 = vmatprep.subr.bf16.mxu0 %v13213_v26  ;;  %6500 = vmatprep.subr.bf16.mxu1 %v13216_v3  ;;  %v13301_v26 = vld [vmem:[%s16973_s13 + $0x100] ss:$16 sps:$4 sm:$0xff]   ;;  %v13304_v3 = vld [vmem:[%s16973_s13 + $0x108] ss:$16 sps:$4 sm:$0xff]  }
 0xf3d   : > { %6460 = vmatpush1.bf16.msra.mxu0 %v13211_v16  ;;  %6501 = vmatpush1.bf16.msra.mxu1 %v13214_v19  ;;  %v13309_v16 = vld [vmem:[%s16973_s13 + $0x124] ss:$16 sps:$4 sm:$0xff]   ;;  %v13312_v19 = vld [vmem:[%s16973_s13 + $0x12c] ss:$16 sps:$4 sm:$0xff]  }
 0xf3e   : > { %6461 = vmatprep.subr.bf16.mxu0 %v13219_v30  ;;  %6502 = vmatprep.subr.bf16.mxu1 %v13222_v31  ;;  %v13307_v30 = vld [vmem:[%s16973_s13 + $0x120] ss:$16 sps:$4 sm:$0xff]   ;;  %v13310_v31 = vld [vmem:[%s16973_s13 + $0x128] ss:$16 sps:$4 sm:$0xff]  }
 0xf41   : > { %6462 = vmatpush1.bf16.msra.mxu0 %v13217_v57  ;;  %6503 = vmatpush1.bf16.msra.mxu1 %v13220_v59  ;;  %v13315_v57 = vld [vmem:[%s16973_s13 + $0x144] ss:$16 sps:$4 sm:$0xff]   ;;  %v13318_v59 = vld [vmem:[%s16973_s13 + $0x14c] ss:$16 sps:$4 sm:$0xff]  }
 0xf42   : > { %6463 = vmatprep.subr.bf16.mxu0 %v13225_v39  ;;  %6504 = vmatprep.subr.bf16.mxu1 %v13228_v56  ;;  %v13313_v39 = vld [vmem:[%s16973_s13 + $0x140] ss:$16 sps:$4 sm:$0xff]   ;;  %v13316_v56 = vld [vmem:[%s16973_s13 + $0x148] ss:$16 sps:$4 sm:$0xff]  }
 0xf45   : > { %6464 = vmatpush1.bf16.msra.mxu0 %v13223_v47  ;;  %6505 = vmatpush1.bf16.msra.mxu1 %v13226_v35  ;;  %v13321_v47 = vld [vmem:[%s16973_s13 + $0x164] ss:$16 sps:$4 sm:$0xff]   ;;  %v13324_v35 = vld [vmem:[%s16973_s13 + $0x16c] ss:$16 sps:$4 sm:$0xff]  }
 0xf46   : > { %6465 = vmatprep.subr.bf16.mxu0 %v13231_v41  ;;  %6506 = vmatprep.subr.bf16.mxu1 %v13234_v1  ;;  %v13319_v41 = vld [vmem:[%s16973_s13 + $0x160] ss:$16 sps:$4 sm:$0xff]   ;;  %v13322_v1 = vld [vmem:[%s16973_s13 + $0x168] ss:$16 sps:$4 sm:$0xff]  }
 0xf49   : > { %6466 = vmatpush1.bf16.msra.mxu0 %v13229_v48  ;;  %6507 = vmatpush1.bf16.msra.mxu1 %v13232_v36  ;;  %v13327_v48 = vld [vmem:[%s16973_s13 + $0x184] ss:$16 sps:$4 sm:$0xff]   ;;  %v13330_v36 = vld [vmem:[%s16973_s13 + $0x18c] ss:$16 sps:$4 sm:$0xff]  }
 0xf4a   : > { %6467 = vmatprep.subr.bf16.mxu0 %v13237_v27  ;;  %6508 = vmatprep.subr.bf16.mxu1 %v13240_v38  ;;  %v13325_v27 = vld [vmem:[%s16973_s13 + $0x180] ss:$16 sps:$4 sm:$0xff]   ;;  %v13328_v38 = vld [vmem:[%s16973_s13 + $0x188] ss:$16 sps:$4 sm:$0xff]  }
 0xf4d   : > { %6468 = vmatpush1.bf16.msra.mxu0 %v13235_v18  ;;  %6509 = vmatpush1.bf16.msra.mxu1 %v13238_v23  ;;  %v13333_v18 = vld [vmem:[%s16973_s13 + $0x1a4] ss:$16 sps:$4 sm:$0xff]   ;;  %v13336_v23 = vld [vmem:[%s16973_s13 + $0x1ac] ss:$16 sps:$4 sm:$0xff]  }
 0xf4e   : > { %6469 = vmatprep.subr.bf16.mxu0 %v13243_v40  ;;  %6510 = vmatprep.subr.bf16.mxu1 %v13246_v32  ;;  %v13331_v40 = vld [vmem:[%s16973_s13 + $0x1a0] ss:$16 sps:$4 sm:$0xff]   ;;  %v13334_v32 = vld [vmem:[%s16973_s13 + $0x1a8] ss:$16 sps:$4 sm:$0xff]  }
 0xf51   : > { %6470 = vmatpush1.bf16.msra.mxu0 %v13241_v14  ;;  %6511 = vmatpush1.bf16.msra.mxu1 %v13244_v52  ;;  %v13339_v14 = vld [vmem:[%s16973_s13 + $0x1c4] ss:$16 sps:$4 sm:$0xff]   ;;  %v13342_v52 = vld [vmem:[%s16973_s13 + $0x1cc] ss:$16 sps:$4 sm:$0xff]  }
 0xf52   : > { %6471 = vmatprep.subr.bf16.mxu0 %v13249_v13  ;;  %6512 = vmatprep.subr.bf16.mxu1 %v13252_v24  ;;  %v13337_v13 = vld [vmem:[%s16973_s13 + $0x1c0] ss:$16 sps:$4 sm:$0xff]   ;;  %v13340_v24 = vld [vmem:[%s16973_s13 + $0x1c8] ss:$16 sps:$4 sm:$0xff]  }
 0xf55   : > { %6472 = vmatpush1.bf16.msra.mxu0 %v13247_v49  ;;  %6513 = vmatpush1.bf16.msra.mxu1 %v13250_v29  ;;  %v13345_v49 = vld [vmem:[%s16973_s13 + $0x1e4] ss:$16 sps:$4 sm:$0xff]   ;;  %v13348_v29 = vld [vmem:[%s16973_s13 + $0x1ec] ss:$16 sps:$4 sm:$0xff]  }
 0xf56   : > { %6843 = vmatprep.subr.bf16.mxu0 %v13255_v60  ;;  %6884 = vmatprep.subr.bf16.mxu1 %v13258_v10  ;;  %v13343_v60 = vld [vmem:[%s16973_s13 + $0x1e0] ss:$16 sps:$4 sm:$0xff]   ;;  %v13346_v10 = vld [vmem:[%s16973_s13 + $0x1e8] ss:$16 sps:$4 sm:$0xff]  }
 0xf58   : > { %6474 = vmatmul.mubr.bf16.vlgmr.msra.gmra.mrb[48].mxu0 %v16179_v0  ;;  %6515 = vmatmul.mubr.bf16.vlgmr.msra.gmra.mrb[48].mxu1 %v16181_v21  ;;  %v13267_v0 = vld [vmem:[%s16973_s13 + $0x44] ss:$16 sps:$4 sm:$0xff]   ;;  %v13270_v21 = vld [vmem:[%s16973_s13 + $0x4c] ss:$16 sps:$4 sm:$0xff]  }
 0xf59   : > { %6844 = vmatpush1.bf16.msra.mxu0 %v13253_v6  ;;  %6875 = vmatprep.mubr.bf16.mxu0 %v15734_v44  ;;  %v16974_v6 = vld [vmem:[#allocation47_spill] sm:$0xff] }
 0xf5a   : > { %6885 = vmatpush1.bf16.msra.mxu1 %v13256_v45  ;;  %6916 = vmatprep.mubr.bf16.mxu1 %v15734_v44  ;;  %v13268_v44 = vld [vmem:[%s16973_s13 + $0x48] ss:$16 sps:$4 sm:$0xff]   ;;  %v16975_v45 = vld [vmem:[#allocation71_spill] sm:$0xff] }
 0xf5b   : > { %6845 = vmatprep.subr.bf16.mxu0 %v13261_v55  ;;  %6886 = vmatprep.subr.bf16.mxu1 %v13264_v51  ;;  %v16976_v55 = vld [vmem:[#allocation32_spill] sm:$0xff]  ;;  %v16977_v51 = vld [vmem:[#allocation51_spill] sm:$0xff] }
 0xf5d   : > { %6846 = vmatpush1.bf16.msra.mxu0 %v13259_v4  ;;  %v16978_v4 = vld [vmem:[#allocation33_spill] sm:$0xff] }
 0xf5e   : > { %6887 = vmatpush1.bf16.msra.mxu1 %v13262_v7  ;;  %6847 = vmatprep.subr.bf16.mxu0 %v13267_v0  ;;  %v16979_v7 = vld [vmem:[#allocation52_spill] sm:$0xff]  ;;  %v16980_v0 = vld [vmem:[#allocation34_spill] sm:$0xff] }
 0xf5f   : > { %6888 = vmatprep.subr.bf16.mxu1 %v13270_v21  ;;  %v16981_v21 = vld [vmem:[#allocation53_spill] sm:$0xff] }
 0xf61   : > { %6848 = vmatpush1.bf16.msra.mxu0 %v13265_v61  ;;  %v16982_v61 = vld [vmem:[#allocation35_spill] sm:$0xff] }
 0xf62   : > { %6889 = vmatpush1.bf16.msra.mxu1 %v13268_v44  ;;  %6849 = vmatprep.subr.bf16.mxu0 %v13273_v34  ;;  %v16983_v44 = vld [vmem:[#allocation54_spill] sm:$0xff]  ;;  %v16984_v34 = vld [vmem:[#allocation36_spill] sm:$0xff] }
 0xf63   : > { %6890 = vmatprep.subr.bf16.mxu1 %v13276_v5  ;;  %v16985_v5 = vld [vmem:[#allocation55_spill] sm:$0xff] }
 0xf65   : > { %6850 = vmatpush1.bf16.msra.mxu0 %v13271_v15  ;;  %v16986_v15 = vld [vmem:[#allocation37_spill] sm:$0xff] }
 0xf66   : > { %6891 = vmatpush1.bf16.msra.mxu1 %v13274_v63  ;;  %6851 = vmatprep.subr.bf16.mxu0 %v13279_v22  ;;  %v16987_v63 = vld [vmem:[#allocation56_spill] sm:$0xff]  ;;  %v16988_v22 = vld [vmem:[#allocation38_spill] sm:$0xff] }
 0xf67   : > { %6892 = vmatprep.subr.bf16.mxu1 %v13282_v58  ;;  %v16989_v58 = vld [vmem:[#allocation57_spill] sm:$0xff] }
 0xf69   : > { %6852 = vmatpush1.bf16.msra.mxu0 %v13277_v54  ;;  %v16990_v54 = vld [vmem:[#allocation39_spill] sm:$0xff] }
 0xf6a   : > { %6893 = vmatpush1.bf16.msra.mxu1 %v13280_v50  ;;  %6853 = vmatprep.subr.bf16.mxu0 %v13285_v8  ;;  %v16991_v50 = vld [vmem:[#allocation58_spill] sm:$0xff]  ;;  %v16992_v8 = vld [vmem:[#allocation40_spill] sm:$0xff] }
 0xf6b   : > { %6894 = vmatprep.subr.bf16.mxu1 %v13288_v43  ;;  %v16993_v43 = vld [vmem:[#allocation59_spill] sm:$0xff] }
 0xf6d   : > { %6854 = vmatpush1.bf16.msra.mxu0 %v13283_v25  ;;  %v16994_v25 = vld [vmem:[#allocation41_spill] sm:$0xff] }
 0xf6e   : > { %6895 = vmatpush1.bf16.msra.mxu1 %v13286_v33  ;;  %6855 = vmatprep.subr.bf16.mxu0 %v13291_v11  ;;  %v16995_v33 = vld [vmem:[#allocation60_spill] sm:$0xff]  ;;  %v16996_v11 = vld [vmem:[#allocation42_spill] sm:$0xff] }
 0xf6f   : > { %6896 = vmatprep.subr.bf16.mxu1 %v13294_v37  ;;  %v16997_v37 = vld [vmem:[#allocation61_spill] sm:$0xff] }
 0xf71   : > { %6856 = vmatpush1.bf16.msra.mxu0 %v13289_v46  ;;  %v16998_v46 = vld [vmem:[#allocation43_spill] sm:$0xff] }
 0xf72   : > { %6897 = vmatpush1.bf16.msra.mxu1 %v13292_v2  ;;  %6857 = vmatprep.subr.bf16.mxu0 %v13297_v9  ;;  %v16999_v2 = vld [vmem:[#allocation62_spill] sm:$0xff]  ;;  %v17000_v9 = vld [vmem:[#allocation44_spill] sm:$0xff] }
 0xf73   : > { %6898 = vmatprep.subr.bf16.mxu1 %v13300_v53  ;;  %v17001_v53 = vld [vmem:[#allocation63_spill] sm:$0xff] }
 0xf75   : > { %6858 = vmatpush1.bf16.msra.mxu0 %v13295_v17  ;;  %v17002_v17 = vld [vmem:[#allocation45_spill] sm:$0xff] }
 0xf76   : > { %6899 = vmatpush1.bf16.msra.mxu1 %v13298_v42  ;;  %6859 = vmatprep.subr.bf16.mxu0 %v13303_v28  ;;  %v17003_v42 = vld [vmem:[#allocation65_spill] sm:$0xff]  ;;  %v17004_v28 = vld [vmem:[#allocation46_spill] sm:$0xff] }
 0xf77   : > { %6900 = vmatprep.subr.bf16.mxu1 %v13306_v20  ;;  %v17005_v20 = vld [vmem:[#allocation66_spill] sm:$0xff] }
 0xf79   : > { %6860 = vmatpush1.bf16.msra.mxu0 %v13301_v26  ;;  %v16415_v26 = vld [vmem:[#allocation18 + $0x8] sm:$0xff] }
 0xf7a   : > { %6901 = vmatpush1.bf16.msra.mxu1 %v13304_v3  ;;  %6861 = vmatprep.subr.bf16.mxu0 %v13309_v16 }
 0xf7b   : > { %6902 = vmatprep.subr.bf16.mxu1 %v13312_v19 }
 0xf7d   : > { %6862 = vmatpush1.bf16.msra.mxu0 %v13307_v30 }
 0xf7e   : > { %6903 = vmatpush1.bf16.msra.mxu1 %v13310_v31  ;;  %6863 = vmatprep.subr.bf16.mxu0 %v13315_v57 }
 0xf7f   : > { %6904 = vmatprep.subr.bf16.mxu1 %v13318_v59 }
 0xf81   : > { %6864 = vmatpush1.bf16.msra.mxu0 %v13313_v39 }
 0xf82   : > { %6905 = vmatpush1.bf16.msra.mxu1 %v13316_v56  ;;  %6865 = vmatprep.subr.bf16.mxu0 %v13321_v47 }
 0xf83   : > { %6906 = vmatprep.subr.bf16.mxu1 %v13324_v35 }
 0xf85   : > { %6866 = vmatpush1.bf16.msra.mxu0 %v13319_v41 }
 0xf86   : > { %6907 = vmatpush1.bf16.msra.mxu1 %v13322_v1  ;;  %6867 = vmatprep.subr.bf16.mxu0 %v13327_v48 }
 0xf87   : > { %6908 = vmatprep.subr.bf16.mxu1 %v13330_v36 }
 0xf89   : > { %6868 = vmatpush1.bf16.msra.mxu0 %v13325_v27 }
 0xf8a   : > { %6909 = vmatpush1.bf16.msra.mxu1 %v13328_v38  ;;  %6869 = vmatprep.subr.bf16.mxu0 %v13333_v18 }
 0xf8b   : > { %6910 = vmatprep.subr.bf16.mxu1 %v13336_v23 }
 0xf8d   : > { %6870 = vmatpush1.bf16.msra.mxu0 %v13331_v40 }
 0xf8e   : > { %6911 = vmatpush1.bf16.msra.mxu1 %v13334_v32  ;;  %6871 = vmatprep.subr.bf16.mxu0 %v13339_v14  ;;  %v6925_v32 = vld [vmem:[%s17006_s22] sm:$0xf] }
 0xf8f   : > { %6912 = vmatprep.subr.bf16.mxu1 %v13342_v52  ;;  %v17007_v52 = vld [vmem:[#allocation48_spill] sm:$0xff] }
 0xf91   : > { %6872 = vmatpush1.bf16.msra.mxu0 %v13337_v13  ;;  %v6934_v13 = vrot.slane %v6925_v32, %v17007_v52 }
 0xf92   : > { %6913 = vmatpush1.bf16.msra.mxu1 %v13340_v24  ;;  %6873 = vmatprep.subr.bf16.mxu0 %v13345_v49  ;;  %v17008_v49 = vld [vmem:[#allocation49_spill] sm:$0xff] }
 0xf93   : > { %6914 = vmatprep.subr.bf16.mxu1 %v13348_v29  ;;  %v6930_v29 = vrot.slane %v6925_v32, %v17008_v49 }
 0xf95   : > { %6874 = vmatpush1.bf16.msra.mxu0 %v13343_v60 }
 0xf96   : > { %6915 = vmatpush1.bf16.msra.mxu1 %v13346_v10  ;;  %12450 = vmatprep.subr.bf16.mxu0 %v15017_v12 }
 0xf97   : > { %12482 = vmatprep.subr.bf16.mxu1 %v16974_v6 }
 0xf98   : > { %6876 = vmatmul.mubr.bf16.vlgmr.msra.gmra.mrb[52].mxu0 %v16975_v45 }
 0xf99   : > { %6917 = vmatmul.mubr.bf16.vlgmr.msra.gmra.mrb[52].mxu1 %v16975_v45  ;;  %12452 = vmatpush3.bf16.msra.mxu0 %v16976_v55  ;;  %v17009_v45 = vld [vmem:[#allocation50_spill] sm:$0xff] }
 0xf9a   : > { %12484 = vmatpush3.bf16.msra.mxu1 %v16977_v51  ;;  %12454 = vmatprep.subr.bf16.mxu0 %v16978_v4 }
 0xf9b   : > { %12486 = vmatprep.subr.bf16.mxu1 %v16979_v7 }
 0xf9d   : > { %12456 = vmatpush3.bf16.msra.mxu0 %v16980_v0 }
 0xf9e   : > { %12488 = vmatpush3.bf16.msra.mxu1 %v16981_v21  ;;  %12458 = vmatprep.subr.bf16.mxu0 %v16982_v61 }
 0xf9f   : > { %12490 = vmatprep.subr.bf16.mxu1 %v16983_v44 }
 0xfa1   : > { %12460 = vmatpush3.bf16.msra.mxu0 %v16984_v34 }
 0xfa2   : > { %12492 = vmatpush3.bf16.msra.mxu1 %v16985_v5  ;;  %12462 = vmatprep.subr.bf16.mxu0 %v16986_v15 }
 0xfa3   : > { %12494 = vmatprep.subr.bf16.mxu1 %v16987_v63 }
 0xfa5   : > { %12464 = vmatpush3.bf16.msra.mxu0 %v16988_v22 }
 0xfa6   : > { %12496 = vmatpush3.bf16.msra.mxu1 %v16989_v58  ;;  %12466 = vmatprep.subr.bf16.mxu0 %v16990_v54 }
 0xfa7   : > { %12498 = vmatprep.subr.bf16.mxu1 %v16991_v50 }
 0xfa9   : > { %12468 = vmatpush3.bf16.msra.mxu0 %v16992_v8 }
 0xfaa   : > { %12500 = vmatpush3.bf16.msra.mxu1 %v16993_v43  ;;  %12470 = vmatprep.subr.bf16.mxu0 %v16994_v25 }
 0xfab   : > { %12502 = vmatprep.subr.bf16.mxu1 %v16995_v33 }
 0xfad   : > { %12472 = vmatpush3.bf16.msra.mxu0 %v16996_v11 }
 0xfae   : > { %12504 = vmatpush3.bf16.msra.mxu1 %v16997_v37  ;;  %12474 = vmatprep.subr.bf16.mxu0 %v16998_v46 }
 0xfaf   : > { %12506 = vmatprep.subr.bf16.mxu1 %v16999_v2 }
 0xfb1   : > { %12476 = vmatpush3.bf16.msra.mxu0 %v17000_v9 }
 0xfb2   : > { %12508 = vmatpush3.bf16.msra.mxu1 %v17001_v53  ;;  %12478 = vmatprep.subr.bf16.mxu0 %v17002_v17 }
 0xfb3   : > { %12510 = vmatprep.subr.bf16.mxu1 %v17003_v42 }
 0xfb5   : > { %12480 = vmatpush3.bf16.msra.mxu0 %v17004_v28 }
 0xfb6   : > { %12512 = vmatpush3.bf16.msra.mxu1 %v17005_v20  ;;  %7094 = vmatprep.subr.mxu0 %v16415_v26 }
 0xfb7   : > { %12514 = vmatprep.subr.bf16.mxu1 %v15017_v12 }
 0xfeb   : > { %v6393_v3 = vpop.f32.mrb[44].mxu0  ;;  %v6434_v16 = vpop.f32.mrb[44].mxu1 }
 0xfec   : > { %v6435_v19 = vadd.f32 %v6434_v16, %v6393_v3  ;;  %v6395_v30 = vpop.f32.mrb[45].mxu0  ;;  %v6436_v31 = vpop.f32.mrb[45].mxu1  ;;  %v6942_v3 = vrot.slane %v6925_v32, %v17009_v45 }
 0xfed   : > { %v6437_v57 = vadd.f32 %v6436_v31, %v6395_v30  ;;  %v6397_v59 = vpop.f32.mrb[46].mxu0  ;;  %v6438_v39 = vpop.f32.mrb[46].mxu1  ;;  %v17010_v30 = vld [vmem:[#allocation64_spill] sm:$0xff] }
 0xfee   : > { %v6398_v56 = vpop.f32.mrb[47].mxu0  ;;  %v6439_v47 = vpop.f32.mrb[47].mxu1  ;;  %v6938_v31 = vrot.slane %v6925_v32, %v17010_v30 }
0x102b   : > { %v6475_v35 = vpop.f32.mrb[48].mxu0  ;;  %v6516_v41 = vpop.f32.mrb[48].mxu1 }
0x102c   : > { %v6517_v1 = vadd.f32 %v6516_v41, %v6475_v35  ;;  %v6477_v48 = vpop.f32.mrb[49].mxu0  ;;  %v6518_v36 = vpop.f32.mrb[49].mxu1 }
0x102d   : > { %v6519_v27 = vadd.f32 %v6518_v36, %v6477_v48  ;;  %v6479_v38 = vpop.f32.mrb[50].mxu0  ;;  %v6520_v18 = vpop.f32.mrb[50].mxu1 }
0x102e   : > { %v6480_v23 = vpop.f32.mrb[51].mxu0  ;;  %v6521_v40 = vpop.f32.mrb[51].mxu1 }
0x106b   : > { %v6877_v14 = vpop.f32.mrb[52].mxu0 }
0x106c   : > { %v6878_v24 = vadd.f32 %v6877_v14, %v6435_v19  ;;  %v6918_v60 = vpop.f32.mrb[52].mxu1  ;;  %v6879_v10 = vpop.f32.mrb[53].mxu0 }
0x106d   : > { %v6919_v16 = vadd.f32 %v6918_v60, %v6517_v1  ;;  %v6880_v59 = vadd.f32 %v6879_v10, %v6437_v57  ;;  %v6920_v39 = vpop.f32.mrb[53].mxu1  ;;  %v6881_v56 = vpop.f32.mrb[54].mxu0  ;;  %v16429_v1 = vld [vmem:[#allocation18] sm:$0xff]  ;;  %v16433_v57 = vld [vmem:[#allocation18 + $0x18] sm:$0xff] }
0x106e   : > { %v6921_v47 = vadd.f32 %v6920_v39, %v6519_v27  ;;  %v6922_v35 = vpop.f32.mrb[54].mxu1  ;;  %v6882_v41 = vpop.f32.mrb[55].mxu0  ;;  %v6947_v38 = vadd.f32 %v6930_v29, %v6878_v24  ;;  %v16453_v29 = vld [vmem:[#allocation18 + $0x10] sm:$0xff] }
0x106f   : > { %v6948_v48 = vadd.f32 %v6934_v13, %v6880_v59  ;;  %v6923_v36 = vpop.f32.mrb[55].mxu1  ;;  %v6949_v19 = vadd.f32 %v6938_v31, %v6919_v16 }
0x1070   : > { %v16426_v18 = vadd.f32 %v6942_v3, %v6921_v47  ;;  %v13351_v36 = vld [vmem:[#allocation9 + $0x4] ss:$16 sps:$4 sm:$0xff]  }
0x1071   : > { %7015 = vmatprep.mubr.f32.mxu0 %v6948_v48 }
0x1072   : > { %7085 = vmatprep.mubr.f32.mxu1 %v16426_v18  ;;  %7016 = vmatmul.mubr.f32.vlgmr.msra.gmra.mrb[42].mxu0 %v6947_v38 }
0x1073   : > { %7086 = vmatmul.mubr.f32.vlgmr.msra.gmra.mrb[42].mxu1 %v6949_v19  ;;  %7095 = vmatpush1.msra.mxu0 %v16429_v1 }
0x1074   : > { %7158 = vmatprep.mubr.f32.mxu0 %v16964_v62  ;;  %7165 = vmatprep.subr.mxu0 %v16433_v57 }
0x1075   : > { %12516 = vmatpush3.bf16.msra.mxu1 %v16976_v55 }
0x1076   : > { %12518 = vmatprep.subr.bf16.mxu1 %v16978_v4 }
0x1079   : > { %12520 = vmatpush3.bf16.msra.mxu1 %v16980_v0 }
0x107a   : > { %12522 = vmatprep.subr.bf16.mxu1 %v16982_v61 }
0x107d   : > { %12524 = vmatpush3.bf16.msra.mxu1 %v16984_v34 }
0x107e   : > { %12526 = vmatprep.subr.bf16.mxu1 %v16986_v15 }
0x1081   : > { %12528 = vmatpush3.bf16.msra.mxu1 %v16988_v22 }
0x1082   : > { %12530 = vmatprep.subr.bf16.mxu1 %v16990_v54 }
0x1085   : > { %12532 = vmatpush3.bf16.msra.mxu1 %v16992_v8 }
0x1086   : > { %12534 = vmatprep.subr.bf16.mxu1 %v16994_v25 }
0x1089   : > { %12536 = vmatpush3.bf16.msra.mxu1 %v16996_v11 }
0x108a   : > { %12538 = vmatprep.subr.bf16.mxu1 %v16998_v46 }
0x108d   : > { %12540 = vmatpush3.bf16.msra.mxu1 %v17000_v9 }
0x108e   : > { %12542 = vmatprep.subr.bf16.mxu1 %v17002_v17 }
0x1091   : > { %12544 = vmatpush3.bf16.msra.mxu1 %v17004_v28 }
0x1092   : > { %7388 = vmatprep.subr.mxu1 %v16415_v26 }
0x1145   : > { %v11841_v27 = vpop.f32.mrb[42].mxu0 }
0x1146   : > { %v11876_v23 = vpop.f32.mrb[42].mxu1  ;;  %v11842_v40 = vpop.f32.mrb[43].mxu0 }
0x1147   : > { %v11843_v32 = vadd.f32 %v11842_v40, %v11841_v27  ;;  %v11877_v14 = vpop.f32.mrb[43].mxu1 }
0x1148   : > { %v11878_v13 = vadd.f32 %v11877_v14, %v11876_v23 }
0x114a   : > { %v7088_v24 = vadd.f32 %v11878_v13, %v11843_v32 }
0x114c   : > { %11156 = vmatmul.mubr.msk.f32.vlgmr.msra.gmra.mrb[56].mxu0 %vm2103_vm0, %v7088_v24 }
0x114d   : > { %7166 = vmatpush1.msra.mxu0 %v16453_v29  ;;  %7229 = vmatprep.mubr.f32.mxu0 %v16964_v62 }
0x114e   : > { %12546 = vmatprep.subr.bf16.mxu0 %v16974_v6 }
0x1150   : > { %11157 = vmatmul.mubr.msk.f32.vlgmr.msra.gmra.mrb[58].mxu0 %vm2103_vm0, %v7088_v24  ;;  %v13349_v24 = vld [vmem:[#allocation9] ss:$16 sps:$4 sm:$0xff]  }
0x1151   : > { %12548 = vmatpush3.bf16.msra.mxu0 %v16977_v51 }
0x1152   : > { %12550 = vmatprep.subr.bf16.mxu0 %v16979_v7 }
0x1155   : > { %12552 = vmatpush3.bf16.msra.mxu0 %v16981_v21 }
0x1156   : > { %12554 = vmatprep.subr.bf16.mxu0 %v16983_v44 }
0x1159   : > { %12556 = vmatpush3.bf16.msra.mxu0 %v16985_v5 }
0x115a   : > { %12558 = vmatprep.subr.bf16.mxu0 %v16987_v63 }
0x115d   : > { %12560 = vmatpush3.bf16.msra.mxu0 %v16989_v58 }
0x115e   : > { %12562 = vmatprep.subr.bf16.mxu0 %v16991_v50 }
0x1161   : > { %12564 = vmatpush3.bf16.msra.mxu0 %v16993_v43 }
0x1162   : > { %12566 = vmatprep.subr.bf16.mxu0 %v16995_v33 }
0x1165   : > { %12568 = vmatpush3.bf16.msra.mxu0 %v16997_v37 }
0x1166   : > { %12570 = vmatprep.subr.bf16.mxu0 %v16999_v2 }
0x1169   : > { %12572 = vmatpush3.bf16.msra.mxu0 %v17001_v53 }
0x116a   : > { %12574 = vmatprep.subr.bf16.mxu0 %v17003_v42 }
0x116d   : > { %12576 = vmatpush3.bf16.msra.mxu0 %v17005_v20 }
0x116e   : > { %7459 = vmatprep.subr.mxu0 %v16433_v57 }
0x121f   : > { %v7160_v60 = vpop.f32.mrb[56].mxu0 }
0x1220   : > { %v16475_v10 = vsub.f32 %v6947_v38, %v7160_v60  ;;  %v7162_v3 = vpop.f32.mrb[57].mxu0  ;;  %v13354_v38 = vld [vmem:[#allocation9 + $0xc] ss:$16 sps:$4 sm:$0xff]   ;;  %v13352_v60 = vld [vmem:[#allocation9 + $0x8] ss:$16 sps:$4 sm:$0xff]  }
0x1221   : > { %v16477_v16 = vsub.f32 %v6948_v48, %v7162_v3  ;;  %v13357_v3 = vld [vmem:[#allocation9 + $0x24] ss:$16 sps:$4 sm:$0xff]  }
0x1222   : > { %v7240_v39 = vmul.f32 %v16475_v10, %v16475_v10 }
0x1223   : > { %v7241_v31 = vmul.f32 %v16477_v16, %v16477_v16  ;;  %v7231_v59 = vpop.f32.mrb[58].mxu0 }
0x1224   : > { %v16483_v56 = vsub.f32 %v6949_v19, %v7231_v59  ;;  %v7233_v47 = vpop.f32.mrb[59].mxu0 }
0x1225   : > { %v16486_v35 = vsub.f32 %v16426_v18, %v7233_v47  ;;  %7308 = vmatprep.mubr.f32.mxu1 %v7241_v31  ;;  %v13360_v31 = vld [vmem:[#allocation9 + $0x2c] ss:$16 sps:$4 sm:$0xff]   ;;  %v13358_v47 = vld [vmem:[#allocation9 + $0x28] ss:$16 sps:$4 sm:$0xff]  }
0x1226   : > { %7309 = vmatmul.mubr.f32.vlgmr.msra.gmra.mrb[56].mxu1 %v7240_v39  ;;  %v7242_v48 = vmul.f32 %v16483_v56, %v16483_v56  ;;  %v13355_v39 = vld [vmem:[#allocation9 + $0x20] ss:$16 sps:$4 sm:$0xff]  }
0x1227   : > { %v7243_v41 = vmul.f32 %v16486_v35, %v16486_v35  ;;  %7389 = vmatpush1.msra.mxu1 %v16429_v1  ;;  %7452 = vmatprep.mubr.f32.mxu1 %v16964_v62 }
0x1228   : > { %8342 = vmatprep.subr.bf16.mxu1 %v13351_v36  ;;  %v13361_v36 = vld [vmem:[#allocation9 + $0x40] ss:$16 sps:$4 sm:$0xff]  }
0x1229   : > { %7378 = vmatprep.mubr.f32.mxu0 %v7243_v41  ;;  %v13363_v41 = vld [vmem:[#allocation9 + $0x44] ss:$16 sps:$4 sm:$0xff]  }
0x122a   : > { %7379 = vmatmul.mubr.f32.vlgmr.msra.gmra.mrb[60].mxu0 %v7242_v48  ;;  %v13366_v48 = vld [vmem:[#allocation9 + $0x4c] ss:$16 sps:$4 sm:$0xff]  }
0x122b   : > { %7460 = vmatpush1.msra.mxu0 %v16453_v29  ;;  %7523 = vmatprep.mubr.f32.mxu0 %v16964_v62 }
0x122c   : > { %8424 = vmatprep.subr.bf16.mxu0 %v13354_v38  ;;  %v13364_v38 = vld [vmem:[#allocation9 + $0x48] ss:$16 sps:$4 sm:$0xff]  }
0x12f9   : > { %v11911_v18 = vpop.f32.mrb[56].mxu1 }
0x12fa   : > { %v11912_v19 = vpop.f32.mrb[57].mxu1 }
0x12fb   : > { %v11913_v27 = vadd.f32 %v11912_v19, %v11911_v18  ;;  %v13369_v18 = vld [vmem:[#allocation9 + $0x64] ss:$16 sps:$4 sm:$0xff]   ;;  %v13372_v19 = vld [vmem:[#allocation9 + $0x6c] ss:$16 sps:$4 sm:$0xff]  }
0x12fd   : > { %v11946_v23 = vpop.f32.mrb[60].mxu0  ;;  %v7311_v32 = vadd.f32 1e-05, %v11913_v27  ;;  %v13367_v27 = vld [vmem:[#allocation9 + $0x60] ss:$16 sps:$4 sm:$0xff]  }
0x12fe   : > { %v11947_v40 = vpop.f32.mrb[61].mxu0 }
0x12ff   : > { %v11948_v14 = vadd.f32 %v11947_v40, %v11946_v23  ;;  %v13370_v23 = vld [vmem:[#allocation9 + $0x68] ss:$16 sps:$4 sm:$0xff]   ;;  %v13375_v40 = vld [vmem:[#allocation9 + $0x84] ss:$16 sps:$4 sm:$0xff]  }
0x1301   : > { %v7381_v13 = vadd.f32 %v11948_v14, %v7311_v32  ;;  %v13378_v32 = vld [vmem:[#allocation9 + $0x8c] ss:$16 sps:$4 sm:$0xff]   ;;  %v13373_v14 = vld [vmem:[#allocation9 + $0x80] ss:$16 sps:$4 sm:$0xff]  }
0x1303   : > { %13787 = vrsqrt.f32 %v7381_v13  ;;  %v13376_v13 = vld [vmem:[#allocation9 + $0x88] ss:$16 sps:$4 sm:$0xff]  }
0x130d   : > { %v13788_v59 = vpop.eup %13787 }
0x130e   : > { %11158 = vmatmul.mubr.msk.f32.vlgmr.msra.gmra.mrb[58].mxu1 %vm2103_vm0, %v13788_v59  ;;  %11159 = vmatmul.mubr.msk.f32.vlgmr.msra.gmra.mrb[62].mxu0 %vm2103_vm0, %v13788_v59  ;;  %v13387_v59 = vld [vmem:[#allocation9 + $0xc4] ss:$16 sps:$4 sm:$0xff]  }
0x130f   : > { %8343 = vmatpush1.bf16.msra.mxu1 %v13349_v24  ;;  %8425 = vmatpush1.bf16.msra.mxu0 %v13352_v60  ;;  %v13381_v24 = vld [vmem:[#allocation9 + $0xa4] ss:$16 sps:$4 sm:$0xff]   ;;  %v13384_v60 = vld [vmem:[#allocation9 + $0xac] ss:$16 sps:$4 sm:$0xff]  }
0x1310   : > { %8344 = vmatprep.subr.bf16.mxu1 %v13357_v3  ;;  %8426 = vmatprep.subr.bf16.mxu0 %v13360_v31  ;;  %v13379_v3 = vld [vmem:[#allocation9 + $0xa0] ss:$16 sps:$4 sm:$0xff]   ;;  %v13382_v31 = vld [vmem:[#allocation9 + $0xa8] ss:$16 sps:$4 sm:$0xff]  }
0x1313   : > { %8345 = vmatpush1.bf16.msra.mxu1 %v13355_v39  ;;  %8427 = vmatpush1.bf16.msra.mxu0 %v13358_v47  ;;  %v13390_v39 = vld [vmem:[#allocation9 + $0xcc] ss:$16 sps:$4 sm:$0xff]   ;;  %v13385_v47 = vld [vmem:[#allocation9 + $0xc0] ss:$16 sps:$4 sm:$0xff]  }
0x1314   : > { %8346 = vmatprep.subr.bf16.mxu1 %v13363_v41  ;;  %8428 = vmatprep.subr.bf16.mxu0 %v13366_v48  ;;  %v13388_v41 = vld [vmem:[#allocation9 + $0xc8] ss:$16 sps:$4 sm:$0xff]   ;;  %v13393_v48 = vld [vmem:[#allocation9 + $0xe4] ss:$16 sps:$4 sm:$0xff]  }
0x1317   : > { %8347 = vmatpush1.bf16.msra.mxu1 %v13361_v36  ;;  %8429 = vmatpush1.bf16.msra.mxu0 %v13364_v38  ;;  %v13396_v36 = vld [vmem:[#allocation9 + $0xec] ss:$16 sps:$4 sm:$0xff]   ;;  %v13391_v38 = vld [vmem:[#allocation9 + $0xe0] ss:$16 sps:$4 sm:$0xff]  }
0x1318   : > { %8348 = vmatprep.subr.bf16.mxu1 %v13369_v18  ;;  %8430 = vmatprep.subr.bf16.mxu0 %v13372_v19  ;;  %v13394_v18 = vld [vmem:[#allocation9 + $0xe8] ss:$16 sps:$4 sm:$0xff]   ;;  %v13399_v19 = vld [vmem:[#allocation9 + $0x104] ss:$16 sps:$4 sm:$0xff]  }
0x131b   : > { %8349 = vmatpush1.bf16.msra.mxu1 %v13367_v27  ;;  %8431 = vmatpush1.bf16.msra.mxu0 %v13370_v23  ;;  %v13402_v27 = vld [vmem:[#allocation9 + $0x10c] ss:$16 sps:$4 sm:$0xff]   ;;  %v13397_v23 = vld [vmem:[#allocation9 + $0x100] ss:$16 sps:$4 sm:$0xff]  }
0x131c   : > { %8350 = vmatprep.subr.bf16.mxu1 %v13375_v40  ;;  %8432 = vmatprep.subr.bf16.mxu0 %v13378_v32  ;;  %v13400_v40 = vld [vmem:[#allocation9 + $0x108] ss:$16 sps:$4 sm:$0xff]   ;;  %v13405_v32 = vld [vmem:[#allocation9 + $0x124] ss:$16 sps:$4 sm:$0xff]  }
0x131f   : > { %8351 = vmatpush1.bf16.msra.mxu1 %v13373_v14  ;;  %8433 = vmatpush1.bf16.msra.mxu0 %v13376_v13  ;;  %v13408_v14 = vld [vmem:[#allocation9 + $0x12c] ss:$16 sps:$4 sm:$0xff]   ;;  %v13403_v13 = vld [vmem:[#allocation9 + $0x120] ss:$16 sps:$4 sm:$0xff]  }
0x1320   : > { %8352 = vmatprep.subr.bf16.mxu1 %v13381_v24  ;;  %8434 = vmatprep.subr.bf16.mxu0 %v13384_v60  ;;  %v13406_v24 = vld [vmem:[#allocation9 + $0x128] ss:$16 sps:$4 sm:$0xff]   ;;  %v13411_v60 = vld [vmem:[#allocation9 + $0x144] ss:$16 sps:$4 sm:$0xff]  }
0x1323   : > { %8353 = vmatpush1.bf16.msra.mxu1 %v13379_v3  ;;  %8435 = vmatpush1.bf16.msra.mxu0 %v13382_v31  ;;  %v13414_v3 = vld [vmem:[#allocation9 + $0x14c] ss:$16 sps:$4 sm:$0xff]   ;;  %v13409_v31 = vld [vmem:[#allocation9 + $0x140] ss:$16 sps:$4 sm:$0xff]  }
0x1324   : > { %8354 = vmatprep.subr.bf16.mxu1 %v13387_v59  ;;  %8436 = vmatprep.subr.bf16.mxu0 %v13390_v39  ;;  %v13412_v59 = vld [vmem:[#allocation9 + $0x148] ss:$16 sps:$4 sm:$0xff]   ;;  %v13417_v39 = vld [vmem:[#allocation9 + $0x164] ss:$16 sps:$4 sm:$0xff]  }
0x1327   : > { %8355 = vmatpush1.bf16.msra.mxu1 %v13385_v47  ;;  %8437 = vmatpush1.bf16.msra.mxu0 %v13388_v41  ;;  %v13420_v47 = vld [vmem:[#allocation9 + $0x16c] ss:$16 sps:$4 sm:$0xff]   ;;  %v13415_v41 = vld [vmem:[#allocation9 + $0x160] ss:$16 sps:$4 sm:$0xff]  }
0x1328   : > { %8356 = vmatprep.subr.bf16.mxu1 %v13393_v48  ;;  %8438 = vmatprep.subr.bf16.mxu0 %v13396_v36  ;;  %v13418_v48 = vld [vmem:[#allocation9 + $0x168] ss:$16 sps:$4 sm:$0xff]   ;;  %v13423_v36 = vld [vmem:[#allocation9 + $0x184] ss:$16 sps:$4 sm:$0xff]  }
0x132b   : > { %8357 = vmatpush1.bf16.msra.mxu1 %v13391_v38  ;;  %8439 = vmatpush1.bf16.msra.mxu0 %v13394_v18  ;;  %v13426_v38 = vld [vmem:[#allocation9 + $0x18c] ss:$16 sps:$4 sm:$0xff]   ;;  %v13421_v18 = vld [vmem:[#allocation9 + $0x180] ss:$16 sps:$4 sm:$0xff]  }
0x132c   : > { %8358 = vmatprep.subr.bf16.mxu1 %v13399_v19  ;;  %8440 = vmatprep.subr.bf16.mxu0 %v13402_v27  ;;  %v13424_v19 = vld [vmem:[#allocation9 + $0x188] ss:$16 sps:$4 sm:$0xff]   ;;  %v13429_v27 = vld [vmem:[#allocation9 + $0x1a4] ss:$16 sps:$4 sm:$0xff]  }
0x132f   : > { %8359 = vmatpush1.bf16.msra.mxu1 %v13397_v23  ;;  %8441 = vmatpush1.bf16.msra.mxu0 %v13400_v40  ;;  %v13432_v23 = vld [vmem:[#allocation9 + $0x1ac] ss:$16 sps:$4 sm:$0xff]   ;;  %v13427_v40 = vld [vmem:[#allocation9 + $0x1a0] ss:$16 sps:$4 sm:$0xff]  }
0x1330   : > { %8360 = vmatprep.subr.bf16.mxu1 %v13405_v32  ;;  %8442 = vmatprep.subr.bf16.mxu0 %v13408_v14  ;;  %v13430_v32 = vld [vmem:[#allocation9 + $0x1a8] ss:$16 sps:$4 sm:$0xff]   ;;  %v13435_v14 = vld [vmem:[#allocation9 + $0x1c4] ss:$16 sps:$4 sm:$0xff]  }
0x1333   : > { %8361 = vmatpush1.bf16.msra.mxu1 %v13403_v13  ;;  %8443 = vmatpush1.bf16.msra.mxu0 %v13406_v24  ;;  %v13438_v13 = vld [vmem:[#allocation9 + $0x1cc] ss:$16 sps:$4 sm:$0xff]   ;;  %v13433_v24 = vld [vmem:[#allocation9 + $0x1c0] ss:$16 sps:$4 sm:$0xff]  }
0x1334   : > { %8362 = vmatprep.subr.bf16.mxu1 %v13411_v60  ;;  %8444 = vmatprep.subr.bf16.mxu0 %v13414_v3  ;;  %v13436_v60 = vld [vmem:[#allocation9 + $0x1c8] ss:$16 sps:$4 sm:$0xff]   ;;  %v13441_v3 = vld [vmem:[#allocation9 + $0x1e4] ss:$16 sps:$4 sm:$0xff]  }
0x1337   : > { %8363 = vmatpush1.bf16.msra.mxu1 %v13409_v31  ;;  %8445 = vmatpush1.bf16.msra.mxu0 %v13412_v59  ;;  %v13444_v31 = vld [vmem:[#allocation9 + $0x1ec] ss:$16 sps:$4 sm:$0xff]   ;;  %v13439_v59 = vld [vmem:[#allocation9 + $0x1e0] ss:$16 sps:$4 sm:$0xff]  }
0x1338   : > { %8364 = vmatprep.subr.bf16.mxu1 %v13417_v39  ;;  %8446 = vmatprep.subr.bf16.mxu0 %v13420_v47  ;;  %v13442_v39 = vld [vmem:[#allocation9 + $0x1e8] ss:$16 sps:$4 sm:$0xff]   ;;  %v13447_v47 = vld [vmem:[#allocation9 + $0x204] ss:$16 sps:$4 sm:$0xff]  }
0x133b   : > { %8365 = vmatpush1.bf16.msra.mxu1 %v13415_v41  ;;  %8447 = vmatpush1.bf16.msra.mxu0 %v13418_v48  ;;  %v13450_v41 = vld [vmem:[#allocation9 + $0x20c] ss:$16 sps:$4 sm:$0xff]  }
0x133c   : > { %8366 = vmatprep.subr.bf16.mxu1 %v13423_v36  ;;  %8448 = vmatprep.subr.bf16.mxu0 %v13426_v38  ;;  %v7539_v36 = vstv %s11160_s1 }
0x133f   : > { %8367 = vmatpush1.bf16.msra.mxu1 %v13421_v18  ;;  %8449 = vmatpush1.bf16.msra.mxu0 %v13424_v19 }
0x1340   : > { %8368 = vmatprep.subr.bf16.mxu1 %v13429_v27  ;;  %8450 = vmatprep.subr.bf16.mxu0 %v13432_v23 }
0x1343   : > { %8369 = vmatpush1.bf16.msra.mxu1 %v13427_v40  ;;  %8451 = vmatpush1.bf16.msra.mxu0 %v13430_v32 }
0x1344   : > { %8370 = vmatprep.subr.bf16.mxu1 %v13435_v14  ;;  %8452 = vmatprep.subr.bf16.mxu0 %v13438_v13 }
0x1347   : > { %8371 = vmatpush1.bf16.msra.mxu1 %v13433_v24  ;;  %8453 = vmatpush1.bf16.msra.mxu0 %v13436_v60 }
0x1348   : > { %8372 = vmatprep.subr.bf16.mxu1 %v13441_v3  ;;  %8454 = vmatprep.subr.bf16.mxu0 %v13444_v31 }
0x134b   : > { %8373 = vmatpush1.bf16.msra.mxu1 %v13439_v59  ;;  %8455 = vmatpush1.bf16.msra.mxu0 %v13442_v39  ;;  %v13448_v59 = vld [vmem:[#allocation9 + $0x208] ss:$16 sps:$4 sm:$0xff]  }
0x134c   : > { %8383 = vmatprep.subr.bf16.mxu1 %v13447_v47  ;;  %8465 = vmatprep.subr.bf16.mxu0 %v13450_v41  ;;  %v13453_v47 = vld [vmem:[#allocation9 + $0x224] ss:$16 sps:$4 sm:$0xff]   ;;  %v13456_v41 = vld [vmem:[#allocation9 + $0x22c] ss:$16 sps:$4 sm:$0xff]  }
0x13e1   : > { %v7454_v48 = vpop.f32.mrb[58].mxu1  ;;  %v7525_v38 = vpop.f32.mrb[62].mxu0 }
0x13e2   : > { %v7530_v18 = vmul.f32 %v7454_v48, %v16475_v10  ;;  %v7532_v19 = vmul.f32 %v7525_v38, %v16483_v56  ;;  %v7456_v27 = vpop.f32.mrb[59].mxu1  ;;  %v7527_v23 = vpop.f32.mrb[63].mxu0  ;;  %v13454_v38 = vld [vmem:[#allocation9 + $0x228] ss:$16 sps:$4 sm:$0xff]  }
0x13e3   : > { %v7531_v40 = vmul.f32 %v7456_v27, %v16477_v16  ;;  %v7533_v32 = vmul.f32 %v7527_v23, %v16486_v35  ;;  %v13445_v16 = vld [vmem:[#allocation9 + $0x200] ss:$16 sps:$4 sm:$0xff]   ;;  %v13460_v23 = vld [vmem:[#allocation9 + $0x248] ss:$16 sps:$4 sm:$0xff]  }
0x13e4   : > { %vm7535_vm13 = vcmp.ge.f32.partialorder %v7530_v18, 0.0  ;;  %v7540_v14 = vmul.f32 %v7539_v36, %v7530_v18  ;;  %vm7537_vm14 = vcmp.ge.f32.partialorder %v7532_v19, 0.0  ;;  %v7542_v13 = vmul.f32 %v7539_v36, %v7532_v19  ;;  %v13457_v27 = vld [vmem:[#allocation9 + $0x240] ss:$16 sps:$4 sm:$0xff]  }
0x13e5   : > { %vm7536_vm15 = vcmp.ge.f32.partialorder %v7531_v40, 0.0  ;;  %v7541_v24 = vmul.f32 %v7539_v36, %v7531_v40  ;;  %vm7538_vm1 = vcmp.ge.f32.partialorder %v7533_v32, 0.0  ;;  %v7543_v60 = vmul.f32 %v7539_v36, %v7533_v32  ;;  %v13451_v36 = vld [vmem:[#allocation9 + $0x220] ss:$16 sps:$4 sm:$0xff]  }
0x13e6   : > { %v16502_v3 = vsel %vm7535_vm13, %v7530_v18, %v7540_v14  ;;  %v16504_v31 = vsel %vm7537_vm14, %v7532_v19, %v7542_v13  ;;  %v13459_v18 = vld [vmem:[#allocation9 + $0x244] ss:$16 sps:$4 sm:$0xff]   ;;  %v13462_v19 = vld [vmem:[#allocation9 + $0x24c] ss:$16 sps:$4 sm:$0xff]   ;;  %v13463_v14 = vld [vmem:[#allocation9 + $0x260] ss:$16 sps:$4 sm:$0xff]  }
0x13e7   : > { %v16506_v10 = vsel %vm7536_vm15, %v7531_v40, %v7541_v24  ;;  %v16510_v35 = vsel %vm7538_vm1, %v7533_v32, %v7543_v60  ;;  %v7548_v39 = vpack.c.bf16 %v16502_v3, %v16502_v3  ;;  %v13465_v40 = vld [vmem:[#allocation9 + $0x264] ss:$16 sps:$4 sm:$0xff]   ;;  %v13468_v32 = vld [vmem:[#allocation9 + $0x26c] ss:$16 sps:$4 sm:$0xff]   ;;  %v13466_v13 = vld [vmem:[#allocation9 + $0x268] ss:$16 sps:$4 sm:$0xff]  }
0x13e8   : > { %v7549_v56 = vpack.c.bf16 %v16506_v10, %v16506_v10  ;;  %v7551_v48 = vpack.c.bf16 %v16510_v35, %v16510_v35  ;;  %v13471_v24 = vld [vmem:[#allocation9 + $0x284] ss:$16 sps:$4 sm:$0xff]   ;;  %v13474_v60 = vld [vmem:[#allocation9 + $0x28c] ss:$16 sps:$4 sm:$0xff]  }
0x13ea   : > { %8374 = vmatprep.mubr.bf16.mxu1 %v7549_v56  ;;  %8456 = vmatprep.mubr.bf16.mxu0 %v7549_v56  ;;  %v13469_v56 = vld [vmem:[#allocation9 + $0x280] ss:$16 sps:$4 sm:$0xff]  }
0x13eb   : > { %8375 = vmatmul.mubr.bf16.vlgmr.msra.gmra.mrb[60].mxu1 %v7548_v39  ;;  %8457 = vmatmul.mubr.bf16.vlgmr.msra.gmra.mrb[64].mxu0 %v7548_v39  ;;  %v13480_v39 = vld [vmem:[#allocation9 + $0x2ac] ss:$16 sps:$4 sm:$0xff]  }
0x13ec   : > { %8384 = vmatpush1.bf16.msra.mxu1 %v13445_v16  ;;  %8466 = vmatpush1.bf16.msra.mxu0 %v13448_v59  ;;  %v13472_v16 = vld [vmem:[#allocation9 + $0x288] ss:$16 sps:$4 sm:$0xff]   ;;  %v13477_v59 = vld [vmem:[#allocation9 + $0x2a4] ss:$16 sps:$4 sm:$0xff]  }
0x13ed   : > { %8415 = vmatprep.mubr.bf16.mxu1 %v7551_v48  ;;  %8497 = vmatprep.mubr.bf16.mxu0 %v7551_v48  ;;  %v13483_v48 = vld [vmem:[#allocation9 + $0x2c4] ss:$16 sps:$4 sm:$0xff]  }
0x13ee   : > { %8385 = vmatprep.subr.bf16.mxu1 %v13453_v47  ;;  %8467 = vmatprep.subr.bf16.mxu0 %v13456_v41  ;;  %v13475_v47 = vld [vmem:[#allocation9 + $0x2a0] ss:$16 sps:$4 sm:$0xff]   ;;  %v13478_v41 = vld [vmem:[#allocation9 + $0x2a8] ss:$16 sps:$4 sm:$0xff]  }
0x13f0   : > { %8386 = vmatpush1.bf16.msra.mxu1 %v13451_v36  ;;  %8468 = vmatpush1.bf16.msra.mxu0 %v13454_v38  ;;  %v13486_v36 = vld [vmem:[#allocation9 + $0x2cc] ss:$16 sps:$4 sm:$0xff]   ;;  %v13481_v38 = vld [vmem:[#allocation9 + $0x2c0] ss:$16 sps:$4 sm:$0xff]  }
0x13f1   : > { %8387 = vmatprep.subr.bf16.mxu1 %v13459_v18  ;;  %8469 = vmatprep.subr.bf16.mxu0 %v13462_v19  ;;  %v13484_v18 = vld [vmem:[#allocation9 + $0x2c8] ss:$16 sps:$4 sm:$0xff]   ;;  %v13489_v19 = vld [vmem:[#allocation9 + $0x2e4] ss:$16 sps:$4 sm:$0xff]  }
0x13f4   : > { %8388 = vmatpush1.bf16.msra.mxu1 %v13457_v27  ;;  %8470 = vmatpush1.bf16.msra.mxu0 %v13460_v23  ;;  %v13492_v27 = vld [vmem:[#allocation9 + $0x2ec] ss:$16 sps:$4 sm:$0xff]   ;;  %v13487_v23 = vld [vmem:[#allocation9 + $0x2e0] ss:$16 sps:$4 sm:$0xff]  }
0x13f5   : > { %8389 = vmatprep.subr.bf16.mxu1 %v13465_v40  ;;  %8471 = vmatprep.subr.bf16.mxu0 %v13468_v32  ;;  %v13490_v40 = vld [vmem:[#allocation9 + $0x2e8] ss:$16 sps:$4 sm:$0xff]   ;;  %v13495_v32 = vld [vmem:[#allocation9 + $0x304] ss:$16 sps:$4 sm:$0xff]  }
0x13f8   : > { %8390 = vmatpush1.bf16.msra.mxu1 %v13463_v14  ;;  %8472 = vmatpush1.bf16.msra.mxu0 %v13466_v13  ;;  %v13498_v14 = vld [vmem:[#allocation9 + $0x30c] ss:$16 sps:$4 sm:$0xff]   ;;  %v13493_v13 = vld [vmem:[#allocation9 + $0x300] ss:$16 sps:$4 sm:$0xff]  }
0x13f9   : > { %8391 = vmatprep.subr.bf16.mxu1 %v13471_v24  ;;  %8473 = vmatprep.subr.bf16.mxu0 %v13474_v60  ;;  %v13496_v24 = vld [vmem:[#allocation9 + $0x308] ss:$16 sps:$4 sm:$0xff]   ;;  %v13501_v60 = vld [vmem:[#allocation9 + $0x324] ss:$16 sps:$4 sm:$0xff]  }
0x13fc   : > { %8392 = vmatpush1.bf16.msra.mxu1 %v13469_v56  ;;  %8474 = vmatpush1.bf16.msra.mxu0 %v13472_v16  ;;  %v13504_v56 = vld [vmem:[#allocation9 + $0x32c] ss:$16 sps:$4 sm:$0xff]   ;;  %v13499_v16 = vld [vmem:[#allocation9 + $0x320] ss:$16 sps:$4 sm:$0xff]  }
0x13fd   : > { %8393 = vmatprep.subr.bf16.mxu1 %v13477_v59  ;;  %8475 = vmatprep.subr.bf16.mxu0 %v13480_v39  ;;  %v13502_v59 = vld [vmem:[#allocation9 + $0x328] ss:$16 sps:$4 sm:$0xff]   ;;  %v13507_v39 = vld [vmem:[#allocation9 + $0x344] ss:$16 sps:$4 sm:$0xff]  }
0x1400   : > { %8394 = vmatpush1.bf16.msra.mxu1 %v13475_v47  ;;  %8476 = vmatpush1.bf16.msra.mxu0 %v13478_v41  ;;  %v13510_v47 = vld [vmem:[#allocation9 + $0x34c] ss:$16 sps:$4 sm:$0xff]   ;;  %v13505_v41 = vld [vmem:[#allocation9 + $0x340] ss:$16 sps:$4 sm:$0xff]  }
0x1401   : > { %8395 = vmatprep.subr.bf16.mxu1 %v13483_v48  ;;  %8477 = vmatprep.subr.bf16.mxu0 %v13486_v36  ;;  %v13508_v48 = vld [vmem:[#allocation9 + $0x348] ss:$16 sps:$4 sm:$0xff]   ;;  %v13513_v36 = vld [vmem:[#allocation9 + $0x364] ss:$16 sps:$4 sm:$0xff]  }
0x1404   : > { %8396 = vmatpush1.bf16.msra.mxu1 %v13481_v38  ;;  %8478 = vmatpush1.bf16.msra.mxu0 %v13484_v18  ;;  %v13516_v38 = vld [vmem:[#allocation9 + $0x36c] ss:$16 sps:$4 sm:$0xff]   ;;  %v13511_v18 = vld [vmem:[#allocation9 + $0x360] ss:$16 sps:$4 sm:$0xff]  }
0x1405   : > { %8397 = vmatprep.subr.bf16.mxu1 %v13489_v19  ;;  %8479 = vmatprep.subr.bf16.mxu0 %v13492_v27  ;;  %v13514_v19 = vld [vmem:[#allocation9 + $0x368] ss:$16 sps:$4 sm:$0xff]   ;;  %v13519_v27 = vld [vmem:[#allocation9 + $0x384] ss:$16 sps:$4 sm:$0xff]  }
0x1408   : > { %8398 = vmatpush1.bf16.msra.mxu1 %v13487_v23  ;;  %8480 = vmatpush1.bf16.msra.mxu0 %v13490_v40  ;;  %v13522_v23 = vld [vmem:[#allocation9 + $0x38c] ss:$16 sps:$4 sm:$0xff]   ;;  %v13517_v40 = vld [vmem:[#allocation9 + $0x380] ss:$16 sps:$4 sm:$0xff]  }
0x1409   : > { %8399 = vmatprep.subr.bf16.mxu1 %v13495_v32  ;;  %8481 = vmatprep.subr.bf16.mxu0 %v13498_v14  ;;  %v13520_v32 = vld [vmem:[#allocation9 + $0x388] ss:$16 sps:$4 sm:$0xff]   ;;  %v13525_v14 = vld [vmem:[#allocation9 + $0x3a4] ss:$16 sps:$4 sm:$0xff]  }
0x140c   : > { %8400 = vmatpush1.bf16.msra.mxu1 %v13493_v13  ;;  %8482 = vmatpush1.bf16.msra.mxu0 %v13496_v24  ;;  %v13528_v13 = vld [vmem:[#allocation9 + $0x3ac] ss:$16 sps:$4 sm:$0xff]   ;;  %v13523_v24 = vld [vmem:[#allocation9 + $0x3a0] ss:$16 sps:$4 sm:$0xff]  }
0x140d   : > { %8401 = vmatprep.subr.bf16.mxu1 %v13501_v60  ;;  %8483 = vmatprep.subr.bf16.mxu0 %v13504_v56  ;;  %v13526_v60 = vld [vmem:[#allocation9 + $0x3a8] ss:$16 sps:$4 sm:$0xff]   ;;  %v13531_v56 = vld [vmem:[#allocation9 + $0x3c4] ss:$16 sps:$4 sm:$0xff]  }
0x1410   : > { %8402 = vmatpush1.bf16.msra.mxu1 %v13499_v16  ;;  %8484 = vmatpush1.bf16.msra.mxu0 %v13502_v59  ;;  %v13534_v16 = vld [vmem:[#allocation9 + $0x3cc] ss:$16 sps:$4 sm:$0xff]   ;;  %v13529_v59 = vld [vmem:[#allocation9 + $0x3c0] ss:$16 sps:$4 sm:$0xff]  }
0x1411   : > { %8403 = vmatprep.subr.bf16.mxu1 %v13507_v39  ;;  %8485 = vmatprep.subr.bf16.mxu0 %v13510_v47  ;;  %v13532_v39 = vld [vmem:[#allocation9 + $0x3c8] ss:$16 sps:$4 sm:$0xff]   ;;  %v13537_v47 = vld [vmem:[#allocation9 + $0x3e4] ss:$16 sps:$4 sm:$0xff]  }
0x1414   : > { %8404 = vmatpush1.bf16.msra.mxu1 %v13505_v41  ;;  %8486 = vmatpush1.bf16.msra.mxu0 %v13508_v48  ;;  %v13540_v41 = vld [vmem:[#allocation9 + $0x3ec] ss:$16 sps:$4 sm:$0xff]   ;;  %v13535_v48 = vld [vmem:[#allocation9 + $0x3e0] ss:$16 sps:$4 sm:$0xff]  }
0x1415   : > { %8405 = vmatprep.subr.bf16.mxu1 %v13513_v36  ;;  %8487 = vmatprep.subr.bf16.mxu0 %v13516_v38  ;;  %v13538_v36 = vld [vmem:[#allocation9 + $0x3e8] ss:$16 sps:$4 sm:$0xff]   ;;  %v7550_v38 = vpack.c.bf16 %v16504_v31, %v16504_v31 }
0x1418   : > { %8406 = vmatpush1.bf16.msra.mxu1 %v13511_v18  ;;  %8488 = vmatpush1.bf16.msra.mxu0 %v13514_v19  ;;  %v7680_v18 = vld [vmem:[#allocation11] sm:$0xf] }
0x1419   : > { %8407 = vmatprep.subr.bf16.mxu1 %v13519_v27  ;;  %8489 = vmatprep.subr.bf16.mxu0 %v13522_v23  ;;  %v7689_v19 = vrot.slane %v7680_v18, %v17007_v52  ;;  %v7697_v27 = vrot.slane %v7680_v18, %v17009_v45  ;;  %v7685_v23 = vrot.slane %v7680_v18, %v17008_v49 }
0x141c   : > { %8408 = vmatpush1.bf16.msra.mxu1 %v13517_v40  ;;  %8490 = vmatpush1.bf16.msra.mxu0 %v13520_v32  ;;  %v7693_v40 = vrot.slane %v7680_v18, %v17010_v30 }
0x141d   : > { %8409 = vmatprep.subr.bf16.mxu1 %v13525_v14  ;;  %8491 = vmatprep.subr.bf16.mxu0 %v13528_v13 }
0x1420   : > { %8410 = vmatpush1.bf16.msra.mxu1 %v13523_v24  ;;  %8492 = vmatpush1.bf16.msra.mxu0 %v13526_v60 }
0x1421   : > { %8411 = vmatprep.subr.bf16.mxu1 %v13531_v56  ;;  %8493 = vmatprep.subr.bf16.mxu0 %v13534_v16 }
0x1424   : > { %8412 = vmatpush1.bf16.msra.mxu1 %v13529_v59  ;;  %8494 = vmatpush1.bf16.msra.mxu0 %v13532_v39 }
0x1425   : > { %8413 = vmatprep.subr.bf16.mxu1 %v13537_v47  ;;  %8495 = vmatprep.subr.bf16.mxu0 %v13540_v41 }
0x1428   : > { %8414 = vmatpush1.bf16.msra.mxu1 %v13535_v48  ;;  %8496 = vmatpush1.bf16.msra.mxu0 %v13538_v36 }
0x1429   : > { %12578 = vmatprep.subr.bf16.mxu1 %v15017_v12  ;;  %12610 = vmatprep.subr.bf16.mxu0 %v16974_v6 }
0x142b   : > { %8416 = vmatmul.mubr.bf16.vlgmr.msra.gmra.mrb[60].mxu1 %v7550_v38  ;;  %8498 = vmatmul.mubr.bf16.vlgmr.msra.gmra.mrb[64].mxu0 %v7550_v38 }
0x142c   : > { %12580 = vmatpush3.bf16.msra.mxu1 %v16976_v55  ;;  %12612 = vmatpush3.bf16.msra.mxu0 %v16977_v51 }
0x142d   : > { %12582 = vmatprep.subr.bf16.mxu1 %v16978_v4  ;;  %12614 = vmatprep.subr.bf16.mxu0 %v16979_v7 }
0x1430   : > { %12584 = vmatpush3.bf16.msra.mxu1 %v16980_v0  ;;  %12616 = vmatpush3.bf16.msra.mxu0 %v16981_v21 }
0x1431   : > { %12586 = vmatprep.subr.bf16.mxu1 %v16982_v61  ;;  %12618 = vmatprep.subr.bf16.mxu0 %v16983_v44 }
0x1434   : > { %12588 = vmatpush3.bf16.msra.mxu1 %v16984_v34  ;;  %12620 = vmatpush3.bf16.msra.mxu0 %v16985_v5 }
0x1435   : > { %12590 = vmatprep.subr.bf16.mxu1 %v16986_v15  ;;  %12622 = vmatprep.subr.bf16.mxu0 %v16987_v63 }
0x1438   : > { %12592 = vmatpush3.bf16.msra.mxu1 %v16988_v22  ;;  %12624 = vmatpush3.bf16.msra.mxu0 %v16989_v58 }
0x1439   : > { %12594 = vmatprep.subr.bf16.mxu1 %v16990_v54  ;;  %12626 = vmatprep.subr.bf16.mxu0 %v16991_v50 }
0x143c   : > { %12596 = vmatpush3.bf16.msra.mxu1 %v16992_v8  ;;  %12628 = vmatpush3.bf16.msra.mxu0 %v16993_v43 }
0x143d   : > { %12598 = vmatprep.subr.bf16.mxu1 %v16994_v25  ;;  %12630 = vmatprep.subr.bf16.mxu0 %v16995_v33 }
0x1440   : > { %12600 = vmatpush3.bf16.msra.mxu1 %v16996_v11  ;;  %12632 = vmatpush3.bf16.msra.mxu0 %v16997_v37 }
0x1441   : > { %12602 = vmatprep.subr.bf16.mxu1 %v16998_v46  ;;  %12634 = vmatprep.subr.bf16.mxu0 %v16999_v2 }
0x1444   : > { %12604 = vmatpush3.bf16.msra.mxu1 %v17000_v9  ;;  %12636 = vmatpush3.bf16.msra.mxu0 %v17001_v53 }
0x1445   : > { %12606 = vmatprep.subr.bf16.mxu1 %v17002_v17  ;;  %12638 = vmatprep.subr.bf16.mxu0 %v17003_v42 }
0x1448   : > { %12608 = vmatpush3.bf16.msra.mxu1 %v17004_v28  ;;  %12640 = vmatpush3.bf16.msra.mxu0 %v17005_v20 }
0x1449   : > { %8649 = vmatprep.subr.mxu1 %v16415_v26  ;;  %8720 = vmatprep.subr.mxu0 %v16433_v57 }
0x14fe   : > { %v8417_v32 = vpop.f32.mrb[60].mxu1  ;;  %v8499_v14 = vpop.f32.mrb[64].mxu0 }
0x14ff   : > { %v8419_v13 = vpop.f32.mrb[61].mxu1  ;;  %v8501_v24 = vpop.f32.mrb[65].mxu0  ;;  %v12707_v59 = vadd.f32 %v8417_v32, %v7685_v23  ;;  %v12709_v39 = vadd.f32 %v8499_v14, %v7693_v40  ;;  %v13562_v23 = vld [vmem:[#allocation14 + $0x130] ss:$8 sps:$4 sm:$0xff]   ;;  %v13567_v40 = vld [vmem:[#allocation14 + $0x44] ss:$8 sps:$4 sm:$0xff]  }
0x1500   : > { %v16556_v60 = vadd.f32 %v8419_v13, %v7689_v19  ;;  %v16558_v56 = vadd.f32 %v8501_v24, %v7697_v27  ;;  %v8421_v26 = vpop.f32.mrb[62].mxu1  ;;  %v8503_v16 = vpop.f32.mrb[66].mxu0  ;;  %v13559_v27 = vld [vmem:[#allocation14 + $0x30] ss:$8 sps:$4 sm:$0xff]   ;;  %v13570_v32 = vld [vmem:[#allocation14 + $0x144] ss:$8 sps:$4 sm:$0xff]  }
0x1501   : > { %v8422_v47 = vpop.f32.mrb[63].mxu1  ;;  %v8504_v41 = vpop.f32.mrb[67].mxu0  ;;  %v13565_v14 = vld [vmem:[#allocation14 + $0x40] ss:$8 sps:$4 sm:$0xff]   ;;  %v13573_v24 = vld [vmem:[#allocation14 + $0x54] ss:$8 sps:$4 sm:$0xff]  }
0x1502   : > { %8570 = vmatprep.mubr.f32.mxu1 %v16556_v60  ;;  %8640 = vmatprep.mubr.f32.mxu0 %v16558_v56  ;;  %v13568_v13 = vld [vmem:[#allocation14 + $0x140] ss:$8 sps:$4 sm:$0xff]   ;;  %v13574_v26 = vld [vmem:[#allocation14 + $0x150] ss:$8 sps:$4 sm:$0xff]   ;;  %v13579_v16 = vld [vmem:[#allocation14 + $0x64] ss:$8 sps:$4 sm:$0xff]  }
0x1503   : > { %8571 = vmatmul.mubr.f32.vlgmr.msra.gmra.mrb[64].mxu1 %v12707_v59  ;;  %8641 = vmatmul.mubr.f32.vlgmr.msra.gmra.mrb[68].mxu0 %v12709_v39  ;;  %v13580_v47 = vld [vmem:[#allocation14 + $0x160] ss:$8 sps:$4 sm:$0xff]   ;;  %v13585_v41 = vld [vmem:[#allocation14 + $0x74] ss:$8 sps:$4 sm:$0xff]  }
0x1504   : > { %8650 = vmatpush1.msra.mxu1 %v16429_v1  ;;  %8721 = vmatpush1.msra.mxu0 %v16453_v29 }
0x1505   : > { %8713 = vmatprep.mubr.f32.mxu1 %v16964_v62  ;;  %8784 = vmatprep.mubr.f32.mxu0 %v16964_v62 }
0x1506   : > { %12642 = vmatprep.subr.bf16.mxu1 %v15017_v12  ;;  %12674 = vmatprep.subr.bf16.mxu0 %v16974_v6  ;;  %v13805_v12 = vld [vmem:[#allocation18 + $0x8] sm:$0xff] }
0x15d6   : > { %v11981_v45 = vpop.f32.mrb[64].mxu1  ;;  %v12016_v30 = vpop.f32.mrb[68].mxu0 }
0x15d7   : > { %v11982_v48 = vpop.f32.mrb[65].mxu1  ;;  %v12017_v36 = vpop.f32.mrb[69].mxu0 }
0x15d8   : > { %v11983_v38 = vadd.f32 %v11982_v48, %v11981_v45  ;;  %v12018_v18 = vadd.f32 %v12017_v36, %v12016_v30  ;;  %v13588_v45 = vld [vmem:[#allocation14 + $0x174] ss:$8 sps:$4 sm:$0xff]   ;;  %v13583_v30 = vld [vmem:[#allocation14 + $0x70] ss:$8 sps:$4 sm:$0xff]   ;;  %v13591_v36 = vld [vmem:[#allocation14 + $0x84] ss:$8 sps:$4 sm:$0xff]  }
0x15d9   : > { %v13586_v48 = vld [vmem:[#allocation14 + $0x170] ss:$8 sps:$4 sm:$0xff]  }
0x15da   : > { %v8643_v19 = vadd.f32 %v12018_v18, %v11983_v38  ;;  %v13594_v38 = vld [vmem:[#allocation14 + $0x184] ss:$8 sps:$4 sm:$0xff]   ;;  %v13589_v18 = vld [vmem:[#allocation14 + $0x80] ss:$8 sps:$4 sm:$0xff]  }
0x15dc   : > { %11289 = vmatmul.mubr.msk.f32.vlgmr.msra.gmra.mrb[66].mxu1 %vm2103_vm0, %v8643_v19  ;;  %11290 = vmatmul.mubr.msk.f32.vlgmr.msra.gmra.mrb[70].mxu0 %vm2103_vm0, %v8643_v19  ;;  %v13592_v19 = vld [vmem:[#allocation14 + $0x180] ss:$8 sps:$4 sm:$0xff]  }
0x15dd   : > { %12644 = vmatpush3.bf16.msra.mxu1 %v16976_v55  ;;  %12676 = vmatpush3.bf16.msra.mxu0 %v16977_v51 }
0x15de   : > { %12646 = vmatprep.subr.bf16.mxu1 %v16978_v4  ;;  %12678 = vmatprep.subr.bf16.mxu0 %v16979_v7 }
0x15e1   : > { %12648 = vmatpush3.bf16.msra.mxu1 %v16980_v0  ;;  %12680 = vmatpush3.bf16.msra.mxu0 %v16981_v21 }
0x15e2   : > { %12650 = vmatprep.subr.bf16.mxu1 %v16982_v61  ;;  %12682 = vmatprep.subr.bf16.mxu0 %v16983_v44 }
0x15e5   : > { %12652 = vmatpush3.bf16.msra.mxu1 %v16984_v34  ;;  %12684 = vmatpush3.bf16.msra.mxu0 %v16985_v5 }
0x15e6   : > { %12654 = vmatprep.subr.bf16.mxu1 %v16986_v15  ;;  %12686 = vmatprep.subr.bf16.mxu0 %v16987_v63  ;;  %v13543_v63 = vld [vmem:[#allocation14 + $0x4] ss:$8 sps:$4 sm:$0xff]  }
0x15e9   : > { %12656 = vmatpush3.bf16.msra.mxu1 %v16988_v22  ;;  %12688 = vmatpush3.bf16.msra.mxu0 %v16989_v58  ;;  %v13546_v22 = vld [vmem:[#allocation14 + $0x104] ss:$8 sps:$4 sm:$0xff]  }
0x15ea   : > { %12658 = vmatprep.subr.bf16.mxu1 %v16990_v54  ;;  %12690 = vmatprep.subr.bf16.mxu0 %v16991_v50 }
0x15ed   : > { %12660 = vmatpush3.bf16.msra.mxu1 %v16992_v8  ;;  %12692 = vmatpush3.bf16.msra.mxu0 %v16993_v43 }
0x15ee   : > { %12662 = vmatprep.subr.bf16.mxu1 %v16994_v25  ;;  %12694 = vmatprep.subr.bf16.mxu0 %v16995_v33 }
0x15f1   : > { %12664 = vmatpush3.bf16.msra.mxu1 %v16996_v11  ;;  %12696 = vmatpush3.bf16.msra.mxu0 %v16997_v37  ;;  %v13541_v37 = vld [vmem:[#allocation14] ss:$8 sps:$4 sm:$0xff]  }
0x15f2   : > { %12666 = vmatprep.subr.bf16.mxu1 %v16998_v46  ;;  %12698 = vmatprep.subr.bf16.mxu0 %v16999_v2  ;;  %v13544_v46 = vld [vmem:[#allocation14 + $0x100] ss:$8 sps:$4 sm:$0xff]   ;;  %v13549_v2 = vld [vmem:[#allocation14 + $0x14] ss:$8 sps:$4 sm:$0xff]  }
0x15f5   : > { %12668 = vmatpush3.bf16.msra.mxu1 %v17000_v9  ;;  %12700 = vmatpush3.bf16.msra.mxu0 %v17001_v53  ;;  %v13552_v9 = vld [vmem:[#allocation14 + $0x114] ss:$8 sps:$4 sm:$0xff]  }
0x15f6   : > { %12670 = vmatprep.subr.bf16.mxu1 %v17002_v17  ;;  %12702 = vmatprep.subr.bf16.mxu0 %v17003_v42  ;;  %v13550_v17 = vld [vmem:[#allocation14 + $0x110] ss:$8 sps:$4 sm:$0xff]   ;;  %v13555_v42 = vld [vmem:[#allocation14 + $0x24] ss:$8 sps:$4 sm:$0xff]  }
0x15f9   : > { %12672 = vmatpush3.bf16.msra.mxu1 %v17004_v28  ;;  %12704 = vmatpush3.bf16.msra.mxu0 %v17005_v20  ;;  %v13558_v28 = vld [vmem:[#allocation14 + $0x124] ss:$8 sps:$4 sm:$0xff]   ;;  %v13553_v20 = vld [vmem:[#allocation14 + $0x20] ss:$8 sps:$4 sm:$0xff]  }
0x15fa   : > { %8943 = vmatprep.subr.mxu1 %v13805_v12  ;;  %9014 = vmatprep.subr.mxu0 %v16433_v57  ;;  %v13561_v57 = vld [vmem:[#allocation14 + $0x34] ss:$8 sps:$4 sm:$0xff]  }
0x15fb   : > { %v13597_v12 = vld [vmem:[#allocation14 + $0x94] ss:$8 sps:$4 sm:$0xff]  }
0x16af   : > { %v8715_v6 = vpop.f32.mrb[66].mxu1  ;;  %v8786_v55 = vpop.f32.mrb[70].mxu0 }
0x16b0   : > { %v16601_v51 = vsub.f32 %v12707_v59, %v8715_v6  ;;  %v16603_v4 = vsub.f32 %v12709_v39, %v8786_v55  ;;  %v8717_v7 = vpop.f32.mrb[67].mxu1  ;;  %v8788_v0 = vpop.f32.mrb[71].mxu0  ;;  %v13582_v59 = vld [vmem:[#allocation14 + $0x164] ss:$8 sps:$4 sm:$0xff]   ;;  %v13577_v39 = vld [vmem:[#allocation14 + $0x60] ss:$8 sps:$4 sm:$0xff]  }
0x16b1   : > { %v16606_v21 = vsub.f32 %v16556_v60, %v8717_v7  ;;  %v16609_v61 = vsub.f32 %v16558_v56, %v8788_v0  ;;  %v13576_v60 = vld [vmem:[#allocation14 + $0x154] ss:$8 sps:$4 sm:$0xff]   ;;  %v13571_v56 = vld [vmem:[#allocation14 + $0x50] ss:$8 sps:$4 sm:$0xff]   ;;  %v13603_v0 = vld [vmem:[#allocation14 + $0xa4] ss:$8 sps:$4 sm:$0xff]  }
0x16b2   : > { %v8795_v5 = vmul.f32 %v16601_v51, %v16601_v51  ;;  %v8797_v15 = vmul.f32 %v16603_v4, %v16603_v4  ;;  %v13600_v6 = vld [vmem:[#allocation14 + $0x194] ss:$8 sps:$4 sm:$0xff]   ;;  %v13595_v55 = vld [vmem:[#allocation14 + $0x90] ss:$8 sps:$4 sm:$0xff]  }
0x16b3   : > { %v8796_v44 = vmul.f32 %v16606_v21, %v16606_v21  ;;  %v8798_v34 = vmul.f32 %v16609_v61, %v16609_v61  ;;  %v13598_v7 = vld [vmem:[#allocation14 + $0x190] ss:$8 sps:$4 sm:$0xff]  }
0x16b5   : > { %8863 = vmatprep.mubr.f32.mxu1 %v8796_v44  ;;  %8933 = vmatprep.mubr.f32.mxu0 %v8798_v34  ;;  %v13606_v44 = vld [vmem:[#allocation14 + $0x1a4] ss:$8 sps:$4 sm:$0xff]   ;;  %v13601_v34 = vld [vmem:[#allocation14 + $0xa0] ss:$8 sps:$4 sm:$0xff]  }
0x16b6   : > { %8864 = vmatmul.mubr.f32.vlgmr.msra.gmra.mrb[68].mxu1 %v8795_v5  ;;  %8934 = vmatmul.mubr.f32.vlgmr.msra.gmra.mrb[72].mxu0 %v8797_v15  ;;  %v13604_v5 = vld [vmem:[#allocation14 + $0x1a0] ss:$8 sps:$4 sm:$0xff]   ;;  %v13609_v15 = vld [vmem:[#allocation14 + $0xb4] ss:$8 sps:$4 sm:$0xff]  }
0x16b7   : > { %8944 = vmatpush1.msra.mxu1 %v16429_v1  ;;  %9015 = vmatpush1.msra.mxu0 %v16453_v29  ;;  %v13556_v1 = vld [vmem:[#allocation14 + $0x120] ss:$8 sps:$4 sm:$0xff]   ;;  %v13564_v29 = vld [vmem:[#allocation14 + $0x134] ss:$8 sps:$4 sm:$0xff]  }
0x16b8   : > { %9007 = vmatprep.mubr.f32.mxu1 %v16964_v62  ;;  %9078 = vmatprep.mubr.f32.mxu0 %v16964_v62  ;;  %v13547_v62 = vld [vmem:[#allocation14 + $0x10] ss:$8 sps:$4 sm:$0xff]  }
0x16b9   : > { %9559 = vmatprep.subr.bf16.mxu1 %v13543_v63  ;;  %9600 = vmatprep.subr.bf16.mxu0 %v13546_v22  ;;  %v13612_v63 = vld [vmem:[#allocation14 + $0x1b4] ss:$8 sps:$4 sm:$0xff]   ;;  %v13607_v22 = vld [vmem:[#allocation14 + $0xb0] ss:$8 sps:$4 sm:$0xff]  }
0x1789   : > { %v12051_v58 = vpop.f32.mrb[68].mxu1  ;;  %v12086_v54 = vpop.f32.mrb[72].mxu0 }
0x178a   : > { %v12052_v50 = vpop.f32.mrb[69].mxu1  ;;  %v12087_v8 = vpop.f32.mrb[73].mxu0 }
0x178b   : > { %v12053_v43 = vadd.f32 %v12052_v50, %v12051_v58  ;;  %v12088_v25 = vadd.f32 %v12087_v8, %v12086_v54  ;;  %v13610_v58 = vld [vmem:[#allocation14 + $0x1b0] ss:$8 sps:$4 sm:$0xff]   ;;  %v13615_v54 = vld [vmem:[#allocation14 + $0xc4] ss:$8 sps:$4 sm:$0xff]   ;;  %v13613_v8 = vld [vmem:[#allocation14 + $0xc0] ss:$8 sps:$4 sm:$0xff]  }
0x178c   : > { %v13618_v50 = vld [vmem:[#allocation14 + $0x1c4] ss:$8 sps:$4 sm:$0xff]  }
0x178d   : > { %v8866_v33 = vadd.f32 1e-05, %v12053_v43  ;;  %v13616_v43 = vld [vmem:[#allocation14 + $0x1c0] ss:$8 sps:$4 sm:$0xff]  }
0x178f   : > { %v8936_v11 = vadd.f32 %v12088_v25, %v8866_v33  ;;  %v13621_v25 = vld [vmem:[#allocation14 + $0xd4] ss:$8 sps:$4 sm:$0xff]  }
0x1790   : > { %v13624_v33 = vld [vmem:[#allocation14 + $0x1d4] ss:$8 sps:$4 sm:$0xff]  }
0x1791   : > { %13789 = vrsqrt.f32 %v8936_v11  ;;  %v13619_v11 = vld [vmem:[#allocation14 + $0xd0] ss:$8 sps:$4 sm:$0xff]  }
0x179b   : > { %v13790_v53 = vpop.eup %13789 }
0x179c   : > { %11291 = vmatmul.mubr.msk.f32.vlgmr.msra.gmra.mrb[70].mxu1 %vm2103_vm0, %v13790_v53  ;;  %11292 = vmatmul.mubr.msk.f32.vlgmr.msra.gmra.mrb[74].mxu0 %vm2103_vm0, %v13790_v53  ;;  %v13628_v53 = vld [vmem:[#allocation14 + $0x1e0] ss:$8 sps:$4 sm:$0xff]  }
0x179d   : > { %9560 = vmatpush1.bf16.msra.mxu1 %v13541_v37  ;;  %9601 = vmatpush1.bf16.msra.mxu0 %v13544_v46  ;;  %v13622_v37 = vld [vmem:[#allocation14 + $0x1d0] ss:$8 sps:$4 sm:$0xff]   ;;  %v13627_v46 = vld [vmem:[#allocation14 + $0xe4] ss:$8 sps:$4 sm:$0xff]  }
0x179e   : > { %9561 = vmatprep.subr.bf16.mxu1 %v13549_v2  ;;  %9602 = vmatprep.subr.bf16.mxu0 %v13552_v9  ;;  %v13630_v2 = vld [vmem:[#allocation14 + $0x1e4] ss:$8 sps:$4 sm:$0xff]   ;;  %v13625_v9 = vld [vmem:[#allocation14 + $0xe0] ss:$8 sps:$4 sm:$0xff]  }
0x17a1   : > { %9562 = vmatpush1.bf16.msra.mxu1 %v13547_v62  ;;  %9603 = vmatpush1.bf16.msra.mxu0 %v13550_v17  ;;  %v13633_v62 = vld [vmem:[#allocation14 + $0xf4] ss:$8 sps:$4 sm:$0xff]  }
0x17a2   : > { %9563 = vmatprep.subr.bf16.mxu1 %v13555_v42  ;;  %9604 = vmatprep.subr.bf16.mxu0 %v13558_v28  ;;  %v13636_v17 = vld [vmem:[#allocation14 + $0x1f4] ss:$8 sps:$4 sm:$0xff]   ;;  %v13631_v42 = vld [vmem:[#allocation14 + $0xf0] ss:$8 sps:$4 sm:$0xff]  }
0x17a3   : > { %v13634_v28 = vld [vmem:[#allocation14 + $0x1f0] ss:$8 sps:$4 sm:$0xff]  }
0x17a5   : > { %9564 = vmatpush1.bf16.msra.mxu1 %v13553_v20  ;;  %9605 = vmatpush1.bf16.msra.mxu0 %v13556_v1  ;;  %v13639_v20 = vld [vmem:[#allocation12 + $0x4] ss:$8 sps:$4 sm:$0xff]  }
0x17a6   : > { %9565 = vmatprep.subr.bf16.mxu1 %v13561_v57  ;;  %9606 = vmatprep.subr.bf16.mxu0 %v13564_v29  ;;  %v13642_v1 = vld [vmem:[#allocation12 + $0x104] ss:$8 sps:$4 sm:$0xff]   ;;  %v9094_v29 = vstv %s11293_s30 }
0x17a9   : > { %9566 = vmatpush1.bf16.msra.mxu1 %v13559_v27  ;;  %9607 = vmatpush1.bf16.msra.mxu0 %v13562_v23 }
0x17aa   : > { %9567 = vmatprep.subr.bf16.mxu1 %v13567_v40  ;;  %9608 = vmatprep.subr.bf16.mxu0 %v13570_v32 }
0x17ad   : > { %9568 = vmatpush1.bf16.msra.mxu1 %v13565_v14  ;;  %9609 = vmatpush1.bf16.msra.mxu0 %v13568_v13 }
0x17ae   : > { %9569 = vmatprep.subr.bf16.mxu1 %v13573_v24  ;;  %9610 = vmatprep.subr.bf16.mxu0 %v13576_v60 }
0x17b1   : > { %9570 = vmatpush1.bf16.msra.mxu1 %v13571_v56  ;;  %9611 = vmatpush1.bf16.msra.mxu0 %v13574_v26 }
0x17b2   : > { %9571 = vmatprep.subr.bf16.mxu1 %v13579_v16  ;;  %9612 = vmatprep.subr.bf16.mxu0 %v13582_v59 }
0x17b5   : > { %9572 = vmatpush1.bf16.msra.mxu1 %v13577_v39  ;;  %9613 = vmatpush1.bf16.msra.mxu0 %v13580_v47 }
0x17b6   : > { %9573 = vmatprep.subr.bf16.mxu1 %v13585_v41  ;;  %9614 = vmatprep.subr.bf16.mxu0 %v13588_v45 }
0x17b9   : > { %9574 = vmatpush1.bf16.msra.mxu1 %v13583_v30  ;;  %9615 = vmatpush1.bf16.msra.mxu0 %v13586_v48  ;;  %v13637_v48 = vld [vmem:[#allocation12] ss:$8 sps:$4 sm:$0xff]  }
0x17ba   : > { %9575 = vmatprep.subr.bf16.mxu1 %v13591_v36  ;;  %9616 = vmatprep.subr.bf16.mxu0 %v13594_v38  ;;  %v13640_v36 = vld [vmem:[#allocation12 + $0x100] ss:$8 sps:$4 sm:$0xff]  }
0x17bd   : > { %9576 = vmatpush1.bf16.msra.mxu1 %v13589_v18  ;;  %9617 = vmatpush1.bf16.msra.mxu0 %v13592_v19  ;;  %v13645_v19 = vld [vmem:[#allocation12 + $0x14] ss:$8 sps:$4 sm:$0xff]  }
0x17be   : > { %9577 = vmatprep.subr.bf16.mxu1 %v13597_v12  ;;  %9618 = vmatprep.subr.bf16.mxu0 %v13600_v6  ;;  %v13648_v12 = vld [vmem:[#allocation12 + $0x114] ss:$8 sps:$4 sm:$0xff]  }
0x17bf   : > { %v17011_v6 = vld [vmem:[#allocation67_spill] sm:$0xff] }
0x17c1   : > { %9578 = vmatpush1.bf16.msra.mxu1 %v13595_v55  ;;  %9619 = vmatpush1.bf16.msra.mxu0 %v13598_v7  ;;  %v13654_v55 = vld [vmem:[#allocation12 + $0x124] ss:$8 sps:$4 sm:$0xff]   ;;  %v13649_v7 = vld [vmem:[#allocation12 + $0x20] ss:$8 sps:$4 sm:$0xff]  }
0x17c2   : > { %9579 = vmatprep.subr.bf16.mxu1 %v13603_v0  ;;  %9620 = vmatprep.subr.bf16.mxu0 %v13606_v44  ;;  %v13652_v0 = vld [vmem:[#allocation12 + $0x120] ss:$8 sps:$4 sm:$0xff]   ;;  %v13657_v44 = vld [vmem:[#allocation12 + $0x34] ss:$8 sps:$4 sm:$0xff]  }
0x17c5   : > { %9580 = vmatpush1.bf16.msra.mxu1 %v13601_v34  ;;  %9621 = vmatpush1.bf16.msra.mxu0 %v13604_v5  ;;  %v13660_v34 = vld [vmem:[#allocation12 + $0x134] ss:$8 sps:$4 sm:$0xff]   ;;  %v13655_v5 = vld [vmem:[#allocation12 + $0x30] ss:$8 sps:$4 sm:$0xff]  }
0x17c6   : > { %9581 = vmatprep.subr.bf16.mxu1 %v13609_v15  ;;  %9622 = vmatprep.subr.bf16.mxu0 %v13612_v63  ;;  %v13658_v15 = vld [vmem:[#allocation12 + $0x130] ss:$8 sps:$4 sm:$0xff]   ;;  %v13663_v63 = vld [vmem:[#allocation12 + $0x44] ss:$8 sps:$4 sm:$0xff]  }
0x17c9   : > { %9582 = vmatpush1.bf16.msra.mxu1 %v13607_v22  ;;  %9623 = vmatpush1.bf16.msra.mxu0 %v13610_v58  ;;  %v13666_v22 = vld [vmem:[#allocation12 + $0x144] ss:$8 sps:$4 sm:$0xff]   ;;  %v13661_v58 = vld [vmem:[#allocation12 + $0x40] ss:$8 sps:$4 sm:$0xff]  }
0x17ca   : > { %9583 = vmatprep.subr.bf16.mxu1 %v13615_v54  ;;  %9624 = vmatprep.subr.bf16.mxu0 %v13618_v50  ;;  %v13664_v54 = vld [vmem:[#allocation12 + $0x140] ss:$8 sps:$4 sm:$0xff]   ;;  %v13669_v50 = vld [vmem:[#allocation12 + $0x54] ss:$8 sps:$4 sm:$0xff]  }
0x17cd   : > { %9584 = vmatpush1.bf16.msra.mxu1 %v13613_v8  ;;  %9625 = vmatpush1.bf16.msra.mxu0 %v13616_v43  ;;  %v13672_v8 = vld [vmem:[#allocation12 + $0x154] ss:$8 sps:$4 sm:$0xff]   ;;  %v13667_v43 = vld [vmem:[#allocation12 + $0x50] ss:$8 sps:$4 sm:$0xff]  }
0x17ce   : > { %9585 = vmatprep.subr.bf16.mxu1 %v13621_v25  ;;  %9626 = vmatprep.subr.bf16.mxu0 %v13624_v33  ;;  %v13670_v25 = vld [vmem:[#allocation12 + $0x150] ss:$8 sps:$4 sm:$0xff]   ;;  %v13675_v33 = vld [vmem:[#allocation12 + $0x64] ss:$8 sps:$4 sm:$0xff]  }
0x17d1   : > { %9586 = vmatpush1.bf16.msra.mxu1 %v13619_v11  ;;  %9627 = vmatpush1.bf16.msra.mxu0 %v13622_v37  ;;  %v13678_v11 = vld [vmem:[#allocation12 + $0x164] ss:$8 sps:$4 sm:$0xff]   ;;  %v13673_v37 = vld [vmem:[#allocation12 + $0x60] ss:$8 sps:$4 sm:$0xff]  }
0x17d2   : > { %9587 = vmatprep.subr.bf16.mxu1 %v13627_v46  ;;  %9628 = vmatprep.subr.bf16.mxu0 %v13630_v2  ;;  %v13676_v46 = vld [vmem:[#allocation12 + $0x160] ss:$8 sps:$4 sm:$0xff]   ;;  %v13681_v2 = vld [vmem:[#allocation12 + $0x74] ss:$8 sps:$4 sm:$0xff]  }
0x17d5   : > { %9588 = vmatpush1.bf16.msra.mxu1 %v13625_v9  ;;  %9629 = vmatpush1.bf16.msra.mxu0 %v13628_v53  ;;  %v13684_v9 = vld [vmem:[#allocation12 + $0x174] ss:$8 sps:$4 sm:$0xff]   ;;  %v13679_v53 = vld [vmem:[#allocation12 + $0x70] ss:$8 sps:$4 sm:$0xff]  }
0x17d6   : > { %9589 = vmatprep.subr.bf16.mxu1 %v13633_v62  ;;  %9630 = vmatprep.subr.bf16.mxu0 %v13636_v17  ;;  %v13682_v62 = vld [vmem:[#allocation12 + $0x170] ss:$8 sps:$4 sm:$0xff]   ;;  %v13687_v17 = vld [vmem:[#allocation12 + $0x84] ss:$8 sps:$4 sm:$0xff]  }
0x17d9   : > { %9590 = vmatpush1.bf16.msra.mxu1 %v13631_v42  ;;  %9631 = vmatpush1.bf16.msra.mxu0 %v13634_v28  ;;  %v13690_v42 = vld [vmem:[#allocation12 + $0x184] ss:$8 sps:$4 sm:$0xff]   ;;  %v13685_v28 = vld [vmem:[#allocation12 + $0x80] ss:$8 sps:$4 sm:$0xff]  }
0x17da   : > { %9961 = vmatprep.subr.bf16.mxu1 %v13639_v20  ;;  %10002 = vmatprep.subr.bf16.mxu0 %v13642_v1  ;;  %v13688_v20 = vld [vmem:[#allocation12 + $0x180] ss:$8 sps:$4 sm:$0xff]   ;;  %v13693_v1 = vld [vmem:[#allocation12 + $0x94] ss:$8 sps:$4 sm:$0xff]  }
0x186f   : > { %v9009_v57 = vpop.f32.mrb[70].mxu1  ;;  %v9080_v27 = vpop.f32.mrb[74].mxu0 }
0x1870   : > { %v9085_v23 = vmul.f32 %v9009_v57, %v16601_v51  ;;  %v9087_v40 = vmul.f32 %v9080_v27, %v16603_v4  ;;  %v9011_v32 = vpop.f32.mrb[71].mxu1  ;;  %v9082_v14 = vpop.f32.mrb[75].mxu0  ;;  %v13696_v57 = vld [vmem:[#allocation12 + $0x194] ss:$8 sps:$4 sm:$0xff]   ;;  %v13694_v27 = vld [vmem:[#allocation12 + $0x190] ss:$8 sps:$4 sm:$0xff]  }
0x1871   : > { %v9086_v13 = vmul.f32 %v9011_v32, %v16606_v21  ;;  %v9088_v24 = vmul.f32 %v9082_v14, %v16609_v61  ;;  %v13697_v32 = vld [vmem:[#allocation12 + $0xa0] ss:$8 sps:$4 sm:$0xff]  }
0x1872   : > { %vm9090_vm0 = vcmp.ge.f32.partialorder %v9085_v23, 0.0  ;;  %v9095_v60 = vmul.f32 %v9094_v29, %v9085_v23  ;;  %vm9092_vm2 = vcmp.ge.f32.partialorder %v9087_v40, 0.0  ;;  %v9097_v56 = vmul.f32 %v9094_v29, %v9087_v40  ;;  %v13700_v14 = vld [vmem:[#allocation12 + $0x1a0] ss:$8 sps:$4 sm:$0xff]  }
0x1873   : > { %vm9091_vm3 = vcmp.ge.f32.partialorder %v9086_v13, 0.0  ;;  %v9096_v26 = vmul.f32 %v9094_v29, %v9086_v13  ;;  %vm9093_vm4 = vcmp.ge.f32.partialorder %v9088_v24, 0.0  ;;  %v9098_v16 = vmul.f32 %v9094_v29, %v9088_v24  ;;  %v13691_v29 = vld [vmem:[#allocation12 + $0x90] ss:$8 sps:$4 sm:$0xff]  }
0x1874   : > { %v9099_v59 = vsel %vm9090_vm0, %v9085_v23, %v9095_v60  ;;  %v9101_v39 = vsel %vm9092_vm2, %v9087_v40, %v9097_v56  ;;  %v13699_v23 = vld [vmem:[#allocation12 + $0xa4] ss:$8 sps:$4 sm:$0xff]   ;;  %v13703_v60 = vld [vmem:[#allocation12 + $0xb0] ss:$8 sps:$4 sm:$0xff]  }
0x1875   : > { %v9103_v51 = vadd.f32 %v9099_v59, %v16502_v3  ;;  %v9105_v4 = vadd.f32 %v9101_v39, %v16504_v31  ;;  %v9100_v47 = vsel %vm9091_vm3, %v9086_v13, %v9096_v26  ;;  %v9102_v41 = vsel %vm9093_vm4, %v9088_v24, %v9098_v16  ;;  %v13643_v3 = vld [vmem:[#allocation12 + $0x10] ss:$8 sps:$4 sm:$0xff]   ;;  %v13702_v40 = vld [vmem:[#allocation12 + $0x1a4] ss:$8 sps:$4 sm:$0xff]   ;;  %v13705_v13 = vld [vmem:[#allocation12 + $0xb4] ss:$8 sps:$4 sm:$0xff]  }
0x1876   : > { %v9104_v21 = vadd.f32 %v9100_v47, %v16506_v10  ;;  %v9106_v61 = vadd.f32 %v9102_v41, %v16510_v35  ;;  %v13646_v31 = vld [vmem:[#allocation12 + $0x110] ss:$8 sps:$4 sm:$0xff]   ;;  %v13651_v35 = vld [vmem:[#allocation12 + $0x24] ss:$8 sps:$4 sm:$0xff]   ;;  %v13708_v24 = vld [vmem:[#allocation12 + $0x1b4] ss:$8 sps:$4 sm:$0xff]  }
0x1877   : > { %v9171_v38 = vpack.c.bf16 %v9103_v51, %v9103_v51  ;;  %v9173_v18 = vpack.c.bf16 %v9105_v4, %v9105_v4  ;;  %v17012_v10 = vld [vmem:[#allocation69_spill] sm:$0xff]  ;;  %v13709_v59 = vld [vmem:[#allocation12 + $0xc0] ss:$8 sps:$4 sm:$0xff]   ;;  %v13717_v51 = vld [vmem:[#allocation12 + $0xd4] ss:$8 sps:$4 sm:$0xff]  }
0x1878   : > { %v9172_v45 = vpack.c.bf16 %v9104_v21, %v9104_v21  ;;  %v9174_v30 = vpack.c.bf16 %v9106_v61, %v9106_v61  ;;  %v13706_v56 = vld [vmem:[#allocation12 + $0x1b0] ss:$8 sps:$4 sm:$0xff]   ;;  %v13711_v26 = vld [vmem:[#allocation12 + $0xc4] ss:$8 sps:$4 sm:$0xff]   ;;  %v13712_v39 = vld [vmem:[#allocation12 + $0x1c0] ss:$8 sps:$4 sm:$0xff]  }
0x1879   : > { %v13714_v16 = vld [vmem:[#allocation12 + $0x1c4] ss:$8 sps:$4 sm:$0xff]   ;;  %v13720_v4 = vld [vmem:[#allocation12 + $0x1d4] ss:$8 sps:$4 sm:$0xff]   ;;  %v13715_v47 = vld [vmem:[#allocation12 + $0xd0] ss:$8 sps:$4 sm:$0xff]  }
0x187a   : > { %9591 = vmatprep.mubr.bf16.mxu1 %v9172_v45  ;;  %9632 = vmatprep.mubr.bf16.mxu0 %v9174_v30  ;;  %v13718_v41 = vld [vmem:[#allocation12 + $0x1d0] ss:$8 sps:$4 sm:$0xff]   ;;  %v13723_v21 = vld [vmem:[#allocation12 + $0xe4] ss:$8 sps:$4 sm:$0xff]   ;;  %v13721_v45 = vld [vmem:[#allocation12 + $0xe0] ss:$8 sps:$4 sm:$0xff]  }
0x187b   : > { %9592 = vmatmul.mubr.bf16.vlgmr.msra.gmra.mrb[72].mxu1 %v9171_v38  ;;  %9633 = vmatmul.mubr.bf16.vlgmr.msra.gmra.mrb[76].mxu0 %v9173_v18  ;;  %v13726_v61 = vld [vmem:[#allocation12 + $0x1e4] ss:$8 sps:$4 sm:$0xff]   ;;  %v13724_v30 = vld [vmem:[#allocation12 + $0x1e0] ss:$8 sps:$4 sm:$0xff]   ;;  %v13727_v38 = vld [vmem:[#allocation12 + $0xf0] ss:$8 sps:$4 sm:$0xff]  }
0x187c   : > { %9962 = vmatpush1.bf16.msra.mxu1 %v13637_v48  ;;  %10003 = vmatpush1.bf16.msra.mxu0 %v13640_v36  ;;  %v13729_v48 = vld [vmem:[#allocation12 + $0xf4] ss:$8 sps:$4 sm:$0xff]   ;;  %v13730_v18 = vld [vmem:[#allocation12 + $0x1f0] ss:$8 sps:$4 sm:$0xff]  }
0x187d   : > { %9993 = vmatprep.mubr.bf16.mxu1 %v17011_v6  ;;  %10034 = vmatprep.mubr.bf16.mxu0 %v17012_v10  ;;  %v13732_v36 = vld [vmem:[#allocation12 + $0x1f4] ss:$8 sps:$4 sm:$0xff]  }
0x187e   : > { %9963 = vmatprep.subr.bf16.mxu1 %v13645_v19  ;;  %10004 = vmatprep.subr.bf16.mxu0 %v13648_v12  ;;  %v17013_v19 = vld [vmem:[#allocation68_spill] sm:$0xff]  ;;  %v17014_v12 = vld [vmem:[#allocation70_spill] sm:$0xff] }
0x1880   : > { %9964 = vmatpush1.bf16.msra.mxu1 %v13643_v3  ;;  %10005 = vmatpush1.bf16.msra.mxu0 %v13646_v31 }
0x1881   : > { %9965 = vmatprep.subr.bf16.mxu1 %v13651_v35  ;;  %10006 = vmatprep.subr.bf16.mxu0 %v13654_v55 }
0x1884   : > { %9966 = vmatpush1.bf16.msra.mxu1 %v13649_v7  ;;  %10007 = vmatpush1.bf16.msra.mxu0 %v13652_v0 }
0x1885   : > { %9967 = vmatprep.subr.bf16.mxu1 %v13657_v44  ;;  %10008 = vmatprep.subr.bf16.mxu0 %v13660_v34 }
0x1888   : > { %9968 = vmatpush1.bf16.msra.mxu1 %v13655_v5  ;;  %10009 = vmatpush1.bf16.msra.mxu0 %v13658_v15  ;;  %v10043_v5 = vld [vmem:[#allocation15] sm:$0x3] }
0x1889   : > { %9969 = vmatprep.subr.bf16.mxu1 %v13663_v63  ;;  %10010 = vmatprep.subr.bf16.mxu0 %v13666_v22 }
0x188c   : > { %9970 = vmatpush1.bf16.msra.mxu1 %v13661_v58  ;;  %10011 = vmatpush1.bf16.msra.mxu0 %v13664_v54 }
0x188d   : > { %9971 = vmatprep.subr.bf16.mxu1 %v13669_v50  ;;  %10012 = vmatprep.subr.bf16.mxu0 %v13672_v8  ;;  %v10048_v50 = vrot.slane %v10043_v5, %v17008_v49 }
0x1890   : > { %9972 = vmatpush1.bf16.msra.mxu1 %v13667_v43  ;;  %10013 = vmatpush1.bf16.msra.mxu0 %v13670_v25 }
0x1891   : > { %9973 = vmatprep.subr.bf16.mxu1 %v13675_v33  ;;  %10014 = vmatprep.subr.bf16.mxu0 %v13678_v11  ;;  %v10052_v33 = vrot.slane %v10043_v5, %v17007_v52 }
0x1894   : > { %9974 = vmatpush1.bf16.msra.mxu1 %v13673_v37  ;;  %10015 = vmatpush1.bf16.msra.mxu0 %v13676_v46 }
0x1895   : > { %9975 = vmatprep.subr.bf16.mxu1 %v13681_v2  ;;  %10016 = vmatprep.subr.bf16.mxu0 %v13684_v9 }
0x1898   : > { %9976 = vmatpush1.bf16.msra.mxu1 %v13679_v53  ;;  %10017 = vmatpush1.bf16.msra.mxu0 %v13682_v62 }
0x1899   : > { %9977 = vmatprep.subr.bf16.mxu1 %v13687_v17  ;;  %10018 = vmatprep.subr.bf16.mxu0 %v13690_v42  ;;  %v13733_v17 = vld [vmem:[%s17015_s5] ss:$8 sps:$4 sm:$0xff]   ;;  %v13735_v42 = vld [vmem:[%s17016_s6 + $0x4] ss:$8 sps:$4 sm:$0xff]  }
0x189c   : > { %9978 = vmatpush1.bf16.msra.mxu1 %v13685_v28  ;;  %10019 = vmatpush1.bf16.msra.mxu0 %v13688_v20  ;;  %v13738_v28 = vld [vmem:[%s17016_s6 + $0x14] ss:$8 sps:$4 sm:$0xff]   ;;  %v13736_v20 = vld [vmem:[%s17016_s6 + $0x10] ss:$8 sps:$4 sm:$0xff]  }
0x189d   : > { %9979 = vmatprep.subr.bf16.mxu1 %v13693_v1  ;;  %10020 = vmatprep.subr.bf16.mxu0 %v13696_v57  ;;  %v13741_v1 = vld [vmem:[%s17016_s6 + $0x24] ss:$8 sps:$4 sm:$0xff]   ;;  %v13739_v57 = vld [vmem:[%s17016_s6 + $0x20] ss:$8 sps:$4 sm:$0xff]  }
0x18a0   : > { %9980 = vmatpush1.bf16.msra.mxu1 %v13691_v29  ;;  %10021 = vmatpush1.bf16.msra.mxu0 %v13694_v27  ;;  %v13744_v29 = vld [vmem:[%s17016_s6 + $0x34] ss:$8 sps:$4 sm:$0xff]   ;;  %v13742_v27 = vld [vmem:[%s17016_s6 + $0x30] ss:$8 sps:$4 sm:$0xff]  }
0x18a1   : > { %9981 = vmatprep.subr.bf16.mxu1 %v13699_v23  ;;  %10022 = vmatprep.subr.bf16.mxu0 %v13702_v40  ;;  %v13747_v23 = vld [vmem:[%s17016_s6 + $0x44] ss:$8 sps:$4 sm:$0xff]   ;;  %v13745_v40 = vld [vmem:[%s17016_s6 + $0x40] ss:$8 sps:$4 sm:$0xff]  }
0x18a4   : > { %9982 = vmatpush1.bf16.msra.mxu1 %v13697_v32  ;;  %10023 = vmatpush1.bf16.msra.mxu0 %v13700_v14  ;;  %v13750_v32 = vld [vmem:[%s17016_s6 + $0x54] ss:$8 sps:$4 sm:$0xff]   ;;  %v13748_v14 = vld [vmem:[%s17016_s6 + $0x50] ss:$8 sps:$4 sm:$0xff]  }
0x18a5   : > { %9983 = vmatprep.subr.bf16.mxu1 %v13705_v13  ;;  %10024 = vmatprep.subr.bf16.mxu0 %v13708_v24  ;;  %v13753_v13 = vld [vmem:[%s17016_s6 + $0x64] ss:$8 sps:$4 sm:$0xff]   ;;  %v13751_v24 = vld [vmem:[%s17016_s6 + $0x60] ss:$8 sps:$4 sm:$0xff]  }
0x18a8   : > { %9984 = vmatpush1.bf16.msra.mxu1 %v13703_v60  ;;  %10025 = vmatpush1.bf16.msra.mxu0 %v13706_v56  ;;  %v13756_v60 = vld [vmem:[%s17016_s6 + $0x74] ss:$8 sps:$4 sm:$0xff]   ;;  %v13754_v56 = vld [vmem:[%s17016_s6 + $0x70] ss:$8 sps:$4 sm:$0xff]  }
0x18a9   : > { %9985 = vmatprep.subr.bf16.mxu1 %v13711_v26  ;;  %10026 = vmatprep.subr.bf16.mxu0 %v13714_v16  ;;  %v13759_v26 = vld [vmem:[%s17016_s6 + $0x84] ss:$8 sps:$4 sm:$0xff]   ;;  %v13757_v16 = vld [vmem:[%s17016_s6 + $0x80] ss:$8 sps:$4 sm:$0xff]  }
0x18ac   : > { %9986 = vmatpush1.bf16.msra.mxu1 %v13709_v59  ;;  %10027 = vmatpush1.bf16.msra.mxu0 %v13712_v39  ;;  %v13762_v59 = vld [vmem:[%s17016_s6 + $0x94] ss:$8 sps:$4 sm:$0xff]   ;;  %v13760_v39 = vld [vmem:[%s17016_s6 + $0x90] ss:$8 sps:$4 sm:$0xff]  }
0x18ad   : > { %9987 = vmatprep.subr.bf16.mxu1 %v13717_v51  ;;  %10028 = vmatprep.subr.bf16.mxu0 %v13720_v4  ;;  %v13765_v51 = vld [vmem:[%s17016_s6 + $0xa4] ss:$8 sps:$4 sm:$0xff]   ;;  %v13763_v4 = vld [vmem:[%s17016_s6 + $0xa0] ss:$8 sps:$4 sm:$0xff]  }
0x18b0   : > { %9988 = vmatpush1.bf16.msra.mxu1 %v13715_v47  ;;  %10029 = vmatpush1.bf16.msra.mxu0 %v13718_v41 }
0x18b1   : > { %9989 = vmatprep.subr.bf16.mxu1 %v13723_v21  ;;  %10030 = vmatprep.subr.bf16.mxu0 %v13726_v61 }
0x18b4   : > { %9990 = vmatpush1.bf16.msra.mxu1 %v13721_v45  ;;  %10031 = vmatpush1.bf16.msra.mxu0 %v13724_v30 }
0x18b5   : > { %9991 = vmatprep.subr.bf16.mxu1 %v13729_v48  ;;  %10032 = vmatprep.subr.bf16.mxu0 %v13732_v36  ;;  %v13768_v36 = vld [vmem:[%s17016_s6 + $0xb4] ss:$8 sps:$4 sm:$0xff]  }
0x18b8   : > { %9992 = vmatpush1.bf16.msra.mxu1 %v13727_v38  ;;  %10033 = vmatpush1.bf16.msra.mxu0 %v13730_v18  ;;  %v13766_v38 = vld [vmem:[%s17016_s6 + $0xb0] ss:$8 sps:$4 sm:$0xff]   ;;  %v13771_v18 = vld [vmem:[%s17016_s6 + $0xc4] ss:$8 sps:$4 sm:$0xff]  }
0x18b9   : > { %10288 = vmatprep.subr.bf16.mxu1 %v13735_v42 }
0x18bb   : > { %9994 = vmatmul.mubr.bf16.vlgmr.msra.gmra.mrb[76].mxu1 %v17013_v19  ;;  %10035 = vmatmul.mubr.bf16.vlgmr.msra.gmra.mrb[80].mxu0 %v17014_v12  ;;  %v13769_v19 = vld [vmem:[%s17016_s6 + $0xc0] ss:$8 sps:$4 sm:$0xff]   ;;  %v13774_v12 = vld [vmem:[%s17016_s6 + $0xd4] ss:$8 sps:$4 sm:$0xff]  }
0x18bc   : > { %10289 = vmatpush1.bf16.msra.mxu1 %v13733_v17 }
0x18bd   : > { %10290 = vmatprep.subr.bf16.mxu1 %v13738_v28 }
0x18c0   : > { %10291 = vmatpush1.bf16.msra.mxu1 %v13736_v20 }
0x18c1   : > { %10292 = vmatprep.subr.bf16.mxu1 %v13741_v1 }
0x18c4   : > { %10293 = vmatpush1.bf16.msra.mxu1 %v13739_v57 }
0x18c5   : > { %10294 = vmatprep.subr.bf16.mxu1 %v13744_v29 }
0x18c8   : > { %10295 = vmatpush1.bf16.msra.mxu1 %v13742_v27 }
0x18c9   : > { %10296 = vmatprep.subr.bf16.mxu1 %v13747_v23 }
0x18cc   : > { %10297 = vmatpush1.bf16.msra.mxu1 %v13745_v40 }
0x18cd   : > { %10298 = vmatprep.subr.bf16.mxu1 %v13750_v32 }
0x18d0   : > { %10299 = vmatpush1.bf16.msra.mxu1 %v13748_v14 }
0x18d1   : > { %10300 = vmatprep.subr.bf16.mxu1 %v13753_v13 }
0x18d4   : > { %10301 = vmatpush1.bf16.msra.mxu1 %v13751_v24 }
0x18d5   : > { %10302 = vmatprep.subr.bf16.mxu1 %v13756_v60 }
0x18d8   : > { %10303 = vmatpush1.bf16.msra.mxu1 %v13754_v56 }
0x18d9   : > { %10304 = vmatprep.subr.bf16.mxu1 %v13759_v26 }
0x18dc   : > { %10305 = vmatpush1.bf16.msra.mxu1 %v13757_v16 }
0x18dd   : > { %10306 = vmatprep.subr.bf16.mxu1 %v13762_v59 }
0x18e0   : > { %10307 = vmatpush1.bf16.msra.mxu1 %v13760_v39 }
0x18e1   : > { %10308 = vmatprep.subr.bf16.mxu1 %v13765_v51 }
0x18e4   : > { %10309 = vmatpush1.bf16.msra.mxu1 %v13763_v4 }
0x18e5   : > { %10310 = vmatprep.subr.bf16.mxu1 %v13768_v36 }
0x18e8   : > { %10311 = vmatpush1.bf16.msra.mxu1 %v13766_v38 }
0x18e9   : > { %10312 = vmatprep.subr.bf16.mxu1 %v13771_v18 }
0x18ec   : > { %10313 = vmatpush1.bf16.msra.mxu1 %v13769_v19 }
0x18ed   : > { %10314 = vmatprep.subr.bf16.mxu1 %v13774_v12 }
0x194e   : > { %v9593_v3 = vpop.f32.mrb[72].mxu1  ;;  %v9634_v31 = vpop.f32.mrb[76].mxu0 }
0x194f   : > { %v9635_v6 = vadd.f32 %v9634_v31, %v9593_v3  ;;  %v9595_v10 = vpop.f32.mrb[73].mxu1  ;;  %v9636_v35 = vpop.f32.mrb[77].mxu0  ;;  %v13772_v3 = vld [vmem:[%s17016_s6 + $0xd0] ss:$8 sps:$4 sm:$0xff]   ;;  %v13777_v31 = vld [vmem:[%s17016_s6 + $0xe4] ss:$8 sps:$4 sm:$0xff]  }
0x1950   : > { %v9637_v55 = vadd.f32 %v9636_v35, %v9595_v10  ;;  %v9597_v7 = vpop.f32.mrb[74].mxu1  ;;  %v9638_v0 = vpop.f32.mrb[78].mxu0  ;;  %10315 = vmatpush1.bf16.msra.mxu1 %v13772_v3  ;;  %v13780_v10 = vld [vmem:[%s17016_s6 + $0xf4] ss:$8 sps:$4 sm:$0xff]   ;;  %v13778_v35 = vld [vmem:[%s17016_s6 + $0xf0] ss:$8 sps:$4 sm:$0xff]  }
0x1951   : > { %v9598_v44 = vpop.f32.mrb[75].mxu1  ;;  %v9639_v34 = vpop.f32.mrb[79].mxu0  ;;  %10316 = vmatprep.subr.bf16.mxu1 %v13777_v31 }
0x1952   : > { %v10077_v34 = vstv %s11422_s11 }
0x198e   : > { %v9995_v15 = vpop.f32.mrb[76].mxu1  ;;  %v10036_v63 = vpop.f32.mrb[80].mxu0 }
0x198f   : > { %v9996_v22 = vadd.f32 %v9995_v15, %v9635_v6  ;;  %v9997_v58 = vpop.f32.mrb[77].mxu1  ;;  %v10038_v54 = vpop.f32.mrb[81].mxu0  ;;  %v13775_v6 = vld [vmem:[%s17016_s6 + $0xe0] ss:$8 sps:$4 sm:$0xff]  }
0x1990   : > { %v9998_v8 = vadd.f32 %v9997_v58, %v9637_v55  ;;  %v9999_v43 = vpop.f32.mrb[78].mxu1  ;;  %v10040_v25 = vpop.f32.mrb[82].mxu0  ;;  %10317 = vmatpush1.bf16.msra.mxu1 %v13775_v6 }
0x1991   : > { %v10037_v11 = vadd.f32 %v10036_v63, %v9996_v22  ;;  %v10000_v37 = vpop.f32.mrb[79].mxu1  ;;  %v10041_v46 = vpop.f32.mrb[83].mxu0  ;;  %10318 = vmatprep.subr.bf16.mxu1 %v13780_v10  ;;  %v10116_v43 = vld [vmem:[#allocation17] sm:$0x3] }
0x1992   : > { %v10039_v2 = vadd.f32 %v10038_v54, %v9998_v8  ;;  %v10121_v25 = vrot.slane %v10116_v43, %v17008_v49 }
0x1993   : > { %v10055_v9 = vadd.f32 %v10048_v50, %v10037_v11 }
0x1994   : > { %v10056_v53 = vadd.f32 %v10052_v33, %v10039_v2  ;;  %10319 = vmatpush1.bf16.msra.mxu1 %v13778_v35  ;;  %v10125_v33 = vrot.slane %v10116_v43, %v17007_v52 }
0x1996   : > { %v10057_v62 = vadd.f32 %v10056_v53, %v10055_v9 }
0x1998   : > { %10058 = vadd.xlane.f32.xlu0 %v10057_v62 }
0x1a25   : > { %v10059_v47 = vpop.xlane.xlu0 %10058 }
0x1a26   : > { %v10061_v41 = vmul.f32 0.00390625, %v10059_v47 }
0x1a28   : > { %v10062_v21 = vsub.f32 %v10055_v9, %v10061_v41  ;;  %v10063_v61 = vsub.f32 %v10056_v53, %v10061_v41 }
0x1a2a   : > { %v10064_v45 = vmul.f32 %v10062_v21, %v10062_v21  ;;  %v10065_v30 = vmul.f32 %v10063_v61, %v10063_v61 }
0x1a2c   : > { %v10066_v48 = vadd.f32 %v10065_v30, %v10064_v45 }
0x1a2e   : > { %10067 = vadd.xlane.f32.xlu0 %v10066_v48 }
0x1abb   : > { %v10068_v55 = vpop.xlane.xlu0 %10067 }
0x1abc   : > { %v10069_v7 = vmul.f32 0.00390625, %v10068_v55 }
0x1abe   : > { %v10070_v0 = vadd.f32 1e-05, %v10069_v7 }
0x1ac0   : > { %13791 = vrsqrt.f32 %v10070_v0 }
0x1aca   : > { %v13792_v44 = vpop.eup %13791 }
0x1acb   : > { %v10072_v5 = vmul.f32 %v13792_v44, %v10062_v21  ;;  %v10073_v15 = vmul.f32 %v13792_v44, %v10063_v61 }
0x1acd   : > { %vm10076_vm5 = vcmp.ge.f32.partialorder %v10073_v15, 0.0  ;;  %v10078_v63 = vmul.f32 %v10077_v34, %v10072_v5  ;;  %v10079_v22 = vmul.f32 %v10077_v34, %v10073_v15  ;;  %vm10075_vm6 = vcmp.ge.f32.partialorder %v10072_v5, 0.0 }
0x1acf   : > { %v10081_v58 = vsel %vm10076_vm5, %v10073_v15, %v10079_v22  ;;  %v10080_v54 = vsel %vm10075_vm6, %v10072_v5, %v10078_v63 }
0x1ad0   : > { %v10083_v50 = vpack.c.bf16 %v10081_v58, %v10081_v58  ;;  %v10082_v8 = vpack.c.bf16 %v10080_v54, %v10080_v54 }
0x1ad2   : > { %10320 = vmatprep.mubr.bf16.mxu1 %v10083_v50 }
0x1ad3   : > { %10321 = vmatmul.mubr.bf16.vlgmr.msra.gmra.mrb[80].mxu1 %v10082_v8 }
0x1ba6   : > { %v10322_v11 = vpop.f32.mrb[80].mxu1 }
0x1ba7   : > { %v10323_v37 = vadd.f32 %v10322_v11, %v10121_v25  ;;  %v10324_v46 = vpop.f32.mrb[81].mxu1 }
0x1ba8   : > { %v10325_v2 = vadd.f32 %v10324_v46, %v10125_v33  ;;  %v10326_v9 = vpop.f32.mrb[82].mxu1 }
0x1ba9   : > { %v10329_v53 = vadd.f32 %v10323_v37, %v10080_v54  ;;  %v10327_v62 = vpop.f32.mrb[83].mxu1 }
0x1baa   : > { %v10330_v17 = vadd.f32 %v10325_v2, %v10081_v58 }
0x1bab   : > { %v10331_v42 = vsub.f32 0.0, %v10329_v53 }
0x1bac   : > { %v10332_v28 = vsub.f32 0.0, %v10330_v17 }
0x1bad   : > { %v10333_v20 = vmul.f32 1.442695, %v10331_v42 }
0x1bae   : > { %v10335_v1 = vmul.f32 1.442695, %v10332_v28 }
0x1baf   : > { %13793 = vpow2.f32 %v10333_v20 }
0x1bb0   : > { %13795 = vpow2.f32 %v10335_v1 }
0x1bb9   : > { %v13794_v57 = vpop.eup %13793 }
0x1bba   : > { %v13796_v29 = vpop.eup %13795  ;;  %v10337_v49 = vadd.f32 1.0, %v13794_v57 }
0x1bbb   : > { %v10338_v27 = vadd.f32 1.0, %v13796_v29 }
0x1bbc   : > { %13797 = vrcp.f32 %v10337_v49 }
0x1bbd   : > { %13799 = vrcp.f32 %v10338_v27 }
0x1bc6   : > { %v13798_v52 = vpop.eup %13797 }
0x1bc7   : > { %v13800_v23 = vpop.eup %13799  ;;  %v10343_v40 = vmul.f32 2.0, %v13798_v52 }
0x1bc8   : > { %v10344_v32 = vmul.f32 2.0, %v13800_v23 }
0x1bc9   : > { %v10345_v14 = vadd.f32 -1.0, %v10343_v40 }
0x1bca   : > { %v10346_v13 = vadd.f32 -1.0, %v10344_v32 }
0x1bcb   : > { %10347 = vst [vmem:[%s916_s12] sm:$0xff] %v10345_v14 }
0x1bcc   : > { %10348 = vst [vmem:[%s916_s12 + $0x8] sm:$0xff] %v10346_v13 }
0x1bcd PF: > { %s17018_s27 = sld [smem:[#allocation31_spill]] }
0x1bd3   : > { %s42_s5 = sadd.s32 1, %s17018_s27  }
0x1bd4   : > { %p39_p9 = scmp.ge.s32.totalorder %s42_s5, 4  }
0x1bd6   :  { %41 = sbr.rel (!%p39_p9) target bundleno = 26 (0x1a), region = 200 }
0x1bdd   :  { %10370 = vsyncpa [#allocation3], 1 }
0x1bde   :  { %10372 = vsyncpa [#allocation3 + $0x1], 1 }
0x1bdf   :  { %10373 = vsyncpa [#allocation7], 1 }
0x1be0   :  { %10374 = vsyncpa [#allocation10], 1 }
0x1be1   :  { %10375 = vsyncpa [#allocation13], 1 }
0x1be2   :  { %10376 = vsyncpa [#allocation16], 1 }
0x1be3   :  { %10377 = vsyncpa [#allocation19], 1 }
0x1be4   :  { %10378 = vsyncpa [#allocation22], 1 }
0x1be5   :  { %10379 = vsyncpa [#allocation4], 1 }
0x1be6   :  { %10381 = vsyncpa [#allocation4 + $0x1], 1 }

</bundles_post_ra>
